<compile_context>
chip_gen: v7x
topology: tpu7x:2x2x1
jax: 0.10.0
libtpu: 0.0.40
codegen_flags: <defaults>
</compile_context>

<pallas_src>
import functools
import math

import jax
import jax.numpy as jnp
from jax import lax
from jax.experimental import pallas as pl
from jax.experimental.pallas import tpu as pltpu

_SQRT2 = math.sqrt(2.0)


# ----------------------------- in-kernel helpers -----------------------------

def _layernorm(x, scale, bias, eps=1e-5):
    # x: (M, C); scale/bias broadcastable (1, C)
    mu = jnp.mean(x, axis=-1, keepdims=True)
    xc = x - mu
    var = jnp.mean(xc * xc, axis=-1, keepdims=True)
    return xc * lax.rsqrt(var + eps) * scale + bias


def _erf(x):
    # Abramowitz & Stegun 7.1.26 (max abs err ~1.5e-7): only exp (EUP) + VPU ops,
    # avoids relying on a lax.erf lowering inside the kernel.
    a1, a2, a3, a4, a5 = (0.254829592, -0.284496736, 1.421413741,
                          -1.453152027, 1.061405429)
    p = 0.3275911
    ax = jnp.abs(x)
    t = 1.0 / (1.0 + p * ax)
    poly = ((((a5 * t + a4) * t + a3) * t + a2) * t + a1) * t
    y = 1.0 - poly * jnp.exp(-ax * ax)
    return jnp.where(x >= 0, y, -y)


def _gelu_exact(x):
    # PyTorch nn.GELU() default (approximate='none').
    return 0.5 * x * (1.0 + _erf(x / _SQRT2))


def _attention(x_norm, wqkv, bqkv, Bt, T, H, Dh, batched_heads):
    """x_norm: (Bt*T, C) f32 -> pre-output-projection attention out (Bt*T, C)."""
    C = H * Dh
    qkv = jnp.dot(x_norm.astype(jnp.bfloat16), wqkv,
                  preferred_element_type=jnp.float32) + bqkv          # (Bt*T, 3C)
    scale = 1.0 / Dh                    # reference uses 1/head_dim (not 1/sqrt)
    row = lax.broadcasted_iota(jnp.int32, (T, T), 0)
    col = lax.broadcasted_iota(jnp.int32, (T, T), 1)
    causal = row >= col
    neg = -1e30                         # finite mask value: no inf-inf NaN risk

    if batched_heads:
        # Single head-batched einsum pair; scale folded into q (scales a
        # (T, Dh) operand instead of the (T, T) scores).
        q = (qkv[:, 0 * C:1 * C] * scale).reshape(Bt, T, H, Dh).astype(jnp.bfloat16)
        k = qkv[:, 1 * C:2 * C].reshape(Bt, T, H, Dh).astype(jnp.bfloat16)
        v = qkv[:, 2 * C:3 * C].reshape(Bt, T, H, Dh).astype(jnp.bfloat16)
        att = jnp.einsum('bthd,bshd->bhts', q, k,
                         preferred_element_type=jnp.float32)          # (Bt,H,T,T)
        att = jnp.where(causal[None, None], att, neg)
        att = att - jnp.max(att, axis=-1, keepdims=True)
        p = jnp.exp(att)
        p = p * (1.0 / jnp.sum(p, axis=-1, keepdims=True))            # exact softmax
        y = jnp.einsum('bhts,bshd->bthd', p.astype(jnp.bfloat16), v,
                       preferred_element_type=jnp.float32)            # (Bt,T,H,Dh)
        return y.reshape(Bt * T, C)

    # Fallback: per-head loop with single-batch-dim einsums only (portable).
    q = qkv[:, 0 * C:1 * C].reshape(Bt, T, C)
    k = qkv[:, 1 * C:2 * C].reshape(Bt, T, C)
    v = qkv[:, 2 * C:3 * C].reshape(Bt, T, C)
    y_heads = []
    for hh in range(H):
        sl = slice(hh * Dh, (hh + 1) * Dh)
        qh = (q[:, :, sl] * scale).astype(jnp.bfloat16)
        kh = k[:, :, sl].astype(jnp.bfloat16)
        vh = v[:, :, sl].astype(jnp.bfloat16)
        att = jnp.einsum('btd,bsd->bts', qh, kh,
                         preferred_element_type=jnp.float32)
        att = jnp.where(causal[None], att, neg)
        att = att - jnp.max(att, axis=-1, keepdims=True)
        p = jnp.exp(att)
        p = p * (1.0 / jnp.sum(p, axis=-1, keepdims=True))
        y_heads.append(jnp.einsum('bts,bsd->btd', p.astype(jnp.bfloat16), vh,
                                  preferred_element_type=jnp.float32))
    return jnp.concatenate(y_heads, axis=-1).reshape(Bt * T, C)


# ------------------------------ Pallas kernels --------------------------------

def gpt_blocks_kernel(x_ref,
                      ln1_s_ref, ln1_b_ref,
                      wqkv_ref, bqkv_ref,
                      wo_ref, bo_ref,
                      ln2_s_ref, ln2_b_ref,
                      wup_ref, bup_ref,
                      wpr_ref, bpr_ref,
                      fn_s_ref, fn_b_ref,
                      xlast_ref,
                      acc_ref,
                      *, Bt, T, H, Dh, mlp_chunk, batched_heads):
    """One grid step == one (batch_tile, layer).  acc_ref is the resident carry."""
    C = H * Dh
    layer = pl.program_id(1)

    @pl.when(layer == 0)
    def _():
        acc_ref[...] = x_ref[...]            # embedding activations for this tile

    x = acc_ref[...]                         # (Bt*T, C) f32, VMEM-resident

    # ---- attention sub-block ----
    h = _layernorm(x, ln1_s_ref[0], ln1_b_ref[0])
    y = _attention(h, wqkv_ref[0], bqkv_ref[0], Bt, T, H, Dh, batched_heads)
    y = jnp.dot(y.astype(jnp.bfloat16), wo_ref[0],
                preferred_element_type=jnp.float32) + bo_ref[0]
    x = x + y

    # ---- MLP sub-block (hidden dim processed in chunks) ----
    h2 = _layernorm(x, ln2_s_ref[0], ln2_b_ref[0]).astype(jnp.bfloat16)
    hidden = wup_ref.shape[-1]               # 4C
    mlp = None
    for lo in range(0, hidden, mlp_chunk):
        hi = lo + mlp_chunk
        u = jnp.dot(h2, wup_ref[0, :, lo:hi],
                    preferred_element_type=jnp.float32) + bup_ref[0, :, lo:hi]
        g = _gelu_exact(u).astype(jnp.bfloat16)
        part = jnp.dot(g, wpr_ref[0, lo:hi, :],
                       preferred_element_type=jnp.float32)
        mlp = part if mlp is None else mlp + part
    x = x + mlp + bpr_ref[0]

    acc_ref[...] = x

    # ---- final LayerNorm of the last token, emitted once per batch tile ----
    @pl.when(layer == pl.num_programs(1) - 1)
    def _():
        x3 = x.reshape(Bt, T, C)
        xl = lax.slice_in_dim(x3, T - 1, T, axis=1).reshape(Bt, C)
        xlast_ref[0] = _layernorm(xl, fn_s_ref[...], fn_b_ref[...])


def head_kernel(xn_ref, w_ref, o_ref):
    # xn_ref is already final-LayerNormed (LN hoisted out of the vocab loop).
    # NOTE: the reference module scales logits by 1/mup only on the training
    # (targets is not None) branch; the inference path returns raw lm_head outputs.
    o_ref[...] = jnp.dot(xn_ref[...].astype(jnp.bfloat16), w_ref[...],
                         preferred_element_type=jnp.float32)


# ------------------------------ sizing helpers ---------------------------------

def _pick_b_tiles(B, T):
    # Expose a 'parallel' batch axis (both TensorCores on v7x) when each tile
    # still has >=128 token rows to keep the MXU fed; harmless on 1-TC chips.
    if B % 2 == 0 and (B // 2) * T >= 128 and ((B // 2) * T) % 8 == 0:
        return 2
    return 1


def _pick_mlp_chunk(F):
    # Chunk the 4C hidden dim so (rows, chunk) intermediates stay small.
    if F <= 1024:
        return F
    for c in (1024, 512, 256, 128):
        if F % c == 0:
            return c
    return F


def _pick_vocab_tile(V):
    if V <= 2048:
        return V
    for t in (2048, 1024, 512, 256, 128):
        if V % t == 0:
            return t
    return V


def _vmem_limit_bytes(rows, Bt, T, H, C, mlp_chunk):
    try:
        cap = int(pltpu.get_tpu_info().vmem_capacity_bytes)   # 128 MiB v5e/v6e, 64 MiB v7x
    except Exception:
        cap = 64 * 1024 * 1024                                # conservative (v7x)
    weights = 2 * (2 * 12 * C * C)                            # double-buffered bf16 layer weights
    acts = 4 * rows * C * 3                                   # x input (2 bufs) + resident carry
    inter = 4 * (rows * 4 * C + Bt * H * T * T * 2 + rows * 2 * mlp_chunk)
    need = weights + acts + inter
    return int(min(max(2 * need, 32 * 1024 * 1024), (3 * cap) // 4))


# ------------------------------ wrappers ---------------------------------------

def pack_params(params):
    """Stack per-layer params along a leading L axis; matmul weights in bf16
    (halves HBM weight streaming, the binding resource at small B*T)."""
    # TODO(synk): fp8 (v7x) / int8 (v6e) weight storage with per-channel scales
    # would halve weight traffic again; kept bf16 here for accuracy headroom.
    blocks = params['blocks']

    def stack_vec(name):                                       # (L, 1, dim) f32
        return jnp.stack([b[name] for b in blocks])[:, None, :]

    return dict(
        ln1_s=stack_vec('ln1_s'), ln1_b=stack_vec('ln1_b'),
        wqkv=jnp.stack([jnp.concatenate([b['wq'], b['wk'], b['wv']], axis=1)
                        for b in blocks]).astype(jnp.bfloat16),          # (L, C, 3C)
        bqkv=jnp.stack([jnp.concatenate([b['bq'], b['bk'], b['bv']])
                        for b in blocks])[:, None, :],                   # (L, 1, 3C)
        wo=jnp.stack([b['wo'] for b in blocks]).astype(jnp.bfloat16),
        bo=stack_vec('bo'),
        ln2_s=stack_vec('ln2_s'), ln2_b=stack_vec('ln2_b'),
        wup=jnp.stack([b['wup'] for b in blocks]).astype(jnp.bfloat16),
        bup=stack_vec('bup'),
        wpr=jnp.stack([b['wpr'] for b in blocks]).astype(jnp.bfloat16),
        bpr=stack_vec('bpr'),
        fn_s=params['fn_s'].reshape(1, -1),
        fn_b=params['fn_b'].reshape(1, -1),
        wte=params['wte'], wpe=params['wpe'],
        lm_head=params['lm_head'].astype(jnp.bfloat16),
    )


def run_blocks(x_flat, packed, *, B, T, H, batched_heads):
    BT, C = x_flat.shape
    assert C % 128 == 0, "embd_dim must be a multiple of 128 for lane-dense tiles"
    Dh = C // H
    L = packed['wqkv'].shape[0]
    b_tiles = _pick_b_tiles(B, T)
    Bt = B // b_tiles
    rows = Bt * T
    mlp_chunk = _pick_mlp_chunk(4 * C)

    kern = functools.partial(gpt_blocks_kernel, Bt=Bt, T=T, H=H, Dh=Dh,
                             mlp_chunk=mlp_chunk, batched_heads=batched_heads)

    def wspec(shape):                                           # per-layer weights
        return pl.BlockSpec((1,) + shape, lambda b, l: (l, 0, 0))

    grid_spec = pltpu.PrefetchScalarGridSpec(
        num_scalar_prefetch=0,
        grid=(b_tiles, L),
        in_specs=[
            pl.BlockSpec((rows, C), lambda b, l: (b, 0)),       # embeddings, read at l==0
            wspec((1, C)), wspec((1, C)),                       # ln1 scale / bias
            wspec((C, 3 * C)), wspec((1, 3 * C)),               # fused QKV weight / bias
            wspec((C, C)), wspec((1, C)),                       # output proj
            wspec((1, C)), wspec((1, C)),                       # ln2 scale / bias
            wspec((C, 4 * C)), wspec((1, 4 * C)),               # mlp up
            wspec((4 * C, C)), wspec((1, C)),                   # mlp proj
            pl.BlockSpec((1, C), lambda b, l: (0, 0)),          # final-norm scale
            pl.BlockSpec((1, C), lambda b, l: (0, 0)),          # final-norm bias
        ],
        out_specs=pl.BlockSpec((1, Bt, C), lambda b, l: (b, 0, 0)),
        scratch_shapes=[pltpu.VMEM((rows, C), jnp.float32)],    # resident activation carry
    )

    xlast = pl.pallas_call(
        kern,
        out_shape=jax.ShapeDtypeStruct((b_tiles, Bt, C), jnp.float32),
        grid_spec=grid_spec,
        compiler_params=pltpu.CompilerParams(
            dimension_semantics=("parallel", "arbitrary"),
            vmem_limit_bytes=_vmem_limit_bytes(rows, Bt, T, H, C, mlp_chunk)),
    )(x_flat,
      packed['ln1_s'], packed['ln1_b'],
      packed['wqkv'], packed['bqkv'],
      packed['wo'], packed['bo'],
      packed['ln2_s'], packed['ln2_b'],
      packed['wup'], packed['bup'],
      packed['wpr'], packed['bpr'],
      packed['fn_s'], packed['fn_b'])
    return xlast.reshape(B, C)                                  # final-LN'd last tokens


def run_head(xn, w_lm_bf16):
    B, C = xn.shape
    V = w_lm_bf16.shape[1]
    tv = _pick_vocab_tile(V)
    return pl.pallas_call(
        head_kernel,
        out_shape=jax.ShapeDtypeStruct((B, V), jnp.float32),
        grid_spec=pltpu.PrefetchScalarGridSpec(
            num_scalar_prefetch=0,
            grid=(V // tv,),
            in_specs=[pl.BlockSpec((B, C), lambda j: (0, 0)),
                      pl.BlockSpec((C, tv), lambda j: (0, j))],
            out_specs=pl.BlockSpec((B, tv), lambda j: (0, j))),
        compiler_params=pltpu.CompilerParams(dimension_semantics=("parallel",)),
    )(xn, w_lm_bf16)


def gpt_forward(idx, packed, *, cfg, batched_heads=True):
    B, T = idx.shape
    C = cfg['embd_dim']
    H = cfg['num_heads']
    mup_mult = math.sqrt(C)

    # TODO(synk): token/position embedding gathers stay in plain JAX/XLA.
    x = (packed['wte'][idx] + packed['wpe'][:T][None, :, :]) / math.sqrt(2.0) * mup_mult

    xlast_norm = run_blocks(x.reshape(B * T, C), packed, B=B, T=T, H=H,
                            batched_heads=batched_heads)        # (B, C)
    logits = run_head(xlast_norm, packed['lm_head'])            # (B, V)
    return logits[:, None, :]                                   # (B, 1, vocab)


# ------------------------------ pure-JAX reference -----------------------------

def gpt_reference(idx, params, cfg):
    B, T = idx.shape
    C = cfg['embd_dim']
    H = cfg['num_heads']
    Dh = C // H
    mup_mult = math.sqrt(C)

    def ln(x, s, b):
        mu = jnp.mean(x, axis=-1, keepdims=True)
        var = jnp.mean((x - mu) ** 2, axis=-1, keepdims=True)
        return (x - mu) / jnp.sqrt(var + 1e-5) * s + b

    x = (params['wte'][idx] + params['wpe'][:T][None]) / math.sqrt(2.0) * mup_mult
    for p in params['blocks']:
        h = ln(x, p['ln1_s'], p['ln1_b'])
        q = h @ p['wq'] + p['bq']
        k = h @ p['wk'] + p['bk']
        v = h @ p['wv'] + p['bv']
        q = q.reshape(B, T, H, Dh).transpose(0, 2, 1, 3)
        k = k.reshape(B, T, H, Dh).transpose(0, 2, 1, 3)
        v = v.reshape(B, T, H, Dh).transpose(0, 2, 1, 3)
        att = jnp.einsum('bhqd,bhkd->bhqk', q, k) * (1.0 / Dh)
        mask = jnp.tril(jnp.ones((T, T), bool))
        att = jnp.where(mask, att, -jnp.inf)
        att = jax.nn.softmax(att, axis=-1)
        y = jnp.einsum('bhqk,bhkd->bhqd', att, v)
        y = y.transpose(0, 2, 1, 3).reshape(B, T, C)
        x = x + (y @ p['wo'] + p['bo'])
        h2 = ln(x, p['ln2_s'], p['ln2_b'])
        u = h2 @ p['wup'] + p['bup']
        g = 0.5 * u * (1.0 + lax.erf(u / _SQRT2))
        x = x + (g @ p['wpr'] + p['bpr'])
    x = ln(x, params['fn_s'], params['fn_b'])
    # Inference (targets=None) branch of the reference: NO 1/mup logit scaling.
    return x[:, -1:, :] @ params['lm_head']


# ------------------------------ parameter init ---------------------------------

def init_params(key, cfg):
    C = cfg['embd_dim']
    V = cfg['vocab_size']
    L = cfg['num_layers']
    ctx = cfg['context_len']
    std_base = math.sqrt(cfg['init_var']) / math.sqrt(C)
    std_proj = math.sqrt(cfg['init_var']) / math.sqrt(2 * L * C)

    def nrm(k, shape, std):
        return jax.random.normal(k, shape, jnp.float32) * std

    keys = jax.random.split(key, 3 + 6 * L)
    params = {
        'wte': nrm(keys[0], (V, C), std_base),
        'wpe': nrm(keys[1], (ctx, C), std_base),
        'lm_head': nrm(keys[2], (C, V), std_base),
        'fn_s': jnp.ones((C,), jnp.float32),
        'fn_b': jnp.zeros((C,), jnp.float32),
        'blocks': [],
    }
    for i in range(L):
        ks = keys[3 + 6 * i: 3 + 6 * (i + 1)]
        params['blocks'].append({
            'ln1_s': jnp.ones((C,), jnp.float32),
            'ln1_b': jnp.zeros((C,), jnp.float32),
            'wq': nrm(ks[0], (C, C), std_base), 'bq': jnp.zeros((C,), jnp.float32),
            'wk': nrm(ks[1], (C, C), std_base), 'bk': jnp.zeros((C,), jnp.float32),
            'wv': nrm(ks[2], (C, C), std_base), 'bv': jnp.zeros((C,), jnp.float32),
            'wo': nrm(ks[3], (C, C), std_proj), 'bo': jnp.zeros((C,), jnp.float32),
            'ln2_s': jnp.ones((C,), jnp.float32),
            'ln2_b': jnp.zeros((C,), jnp.float32),
            'wup': nrm(ks[4], (C, 4 * C), std_base),
            'bup': jnp.zeros((4 * C,), jnp.float32),
            'wpr': nrm(ks[5], (4 * C, C), std_proj),
            'bpr': jnp.zeros((C,), jnp.float32),
        })
    return params


# ----------------------------------- main ---------------------------------------

if __name__ == "__main__":
    # Lane-dense small config: C=128, head_dim=64, 4C=512, V=256, L=2.
    cfg = dict(vocab_size=256, context_len=32, embd_dim=128,
               num_heads=2, num_layers=2, bias=True, init_var=1.0)

    key = jax.random.PRNGKey(0)
    kp, kd = jax.random.split(key)
    params = init_params(kp, cfg)
    packed = pack_params(params)

    # B*T = 256 token rows per pallas_call (raises arithmetic intensity of the
    # weight-streaming-bound block kernel while staying a small test shape).
    B, T = 8, 32
    idx = jax.random.randint(kd, (B, T), 0, cfg['vocab_size'], dtype=jnp.int32)

    fwd = jax.jit(functools.partial(gpt_forward, cfg=cfg, batched_heads=True))
    try:
        logits = jax.block_until_ready(fwd(idx, packed))
    except Exception:
        # Portability guard: some Mosaic versions reject multi-batch-dim
        # dot_general / 4-D relayouts; fall back to the numerically identical
        # per-head formulation.
        fwd = jax.jit(functools.partial(gpt_forward, cfg=cfg, batched_heads=False))
        logits = jax.block_until_ready(fwd(idx, packed))

    ref = jax.block_until_ready(gpt_reference(idx, params, cfg))

    assert logits.shape == (B, 1, cfg['vocab_size'])
    max_err = float(jnp.max(jnp.abs(logits - ref)))
    # bf16-weight matmuls vs the f32 reference
    assert max_err < 5e-2, f"mismatch vs reference: {max_err}"

    print("KERNEL_OK")
</pallas_src>

<mosaic_0001>
module attributes {stable_mosaic.version = 11 : i64} {
  func.func @head_kernel(%arg0: i32, %arg1: memref<8x128xf32, #tpu.memory_space<vmem>>, %arg2: memref<128x256xbf16, #tpu.memory_space<vmem>>, %arg3: memref<8x256xf32, #tpu.memory_space<vmem>>) attributes {dimension_semantics = [#tpu.dimension_semantics<parallel>], iteration_bounds = array<i64: 1>, scalar_prefetch = 0 : i64, scratch_operands = 0 : i64, tpu.core_type = #tpu.core_type<tc>, window_params = [{pipeline_mode = #tpu.pipeline_mode<synchronous>, transform_indices = @transform_0, window_bounds = array<i64: 8, 128>}, {transform_indices = @transform_1, window_bounds = array<i64: 128, 256>}, {transform_indices = @transform_2, window_bounds = array<i64: 8, 256>}]} {
    %c0 = arith.constant 0 : index
    %c0_0 = arith.constant 0 : index
    %0 = vector.load %arg1[%c0, %c0_0] : memref<8x128xf32, #tpu.memory_space<vmem>>, vector<8x128xf32>
    %1 = arith.truncf %0 : vector<8x128xf32> to vector<8x128xbf16>
    %c0_1 = arith.constant 0 : index
    %c0_2 = arith.constant 0 : index
    %2 = vector.load %arg2[%c0_1, %c0_2] : memref<128x256xbf16, #tpu.memory_space<vmem>>, vector<128x256xbf16>
    %cst = arith.constant dense<0.000000e+00> : vector<8x256xf32>
    %3 = tpu.matmul %1, %2, %cst {dimension_numbers = #tpu.dot_dimension_numbers<[1], [0], [0], [1], [0, 0, 1, 1], [], []>} : vector<8x128xbf16>, vector<128x256xbf16>, vector<8x256xf32> -> vector<8x256xf32>
    %c0_3 = arith.constant 0 : index
    %c0_4 = arith.constant 0 : index
    %4 = vector.load %arg3[%c0_3, %c0_4] : memref<8x256xf32, #tpu.memory_space<vmem>>, vector<8x256xf32>
    tpu.vector_store %arg3[%c0_3, %c0_4], %3 {strides = array<i32>} : memref<8x256xf32, #tpu.memory_space<vmem>>, vector<8x256xf32>,
    return
  }
  func.func @transform_0(%arg0: i32) -> (i32, i32) {
    %c0_i32 = arith.constant 0 : i32
    %c0_i32_0 = arith.constant 0 : i32
    %c0_i32_1 = arith.constant 0 : i32
    return %c0_i32, %c0_i32_0 : i32, i32
  }
  func.func @transform_1(%arg0: i32) -> (i32, i32) {
    %c0_i32 = arith.constant 0 : i32
    %c0_i32_0 = arith.constant 0 : i32
    return %c0_i32, %arg0 : i32, i32
  }
  func.func @transform_2(%arg0: i32) -> (i32, i32) {
    %c0_i32 = arith.constant 0 : i32
    %c0_i32_0 = arith.constant 0 : i32
    return %c0_i32, %arg0 : i32, i32
  }
}

module attributes {stable_mosaic.version = 11 : i64} {
  func.func @gpt_blocks_kernel(%arg0: i32, %arg1: i32, %arg2: memref<128x128xf32, #tpu.memory_space<vmem>>, %arg3: memref<1x1x128xf32, #tpu.memory_space<vmem>>, %arg4: memref<1x1x128xf32, #tpu.memory_space<vmem>>, %arg5: memref<1x128x384xbf16, #tpu.memory_space<vmem>>, %arg6: memref<1x1x384xf32, #tpu.memory_space<vmem>>, %arg7: memref<1x128x128xbf16, #tpu.memory_space<vmem>>, %arg8: memref<1x1x128xf32, #tpu.memory_space<vmem>>, %arg9: memref<1x1x128xf32, #tpu.memory_space<vmem>>, %arg10: memref<1x1x128xf32, #tpu.memory_space<vmem>>, %arg11: memref<1x128x512xbf16, #tpu.memory_space<vmem>>, %arg12: memref<1x1x512xf32, #tpu.memory_space<vmem>>, %arg13: memref<1x512x128xbf16, #tpu.memory_space<vmem>>, %arg14: memref<1x1x128xf32, #tpu.memory_space<vmem>>, %arg15: memref<1x128xf32, #tpu.memory_space<vmem>>, %arg16: memref<1x128xf32, #tpu.memory_space<vmem>>, %arg17: memref<1x4x128xf32, #tpu.memory_space<vmem>>, %arg18: memref<128x128xf32, #tpu.memory_space<vmem>>) attributes {dimension_semantics = [#tpu.dimension_semantics<parallel>, #tpu.dimension_semantics<arbitrary>], iteration_bounds = array<i64: 2, 2>, scalar_prefetch = 0 : i64, scratch_operands = 1 : i64, tpu.core_type = #tpu.core_type<tc>, window_params = [{transform_indices = @transform_0, window_bounds = array<i64: 128, 128>}, {transform_indices = @transform_1, window_bounds = array<i64: 1, 1, 128>}, {transform_indices = @transform_2, window_bounds = array<i64: 1, 1, 128>}, {transform_indices = @transform_3, window_bounds = array<i64: 1, 128, 384>}, {transform_indices = @transform_4, window_bounds = array<i64: 1, 1, 384>}, {transform_indices = @transform_5, window_bounds = array<i64: 1, 128, 128>}, {transform_indices = @transform_6, window_bounds = array<i64: 1, 1, 128>}, {transform_indices = @transform_7, window_bounds = array<i64: 1, 1, 128>}, {transform_indices = @transform_8, window_bounds = array<i64: 1, 1, 128>}, {transform_indices = @transform_9, window_bounds = array<i64: 1, 128, 512>}, {transform_indices = @transform_10, window_bounds = array<i64: 1, 1, 512>}, {transform_indices = @transform_11, window_bounds = array<i64: 1, 512, 128>}, {transform_indices = @transform_12, window_bounds = array<i64: 1, 1, 128>}, {pipeline_mode = #tpu.pipeline_mode<synchronous>, transform_indices = @transform_13, window_bounds = array<i64: 1, 128>}, {pipeline_mode = #tpu.pipeline_mode<synchronous>, transform_indices = @transform_14, window_bounds = array<i64: 1, 128>}, {transform_indices = @transform_15, window_bounds = array<i64: 1, 4, 128>}]} {
    %c0_i32 = arith.constant 0 : i32
    %0 = arith.cmpi eq, %arg1, %c0_i32 : i32
    %1 = arith.extui %0 : i1 to i32
    %c0_i32_0 = arith.constant 0 : i32
    %2 = arith.cmpi ne, %1, %c0_i32_0 : i32
    scf.if %2 {
      %c0_83 = arith.constant 0 : index
      %c0_84 = arith.constant 0 : index
      %195 = vector.load %arg2[%c0_83, %c0_84] : memref<128x128xf32, #tpu.memory_space<vmem>>, vector<128x128xf32>
      %c0_85 = arith.constant 0 : index
      %c0_86 = arith.constant 0 : index
      %196 = vector.load %arg18[%c0_85, %c0_86] : memref<128x128xf32, #tpu.memory_space<vmem>>, vector<128x128xf32>
      tpu.vector_store %arg18[%c0_85, %c0_86], %195 {strides = array<i32>} : memref<128x128xf32, #tpu.memory_space<vmem>>, vector<128x128xf32>,
    } else {
    }
    %c0 = arith.constant 0 : index
    %c0_1 = arith.constant 0 : index
    %3 = vector.load %arg18[%c0, %c0_1] : memref<128x128xf32, #tpu.memory_space<vmem>>, vector<128x128xf32>
    %c0_2 = arith.constant 0 : index
    %c0_3 = arith.constant 0 : index
    %c0_4 = arith.constant 0 : index
    %4 = vector.load %arg3[%c0_2, %c0_3, %c0_4] : memref<1x1x128xf32, #tpu.memory_space<vmem>>, vector<1x1x128xf32>
    %5 = vector.shape_cast %4 : vector<1x1x128xf32> to vector<1x128xf32>
    %c0_5 = arith.constant 0 : index
    %c0_6 = arith.constant 0 : index
    %c0_7 = arith.constant 0 : index
    %6 = vector.load %arg4[%c0_5, %c0_6, %c0_7] : memref<1x1x128xf32, #tpu.memory_space<vmem>>, vector<1x1x128xf32>
    %7 = vector.shape_cast %6 : vector<1x1x128xf32> to vector<1x128xf32>
    %cst = arith.constant dense<0.000000e+00> : vector<128xf32>
    %8 = vector.multi_reduction <add>, %3, %cst [1] : vector<128x128xf32> to vector<128xf32>
    %9 = vector.shape_cast %8 : vector<128xf32> to vector<128x1xf32>
    %cst_8 = arith.constant 1.280000e+02 : f32
    %10 = vector.broadcast %cst_8 : f32 to vector<128x1xf32>
    %11 = arith.divf %9, %10 : vector<128x1xf32>
    %12 = vector.broadcast %11 : vector<128x1xf32> to vector<128x128xf32>
    %13 = arith.subf %3, %12 : vector<128x128xf32>
    %14 = arith.mulf %13, %13 : vector<128x128xf32>
    %cst_9 = arith.constant dense<0.000000e+00> : vector<128xf32>
    %15 = vector.multi_reduction <add>, %14, %cst_9 [1] : vector<128x128xf32> to vector<128xf32>
    %16 = vector.shape_cast %15 : vector<128xf32> to vector<128x1xf32>
    %cst_10 = arith.constant 1.280000e+02 : f32
    %17 = vector.broadcast %cst_10 : f32 to vector<128x1xf32>
    %18 = arith.divf %16, %17 : vector<128x1xf32>
    %cst_11 = arith.constant 9.99999974E-6 : f32
    %19 = vector.broadcast %cst_11 : f32 to vector<128x1xf32>
    %20 = arith.addf %18, %19 : vector<128x1xf32>
    %21 = math.rsqrt %20 : vector<128x1xf32>
    %22 = vector.broadcast %21 : vector<128x1xf32> to vector<128x128xf32>
    %23 = arith.mulf %13, %22 : vector<128x128xf32>
    %24 = vector.broadcast %5 : vector<1x128xf32> to vector<128x128xf32>
    %25 = arith.mulf %23, %24 : vector<128x128xf32>
    %26 = vector.broadcast %7 : vector<1x128xf32> to vector<128x128xf32>
    %27 = arith.addf %25, %26 : vector<128x128xf32>
    %c0_12 = arith.constant 0 : index
    %c0_13 = arith.constant 0 : index
    %c0_14 = arith.constant 0 : index
    %28 = vector.load %arg5[%c0_12, %c0_13, %c0_14] : memref<1x128x384xbf16, #tpu.memory_space<vmem>>, vector<1x128x384xbf16>
    %29 = vector.shape_cast %28 : vector<1x128x384xbf16> to vector<128x384xbf16>
    %c0_15 = arith.constant 0 : index
    %c0_16 = arith.constant 0 : index
    %c0_17 = arith.constant 0 : index
    %30 = vector.load %arg6[%c0_15, %c0_16, %c0_17] : memref<1x1x384xf32, #tpu.memory_space<vmem>>, vector<1x1x384xf32>
    %31 = vector.shape_cast %30 : vector<1x1x384xf32> to vector<1x384xf32>
    %32 = arith.truncf %27 : vector<128x128xf32> to vector<128x128xbf16>
    %cst_18 = arith.constant dense<0.000000e+00> : vector<128x384xf32>
    %33 = tpu.matmul %32, %29, %cst_18 {dimension_numbers = #tpu.dot_dimension_numbers<[1], [0], [0], [1], [0, 0, 1, 1], [], []>} : vector<128x128xbf16>, vector<128x384xbf16>, vector<128x384xf32> -> vector<128x384xf32>
    %34 = vector.broadcast %31 : vector<1x384xf32> to vector<128x384xf32>
    %35 = arith.addf %33, %34 : vector<128x384xf32>
    %36 = tpu.iota {dimensions = array<i32: 0>} : vector<32x32xi32>
    %37 = tpu.iota {dimensions = array<i32: 1>} : vector<32x32xi32>
    %38 = arith.cmpi sge, %36, %37 : vector<32x32xi32>
    %39 = vector.extract_strided_slice %35 {offsets = [0, 0], sizes = [128, 128], strides = [1, 1]} : vector<128x384xf32> to vector<128x128xf32>
    %40 = vector.shape_cast %39 : vector<128x128xf32> to vector<4x32x128xf32>
    %41 = vector.extract_strided_slice %35 {offsets = [0, 128], sizes = [128, 128], strides = [1, 1]} : vector<128x384xf32> to vector<128x128xf32>
    %42 = vector.shape_cast %41 : vector<128x128xf32> to vector<4x32x128xf32>
    %43 = vector.extract_strided_slice %35 {offsets = [0, 256], sizes = [128, 128], strides = [1, 1]} : vector<128x384xf32> to vector<128x128xf32>
    %44 = vector.shape_cast %43 : vector<128x128xf32> to vector<4x32x128xf32>
    %45 = vector.extract_strided_slice %40 {offsets = [0, 0, 0], sizes = [4, 32, 64], strides = [1, 1, 1]} : vector<4x32x128xf32> to vector<4x32x64xf32>
    %cst_19 = arith.constant 1.562500e-02 : f32
    %46 = vector.broadcast %cst_19 : f32 to vector<4x32x64xf32>
    %47 = arith.mulf %45, %46 : vector<4x32x64xf32>
    %48 = arith.truncf %47 : vector<4x32x64xf32> to vector<4x32x64xbf16>
    %49 = vector.extract_strided_slice %42 {offsets = [0, 0, 0], sizes = [4, 32, 64], strides = [1, 1, 1]} : vector<4x32x128xf32> to vector<4x32x64xf32>
    %50 = arith.truncf %49 : vector<4x32x64xf32> to vector<4x32x64xbf16>
    %51 = vector.extract_strided_slice %44 {offsets = [0, 0, 0], sizes = [4, 32, 64], strides = [1, 1, 1]} : vector<4x32x128xf32> to vector<4x32x64xf32>
    %52 = arith.truncf %51 : vector<4x32x64xf32> to vector<4x32x64xbf16>
    "tpu.trace_start"() <{level = 10 : i32, message = "btd,bsd->bts"}> : () -> ()
    %cst_20 = arith.constant dense<0.000000e+00> : vector<4x32x32xf32>
    %53 = tpu.matmul %48, %50, %cst_20 {dimension_numbers = #tpu.dot_dimension_numbers<[2], [2], [1], [1], [0, 0, 0, 1, 1, 1], [0], [0]>} : vector<4x32x64xbf16>, vector<4x32x64xbf16>, vector<4x32x32xf32> -> vector<4x32x32xf32>
    "tpu.trace_stop"() : () -> ()
    %54 = vector.shape_cast %38 : vector<32x32xi1> to vector<1x32x32xi1>
    %cst_21 = arith.constant -1.000000e+30 : f32
    %55 = vector.shape_cast %54 : vector<1x32x32xi1> to vector<1x32x32xi1>
    %56 = vector.broadcast %55 : vector<1x32x32xi1> to vector<4x32x32xi1>
    %57 = vector.broadcast %cst_21 : f32 to vector<4x32x32xf32>
    %58 = arith.select %56, %53, %57 : vector<4x32x32xi1>, vector<4x32x32xf32>
    %cst_22 = arith.constant dense<0xFF800000> : vector<4x32xf32>
    %59 = vector.multi_reduction <maximumf>, %58, %cst_22 [2] : vector<4x32x32xf32> to vector<4x32xf32>
    %60 = vector.shape_cast %59 : vector<4x32xf32> to vector<4x32x1xf32>
    %61 = vector.broadcast %60 : vector<4x32x1xf32> to vector<4x32x32xf32>
    %62 = arith.subf %58, %61 : vector<4x32x32xf32>
    %63 = math.exp %62 : vector<4x32x32xf32>
    %cst_23 = arith.constant dense<0.000000e+00> : vector<4x32xf32>
    %64 = vector.multi_reduction <add>, %63, %cst_23 [2] : vector<4x32x32xf32> to vector<4x32xf32>
    %65 = vector.shape_cast %64 : vector<4x32xf32> to vector<4x32x1xf32>
    %cst_24 = arith.constant 1.000000e+00 : f32
    %66 = vector.broadcast %cst_24 : f32 to vector<4x32x1xf32>
    %67 = arith.divf %66, %65 : vector<4x32x1xf32>
    %68 = vector.broadcast %67 : vector<4x32x1xf32> to vector<4x32x32xf32>
    %69 = arith.mulf %63, %68 : vector<4x32x32xf32>
    %70 = arith.truncf %69 : vector<4x32x32xf32> to vector<4x32x32xbf16>
    "tpu.trace_start"() <{level = 10 : i32, message = "bts,bsd->btd"}> : () -> ()
    %cst_25 = arith.constant dense<0.000000e+00> : vector<4x32x64xf32>
    %71 = tpu.matmul %70, %52, %cst_25 {dimension_numbers = #tpu.dot_dimension_numbers<[2], [1], [1], [2], [0, 0, 0, 1, 1, 2], [0], [0]>} : vector<4x32x32xbf16>, vector<4x32x64xbf16>, vector<4x32x64xf32> -> vector<4x32x64xf32>
    "tpu.trace_stop"() : () -> ()
    %72 = vector.extract_strided_slice %40 {offsets = [0, 0, 64], sizes = [4, 32, 64], strides = [1, 1, 1]} : vector<4x32x128xf32> to vector<4x32x64xf32>
    %cst_26 = arith.constant 1.562500e-02 : f32
    %73 = vector.broadcast %cst_26 : f32 to vector<4x32x64xf32>
    %74 = arith.mulf %72, %73 : vector<4x32x64xf32>
    %75 = arith.truncf %74 : vector<4x32x64xf32> to vector<4x32x64xbf16>
    %76 = vector.extract_strided_slice %42 {offsets = [0, 0, 64], sizes = [4, 32, 64], strides = [1, 1, 1]} : vector<4x32x128xf32> to vector<4x32x64xf32>
    %77 = arith.truncf %76 : vector<4x32x64xf32> to vector<4x32x64xbf16>
    %78 = vector.extract_strided_slice %44 {offsets = [0, 0, 64], sizes = [4, 32, 64], strides = [1, 1, 1]} : vector<4x32x128xf32> to vector<4x32x64xf32>
    %79 = arith.truncf %78 : vector<4x32x64xf32> to vector<4x32x64xbf16>
    "tpu.trace_start"() <{level = 10 : i32, message = "btd,bsd->bts"}> : () -> ()
    %cst_27 = arith.constant dense<0.000000e+00> : vector<4x32x32xf32>
    %80 = tpu.matmul %75, %77, %cst_27 {dimension_numbers = #tpu.dot_dimension_numbers<[2], [2], [1], [1], [0, 0, 0, 1, 1, 1], [0], [0]>} : vector<4x32x64xbf16>, vector<4x32x64xbf16>, vector<4x32x32xf32> -> vector<4x32x32xf32>
    "tpu.trace_stop"() : () -> ()
    %81 = vector.shape_cast %38 : vector<32x32xi1> to vector<1x32x32xi1>
    %cst_28 = arith.constant -1.000000e+30 : f32
    %82 = vector.shape_cast %81 : vector<1x32x32xi1> to vector<1x32x32xi1>
    %83 = vector.broadcast %82 : vector<1x32x32xi1> to vector<4x32x32xi1>
    %84 = vector.broadcast %cst_28 : f32 to vector<4x32x32xf32>
    %85 = arith.select %83, %80, %84 : vector<4x32x32xi1>, vector<4x32x32xf32>
    %cst_29 = arith.constant dense<0xFF800000> : vector<4x32xf32>
    %86 = vector.multi_reduction <maximumf>, %85, %cst_29 [2] : vector<4x32x32xf32> to vector<4x32xf32>
    %87 = vector.shape_cast %86 : vector<4x32xf32> to vector<4x32x1xf32>
    %88 = vector.broadcast %87 : vector<4x32x1xf32> to vector<4x32x32xf32>
    %89 = arith.subf %85, %88 : vector<4x32x32xf32>
    %90 = math.exp %89 : vector<4x32x32xf32>
    %cst_30 = arith.constant dense<0.000000e+00> : vector<4x32xf32>
    %91 = vector.multi_reduction <add>, %90, %cst_30 [2] : vector<4x32x32xf32> to vector<4x32xf32>
    %92 = vector.shape_cast %91 : vector<4x32xf32> to vector<4x32x1xf32>
    %cst_31 = arith.constant 1.000000e+00 : f32
    %93 = vector.broadcast %cst_31 : f32 to vector<4x32x1xf32>
    %94 = arith.divf %93, %92 : vector<4x32x1xf32>
    %95 = vector.broadcast %94 : vector<4x32x1xf32> to vector<4x32x32xf32>
    %96 = arith.mulf %90, %95 : vector<4x32x32xf32>
    %97 = arith.truncf %96 : vector<4x32x32xf32> to vector<4x32x32xbf16>
    "tpu.trace_start"() <{level = 10 : i32, message = "bts,bsd->btd"}> : () -> ()
    %cst_32 = arith.constant dense<0.000000e+00> : vector<4x32x64xf32>
    %98 = tpu.matmul %97, %79, %cst_32 {dimension_numbers = #tpu.dot_dimension_numbers<[2], [1], [1], [2], [0, 0, 0, 1, 1, 2], [0], [0]>} : vector<4x32x32xbf16>, vector<4x32x64xbf16>, vector<4x32x64xf32> -> vector<4x32x64xf32>
    "tpu.trace_stop"() : () -> ()
    %99 = tpu.concatenate %71, %98 in 2 : vector<4x32x64xf32>, vector<4x32x64xf32> -> vector<4x32x128xf32>
    %100 = vector.shape_cast %99 : vector<4x32x128xf32> to vector<128x128xf32>
    %101 = arith.truncf %100 : vector<128x128xf32> to vector<128x128xbf16>
    %c0_33 = arith.constant 0 : index
    %c0_34 = arith.constant 0 : index
    %c0_35 = arith.constant 0 : index
    %102 = vector.load %arg7[%c0_33, %c0_34, %c0_35] : memref<1x128x128xbf16, #tpu.memory_space<vmem>>, vector<1x128x128xbf16>
    %103 = vector.shape_cast %102 : vector<1x128x128xbf16> to vector<128x128xbf16>
    %cst_36 = arith.constant dense<0.000000e+00> : vector<128x128xf32>
    %104 = tpu.matmul %101, %103, %cst_36 {dimension_numbers = #tpu.dot_dimension_numbers<[1], [0], [0], [1], [0, 0, 1, 1], [], []>} : vector<128x128xbf16>, vector<128x128xbf16>, vector<128x128xf32> -> vector<128x128xf32>
    %c0_37 = arith.constant 0 : index
    %c0_38 = arith.constant 0 : index
    %c0_39 = arith.constant 0 : index
    %105 = vector.load %arg8[%c0_37, %c0_38, %c0_39] : memref<1x1x128xf32, #tpu.memory_space<vmem>>, vector<1x1x128xf32>
    %106 = vector.shape_cast %105 : vector<1x1x128xf32> to vector<1x128xf32>
    %107 = vector.broadcast %106 : vector<1x128xf32> to vector<128x128xf32>
    %108 = arith.addf %104, %107 : vector<128x128xf32>
    %109 = arith.addf %3, %108 : vector<128x128xf32>
    %c0_40 = arith.constant 0 : index
    %c0_41 = arith.constant 0 : index
    %c0_42 = arith.constant 0 : index
    %110 = vector.load %arg9[%c0_40, %c0_41, %c0_42] : memref<1x1x128xf32, #tpu.memory_space<vmem>>, vector<1x1x128xf32>
    %111 = vector.shape_cast %110 : vector<1x1x128xf32> to vector<1x128xf32>
    %c0_43 = arith.constant 0 : index
    %c0_44 = arith.constant 0 : index
    %c0_45 = arith.constant 0 : index
    %112 = vector.load %arg10[%c0_43, %c0_44, %c0_45] : memref<1x1x128xf32, #tpu.memory_space<vmem>>, vector<1x1x128xf32>
    %113 = vector.shape_cast %112 : vector<1x1x128xf32> to vector<1x128xf32>
    %cst_46 = arith.constant dense<0.000000e+00> : vector<128xf32>
    %114 = vector.multi_reduction <add>, %109, %cst_46 [1] : vector<128x128xf32> to vector<128xf32>
    %115 = vector.shape_cast %114 : vector<128xf32> to vector<128x1xf32>
    %cst_47 = arith.constant 1.280000e+02 : f32
    %116 = vector.broadcast %cst_47 : f32 to vector<128x1xf32>
    %117 = arith.divf %115, %116 : vector<128x1xf32>
    %118 = vector.broadcast %117 : vector<128x1xf32> to vector<128x128xf32>
    %119 = arith.subf %109, %118 : vector<128x128xf32>
    %120 = arith.mulf %119, %119 : vector<128x128xf32>
    %cst_48 = arith.constant dense<0.000000e+00> : vector<128xf32>
    %121 = vector.multi_reduction <add>, %120, %cst_48 [1] : vector<128x128xf32> to vector<128xf32>
    %122 = vector.shape_cast %121 : vector<128xf32> to vector<128x1xf32>
    %cst_49 = arith.constant 1.280000e+02 : f32
    %123 = vector.broadcast %cst_49 : f32 to vector<128x1xf32>
    %124 = arith.divf %122, %123 : vector<128x1xf32>
    %cst_50 = arith.constant 9.99999974E-6 : f32
    %125 = vector.broadcast %cst_50 : f32 to vector<128x1xf32>
    %126 = arith.addf %124, %125 : vector<128x1xf32>
    %127 = math.rsqrt %126 : vector<128x1xf32>
    %128 = vector.broadcast %127 : vector<128x1xf32> to vector<128x128xf32>
    %129 = arith.mulf %119, %128 : vector<128x128xf32>
    %130 = vector.broadcast %111 : vector<1x128xf32> to vector<128x128xf32>
    %131 = arith.mulf %129, %130 : vector<128x128xf32>
    %132 = vector.broadcast %113 : vector<1x128xf32> to vector<128x128xf32>
    %133 = arith.addf %131, %132 : vector<128x128xf32>
    %134 = arith.truncf %133 : vector<128x128xf32> to vector<128x128xbf16>
    %c0_51 = arith.constant 0 : index
    %c0_52 = arith.constant 0 : index
    %c0_53 = arith.constant 0 : index
    %135 = vector.load %arg11[%c0_51, %c0_52, %c0_53] : memref<1x128x512xbf16, #tpu.memory_space<vmem>>, vector<1x128x512xbf16>
    %136 = vector.shape_cast %135 : vector<1x128x512xbf16> to vector<128x512xbf16>
    %cst_54 = arith.constant dense<0.000000e+00> : vector<128x512xf32>
    %137 = tpu.matmul %134, %136, %cst_54 {dimension_numbers = #tpu.dot_dimension_numbers<[1], [0], [0], [1], [0, 0, 1, 1], [], []>} : vector<128x128xbf16>, vector<128x512xbf16>, vector<128x512xf32> -> vector<128x512xf32>
    %c0_55 = arith.constant 0 : index
    %c0_56 = arith.constant 0 : index
    %c0_57 = arith.constant 0 : index
    %138 = vector.load %arg12[%c0_55, %c0_56, %c0_57] : memref<1x1x512xf32, #tpu.memory_space<vmem>>, vector<1x1x512xf32>
    %139 = vector.shape_cast %138 : vector<1x1x512xf32> to vector<1x512xf32>
    %140 = vector.broadcast %139 : vector<1x512xf32> to vector<128x512xf32>
    %141 = arith.addf %137, %140 : vector<128x512xf32>
    %cst_58 = arith.constant 5.000000e-01 : f32
    %142 = vector.broadcast %cst_58 : f32 to vector<128x512xf32>
    %143 = arith.mulf %142, %141 : vector<128x512xf32>
    %cst_59 = arith.constant 1.41421354 : f32
    %144 = vector.broadcast %cst_59 : f32 to vector<128x512xf32>
    %145 = arith.divf %141, %144 : vector<128x512xf32>
    %146 = math.absf %145 : vector<128x512xf32>
    %cst_60 = arith.constant 0.327591091 : f32
    %147 = vector.broadcast %cst_60 : f32 to vector<128x512xf32>
    %148 = arith.mulf %147, %146 : vector<128x512xf32>
    %cst_61 = arith.constant 1.000000e+00 : f32
    %149 = vector.broadcast %cst_61 : f32 to vector<128x512xf32>
    %150 = arith.addf %149, %148 : vector<128x512xf32>
    %cst_62 = arith.constant 1.000000e+00 : f32
    %151 = vector.broadcast %cst_62 : f32 to vector<128x512xf32>
    %152 = arith.divf %151, %150 : vector<128x512xf32>
    %cst_63 = arith.constant 1.06140542 : f32
    %153 = vector.broadcast %cst_63 : f32 to vector<128x512xf32>
    %154 = arith.mulf %153, %152 : vector<128x512xf32>
    %cst_64 = arith.constant -1.45315206 : f32
    %155 = vector.broadcast %cst_64 : f32 to vector<128x512xf32>
    %156 = arith.addf %154, %155 : vector<128x512xf32>
    %157 = arith.mulf %156, %152 : vector<128x512xf32>
    %cst_65 = arith.constant 1.42141378 : f32
    %158 = vector.broadcast %cst_65 : f32 to vector<128x512xf32>
    %159 = arith.addf %157, %158 : vector<128x512xf32>
    %160 = arith.mulf %159, %152 : vector<128x512xf32>
    %cst_66 = arith.constant -0.284496725 : f32
    %161 = vector.broadcast %cst_66 : f32 to vector<128x512xf32>
    %162 = arith.addf %160, %161 : vector<128x512xf32>
    %163 = arith.mulf %162, %152 : vector<128x512xf32>
    %cst_67 = arith.constant 0.254829586 : f32
    %164 = vector.broadcast %cst_67 : f32 to vector<128x512xf32>
    %165 = arith.addf %163, %164 : vector<128x512xf32>
    %166 = arith.mulf %165, %152 : vector<128x512xf32>
    %cst_68 = arith.constant 0.000000e+00 : f32
    %167 = vector.broadcast %cst_68 : f32 to vector<128x512xf32>
    %168 = arith.subf %167, %146 : vector<128x512xf32>
    %169 = arith.mulf %168, %146 : vector<128x512xf32>
    %170 = math.exp %169 : vector<128x512xf32>
    %171 = arith.mulf %166, %170 : vector<128x512xf32>
    %cst_69 = arith.constant 1.000000e+00 : f32
    %172 = vector.broadcast %cst_69 : f32 to vector<128x512xf32>
    %173 = arith.subf %172, %171 : vector<128x512xf32>
    %cst_70 = arith.constant 0.000000e+00 : f32
    %174 = vector.broadcast %cst_70 : f32 to vector<128x512xf32>
    %175 = arith.cmpf oge, %145, %174 : vector<128x512xf32>
    %cst_71 = arith.constant 0.000000e+00 : f32
    %176 = vector.broadcast %cst_71 : f32 to vector<128x512xf32>
    %177 = arith.subf %176, %173 : vector<128x512xf32>
    %178 = arith.select %175, %173, %177 : vector<128x512xi1>, vector<128x512xf32>
    %cst_72 = arith.constant 1.000000e+00 : f32
    %179 = vector.broadcast %cst_72 : f32 to vector<128x512xf32>
    %180 = arith.addf %179, %178 : vector<128x512xf32>
    %181 = arith.mulf %143, %180 : vector<128x512xf32>
    %182 = arith.truncf %181 : vector<128x512xf32> to vector<128x512xbf16>
    %c0_73 = arith.constant 0 : index
    %c0_74 = arith.constant 0 : index
    %c0_75 = arith.constant 0 : index
    %183 = vector.load %arg13[%c0_73, %c0_74, %c0_75] : memref<1x512x128xbf16, #tpu.memory_space<vmem>>, vector<1x512x128xbf16>
    %184 = vector.shape_cast %183 : vector<1x512x128xbf16> to vector<512x128xbf16>
    %cst_76 = arith.constant dense<0.000000e+00> : vector<128x128xf32>
    %185 = tpu.matmul %182, %184, %cst_76 {dimension_numbers = #tpu.dot_dimension_numbers<[1], [0], [0], [1], [0, 0, 1, 1], [], []>} : vector<128x512xbf16>, vector<512x128xbf16>, vector<128x128xf32> -> vector<128x128xf32>
    %186 = arith.addf %109, %185 : vector<128x128xf32>
    %c0_77 = arith.constant 0 : index
    %c0_78 = arith.constant 0 : index
    %c0_79 = arith.constant 0 : index
    %187 = vector.load %arg14[%c0_77, %c0_78, %c0_79] : memref<1x1x128xf32, #tpu.memory_space<vmem>>, vector<1x1x128xf32>
    %188 = vector.shape_cast %187 : vector<1x1x128xf32> to vector<1x128xf32>
    %189 = vector.broadcast %188 : vector<1x128xf32> to vector<128x128xf32>
    %190 = arith.addf %186, %189 : vector<128x128xf32>
    %c0_80 = arith.constant 0 : index
    %c0_81 = arith.constant 0 : index
    %191 = vector.load %arg18[%c0_80, %c0_81] : memref<128x128xf32, #tpu.memory_space<vmem>>, vector<128x128xf32>
    tpu.vector_store %arg18[%c0_80, %c0_81], %190 {strides = array<i32>} : memref<128x128xf32, #tpu.memory_space<vmem>>, vector<128x128xf32>,
    %c1_i32 = arith.constant 1 : i32
    %192 = arith.cmpi eq, %arg1, %c1_i32 : i32
    %193 = arith.extui %192 : i1 to i32
    %c0_i32_82 = arith.constant 0 : i32
    %194 = arith.cmpi ne, %193, %c0_i32_82 : i32
    scf.if %194 {
      %195 = vector.shape_cast %190 : vector<128x128xf32> to vector<4x32x128xf32>
      %196 = vector.extract_strided_slice %195 {offsets = [0, 31, 0], sizes = [4, 1, 128], strides = [1, 1, 1]} : vector<4x32x128xf32> to vector<4x1x128xf32>
      %197 = vector.shape_cast %196 : vector<4x1x128xf32> to vector<4x128xf32>
      %c0_83 = arith.constant 0 : index
      %c0_84 = arith.constant 0 : index
      %198 = vector.load %arg15[%c0_83, %c0_84] : memref<1x128xf32, #tpu.memory_space<vmem>>, vector<1x128xf32>
      %c0_85 = arith.constant 0 : index
      %c0_86 = arith.constant 0 : index
      %199 = vector.load %arg16[%c0_85, %c0_86] : memref<1x128xf32, #tpu.memory_space<vmem>>, vector<1x128xf32>
      %cst_87 = arith.constant dense<0.000000e+00> : vector<4xf32>
      %200 = vector.multi_reduction <add>, %197, %cst_87 [1] : vector<4x128xf32> to vector<4xf32>
      %201 = vector.shape_cast %200 : vector<4xf32> to vector<4x1xf32>
      %cst_88 = arith.constant 1.280000e+02 : f32
      %202 = vector.broadcast %cst_88 : f32 to vector<4x1xf32>
      %203 = arith.divf %201, %202 : vector<4x1xf32>
      %204 = vector.broadcast %203 : vector<4x1xf32> to vector<4x128xf32>
      %205 = arith.subf %197, %204 : vector<4x128xf32>
      %206 = arith.mulf %205, %205 : vector<4x128xf32>
      %cst_89 = arith.constant dense<0.000000e+00> : vector<4xf32>
      %207 = vector.multi_reduction <add>, %206, %cst_89 [1] : vector<4x128xf32> to vector<4xf32>
      %208 = vector.shape_cast %207 : vector<4xf32> to vector<4x1xf32>
      %cst_90 = arith.constant 1.280000e+02 : f32
      %209 = vector.broadcast %cst_90 : f32 to vector<4x1xf32>
      %210 = arith.divf %208, %209 : vector<4x1xf32>
      %cst_91 = arith.constant 9.99999974E-6 : f32
      %211 = vector.broadcast %cst_91 : f32 to vector<4x1xf32>
      %212 = arith.addf %210, %211 : vector<4x1xf32>
      %213 = math.rsqrt %212 : vector<4x1xf32>
      %214 = vector.broadcast %213 : vector<4x1xf32> to vector<4x128xf32>
      %215 = arith.mulf %205, %214 : vector<4x128xf32>
      %216 = vector.broadcast %198 : vector<1x128xf32> to vector<4x128xf32>
      %217 = arith.mulf %215, %216 : vector<4x128xf32>
      %218 = vector.broadcast %199 : vector<1x128xf32> to vector<4x128xf32>
      %219 = arith.addf %217, %218 : vector<4x128xf32>
      %c0_92 = arith.constant 0 : index
      %c0_93 = arith.constant 0 : index
      %c0_94 = arith.constant 0 : index
      %220 = vector.load %arg17[%c0_92, %c0_93, %c0_94] : memref<1x4x128xf32, #tpu.memory_space<vmem>>, vector<1x4x128xf32>
      %221 = vector.shape_cast %220 : vector<1x4x128xf32> to vector<4x128xf32>
      %222 = vector.shape_cast %219 : vector<4x128xf32> to vector<1x4x128xf32>
      tpu.vector_store %arg17[%c0_92, %c0_93, %c0_94], %222 {strides = array<i32>} : memref<1x4x128xf32, #tpu.memory_space<vmem>>, vector<1x4x128xf32>,
    } else {
    }
    return
  }
  func.func @transform_0(%arg0: i32, %arg1: i32) -> (i32, i32) {
    %c0_i32 = arith.constant 0 : i32
    %c0_i32_0 = arith.constant 0 : i32
    return %arg0, %c0_i32 : i32, i32
  }
  func.func @transform_1(%arg0: i32, %arg1: i32) -> (i32, i32, i32) {
    %c0_i32 = arith.constant 0 : i32
    %c0_i32_0 = arith.constant 0 : i32
    %c0_i32_1 = arith.constant 0 : i32
    return %arg1, %c0_i32, %c0_i32_0 : i32, i32, i32
  }
  func.func @transform_2(%arg0: i32, %arg1: i32) -> (i32, i32, i32) {
    %c0_i32 = arith.constant 0 : i32
    %c0_i32_0 = arith.constant 0 : i32
    %c0_i32_1 = arith.constant 0 : i32
    return %arg1, %c0_i32, %c0_i32_0 : i32, i32, i32
  }
  func.func @transform_3(%arg0: i32, %arg1: i32) -> (i32, i32, i32) {
    %c0_i32 = arith.constant 0 : i32
    %c0_i32_0 = arith.constant 0 : i32
    %c0_i32_1 = arith.constant 0 : i32
    return %arg1, %c0_i32, %c0_i32_0 : i32, i32, i32
  }
  func.func @transform_4(%arg0: i32, %arg1: i32) -> (i32, i32, i32) {
    %c0_i32 = arith.constant 0 : i32
    %c0_i32_0 = arith.constant 0 : i32
    %c0_i32_1 = arith.constant 0 : i32
    return %arg1, %c0_i32, %c0_i32_0 : i32, i32, i32
  }
  func.func @transform_5(%arg0: i32, %arg1: i32) -> (i32, i32, i32) {
    %c0_i32 = arith.constant 0 : i32
    %c0_i32_0 = arith.constant 0 : i32
    %c0_i32_1 = arith.constant 0 : i32
    return %arg1, %c0_i32, %c0_i32_0 : i32, i32, i32
  }
  func.func @transform_6(%arg0: i32, %arg1: i32) -> (i32, i32, i32) {
    %c0_i32 = arith.constant 0 : i32
    %c0_i32_0 = arith.constant 0 : i32
    %c0_i32_1 = arith.constant 0 : i32
    return %arg1, %c0_i32, %c0_i32_0 : i32, i32, i32
  }
  func.func @transform_7(%arg0: i32, %arg1: i32) -> (i32, i32, i32) {
    %c0_i32 = arith.constant 0 : i32
    %c0_i32_0 = arith.constant 0 : i32
    %c0_i32_1 = arith.constant 0 : i32
    return %arg1, %c0_i32, %c0_i32_0 : i32, i32, i32
  }
  func.func @transform_8(%arg0: i32, %arg1: i32) -> (i32, i32, i32) {
    %c0_i32 = arith.constant 0 : i32
    %c0_i32_0 = arith.constant 0 : i32
    %c0_i32_1 = arith.constant 0 : i32
    return %arg1, %c0_i32, %c0_i32_0 : i32, i32, i32
  }
  func.func @transform_9(%arg0: i32, %arg1: i32) -> (i32, i32, i32) {
    %c0_i32 = arith.constant 0 : i32
    %c0_i32_0 = arith.constant 0 : i32
    %c0_i32_1 = arith.constant 0 : i32
    return %arg1, %c0_i32, %c0_i32_0 : i32, i32, i32
  }
  func.func @transform_10(%arg0: i32, %arg1: i32) -> (i32, i32, i32) {
    %c0_i32 = arith.constant 0 : i32
    %c0_i32_0 = arith.constant 0 : i32
    %c0_i32_1 = arith.constant 0 : i32
    return %arg1, %c0_i32, %c0_i32_0 : i32, i32, i32
  }
  func.func @transform_11(%arg0: i32, %arg1: i32) -> (i32, i32, i32) {
    %c0_i32 = arith.constant 0 : i32
    %c0_i32_0 = arith.constant 0 : i32
    %c0_i32_1 = arith.constant 0 : i32
    return %arg1, %c0_i32, %c0_i32_0 : i32, i32, i32
  }
  func.func @transform_12(%arg0: i32, %arg1: i32) -> (i32, i32, i32) {
    %c0_i32 = arith.constant 0 : i32
    %c0_i32_0 = arith.constant 0 : i32
    %c0_i32_1 = arith.constant 0 : i32
    return %arg1, %c0_i32, %c0_i32_0 : i32, i32, i32
  }
  func.func @transform_13(%arg0: i32, %arg1: i32) -> (i32, i32) {
    %c0_i32 = arith.constant 0 : i32
    %c0_i32_0 = arith.constant 0 : i32
    %c0_i32_1 = arith.constant 0 : i32
    return %c0_i32, %c0_i32_0 : i32, i32
  }
  func.func @transform_14(%arg0: i32, %arg1: i32) -> (i32, i32) {
    %c0_i32 = arith.constant 0 : i32
    %c0_i32_0 = arith.constant 0 : i32
    %c0_i32_1 = arith.constant 0 : i32
    return %c0_i32, %c0_i32_0 : i32, i32
  }
  func.func @transform_15(%arg0: i32, %arg1: i32) -> (i32, i32, i32) {
    %c0_i32 = arith.constant 0 : i32
    %c0_i32_0 = arith.constant 0 : i32
    %c0_i32_1 = arith.constant 0 : i32
    return %arg0, %c0_i32, %c0_i32_0 : i32, i32, i32
  }
}

</mosaic_0001>

<bundles_post_ra>
// kernel: gpt_forward.3
= control target key start
LH: loop header
LB: loop body
LE: loop exit
PB: predicated region body
PF: predicated region fallthrough
CT: control target
= control target key end

     0   :  { %v198_v1 = vmov 0   ;;  %s271_s1 = inlined_call_operand.vmem [shape: bf16[128,256], index: 1, kind: input, shape index: {}]   ;;  %s272_s0 = inlined_call_operand.vmem [shape: f32[8,128], index: 0, kind: input, shape index: {}]   ;;  %s273_s2 = inlined_call_operand.vmem [shape: f32[8,256], index: 2, kind: output, shape index: {}]  }
   0x1   :  { %v174_v0 = vld [vmem:[%s271_s1 + $0x4] ss:$8 sps:$4 sm:$0xff]   ;;  %142 = vmatprep.mubr.bf16.mxu0 %v198_v1  ;;  %v176_v2 = vld [vmem:[%s271_s1] ss:$8 sps:$4 sm:$0xff]   ;;  %v177_v3 = vld [vmem:[%s271_s1 + $0x14] ss:$8 sps:$4 sm:$0xff]  }
   0x2   :  { %110 = vmatprep.subr.bf16.mxu0 %v174_v0  ;;  %v179_v4 = vld [vmem:[%s271_s1 + $0x10] ss:$8 sps:$4 sm:$0xff]   ;;  %v180_v5 = vld [vmem:[%s271_s1 + $0x24] ss:$8 sps:$4 sm:$0xff]   ;;  %v182_v6 = vld [vmem:[%s271_s1 + $0x20] ss:$8 sps:$4 sm:$0xff]  }
   0x3   :  { %111 = vmatpush1.bf16.msra.mxu0 %v176_v2  ;;  %v183_v7 = vld [vmem:[%s271_s1 + $0x34] ss:$8 sps:$4 sm:$0xff]   ;;  %v185_v8 = vld [vmem:[%s271_s1 + $0x30] ss:$8 sps:$4 sm:$0xff]   ;;  %v186_v9 = vld [vmem:[%s271_s1 + $0x44] ss:$8 sps:$4 sm:$0xff]  }
   0x4   :  { %112 = vmatprep.subr.bf16.mxu0 %v177_v3  ;;  %v188_v10 = vld [vmem:[%s271_s1 + $0x40] ss:$8 sps:$4 sm:$0xff]   ;;  %v189_v11 = vld [vmem:[%s271_s1 + $0x54] ss:$8 sps:$4 sm:$0xff]   ;;  %v191_v12 = vld [vmem:[%s271_s1 + $0x50] ss:$8 sps:$4 sm:$0xff]  }
   0x5   :  { %v192_v13 = vld [vmem:[%s271_s1 + $0x64] ss:$8 sps:$4 sm:$0xff]   ;;  %v194_v14 = vld [vmem:[%s271_s1 + $0x60] ss:$8 sps:$4 sm:$0xff]   ;;  %v195_v15 = vld [vmem:[%s271_s1 + $0x74] ss:$8 sps:$4 sm:$0xff]  }
   0x6   :  { %v197_v16 = vld [vmem:[%s271_s1 + $0x70] ss:$8 sps:$4 sm:$0xff]   ;;  %v12_v17 = vld [vmem:[%s272_s0] sm:$0xff] }
   0x7   :  { %113 = vmatpush1.bf16.msra.mxu0 %v179_v4  ;;  %v13_v18 = vpack.c.bf16 %v12_v17, %v12_v17 }
   0x8   :  { %114 = vmatprep.subr.bf16.mxu0 %v180_v5 }
   0xb   :  { %115 = vmatpush1.bf16.msra.mxu0 %v182_v6 }
   0xc   :  { %116 = vmatprep.subr.bf16.mxu0 %v183_v7 }
   0xf   :  { %117 = vmatpush1.bf16.msra.mxu0 %v185_v8 }
  0x10   :  { %118 = vmatprep.subr.bf16.mxu0 %v186_v9 }
  0x13   :  { %119 = vmatpush1.bf16.msra.mxu0 %v188_v10 }
  0x14   :  { %120 = vmatprep.subr.bf16.mxu0 %v189_v11 }
  0x17   :  { %121 = vmatpush1.bf16.msra.mxu0 %v191_v12 }
  0x18   :  { %122 = vmatprep.subr.bf16.mxu0 %v192_v13 }
  0x1b   :  { %123 = vmatpush1.bf16.msra.mxu0 %v194_v14 }
  0x1c   :  { %124 = vmatprep.subr.bf16.mxu0 %v195_v15 }
  0x1f   :  { %125 = vmatpush1.bf16.msra.mxu0 %v197_v16 }
  0x22   :  { %143 = vmatmul.mubr.bf16.vlgmr.msra.gmra.mrb[0].mxu0 %v13_v18 }
  0xf5   :  { %v144_v19 = vpop.f32.mrb[0].mxu0 }
  0xf6   :  { %151 = vst [vmem:[%s273_s2] sm:$0xff] %v144_v19  ;;  %v146_v20 = vpop.f32.mrb[1].mxu0 }
  0xf7   :  { %152 = vst [vmem:[%s273_s2 + $0x8] sm:$0xff] %v146_v20  ;;  %v148_v21 = vpop.f32.mrb[2].mxu0 }
  0xf8   :  { %v149_v22 = vpop.f32.mrb[3].mxu0 }

// kernel: gpt_forward.2
= control target key start
LH: loop header
LB: loop body
LE: loop exit
PB: predicated region body
PF: predicated region fallthrough
CT: control target
= control target key end

     0   :  { %s7775_s18 = smov 0   ;;  %s7777_s19 = smov 0   ;;  %s11217_s0 = inlined_call_operand.vmem [shape: f32[256,128], index: 0, kind: input, shape index: {}]   ;;  %s11218_s1 = inlined_call_operand.vmem [shape: f32[2,1,128], index: 1, kind: input, shape index: {}]   ;;  %s11219_s2 = inlined_call_operand.vmem [shape: f32[2,1,128], index: 2, kind: input, shape index: {}]   ;;  %s11220_s3 = inlined_call_operand.vmem [shape: bf16[2,128,384], index: 3, kind: input, shape index: {}]   ;;  %s11221_s4 = inlined_call_operand.vmem [shape: f32[2,1,384], index: 4, kind: input, shape index: {}]   ;;  %s11222_s5 = inlined_call_operand.vmem [shape: bf16[2,128,128], index: 5, kind: input, shape index: {}]   ;;  %s11223_s6 = inlined_call_operand.vmem [shape: f32[2,1,128], index: 6, kind: input, shape index: {}]   ;;  %s11224_s7 = inlined_call_operand.vmem [shape: f32[2,1,128], index: 7, kind: input, shape index: {}]   ;;  %s11225_s8 = inlined_call_operand.vmem [shape: f32[2,1,128], index: 8, kind: input, shape index: {}]   ;;  %s11226_s9 = inlined_call_operand.vmem [shape: bf16[2,128,512], index: 9, kind: input, shape index: {}]   ;;  %s11227_s10 = inlined_call_operand.vmem [shape: f32[2,1,512], index: 10, kind: input, shape index: {}]   ;;  %s11228_s11 = inlined_call_operand.vmem [shape: bf16[2,512,128], index: 11, kind: input, shape index: {}]   ;;  %s11229_s12 = inlined_call_operand.vmem [shape: f32[2,1,128], index: 12, kind: input, shape index: {}]   ;;  %s11230_s13 = inlined_call_operand.vmem [shape: f32[1,128], index: 13, kind: input, shape index: {}]   ;;  %s11231_s14 = inlined_call_operand.vmem [shape: f32[1,128], index: 14, kind: input, shape index: {}]   ;;  %s11232_s15 = inlined_call_operand.vmem [shape: f32[2,4,128], index: 15, kind: output, shape index: {}]  }
   0x1   :  { %11280 = sst [smem:[#allocation70_spill]] %s11217_s0  ;;  %s7779_s20 = smov 0  }
   0x2   :  { %11281 = sst [smem:[#allocation71_spill]] %s11218_s1  ;;  %s7781_s21 = smov 0  }
   0x3   :  { %11282 = sst [smem:[#allocation72_spill]] %s11219_s2  ;;  %s7783_s22 = smov 0  }
   0x4   :  { %11283 = sst [smem:[#allocation73_spill]] %s11220_s3 }
   0x5   :  { %11284 = sst [smem:[#allocation74_spill]] %s11221_s4 }
   0x6   :  { %11285 = sst [smem:[#allocation75_spill]] %s11230_s13 }
   0x7   :  { %11286 = sst [smem:[#allocation76_spill]] %s11231_s14 }
   0x8 LB: > { %11287 = sst [smem:[#allocation3_spill]] %s7675_s18  ;;  %s34_s23 = sadd.s32 1, %s7683_s20  ;;  %s7691_s22 = sphi %s7783_s22, %s25_s22   ;;  %s7687_s21 = sphi %s7781_s21, %s11543_s21   ;;  %s7683_s20 = sphi %s7779_s20, %s11542_s20   ;;  %s7679_s19 = sphi %s7777_s19, %s11541_s19   ;;  %s7675_s18 = sphi %s7775_s18, %s11540_s18  }
   0x9   : > { %11288 = sst [smem:[#allocation4_spill]] %s7683_s20  ;;  %s37_s24 = sadd.s32 1, %s7687_s21 }
   0xa   : > { %11289 = sst [smem:[#allocation5_spill]] %s7687_s21  ;;  %p35_p0 = scmp.ge.s32.totalorder %s34_s23, 2 }
   0xb   : > { %11290 = sst [smem:[#allocation6_spill]] %s7691_s22  ;;  %p6394_p1 = scmp.ge.s32.totalorder %s7691_s22, 1 }
   0xc   : > { %p556_p2 = scmp.lt.s32.totalorder %s7691_s22, 5  ;;  %s11545_s23 = smov (%p35_p0, %s34_s23), 0 }
   0xd   : > { %11291 = sst [smem:[#allocation7_spill]] %s11545_s23  ;;  %s11547_s24 = smov (!%p35_p0, %s37_s24), %s7687_s21 }
   0xe   : > { %p557_p3 = pnand %p6394_p1, %p556_p2  ;;  %p39_p4 = scmp.ge.s32.totalorder %s11547_s24, 2 }
  0x10   : > { %s11549_s24 = smov (%p39_p4, %s11547_s24), 0  ;;  %560 = sbr.rel (%p557_p3) target bundleno = 3890 (0xf32), region = 80 }
  0x11   : > { %11292 = sst [smem:[#allocation8_spill]] %s11549_s24 }
  0x17   : > { %s6395_s25 = sshll.u32 %s7679_s19, 4  ;;  %p655_p5 = scmp.lt.s32.totalorder %s7675_s18, 1 }
  0x18   : > { %p650_p6 = scmp.lt.s32.totalorder %s6395_s25, 31  ;;  %p701_p7 = scmp.lt.s32.totalorder %s7679_s19, 1 }
  0x19   : > { %s7813_s26 = scalar_select %p655_p5, %s7675_s18, 1 }
  0x1a   : > { %s11551_s25 = smov (!%p650_p6, %s6395_s25), 31  ;;  %s11295_s0 = sld [smem:[#allocation70_spill]] }
  0x1b   : > { %s6396_s24 = sshll.u32 %s11551_s25, 3  ;;  %s6981_s23 = smul.u32 192, %s7813_s26 }
  0x1c   : > { %s6982_s14 = smul.u32 3, %s7813_s26  ;;  %s11296_s3 = sld [smem:[#allocation73_spill]] }
  0x1d   : > { %s6546_s28 = sshll.u32 %s7813_s26, 6  ;;  %s11297_s4 = sld [smem:[#allocation74_spill]] }
  0x1e   : > { %s7844_s20 = scalar_lea.vmem %s11222_s5, %s6546_s28  ;;  %s6547_s29 = sshll.u32 %s7813_s26, 8 }
  0x1f   : > { %s6402_s17 = sshll.u32 %s7813_s26, 2  ;;  %s7873_s1 = scalar_lea.vmem %s11228_s11, %s6547_s29 }
  0x20   : > { %s7827_s22 = scalar_lea.vmem %s11295_s0, %s6396_s24  ;;  %s7868_s21 = scalar_lea.vmem %s11227_s10, %s6402_s17 }
  0x21   : > { %s11553_s19 = smov (!%p701_p7, %s7679_s19), 1  ;;  %s11298_s28 = sld [smem:[#allocation3_spill]] }
  0x22   : > { %s7833_s27 = scalar_lea.vmem %s11296_s3, %s6981_s23  ;;  %s700_s23 = scalar_lea.vmem %s11229_s12, %s7813_s26 }
  0x23   : > { %s7839_s25 = scalar_lea.vmem %s11297_s4, %s6982_s14  ;;  %s7862_s4 = scalar_lea.vmem %s11226_s9, %s6547_s29 }
  0x24   : > { %s6405_s14 = sshll.u32 %s11553_s19, 2 }
  0x25   : > { %s7885_s13 = scalar_lea.vmem %s11232_s15, %s6405_s14 }
  0x27   : > { %p6406_p8 = scmp.ne.s32.totalorder %s11298_s28, 0 }
  0x28   : > { %v710_v0 = vld [vmem:[%s7827_s22] sm:$0xff] (!%p6406_p8)  ;;  %v711_v1 = vld [vmem:[%s7827_s22 + $0x8] sm:$0xff] (!%p6406_p8)  ;;  %v712_v2 = vld [vmem:[%s7827_s22 + $0x10] sm:$0xff] (!%p6406_p8) }
  0x29   : > { %709 = sbr.rel (%p6406_p8) target bundleno = 49 (0x31), region = 84  ;;  %726 = vst [vmem:[#allocation2] sm:$0xff] (!%p6406_p8), %v710_v0  ;;  %727 = vst [vmem:[#allocation2 + $0x8] sm:$0xff] (!%p6406_p8), %v711_v1  ;;  %v713_v3 = vld [vmem:[%s7827_s22 + $0x18] sm:$0xff] (!%p6406_p8)  ;;  %v714_v4 = vld [vmem:[%s7827_s22 + $0x20] sm:$0xff] (!%p6406_p8) }
  0x2a   : > { %728 = vst [vmem:[#allocation2 + $0x10] sm:$0xff] (!%p6406_p8), %v712_v2  ;;  %v715_v5 = vld [vmem:[%s7827_s22 + $0x28] sm:$0xff] (!%p6406_p8)  ;;  %729 = vst [vmem:[#allocation2 + $0x18] sm:$0xff] (!%p6406_p8), %v713_v3  ;;  %v716_v6 = vld [vmem:[%s7827_s22 + $0x30] sm:$0xff] (!%p6406_p8) }
  0x2b   : > { %730 = vst [vmem:[#allocation2 + $0x20] sm:$0xff] (!%p6406_p8), %v714_v4  ;;  %731 = vst [vmem:[#allocation2 + $0x28] sm:$0xff] (!%p6406_p8), %v715_v5  ;;  %v717_v7 = vld [vmem:[%s7827_s22 + $0x38] sm:$0xff] (!%p6406_p8)  ;;  %v718_v8 = vld [vmem:[%s7827_s22 + $0x40] sm:$0xff] (!%p6406_p8) }
  0x2c   : > { %732 = vst [vmem:[#allocation2 + $0x30] sm:$0xff] (!%p6406_p8), %v716_v6  ;;  %733 = vst [vmem:[#allocation2 + $0x38] sm:$0xff] (!%p6406_p8), %v717_v7  ;;  %v719_v9 = vld [vmem:[%s7827_s22 + $0x48] sm:$0xff] (!%p6406_p8)  ;;  %v720_v10 = vld [vmem:[%s7827_s22 + $0x50] sm:$0xff] (!%p6406_p8) }
  0x2d   : > { %734 = vst [vmem:[#allocation2 + $0x40] sm:$0xff] (!%p6406_p8), %v718_v8  ;;  %v721_v11 = vld [vmem:[%s7827_s22 + $0x58] sm:$0xff] (!%p6406_p8)  ;;  %735 = vst [vmem:[#allocation2 + $0x48] sm:$0xff] (!%p6406_p8), %v719_v9  ;;  %v722_v12 = vld [vmem:[%s7827_s22 + $0x60] sm:$0xff] (!%p6406_p8) }
  0x2e   : > { %736 = vst [vmem:[#allocation2 + $0x50] sm:$0xff] (!%p6406_p8), %v720_v10  ;;  %737 = vst [vmem:[#allocation2 + $0x58] sm:$0xff] (!%p6406_p8), %v721_v11  ;;  %v723_v13 = vld [vmem:[%s7827_s22 + $0x68] sm:$0xff] (!%p6406_p8)  ;;  %v724_v14 = vld [vmem:[%s7827_s22 + $0x70] sm:$0xff] (!%p6406_p8) }
  0x2f   : > { %738 = vst [vmem:[#allocation2 + $0x60] sm:$0xff] (!%p6406_p8), %v722_v12  ;;  %739 = vst [vmem:[#allocation2 + $0x68] sm:$0xff] (!%p6406_p8), %v723_v13  ;;  %v725_v15 = vld [vmem:[%s7827_s22 + $0x78] sm:$0xff] (!%p6406_p8) }
  0x30   : > { %740 = vst [vmem:[#allocation2 + $0x70] sm:$0xff] %v724_v14  ;;  %741 = vst [vmem:[#allocation2 + $0x78] sm:$0xff] %v725_v15 }
  0x31 PF: > { %v742_v16 = vld [vmem:[#allocation2] sm:$0xff]  ;;  %v743_v18 = vld [vmem:[#allocation2 + $0x8] sm:$0xff]  ;;  %s11299_s19 = sld [smem:[#allocation71_spill]]  ;;  %s11301_s17 = sld [smem:[#allocation72_spill]]  ;;  %vm1427_vm0 = vcmask 523264   ;;  %vm1696_vm2 = vcmask 261120  }
  0x32   : > { %v744_v17 = vld [vmem:[#allocation2 + $0x10] sm:$0xff]  ;;  %760 = vadd.xlane.f32.xlu0 %v742_v16  ;;  %v745_v19 = vld [vmem:[#allocation2 + $0x18] sm:$0xff]  ;;  %v7067_v33 = vld [vmem:[%s7833_s27] ss:$12 sps:$4 sm:$0xff]   ;;  %s11317_s2 = scalar_lea.vmem %s11223_s6, %s7813_s26  ;;  %s11334_s14 = scalar_lea.vmem %s11224_s7, %s7813_s26 }
  0x33   : > { %764 = vadd.xlane.f32.xlu1 %v744_v17  ;;  %v746_v20 = vld [vmem:[#allocation2 + $0x20] sm:$0xff]  ;;  %v747_v21 = vld [vmem:[#allocation2 + $0x28] sm:$0xff]  ;;  %s11335_s0 = scalar_lea.vmem %s11225_s8, %s7813_s26 }
  0x34   : > { %v7904_v22 = vld [vmem:[#allocation2 + $0x30] sm:$0xff]  ;;  %v7906_v23 = vld [vmem:[#allocation2 + $0x38] sm:$0xff] }
  0x35   : > { %v7908_v24 = vld [vmem:[#allocation2 + $0x40] sm:$0xff]  ;;  %v7910_v25 = vld [vmem:[#allocation2 + $0x48] sm:$0xff] }
  0x36   : > { %762 = vadd.xlane.f32.xlu0 %v743_v18  ;;  %v7914_v26 = vld [vmem:[#allocation2 + $0x50] sm:$0xff]  ;;  %v7916_v27 = vld [vmem:[#allocation2 + $0x58] sm:$0xff] }
  0x37   : > { %766 = vadd.xlane.f32.xlu1 %v745_v19  ;;  %v7920_v28 = vld [vmem:[#allocation2 + $0x60] sm:$0xff]  ;;  %v7922_v29 = vld [vmem:[#allocation2 + $0x68] sm:$0xff]  ;;  %v7926_v30 = vld [vmem:[#allocation2 + $0x70] sm:$0xff]  ;;  %s11300_s22 = scalar_lea.vmem %s11299_s19, %s7813_s26  ;;  %s11302_s16 = scalar_lea.vmem %s11301_s17, %s7813_s26 }
  0x38   : > { %v7928_v31 = vld [vmem:[#allocation2 + $0x78] sm:$0xff]  ;;  %v7065_v32 = vld [vmem:[%s7833_s27 + $0x4] ss:$12 sps:$4 sm:$0xff]   ;;  %v7070_v35 = vld [vmem:[%s7833_s27 + $0x8] ss:$12 sps:$4 sm:$0xff]   ;;  %s11536_s26 = sld [smem:[#allocation3_spill]] }
  0x39   : > { %v7068_v34 = vld [vmem:[%s7833_s27 + $0x1c] ss:$12 sps:$4 sm:$0xff]   ;;  %1166 = vmatprep.subr.bf16.mxu0 %v7065_v32  ;;  %6773 = vmatprep.subr.bf16.mxu1 %v7070_v35  ;;  %v7071_v10 = vld [vmem:[%s7833_s27 + $0x18] ss:$12 sps:$4 sm:$0xff]  }
  0x3a   : > { %768 = vadd.xlane.f32.xlu0 %v746_v20  ;;  %1167 = vmatpush1.bf16.msra.mxu0 %v7067_v33 }
  0x3b   : > { %770 = vadd.xlane.f32.xlu1 %v747_v21  ;;  %1168 = vmatprep.subr.bf16.mxu0 %v7068_v34  ;;  %v7076_v34 = vld [vmem:[%s7833_s27 + $0x4c] ss:$12 sps:$4 sm:$0xff]  }
  0x3c   : > { %6774 = vmatpush3.bf16.msra.mxu1 %v7070_v35  ;;  %v7078_v35 = vld [vmem:[%s7833_s27 + $0x38] ss:$12 sps:$4 sm:$0xff]  }
  0x3e   : > { %772 = vadd.xlane.f32.xlu0 %v7904_v22  ;;  %1169 = vmatpush1.bf16.msra.mxu0 %v7071_v10  ;;  %p6541_p9 = scmp.ne.s32.totalorder %s11536_s26, 1 }
  0x3f   : > { %774 = vadd.xlane.f32.xlu1 %v7906_v23  ;;  %s11537_s19 = sld [smem:[#allocation75_spill]] (!%p6541_p9)  ;;  %s11538_s29 = sld [smem:[#allocation76_spill]] (!%p6541_p9) }
  0x42   : > { %776 = vadd.xlane.f32.xlu0 %v7908_v24 }
  0x43   : > { %778 = vadd.xlane.f32.xlu1 %v7910_v25 }
  0x46   : > { %780 = vadd.xlane.f32.xlu0 %v7914_v26 }
  0x47   : > { %782 = vadd.xlane.f32.xlu1 %v7916_v27 }
  0x4a   : > { %784 = vadd.xlane.f32.xlu0 %v7920_v28 }
  0x4b   : > { %786 = vadd.xlane.f32.xlu1 %v7922_v29 }
  0x4e   : > { %788 = vadd.xlane.f32.xlu0 %v7926_v30 }
  0x4f   : > { %790 = vadd.xlane.f32.xlu1 %v7928_v31 }
  0xbf   : > { %v761_v36 = vpop.xlane.xlu0 %760 }
  0xc0   : > { %v765_v37 = vpop.xlane.xlu1 %764  ;;  %v793_v38 = vmul.f32 0.0078125, %v761_v36 }
  0xc1   : > { %v795_v39 = vmul.f32 0.0078125, %v765_v37 }
  0xc2   : > { %v7938_v40 = vsub.f32 %v742_v16, %v793_v38  ;;  %v7072_v16 = vld [vmem:[%s7833_s27 + $0x34] ss:$12 sps:$4 sm:$0xff]  }
  0xc3   : > { %v7940_v41 = vsub.f32 %v744_v17, %v795_v39  ;;  %v763_v42 = vpop.xlane.xlu0 %762  ;;  %v7074_v17 = vld [vmem:[%s7833_s27 + $0x20] ss:$12 sps:$4 sm:$0xff]   ;;  %1170 = vmatprep.subr.bf16.mxu0 %v7072_v16  ;;  %v7079_v38 = vld [vmem:[%s7833_s27 + $0x48] ss:$12 sps:$4 sm:$0xff]  }
  0xc4   : > { %v767_v43 = vpop.xlane.xlu1 %766  ;;  %v794_v44 = vmul.f32 0.0078125, %v763_v42  ;;  %v825_v45 = vmul.f32 %v7938_v40, %v7938_v40  ;;  %6775 = vmatprep.subr.bf16.mxu1 %v7074_v17 }
  0xc5   : > { %v796_v46 = vmul.f32 0.0078125, %v767_v43  ;;  %v827_v47 = vmul.f32 %v7940_v41, %v7940_v41  ;;  %6776 = vmatpush3.bf16.msra.mxu1 %v7074_v17 }
  0xc6   : > { %841 = vadd.xlane.f32.xlu0 %v825_v45  ;;  %v7946_v48 = vsub.f32 %v743_v18, %v794_v44  ;;  %6777 = vmatprep.subr.bf16.mxu1 %v7078_v35  ;;  %v7080_v45 = vld [vmem:[%s7833_s27 + $0x64] ss:$12 sps:$4 sm:$0xff]  }
  0xc7   : > { %v7948_v49 = vsub.f32 %v745_v19, %v796_v46  ;;  %v769_v50 = vpop.xlane.xlu0 %768  ;;  %v7082_v46 = vld [vmem:[%s7833_s27 + $0x50] ss:$12 sps:$4 sm:$0xff]  }
  0xc8   : > { %v771_v51 = vpop.xlane.xlu1 %770  ;;  %v797_v52 = vmul.f32 0.0078125, %v769_v50  ;;  %v826_v53 = vmul.f32 %v7946_v48, %v7946_v48 }
  0xc9   : > { %v798_v54 = vmul.f32 0.0078125, %v771_v51  ;;  %v828_v55 = vmul.f32 %v7948_v49, %v7948_v49  ;;  %6778 = vmatpush3.bf16.msra.mxu1 %v7078_v35  ;;  %v7086_v51 = vld [vmem:[%s7833_s27 + $0x68] ss:$12 sps:$4 sm:$0xff]  }
  0xca   : > { %845 = vadd.xlane.f32.xlu0 %v827_v47  ;;  %843 = vadd.xlane.f32.xlu1 %v826_v53  ;;  %v7954_v56 = vsub.f32 %v746_v20, %v797_v52  ;;  %v7083_v47 = vld [vmem:[%s7833_s27 + $0x60] ss:$12 sps:$4 sm:$0xff]   ;;  %v7087_v52 = vld [vmem:[%s7833_s27 + $0x78] ss:$12 sps:$4 sm:$0xff]  }
  0xcb   : > { %v7956_v57 = vsub.f32 %v747_v21, %v798_v54  ;;  %v773_v58 = vpop.xlane.xlu0 %772  ;;  %6779 = vmatprep.subr.bf16.mxu1 %v7082_v46  ;;  %v7088_v53 = vld [vmem:[%s7833_s27 + $0x94] ss:$12 sps:$4 sm:$0xff]  }
  0xcc   : > { %v775_v59 = vpop.xlane.xlu1 %774  ;;  %v799_v60 = vmul.f32 0.0078125, %v773_v58  ;;  %v829_v61 = vmul.f32 %v7954_v56, %v7954_v56  ;;  %v7090_v54 = vld [vmem:[%s7833_s27 + $0x80] ss:$12 sps:$4 sm:$0xff]  }
  0xcd   : > { %v800_v62 = vmul.f32 0.0078125, %v775_v59  ;;  %v830_v63 = vmul.f32 %v7956_v57, %v7956_v57  ;;  %6780 = vmatpush3.bf16.msra.mxu1 %v7082_v46  ;;  %v7092_v58 = vld [vmem:[%s7833_s27 + $0xac] ss:$12 sps:$4 sm:$0xff]  }
  0xce   : > { %847 = vadd.xlane.f32.xlu1 %v828_v55  ;;  %849 = vadd.xlane.f32.xlu0 %v829_v61  ;;  %v7963_v0 = vsub.f32 %v7904_v22, %v799_v60  ;;  %v7091_v55 = vld [vmem:[%s7833_s27 + $0x90] ss:$12 sps:$4 sm:$0xff]   ;;  %v7094_v59 = vld [vmem:[%s7833_s27 + $0x98] ss:$12 sps:$4 sm:$0xff]   ;;  %v7095_v60 = vld [vmem:[%s7833_s27 + $0xa8] ss:$12 sps:$4 sm:$0xff]  }
  0xcf   : > { %v7966_v1 = vsub.f32 %v7906_v23, %v800_v62  ;;  %v777_v2 = vpop.xlane.xlu0 %776  ;;  %v7075_v23 = vld [vmem:[%s7833_s27 + $0x30] ss:$12 sps:$4 sm:$0xff]   ;;  %6781 = vmatprep.subr.bf16.mxu1 %v7086_v51  ;;  %v11240_v62 = vmov 0  }
  0xd0   : > { %v779_v3 = vpop.xlane.xlu1 %778  ;;  %v801_v4 = vmul.f32 0.0078125, %v777_v2  ;;  %v831_v5 = vmul.f32 %v7963_v0, %v7963_v0  ;;  %1171 = vmatpush1.bf16.msra.mxu0 %v7075_v23  ;;  %v7096_v61 = vld [vmem:[%s7833_s27 + $0xb0] ss:$12 sps:$4 sm:$0xff]   ;;  %1198 = vmatprep.mubr.bf16.mxu0 %v11240_v62 }
  0xd1   : > { %v802_v6 = vmul.f32 0.0078125, %v779_v3  ;;  %v832_v7 = vmul.f32 %v7966_v1, %v7966_v1  ;;  %1172 = vmatprep.subr.bf16.mxu0 %v7076_v34  ;;  %6782 = vmatpush3.bf16.msra.mxu1 %v7086_v51 }
  0xd2   : > { %851 = vadd.xlane.f32.xlu1 %v830_v63  ;;  %853 = vadd.xlane.f32.xlu0 %v831_v5  ;;  %v7973_v8 = vsub.f32 %v7908_v24, %v801_v4 }
  0xd3   : > { %v7976_v9 = vsub.f32 %v7910_v25, %v802_v6  ;;  %v781_v11 = vpop.xlane.xlu0 %780  ;;  %6783 = vmatprep.subr.bf16.mxu1 %v7090_v54 }
  0xd4   : > { %v783_v12 = vpop.xlane.xlu1 %782  ;;  %v803_v13 = vmul.f32 0.0078125, %v781_v11  ;;  %v833_v14 = vmul.f32 %v7973_v8, %v7973_v8  ;;  %1173 = vmatpush1.bf16.msra.mxu0 %v7079_v38  ;;  %v8039_v38 = vld [vmem:[%s11300_s22] ss:$0 sm:$0xff] }
  0xd5   : > { %v804_v15 = vmul.f32 0.0078125, %v783_v12  ;;  %v834_v18 = vmul.f32 %v7976_v9, %v7976_v9  ;;  %1174 = vmatprep.subr.bf16.mxu0 %v7080_v45  ;;  %6784 = vmatpush3.bf16.msra.mxu1 %v7090_v54 }
  0xd6   : > { %855 = vadd.xlane.f32.xlu1 %v832_v7  ;;  %857 = vadd.xlane.f32.xlu0 %v833_v14  ;;  %v7986_v19 = vsub.f32 %v7914_v26, %v803_v13 }
  0xd7   : > { %v7989_v20 = vsub.f32 %v7916_v27, %v804_v15  ;;  %v785_v21 = vpop.xlane.xlu0 %784  ;;  %6785 = vmatprep.subr.bf16.mxu1 %v7094_v59 }
  0xd8   : > { %v787_v22 = vpop.xlane.xlu1 %786  ;;  %v805_v24 = vmul.f32 0.0078125, %v785_v21  ;;  %v835_v25 = vmul.f32 %v7986_v19, %v7986_v19  ;;  %1175 = vmatpush1.bf16.msra.mxu0 %v7083_v47 }
  0xd9   : > { %v806_v32 = vmul.f32 0.0078125, %v787_v22  ;;  %v836_v26 = vmul.f32 %v7989_v20, %v7989_v20  ;;  %6786 = vmatpush3.bf16.msra.mxu1 %v7094_v59 }
  0xda   : > { %859 = vadd.xlane.f32.xlu1 %v834_v18  ;;  %861 = vadd.xlane.f32.xlu0 %v835_v25  ;;  %v7997_v27 = vsub.f32 %v7920_v28, %v805_v24 }
  0xdb   : > { %v8000_v33 = vsub.f32 %v7922_v29, %v806_v32  ;;  %v789_v36 = vpop.xlane.xlu0 %788  ;;  %6787 = vmatprep.subr.bf16.mxu1 %v7096_v61 }
  0xdc   : > { %v791_v37 = vpop.xlane.xlu1 %790  ;;  %v807_v39 = vmul.f32 0.0078125, %v789_v36  ;;  %v837_v42 = vmul.f32 %v7997_v27, %v7997_v27 }
  0xdd   : > { %v808_v43 = vmul.f32 0.0078125, %v791_v37  ;;  %v838_v28 = vmul.f32 %v8000_v33, %v8000_v33  ;;  %6788 = vmatpush3.bf16.msra.mxu1 %v7096_v61 }
  0xde   : > { %863 = vadd.xlane.f32.xlu1 %v836_v26  ;;  %865 = vadd.xlane.f32.xlu0 %v837_v42  ;;  %v8010_v29 = vsub.f32 %v7926_v30, %v807_v39 }
  0xdf   : > { %v8013_v44 = vsub.f32 %v7928_v31, %v808_v43  ;;  %v7084_v31 = vld [vmem:[%s7833_s27 + $0x7c] ss:$12 sps:$4 sm:$0xff]  }
  0xe0   : > { %v839_v50 = vmul.f32 %v8010_v29, %v8010_v29  ;;  %1176 = vmatprep.subr.bf16.mxu0 %v7084_v31  ;;  %v8048_v31 = vld [vmem:[%s11302_s16] ss:$0 sm:$0xff] }
  0xe1   : > { %v840_v30 = vmul.f32 %v8013_v44, %v8013_v44  ;;  %1177 = vmatpush1.bf16.msra.mxu0 %v7087_v52 }
  0xe2   : > { %867 = vadd.xlane.f32.xlu1 %v838_v28  ;;  %869 = vadd.xlane.f32.xlu0 %v839_v50 }
  0xe3   : > { %1178 = vmatprep.subr.bf16.mxu0 %v7088_v53 }
  0xe5   : > { %1179 = vmatpush1.bf16.msra.mxu0 %v7091_v55 }
  0xe6   : > { %871 = vadd.xlane.f32.xlu1 %v840_v30  ;;  %1180 = vmatprep.subr.bf16.mxu0 %v7092_v58 }
  0xe9   : > { %1181 = vmatpush1.bf16.msra.mxu0 %v7095_v60 }
 0x153   : > { %v842_v63 = vpop.xlane.xlu0 %841 }
 0x154   : > { %v873_v2 = vmul.f32 0.0078125, %v842_v63 }
 0x156   : > { %v889_v3 = vadd.f32 1e-05, %v873_v2 }
 0x157   : > { %v844_v4 = vpop.xlane.xlu1 %843  ;;  %v846_v5 = vpop.xlane.xlu0 %845 }
 0x158   : > { %7185 = vrsqrt.f32 %v889_v3  ;;  %v874_v6 = vmul.f32 0.0078125, %v844_v4  ;;  %v875_v7 = vmul.f32 0.0078125, %v846_v5 }
 0x15a   : > { %v890_v10 = vadd.f32 1e-05, %v874_v6  ;;  %v891_v11 = vadd.f32 1e-05, %v875_v7 }
 0x15b   : > { %v848_v12 = vpop.xlane.xlu1 %847  ;;  %v850_v13 = vpop.xlane.xlu0 %849 }
 0x15c   : > { %7187 = vrsqrt.f32 %v890_v10  ;;  %v876_v14 = vmul.f32 0.0078125, %v848_v12  ;;  %v877_v15 = vmul.f32 0.0078125, %v850_v13 }
 0x15d   : > { %7189 = vrsqrt.f32 %v891_v11 }
 0x15e   : > { %v892_v16 = vadd.f32 1e-05, %v876_v14  ;;  %v893_v17 = vadd.f32 1e-05, %v877_v15 }
 0x15f   : > { %v852_v18 = vpop.xlane.xlu1 %851  ;;  %v854_v21 = vpop.xlane.xlu0 %853 }
 0x160   : > { %7191 = vrsqrt.f32 %v892_v16  ;;  %v878_v22 = vmul.f32 0.0078125, %v852_v18  ;;  %v879_v23 = vmul.f32 0.0078125, %v854_v21 }
 0x161   : > { %7193 = vrsqrt.f32 %v893_v17 }
 0x162   : > { %v7186_v24 = vpop.eup %7185  ;;  %v894_v25 = vadd.f32 1e-05, %v878_v22  ;;  %v895_v32 = vadd.f32 1e-05, %v879_v23 }
 0x163   : > { %v856_v26 = vpop.xlane.xlu1 %855  ;;  %v858_v34 = vpop.xlane.xlu0 %857  ;;  %v921_v35 = vmul.f32 %v7186_v24, %v7938_v40 }
 0x164   : > { %7195 = vrsqrt.f32 %v894_v25  ;;  %v880_v36 = vmul.f32 0.0078125, %v856_v26  ;;  %v881_v37 = vmul.f32 0.0078125, %v858_v34 }
 0x165   : > { %7197 = vrsqrt.f32 %v895_v32  ;;  %v943_v40 = vmul.f32 %v8039_v38, %v921_v35 }
 0x166   : > { %v7188_v39 = vpop.eup %7187  ;;  %v896_v42 = vadd.f32 1e-05, %v880_v36  ;;  %v897_v43 = vadd.f32 1e-05, %v881_v37 }
 0x167   : > { %v7190_v28 = vpop.eup %7189  ;;  %v860_v45 = vpop.xlane.xlu1 %859  ;;  %v922_v47 = vmul.f32 %v7188_v39, %v7946_v48  ;;  %v965_v61 = vadd.f32 %v8048_v31, %v943_v40 }
 0x168   : > { %v862_v46 = vpop.xlane.xlu0 %861  ;;  %7199 = vrsqrt.f32 %v896_v42  ;;  %v882_v50 = vmul.f32 0.0078125, %v860_v45  ;;  %v923_v51 = vmul.f32 %v7190_v28, %v7940_v41 }
 0x169   : > { %v883_v30 = vmul.f32 0.0078125, %v862_v46  ;;  %7201 = vrsqrt.f32 %v897_v43  ;;  %v944_v52 = vmul.f32 %v8039_v38, %v922_v47 }
 0x16a   : > { %v7192_v53 = vpop.eup %7191  ;;  %v898_v54 = vadd.f32 1e-05, %v882_v50  ;;  %v945_v48 = vmul.f32 %v8039_v38, %v923_v51 }
 0x16b   : > { %v899_v55 = vadd.f32 1e-05, %v883_v30  ;;  %v7194_v58 = vpop.eup %7193  ;;  %v864_v59 = vpop.xlane.xlu1 %863  ;;  %v966_v63 = vadd.f32 %v8048_v31, %v944_v52  ;;  %v924_v2 = vmul.f32 %v7192_v53, %v7948_v49 }
 0x16c   : > { %v866_v60 = vpop.xlane.xlu0 %865  ;;  %7203 = vrsqrt.f32 %v898_v54  ;;  %v884_v3 = vmul.f32 0.0078125, %v864_v59  ;;  %v925_v6 = vmul.f32 %v7194_v58, %v7954_v56  ;;  %v967_v12 = vadd.f32 %v8048_v31, %v945_v48 }
 0x16d   : > { %v885_v41 = vmul.f32 0.0078125, %v866_v60  ;;  %7205 = vrsqrt.f32 %v899_v55  ;;  %v1014_v4 = vpack.c.bf16 %v966_v63, %v965_v61  ;;  %v946_v5 = vmul.f32 %v8039_v38, %v924_v2 }
 0x16e   : > { %v7196_v7 = vpop.eup %7195  ;;  %v900_v10 = vadd.f32 1e-05, %v884_v3  ;;  %v947_v17 = vmul.f32 %v8039_v38, %v925_v6 }
 0x16f   : > { %v901_v11 = vadd.f32 1e-05, %v885_v41  ;;  %v7198_v13 = vpop.eup %7197  ;;  %v868_v14 = vpop.xlane.xlu1 %867  ;;  %1199 = vmatmul.mubr.bf16.vlgmr.msra.gmra.mrb[0].mxu0 %v1014_v4  ;;  %6789 = vmatprep.mubr.bf16.mxu1 %v1014_v4  ;;  %v968_v49 = vadd.f32 %v8048_v31, %v946_v5  ;;  %v926_v16 = vmul.f32 %v7196_v7, %v7956_v57 }
 0x170   : > { %v870_v15 = vpop.xlane.xlu0 %869  ;;  %7207 = vrsqrt.f32 %v900_v10  ;;  %v886_v18 = vmul.f32 0.0078125, %v868_v14  ;;  %1208 = vmatprep.mubr.bf16.mxu0 %v11240_v62  ;;  %v927_v56 = vmul.f32 %v7198_v13, %v7963_v0  ;;  %v969_v35 = vadd.f32 %v8048_v31, %v947_v17 }
 0x171   : > { %v887_v21 = vmul.f32 0.0078125, %v870_v15  ;;  %7209 = vrsqrt.f32 %v901_v11  ;;  %v1015_v22 = vpack.c.bf16 %v968_v49, %v967_v12  ;;  %v948_v23 = vmul.f32 %v8039_v38, %v926_v16  ;;  %v1013_v15 = vld [vmem:[%s7839_s25] sm:$0x7]  ;;  %s7694_s25 = smov 64  }
 0x172   : > { %v7200_v24 = vpop.eup %7199  ;;  %v902_v25 = vadd.f32 1e-05, %v886_v18  ;;  %v949_v26 = vmul.f32 %v8039_v38, %v927_v56 }
 0x173   : > { %v903_v32 = vadd.f32 1e-05, %v887_v21  ;;  %v7202_v34 = vpop.eup %7201  ;;  %v872_v57 = vpop.xlane.xlu1 %871  ;;  %6790 = vmatmul.mubr.bf16.vlgmr.msra.gmra.mrb[0].mxu1 %v1015_v22  ;;  %v970_v36 = vadd.f32 %v8048_v31, %v948_v23  ;;  %v928_v37 = vmul.f32 %v7200_v24, %v7966_v1 }
 0x174   : > { %7211 = vrsqrt.f32 %v902_v25  ;;  %v888_v0 = vmul.f32 0.0078125, %v872_v57  ;;  %v929_v39 = vmul.f32 %v7202_v34, %v7973_v8  ;;  %v971_v46 = vadd.f32 %v8048_v31, %v949_v26 }
 0x175   : > { %7213 = vrsqrt.f32 %v903_v32  ;;  %v1016_v42 = vpack.c.bf16 %v970_v36, %v969_v35  ;;  %v950_v43 = vmul.f32 %v8039_v38, %v928_v37 }
 0x176   : > { %v7204_v28 = vpop.eup %7203  ;;  %v904_v45 = vadd.f32 1e-05, %v888_v0  ;;  %v951_v1 = vmul.f32 %v8039_v38, %v929_v39 }
 0x177   : > { %v7206_v47 = vpop.eup %7205  ;;  %1209 = vmatmul.mubr.bf16.gmra.mrb[4].mxu0 %v1015_v22  ;;  %6793 = vmatprep.mubr.bf16.mxu1 %v1016_v42  ;;  %v972_v40 = vadd.f32 %v8048_v31, %v950_v43  ;;  %v930_v50 = vmul.f32 %v7204_v28, %v7976_v9 }
 0x178   : > { %7215 = vrsqrt.f32 %v904_v45  ;;  %1218 = vmatprep.mubr.bf16.mxu0 %v11240_v62  ;;  %v931_v8 = vmul.f32 %v7206_v47, %v7986_v19  ;;  %v973_v55 = vadd.f32 %v8048_v31, %v951_v1 }
 0x179   : > { %v1017_v30 = vpack.c.bf16 %v972_v40, %v971_v46  ;;  %v952_v51 = vmul.f32 %v8039_v38, %v930_v50 }
 0x17a   : > { %v7208_v52 = vpop.eup %7207  ;;  %v953_v53 = vmul.f32 %v8039_v38, %v931_v8 }
 0x17b   : > { %v7210_v54 = vpop.eup %7209  ;;  %6794 = vmatmul.mubr.bf16.gmra.mrb[4].mxu1 %v1017_v30  ;;  %v974_v48 = vadd.f32 %v8048_v31, %v952_v51  ;;  %v932_v9 = vmul.f32 %v7208_v52, %v7989_v20 }
 0x17c   : > { %v933_v58 = vmul.f32 %v7210_v54, %v7997_v27  ;;  %v975_v61 = vadd.f32 %v8048_v31, %v953_v53 }
 0x17d   : > { %v1018_v59 = vpack.c.bf16 %v974_v48, %v973_v55  ;;  %v954_v60 = vmul.f32 %v8039_v38, %v932_v9 }
 0x17e   : > { %v7212_v19 = vpop.eup %7211  ;;  %v955_v41 = vmul.f32 %v8039_v38, %v933_v58 }
 0x17f   : > { %v7214_v63 = vpop.eup %7213  ;;  %1219 = vmatmul.mubr.bf16.gmra.mrb[8].mxu0 %v1016_v42  ;;  %6797 = vmatprep.mubr.bf16.mxu1 %v1018_v59  ;;  %v976_v2 = vadd.f32 %v8048_v31, %v954_v60  ;;  %v934_v3 = vmul.f32 %v7212_v19, %v8000_v33 }
 0x180   : > { %1228 = vmatprep.mubr.bf16.mxu0 %v11240_v62  ;;  %v935_v20 = vmul.f32 %v7214_v63, %v8010_v29  ;;  %v977_v6 = vadd.f32 %v8048_v31, %v955_v41 }
 0x181   : > { %v1019_v27 = vpack.c.bf16 %v976_v2, %v975_v61  ;;  %v956_v4 = vmul.f32 %v8039_v38, %v934_v3 }
 0x182   : > { %v7216_v5 = vpop.eup %7215  ;;  %v957_v11 = vmul.f32 %v8039_v38, %v935_v20 }
 0x183   : > { %6798 = vmatmul.mubr.bf16.gmra.mrb[8].mxu1 %v1019_v27  ;;  %v978_v7 = vadd.f32 %v8048_v31, %v956_v4  ;;  %v936_v10 = vmul.f32 %v7216_v5, %v8013_v44  ;;  %v1023_v44 = vlaneseq }
 0x184   : > { %v979_v29 = vadd.f32 %v8048_v31, %v957_v11 }
 0x185   : > { %v1020_v33 = vpack.c.bf16 %v978_v7, %v977_v6  ;;  %v958_v12 = vmul.f32 %v8039_v38, %v936_v10  ;;  %v8103_v38 = vshrl.u32 %v1023_v44, 7 }
 0x187   : > { %1229 = vmatmul.mubr.bf16.gmra.mrb[12].mxu0 %v1017_v30  ;;  %6801 = vmatprep.mubr.bf16.mxu1 %v1020_v33  ;;  %v980_v13 = vadd.f32 %v8048_v31, %v958_v12  ;;  %11303 = vst [vmem:[#allocation9_spill] sm:$0xff] %v8103_v38  ;;  %v11239_v31 = vsub.s32 0, %v8103_v38  ;;  %v11237_v49 = vsub.s32 1, %v8103_v38  ;;  %v11238_v17 = vsub.s32 2, %v8103_v38 }
 0x188   : > { %1238 = vmatprep.mubr.bf16.mxu0 %v11240_v62 }
 0x189   : > { %v1021_v14 = vpack.c.bf16 %v980_v13, %v979_v29  ;;  %v8110_v16 = vrot.slane %v1013_v15, %v11239_v31  ;;  %v8115_v21 = vrot.slane %v1013_v15, %v11237_v49  ;;  %v8121_v32 = vrot.slane %v1013_v15, %v11238_v17 }
 0x18b   : > { %6802 = vmatmul.mubr.bf16.gmra.mrb[12].mxu1 %v1021_v14 }
 0x18f   : > { %1239 = vmatmul.mubr.bf16.gmra.mrb[16].mxu0 %v1018_v59 }
 0x190   : > { %1248 = vmatprep.mubr.bf16.mxu0 %v11240_v62 }
 0x197   : > { %1249 = vmatmul.mubr.bf16.gmra.mrb[20].mxu0 %v1019_v27 }
 0x198   : > { %1258 = vmatprep.mubr.bf16.mxu0 %v11240_v62 }
 0x19f   : > { %1259 = vmatmul.mubr.bf16.gmra.mrb[24].mxu0 %v1020_v33 }
 0x1a0   : > { %1268 = vmatprep.mubr.bf16.mxu0 %v11240_v62 }
 0x1a7   : > { %1269 = vmatmul.mubr.bf16.gmra.mrb[28].mxu0 %v1021_v14 }
 0x242   : > { %v1200_v18 = vpop.f32.mrb[0].mxu0 }
 0x243   : > { %v1201_v56 = vadd.f32 %v1200_v18, %v8110_v16  ;;  %v1202_v22 = vpop.f32.mrb[1].mxu0 }
 0x244   : > { %v1204_v23 = vpop.f32.mrb[2].mxu0  ;;  %v1203_v26 = vadd.f32 %v1202_v22, %v8115_v21 }
 0x245   : > { %v1205_v24 = vadd.f32 %v1204_v23, %v8110_v16  ;;  %v1206_v25 = vpop.f32.mrb[3].mxu0  ;;  %v1387_v35 = vmul.f32 0.015625, %v1201_v56 }
 0x246   : > { %v1207_v34 = vadd.f32 %v1206_v25, %v8115_v21  ;;  %v6791_v57 = vpop.f32.mrb[0].mxu1 }
 0x247   : > { %v1388_v36 = vmul.f32 0.015625, %v1205_v24  ;;  %v1313_v37 = vpop.f32.mrb[1].mxu1  ;;  %v1322_v43 = vadd.f32 %v6791_v57, %v8121_v32 }
 0x248   : > { %v8125_v0 = vpack.c.bf16 %v1207_v34, %v1203_v26  ;;  %v6792_v39 = vpop.f32.mrb[2].mxu1  ;;  %v1314_v46 = vadd.f32 %v1313_v37, %v8121_v32 }
 0x249   : > { %v8127_v42 = vpack.c.bf16 %v1388_v36, %v1387_v35  ;;  %v1325_v28 = vadd.f32 %v6792_v39, %v8121_v32  ;;  %v1316_v45 = vpop.f32.mrb[3].mxu1 }
 0x24a   : > { %v1317_v47 = vadd.f32 %v1316_v45, %v8121_v32  ;;  %v1210_v40 = vpop.f32.mrb[4].mxu0  ;;  %6965 = vmatprep.subr.msk.bf16.mxu1 %vm1427_vm0, %v8125_v0  ;;  %v1435_v50 = vsel %vm1427_vm0, %v8125_v0, 0 }
 0x24b   : > { %v8137_v1 = vpack.c.bf16 %v1325_v28, %v1322_v43  ;;  %v1211_v8 = vadd.f32 %v1210_v40, %v8110_v16  ;;  %v1212_v30 = vpop.f32.mrb[5].mxu0  ;;  %6806 = vmatpush3.bf16.xpose.msra.mxu1 %v1435_v50  ;;  %6809 = vmatprep.mubr.msk.bf16.mxu1 %vm1427_vm0, %v8127_v42 }
 0x24c   : > { %v8142_v51 = vpack.c.bf16 %v1317_v47, %v1314_v46  ;;  %v1214_v52 = vpop.f32.mrb[6].mxu0  ;;  %v1213_v55 = vadd.f32 %v1212_v30, %v8115_v21 }
 0x24d   : > { %v1215_v53 = vadd.f32 %v1214_v52, %v8110_v16  ;;  %v1216_v54 = vpop.f32.mrb[7].mxu0  ;;  %v1389_v58 = vmul.f32 0.015625, %v1211_v8 }
 0x24e   : > { %v1217_v48 = vadd.f32 %v1216_v54, %v8115_v21  ;;  %v6795_v9 = vpop.f32.mrb[4].mxu1 }
 0x24f   : > { %v1390_v59 = vmul.f32 0.015625, %v1215_v53  ;;  %v1329_v60 = vpop.f32.mrb[5].mxu1  ;;  %v1338_v2 = vadd.f32 %v6795_v9, %v8121_v32 }
 0x250   : > { %v8147_v19 = vpack.c.bf16 %v1217_v48, %v1213_v55  ;;  %v6796_v61 = vpop.f32.mrb[6].mxu1  ;;  %v1330_v20 = vadd.f32 %v1329_v60, %v8121_v32 }
 0x251   : > { %v8149_v63 = vpack.c.bf16 %v1390_v59, %v1389_v58  ;;  %v1341_v3 = vadd.f32 %v6796_v61, %v8121_v32  ;;  %v1332_v41 = vpop.f32.mrb[7].mxu1 }
 0x252   : > { %v1333_v27 = vadd.f32 %v1332_v41, %v8121_v32  ;;  %v1220_v4 = vpop.f32.mrb[8].mxu0  ;;  %6966 = vmatprep.subr.msk.bf16.mxu1 %vm1427_vm0, %v8147_v19  ;;  %v1438_v5 = vsel %vm1427_vm0, %v8147_v19, 0 }
 0x253   : > { %v8159_v6 = vpack.c.bf16 %v1341_v3, %v1338_v2  ;;  %v1221_v7 = vadd.f32 %v1220_v4, %v8110_v16  ;;  %v1222_v10 = vpop.f32.mrb[9].mxu0  ;;  %6808 = vmatpush3.bf16.xpose.msra.mxu1 %v1438_v5 }
 0x254   : > { %v8162_v11 = vpack.c.bf16 %v1333_v27, %v1330_v20  ;;  %v1224_v33 = vpop.f32.mrb[10].mxu0  ;;  %v1223_v13 = vadd.f32 %v1222_v10, %v8115_v21 }
 0x255   : > { %11304 = vst [vmem:[#allocation10_spill] sm:$0xff] %v8159_v6  ;;  %v1225_v12 = vadd.f32 %v1224_v33, %v8110_v16  ;;  %v1226_v29 = vpop.f32.mrb[11].mxu0  ;;  %v1391_v18 = vmul.f32 0.015625, %v1221_v7 }
 0x256   : > { %11305 = vst [vmem:[#allocation11_spill] sm:$0xff] %v8162_v11  ;;  %v1227_v14 = vadd.f32 %v1226_v29, %v8115_v21  ;;  %v6799_v15 = vpop.f32.mrb[8].mxu1 }
 0x257   : > { %v1392_v56 = vmul.f32 0.015625, %v1225_v12  ;;  %v1354_v22 = vadd.f32 %v6799_v15, %v8121_v32  ;;  %v1345_v23 = vpop.f32.mrb[9].mxu1 }
 0x258   : > { %v8168_v24 = vpack.c.bf16 %v1227_v14, %v1223_v13  ;;  %v6800_v25 = vpop.f32.mrb[10].mxu1  ;;  %v1346_v35 = vadd.f32 %v1345_v23, %v8121_v32 }
 0x259   : > { %v8170_v26 = vpack.c.bf16 %v1392_v56, %v1391_v18  ;;  %v1357_v34 = vadd.f32 %v6800_v25, %v8121_v32  ;;  %v1348_v57 = vpop.f32.mrb[11].mxu1 }
 0x25a   : > { %v1349_v36 = vadd.f32 %v1348_v57, %v8121_v32  ;;  %v1230_v37 = vpop.f32.mrb[12].mxu0  ;;  %6810 = vmatmul.mubr.msk.bf16.vlgmr.msra.gmra.mrb[16].mxu1 %vm1427_vm0, %v8149_v63  ;;  %6967 = vmatprep.subr.msk.bf16.mxu1 %vm1427_vm0, %v8168_v24  ;;  %v1496_v39 = vsel %vm1427_vm0, %v8168_v24, 0 }
 0x25b   : > { %v8181_v43 = vpack.c.bf16 %v1357_v34, %v1354_v22  ;;  %v1231_v28 = vadd.f32 %v1230_v37, %v8110_v16  ;;  %v1232_v45 = vpop.f32.mrb[13].mxu0  ;;  %6814 = vmatpush3.bf16.xpose.msra.mxu1 %v1496_v39  ;;  %6817 = vmatprep.mubr.msk.bf16.mxu1 %vm1427_vm0, %v8170_v26 }
 0x25c   : > { %v8186_v46 = vpack.c.bf16 %v1349_v36, %v1346_v35  ;;  %v1234_v47 = vpop.f32.mrb[14].mxu0  ;;  %v1233_v8 = vadd.f32 %v1232_v45, %v8115_v21 }
 0x25d   : > { %v1235_v40 = vadd.f32 %v1234_v47, %v8110_v16  ;;  %v1236_v50 = vpop.f32.mrb[15].mxu0  ;;  %v1393_v53 = vmul.f32 0.015625, %v1231_v28 }
 0x25e   : > { %v1237_v30 = vadd.f32 %v1236_v50, %v8115_v21  ;;  %v6803_v52 = vpop.f32.mrb[12].mxu1 }
 0x25f   : > { %v1394_v54 = vmul.f32 0.015625, %v1235_v40  ;;  %v1370_v55 = vadd.f32 %v6803_v52, %v8121_v32  ;;  %v1361_v48 = vpop.f32.mrb[13].mxu1 }
 0x260   : > { %v8192_v9 = vpack.c.bf16 %v1237_v30, %v1233_v8  ;;  %v6804_v58 = vpop.f32.mrb[14].mxu1  ;;  %v1362_v2 = vadd.f32 %v1361_v48, %v8121_v32 }
 0x261   : > { %v8194_v59 = vpack.c.bf16 %v1394_v54, %v1393_v53  ;;  %v1373_v60 = vadd.f32 %v6804_v58, %v8121_v32  ;;  %v1364_v61 = vpop.f32.mrb[15].mxu1 }
 0x262   : > { %v1365_v3 = vadd.f32 %v1364_v61, %v8121_v32  ;;  %v1240_v41 = vpop.f32.mrb[16].mxu0  ;;  %6968 = vmatprep.subr.msk.bf16.mxu1 %vm1427_vm0, %v8192_v9  ;;  %v1499_v20 = vsel %vm1427_vm0, %v8192_v9, 0 }
 0x263   : > { %v8203_v27 = vpack.c.bf16 %v1373_v60, %v1370_v55  ;;  %v1241_v4 = vadd.f32 %v1240_v41, %v8110_v16  ;;  %v1242_v5 = vpop.f32.mrb[17].mxu0  ;;  %6816 = vmatpush3.bf16.xpose.msra.mxu1 %v1499_v20 }
 0x264   : > { %v8206_v7 = vpack.c.bf16 %v1365_v3, %v1362_v2  ;;  %v1244_v10 = vpop.f32.mrb[18].mxu0  ;;  %v1243_v32 = vadd.f32 %v1242_v5, %v8115_v21 }
 0x265   : > { %v1245_v33 = vadd.f32 %v1244_v10, %v8110_v16  ;;  %v1246_v12 = vpop.f32.mrb[19].mxu0  ;;  %v1395_v13 = vmul.f32 0.015625, %v1241_v4 }
 0x266   : > { %v1247_v29 = vadd.f32 %v1246_v12, %v8115_v21 }
 0x267   : > { %v1396_v14 = vmul.f32 0.015625, %v1245_v33 }
 0x268   : > { %v8211_v15 = vpack.c.bf16 %v1247_v29, %v1243_v32 }
 0x269   : > { %v8213_v18 = vpack.c.bf16 %v1396_v14, %v1395_v13 }
 0x26a   : > { %v1250_v56 = vpop.f32.mrb[20].mxu0  ;;  %6818 = vmatmul.mubr.msk.bf16.vlgmr.msra.gmra.mrb[20].mxu1 %vm1427_vm0, %v8194_v59  ;;  %6969 = vmatprep.subr.msk.bf16.mxu0 %vm1427_vm0, %v8211_v15  ;;  %v1557_v22 = vsel %vm1427_vm0, %v8211_v15, 0 }
 0x26b   : > { %v1251_v23 = vadd.f32 %v1250_v56, %v8110_v16  ;;  %v1252_v25 = vpop.f32.mrb[21].mxu0  ;;  %6822 = vmatpush3.bf16.xpose.msra.mxu0 %v1557_v22  ;;  %6825 = vmatprep.mubr.msk.bf16.mxu0 %vm1427_vm0, %v8213_v18 }
 0x26c   : > { %v1254_v34 = vpop.f32.mrb[22].mxu0  ;;  %v1253_v36 = vadd.f32 %v1252_v25, %v8115_v21 }
 0x26d   : > { %v1255_v57 = vadd.f32 %v1254_v34, %v8110_v16  ;;  %v1256_v35 = vpop.f32.mrb[23].mxu0  ;;  %v1397_v39 = vmul.f32 0.015625, %v1251_v23  ;;  %v1382_v34 = vand.u32 127, %v1023_v44 }
 0x26e   : > { %v1257_v37 = vadd.f32 %v1256_v35, %v8115_v21  ;;  %v1378_v35 = vadd.s32 8, %v8103_v38 }
 0x26f   : > { %v1398_v28 = vmul.f32 0.015625, %v1255_v57  ;;  %v1379_v57 = vadd.s32 16, %v8103_v38  ;;  %vm8279_vm1 = vcmp.ge.s32.totalorder %v8103_v38, %v1382_v34 }
 0x270   : > { %v8227_v45 = vpack.c.bf16 %v1257_v37, %v1253_v36  ;;  %vm8292_vm4 = vcmp.ge.s32.totalorder %v1378_v35, %v1382_v34 }
 0x271   : > { %v8229_v47 = vpack.c.bf16 %v1398_v28, %v1397_v39  ;;  %v1380_v39 = vadd.s32 24, %v8103_v38  ;;  %vm8288_vm3 = vcmp.ge.s32.totalorder %v1379_v57, %v1382_v34 }
 0x272   : > { %v1260_v40 = vpop.f32.mrb[24].mxu0  ;;  %6970 = vmatprep.subr.msk.bf16.mxu0 %vm1427_vm0, %v8227_v45  ;;  %v1560_v50 = vsel %vm1427_vm0, %v8227_v45, 0 }
 0x273   : > { %v1261_v8 = vadd.f32 %v1260_v40, %v8110_v16  ;;  %v1262_v30 = vpop.f32.mrb[25].mxu0  ;;  %6824 = vmatpush3.bf16.xpose.msra.mxu0 %v1560_v50  ;;  %vm8306_vm5 = vcmp.ge.s32.totalorder %v1380_v39, %v1382_v34 }
 0x274   : > { %v1264_v52 = vpop.f32.mrb[26].mxu0  ;;  %6837 = vmatprep.subr.bf16.mxu0 %v8142_v51  ;;  %v1263_v55 = vadd.f32 %v1262_v30, %v8115_v21 }
 0x275   : > { %v1265_v53 = vadd.f32 %v1264_v52, %v8110_v16  ;;  %v1266_v54 = vpop.f32.mrb[27].mxu0  ;;  %v1399_v58 = vmul.f32 0.015625, %v1261_v8 }
 0x276   : > { %v1267_v48 = vadd.f32 %v1266_v54, %v8115_v21 }
 0x277   : > { %v1400_v60 = vmul.f32 0.015625, %v1265_v53 }
 0x278   : > { %v8240_v61 = vpack.c.bf16 %v1267_v48, %v1263_v55 }
 0x279   : > { %v8242_v2 = vpack.c.bf16 %v1400_v60, %v1399_v58 }
 0x27a   : > { %v1270_v3 = vpop.f32.mrb[28].mxu0  ;;  %6826 = vmatmul.mubr.msk.bf16.vlgmr.msra.gmra.mrb[32].mxu0 %vm1427_vm0, %v8229_v47  ;;  %6971 = vmatprep.subr.msk.bf16.mxu1 %vm1427_vm0, %v8240_v61  ;;  %v1618_v41 = vsel %vm1427_vm0, %v8240_v61, 0 }
 0x27b   : > { %v1271_v20 = vadd.f32 %v1270_v3, %v8110_v16  ;;  %v1272_v4 = vpop.f32.mrb[29].mxu0  ;;  %6830 = vmatpush3.bf16.xpose.msra.mxu1 %v1618_v41  ;;  %6833 = vmatprep.mubr.msk.bf16.mxu1 %vm1427_vm0, %v8242_v2 }
 0x27c   : > { %6838 = vmatpush3.bf16.msra.mxu0 %v8142_v51  ;;  %v1274_v5 = vpop.f32.mrb[30].mxu0  ;;  %v1273_v12 = vadd.f32 %v1272_v4, %v8115_v21 }
 0x27d   : > { %v1275_v10 = vadd.f32 %v1274_v5, %v8110_v16  ;;  %6839 = vmatprep.subr.bf16.mxu0 %v8137_v1  ;;  %v1276_v33 = vpop.f32.mrb[31].mxu0  ;;  %v1401_v29 = vmul.f32 0.015625, %v1271_v20 }
 0x27e   : > { %v1277_v32 = vadd.f32 %v1276_v33, %v8115_v21 }
 0x27f   : > { %v1402_v13 = vmul.f32 0.015625, %v1275_v10 }
 0x280   : > { %v8258_v14 = vpack.c.bf16 %v1277_v32, %v1273_v12  ;;  %6840 = vmatpush3.bf16.msra.mxu0 %v8137_v1 }
 0x281   : > { %v8261_v56 = vpack.c.bf16 %v1402_v13, %v1401_v29  ;;  %6853 = vmatprep.subr.bf16.mxu0 %v8186_v46 }
 0x282   : > { %6972 = vmatprep.subr.msk.bf16.mxu1 %vm1427_vm0, %v8258_v14  ;;  %v1621_v16 = vsel %vm1427_vm0, %v8258_v14, 0 }
 0x283   : > { %6832 = vmatpush3.bf16.xpose.msra.mxu1 %v1621_v16 }
 0x284   : > { %6845 = vmatprep.subr.bf16.mxu1 %v8162_v11 }
 0x28a   : > { %6834 = vmatmul.mubr.msk.bf16.vlgmr.msra.gmra.mrb[24].mxu1 %vm1427_vm0, %v8261_v56 }
 0x28b   : > { %6846 = vmatpush3.bf16.msra.mxu1 %v8162_v11 }
 0x28c   : > { %6847 = vmatprep.subr.bf16.mxu1 %v8159_v6 }
 0x28f   : > { %6848 = vmatpush3.bf16.msra.mxu1 %v8159_v6 }
 0x290   : > { %6861 = vmatprep.subr.bf16.mxu1 %v8206_v7 }
 0x32d   : > { %v6811_v21 = vpop.f32.mrb[16].mxu1 }
 0x32e   : > { %v1474_v22 = vpop.f32.mrb[17].mxu1 }
 0x32f   : > { %v6812_v23 = vpop.f32.mrb[18].mxu1  ;;  %v1680_v39 = vsel %vm8279_vm1, %v1474_v22, -1e+30 }
 0x330   : > { %v1477_v25 = vpop.f32.mrb[19].mxu1 }
 0x33d   : > { %v6819_v36 = vpop.f32.mrb[20].mxu1 }
 0x33e   : > { %v1535_v28 = vpop.f32.mrb[21].mxu1  ;;  %v8300_v53 = vsel %vm8288_vm3, %v6819_v36, -1e+30 }
 0x33f   : > { %v8286_v40 = vsel %vm8279_vm1, %v1535_v28, -1e+30  ;;  %v6820_v50 = vpop.f32.mrb[22].mxu1  ;;  %v1715_v60 = vsel %vm1696_vm2, %v8300_v53, -inf }
 0x340   : > { %v1538_v30 = vpop.f32.mrb[23].mxu1  ;;  %v1709_v52 = vsel %vm1696_vm2, %v8286_v40, -inf  ;;  %v8314_v58 = vsel %vm8306_vm5, %v6820_v50, -1e+30  ;;  %v1681_v50 = vsel %vm8292_vm4, %v1477_v25, -1e+30 }
 0x341   : > { %v8304_v54 = vsel %vm8292_vm4, %v1538_v30, -1e+30  ;;  %1710 = vmax.xlane.f32.xlu0 %v1709_v52  ;;  %v1718_v3 = vsel %vm1696_vm2, %v8314_v58, -inf  ;;  %v1697_v30 = vsel %vm1696_vm2, %v1680_v39, -inf  ;;  %v1682_v52 = vsel %vm8288_vm3, %v6811_v21, -1e+30 }
 0x342   : > { %v1712_v48 = vsel %vm1696_vm2, %v8304_v54, -inf  ;;  %v1703_v22 = vsel %vm1696_vm2, %v1682_v52, -inf }
 0x343   : > { %1713 = vmax.xlane.f32.xlu1 %v1712_v48  ;;  %v1700_v48 = vsel %vm1696_vm2, %v1681_v50, -inf }
 0x345   : > { %1716 = vmax.xlane.f32.xlu0 %v1715_v60  ;;  %v1683_v60 = vsel %vm8306_vm5, %v6812_v23, -1e+30 }
 0x346   : > { %v1706_v25 = vsel %vm1696_vm2, %v1683_v60, -inf }
 0x347   : > { %1719 = vmax.xlane.f32.xlu1 %v1718_v3 }
 0x34d   : > { %v6827_v41 = vpop.f32.mrb[32].mxu0 }
 0x34e   : > { %v1596_v20 = vpop.f32.mrb[33].mxu0 }
 0x34f   : > { %v6828_v4 = vpop.f32.mrb[34].mxu0  ;;  %v1688_v3 = vsel %vm8279_vm1, %v1596_v20, -1e+30 }
 0x350   : > { %v1599_v5 = vpop.f32.mrb[35].mxu0  ;;  %v1721_v21 = vsel %vm1696_vm2, %v1688_v3, -inf  ;;  %v8371_v20 = vsel %vm8306_vm5, %v6828_v4, -1e+30 }
 0x35d   : > { %v6835_v10 = vpop.f32.mrb[24].mxu1 }
 0x35e   : > { %v1657_v33 = vpop.f32.mrb[25].mxu1  ;;  %v8328_v16 = vsel %vm8288_vm3, %v6835_v10, -1e+30  ;;  %v8360_v10 = vsel %vm8292_vm4, %v1599_v5, -1e+30 }
 0x35f   : > { %v8322_v12 = vsel %vm8279_vm1, %v1657_v33, -1e+30  ;;  %v6836_v32 = vpop.f32.mrb[26].mxu1  ;;  %v1739_v36 = vsel %vm1696_vm2, %v8328_v16, -inf  ;;  %v8365_v33 = vsel %vm8288_vm3, %v6827_v41, -1e+30 }
 0x360   : > { %v1660_v29 = vpop.f32.mrb[27].mxu1  ;;  %v1733_v13 = vsel %vm1696_vm2, %v8322_v12, -inf  ;;  %v8338_v35 = vsel %vm8306_vm5, %v6836_v32, -1e+30  ;;  %v1724_v23 = vsel %vm1696_vm2, %v8360_v10, -inf  ;;  %v1727_v5 = vsel %vm1696_vm2, %v8365_v33, -inf }
 0x361   : > { %v8332_v34 = vsel %vm8292_vm4, %v1660_v29, -1e+30  ;;  %1734 = vmax.xlane.f32.xlu0 %v1733_v13  ;;  %v1742_v28 = vsel %vm1696_vm2, %v8338_v35, -inf  ;;  %v1730_v32 = vsel %vm1696_vm2, %v8371_v20, -inf }
 0x362   : > { %v1736_v57 = vsel %vm1696_vm2, %v8332_v34, -inf }
 0x363   : > { %1737 = vmax.xlane.f32.xlu1 %v1736_v57 }
 0x365   : > { %1740 = vmax.xlane.f32.xlu0 %v1739_v36 }
 0x367   : > { %1743 = vmax.xlane.f32.xlu1 %v1742_v28 }
 0x369   : > { %1698 = vmax.xlane.f32.xlu0 %v1697_v30 }
 0x36b   : > { %1701 = vmax.xlane.f32.xlu1 %v1700_v48 }
 0x36d   : > { %1704 = vmax.xlane.f32.xlu0 %v1703_v22 }
 0x36f   : > { %1707 = vmax.xlane.f32.xlu1 %v1706_v25 }
 0x371   : > { %1722 = vmax.xlane.f32.xlu0 %v1721_v21 }
 0x373   : > { %1725 = vmax.xlane.f32.xlu1 %v1724_v23 }
 0x375   : > { %1728 = vmax.xlane.f32.xlu0 %v1727_v5 }
 0x377   : > { %1731 = vmax.xlane.f32.xlu1 %v1730_v32 }
 0x3ce   : > { %v1711_v29 = vpop.xlane.xlu0 %1710 }
 0x3cf   : > { %v1749_v21 = vsub.f32 %v8286_v40, %v1711_v29 }
 0x3d0   : > { %v1714_v41 = vpop.xlane.xlu1 %1713 }
 0x3d1   : > { %v1769_v38 = vmul.f32 1.442695, %v1749_v21  ;;  %v1750_v11 = vsub.f32 %v8304_v54, %v1714_v41 }
 0x3d2   : > { %v1717_v13 = vpop.xlane.xlu0 %1716 }
 0x3d3   : > { %v1751_v4 = vsub.f32 %v8300_v53, %v1717_v13 }
 0x3d4   : > { %v1720_v57 = vpop.xlane.xlu1 %1719 }
 0x3d5   : > { %v1773_v23 = vmul.f32 1.442695, %v1751_v4  ;;  %v1752_v31 = vsub.f32 %v8314_v58, %v1720_v57  ;;  %v1771_v4 = vmul.f32 1.442695, %v1750_v11 }
 0x3ee   : > { %v1735_v36 = vpop.xlane.xlu0 %1734 }
 0x3f0   : > { %v8377_v28 = vpop.xlane.xlu1 %1737 }
 0x3f2   : > { %v1741_v30 = vpop.xlane.xlu0 %1740 }
 0x3f3   : > { %v1759_v29 = vsub.f32 %v8328_v16, %v1741_v30 }
 0x3f4   : > { %v8380_v48 = vpop.xlane.xlu1 %1743 }
 0x3f6   : > { %v1699_v22 = vpop.xlane.xlu0 %1698 }
 0x3f7   : > { %v1745_v25 = vsub.f32 %v1680_v39, %v1699_v22  ;;  %v1775_v39 = vmul.f32 1.442695, %v1752_v31 }
 0x3f8   : > { %v1702_v5 = vpop.xlane.xlu1 %1701 }
 0x3f9   : > { %v1761_v49 = vmul.f32 1.442695, %v1745_v25  ;;  %v1746_v32 = vsub.f32 %v1681_v50, %v1702_v5  ;;  %v1760_v5 = vsub.f32 %v8338_v35, %v8380_v48 }
 0x3fa   : > { %v1705_v17 = vpop.xlane.xlu0 %1704 }
 0x3fb   : > { %7217 = vpow2.f32 %v1761_v49  ;;  %v1763_v62 = vmul.f32 1.442695, %v1746_v32  ;;  %v1747_v53 = vsub.f32 %v1682_v52, %v1705_v17  ;;  %v1789_v17 = vmul.f32 1.442695, %v1759_v29 }
 0x3fc   : > { %7219 = vpow2.f32 %v1773_v23  ;;  %v1708_v6 = vpop.xlane.xlu1 %1707 }
 0x3fd   : > { %7221 = vpow2.f32 %v1763_v62  ;;  %v1748_v13 = vsub.f32 %v1683_v60, %v1708_v6  ;;  %v1765_v50 = vmul.f32 1.442695, %v1747_v53  ;;  %v1757_v62 = vsub.f32 %v8322_v12, %v1735_v36 }
 0x3fe   : > { %7223 = vpow2.f32 %v1769_v38  ;;  %v1723_v40 = vpop.xlane.xlu0 %1722 }
 0x3ff   : > { %v1767_v22 = vmul.f32 1.442695, %v1748_v13  ;;  %v1753_v49 = vsub.f32 %v1688_v3, %v1723_v40  ;;  %v1785_v60 = vmul.f32 1.442695, %v1757_v62  ;;  %v1791_v40 = vmul.f32 1.442695, %v1760_v5 }
 0x400   : > { %v1726_v58 = vpop.xlane.xlu1 %1725 }
 0x401   : > { %7225 = vpow2.f32 %v1767_v22  ;;  %v1777_v54 = vmul.f32 1.442695, %v1753_v49  ;;  %v1754_v11 = vsub.f32 %v8360_v10, %v1726_v58  ;;  %v1758_v22 = vsub.f32 %v8332_v34, %v8377_v28 }
 0x402   : > { %7227 = vpow2.f32 %v1775_v39  ;;  %v1729_v16 = vpop.xlane.xlu0 %1728 }
 0x403   : > { %7229 = vpow2.f32 %v1765_v50  ;;  %v1779_v36 = vmul.f32 1.442695, %v1754_v11  ;;  %v1755_v30 = vsub.f32 %v8365_v33, %v1729_v16  ;;  %v1787_v49 = vmul.f32 1.442695, %v1758_v22 }
 0x404   : > { %7231 = vpow2.f32 %v1771_v4  ;;  %v1732_v35 = vpop.xlane.xlu1 %1731 }
 0x405   : > { %v8386_v57 = vpop.eup %7217  ;;  %7233 = vpow2.f32 %v1789_v17  ;;  %v1781_v32 = vmul.f32 1.442695, %v1755_v30  ;;  %v1756_v58 = vsub.f32 %v8371_v20, %v1732_v35 }
 0x406   : > { %v8389_v6 = vpop.eup %7219  ;;  %v1793_v38 = vsel %vm1696_vm2, %v8386_v57, 0.0  ;;  %7235 = vpow2.f32 %v1777_v54 }
 0x407   : > { %v8393_v31 = vpop.eup %7221  ;;  %1794 = vadd.xlane.f32.xlu0 %v1793_v38  ;;  %v1811_v3 = vsel %vm1696_vm2, %v8389_v6, 0.0  ;;  %7237 = vpow2.f32 %v1785_v60  ;;  %v1783_v17 = vmul.f32 1.442695, %v1756_v58 }
 0x408   : > { %v1796_v52 = vsel %vm1696_vm2, %v8393_v31, 0.0  ;;  %v8398_v12 = vpop.eup %7223  ;;  %7239 = vpow2.f32 %v1779_v36 }
 0x409   : > { %1797 = vadd.xlane.f32.xlu1 %v1796_v52  ;;  %v1805_v21 = vsel %vm1696_vm2, %v8398_v12, 0.0  ;;  %7241 = vpow2.f32 %v1781_v32 }
 0x40a   : > { %7243 = vpow2.f32 %v1791_v40 }
 0x40b   : > { %v8402_v41 = vpop.eup %7225  ;;  %1812 = vadd.xlane.f32.xlu0 %v1811_v3  ;;  %7245 = vpow2.f32 %v1787_v49 }
 0x40c   : > { %v1802_v10 = vsel %vm1696_vm2, %v8402_v41, 0.0  ;;  %v8407_v25 = vpop.eup %7227  ;;  %7247 = vpow2.f32 %v1783_v17 }
 0x40d   : > { %1803 = vadd.xlane.f32.xlu1 %v1802_v10  ;;  %v8411_v23 = vpop.eup %7229  ;;  %v1814_v33 = vsel %vm1696_vm2, %v8407_v25, 0.0 }
 0x40e   : > { %v8417_v53 = vpop.eup %7231  ;;  %v1799_v13 = vsel %vm1696_vm2, %v8411_v23, 0.0 }
 0x40f   : > { %1806 = vadd.xlane.f32.xlu0 %v1805_v21  ;;  %v8421_v39 = vpop.eup %7233  ;;  %v1808_v48 = vsel %vm1696_vm2, %v8417_v53, 0.0 }
 0x410   : > { %v8427_v29 = vpop.eup %7235  ;;  %v1835_v50 = vsel %vm1696_vm2, %v8421_v39, 0.0 }
 0x411   : > { %1815 = vadd.xlane.f32.xlu1 %v1814_v33  ;;  %v8431_v4 = vpop.eup %7237  ;;  %v1817_v34 = vsel %vm1696_vm2, %v8427_v29, 0.0 }
 0x412   : > { %v8436_v28 = vpop.eup %7239  ;;  %v1829_v62 = vsel %vm1696_vm2, %v8431_v4, 0.0 }
 0x413   : > { %1800 = vadd.xlane.f32.xlu0 %v1799_v13  ;;  %v1820_v38 = vsel %vm1696_vm2, %v8436_v28, 0.0  ;;  %v8442_v54 = vpop.eup %7241 }
 0x414   : > { %v1823_v20 = vsel %vm1696_vm2, %v8442_v54, 0.0  ;;  %v8446_v11 = vpop.eup %7243 }
 0x415   : > { %1809 = vadd.xlane.f32.xlu1 %v1808_v48  ;;  %v1838_v16 = vsel %vm1696_vm2, %v8446_v11, 0.0  ;;  %v8450_v52 = vpop.eup %7245 }
 0x416   : > { %v1832_v60 = vsel %vm1696_vm2, %v8450_v52, 0.0  ;;  %v8454_v3 = vpop.eup %7247 }
 0x417   : > { %1836 = vadd.xlane.f32.xlu0 %v1835_v50  ;;  %v1826_v36 = vsel %vm1696_vm2, %v8454_v3, 0.0 }
 0x419   : > { %1818 = vadd.xlane.f32.xlu1 %v1817_v34 }
 0x41b   : > { %1830 = vadd.xlane.f32.xlu0 %v1829_v62 }
 0x41d   : > { %1821 = vadd.xlane.f32.xlu1 %v1820_v38 }
 0x421   : > { %1824 = vadd.xlane.f32.xlu1 %v1823_v20 }
 0x425   : > { %1839 = vadd.xlane.f32.xlu1 %v1838_v16 }
 0x429   : > { %1833 = vadd.xlane.f32.xlu1 %v1832_v60 }
 0x42d   : > { %1827 = vadd.xlane.f32.xlu1 %v1826_v36 }
 0x431   : > { %2125 = vrot.lane.b32.xlu0 %v8125_v0, %s7694_s25 }
 0x435   : > { %2119 = vrot.lane.b32.xlu0 %v8127_v42, %s7694_s25 }
 0x439   : > { %2121 = vrot.lane.b32.xlu0 %v8149_v63, %s7694_s25 }
 0x43d   : > { %2198 = vrot.lane.b32.xlu0 %v8168_v24, %s7694_s25 }
 0x43e   : > { %2127 = vrot.lane.b32.xlu1 %v8147_v19, %s7694_s25 }
 0x441   : > { %2192 = vrot.lane.b32.xlu0 %v8170_v26, %s7694_s25 }
 0x442   : > { %2200 = vrot.lane.b32.xlu1 %v8192_v9, %s7694_s25 }
 0x445   : > { %2271 = vrot.lane.b32.xlu0 %v8211_v15, %s7694_s25 }
 0x446   : > { %2194 = vrot.lane.b32.xlu1 %v8194_v59, %s7694_s25 }
 0x449   : > { %2265 = vrot.lane.b32.xlu0 %v8213_v18, %s7694_s25 }
 0x44a   : > { %2273 = vrot.lane.b32.xlu1 %v8227_v45, %s7694_s25 }
 0x44d   : > { %2344 = vrot.lane.b32.xlu0 %v8240_v61, %s7694_s25 }
 0x44e   : > { %2267 = vrot.lane.b32.xlu1 %v8229_v47, %s7694_s25 }
 0x451   : > { %2338 = vrot.lane.b32.xlu0 %v8242_v2, %s7694_s25 }
 0x452   : > { %2346 = vrot.lane.b32.xlu1 %v8258_v14, %s7694_s25 }
 0x456   : > { %2340 = vrot.lane.b32.xlu1 %v8261_v56, %s7694_s25 }
 0x494   : > { %v1795_v0 = vpop.xlane.xlu0 %1794 }
 0x495   : > { %7249 = vrcp.f32 %v1795_v0 }
 0x496   : > { %v1798_v42 = vpop.xlane.xlu1 %1797 }
 0x497   : > { %7251 = vrcp.f32 %v1798_v42 }
 0x498   : > { %v1813_v19 = vpop.xlane.xlu0 %1812 }
 0x49a   : > { %v1804_v63 = vpop.xlane.xlu1 %1803 }
 0x49b   : > { %7253 = vrcp.f32 %v1804_v63 }
 0x49c   : > { %v1807_v24 = vpop.xlane.xlu0 %1806 }
 0x49d   : > { %7255 = vrcp.f32 %v1807_v24 }
 0x49e   : > { %v1816_v26 = vpop.xlane.xlu1 %1815 }
 0x49f   : > { %v7250_v9 = vpop.eup %7249  ;;  %7257 = vrcp.f32 %v1816_v26 }
 0x4a0   : > { %v1801_v59 = vpop.xlane.xlu0 %1800  ;;  %v1873_v45 = vmul.f32 %v7250_v9, %v8386_v57 }
 0x4a1   : > { %v7252_v15 = vpop.eup %7251  ;;  %7259 = vrcp.f32 %v1801_v59 }
 0x4a2   : > { %7261 = vrcp.f32 %v1813_v19  ;;  %v1810_v18 = vpop.xlane.xlu1 %1809  ;;  %v1874_v47 = vmul.f32 %v7252_v15, %v8393_v31 }
 0x4a3   : > { %7263 = vrcp.f32 %v1810_v18 }
 0x4a4   : > { %v1837_v61 = vpop.xlane.xlu0 %1836  ;;  %v1889_v2 = vpack.c.bf16 %v1874_v47, %v1873_v45 }
 0x4a5   : > { %v7254_v56 = vpop.eup %7253 }
 0x4a6   : > { %6841 = vmatprep.mubr.msk.bf16.mxu0 %vm1696_vm2, %v1889_v2  ;;  %v1819_v14 = vpop.xlane.xlu1 %1818  ;;  %v1876_v13 = vmul.f32 %v7254_v56, %v8402_v41 }
 0x4a7   : > { %v7256_v10 = vpop.eup %7255  ;;  %7265 = vrcp.f32 %v1819_v14 }
 0x4a8   : > { %v1831_v30 = vpop.xlane.xlu0 %1830  ;;  %v1877_v50 = vmul.f32 %v7256_v10, %v8398_v12 }
 0x4a9   : > { %v7258_v21 = vpop.eup %7257 }
 0x4aa   : > { %v1822_v5 = vpop.xlane.xlu1 %1821  ;;  %v1880_v40 = vmul.f32 %v7258_v21, %v8407_v25 }
 0x4ab   : > { %v7260_v32 = vpop.eup %7259  ;;  %7267 = vrcp.f32 %v1822_v5 }
 0x4ac   : > { %v7262_v33 = vpop.eup %7261  ;;  %v1875_v57 = vmul.f32 %v7260_v32, %v8411_v23  ;;  %v2126_v31 = vpop.permute.xlu0 %2125 }
 0x4ad   : > { %v7264_v22 = vpop.eup %7263  ;;  %v1879_v58 = vmul.f32 %v7262_v33, %v8389_v6  ;;  %v2136_v56 = vsel %vm1427_vm0, %v2126_v31, 0 }
 0x4ae   : > { %v1825_v35 = vpop.xlane.xlu1 %1824  ;;  %v1890_v48 = vpack.c.bf16 %v1876_v13, %v1875_v57  ;;  %v1878_v49 = vmul.f32 %v7264_v22, %v8417_v53 }
 0x4af   : > { %v1892_v41 = vpack.c.bf16 %v1880_v40, %v1879_v58 }
 0x4b0   : > { %v2120_v34 = vpop.permute.xlu0 %2119  ;;  %6842 = vmatmul.mubr.msk.bf16.vlgmr.msra.gmra.mrb[36].mxu0 %vm1696_vm2, %v1890_v48  ;;  %v1891_v62 = vpack.c.bf16 %v1878_v49, %v1877_v50 }
 0x4b1   : > { %6854 = vmatpush3.bf16.msra.mxu0 %v8186_v46  ;;  %v7266_v23 = vpop.eup %7265 }
 0x4b2   : > { %6855 = vmatprep.subr.bf16.mxu0 %v8181_v43  ;;  %6849 = vmatprep.mubr.msk.bf16.mxu1 %vm1696_vm2, %v1891_v62  ;;  %v1840_v25 = vpop.xlane.xlu1 %1839  ;;  %v1881_v17 = vmul.f32 %v7266_v23, %v8427_v29 }
 0x4b3   : > { %6850 = vmatmul.mubr.msk.bf16.vlgmr.msra.gmra.mrb[28].mxu1 %vm1696_vm2, %v1892_v41  ;;  %7269 = vrcp.f32 %v1840_v25 }
 0x4b4   : > { %6862 = vmatpush3.bf16.msra.mxu1 %v8206_v7  ;;  %v2122_v12 = vpop.permute.xlu0 %2121  ;;  %7271 = vrcp.f32 %v1831_v30 }
 0x4b5   : > { %v7268_v6 = vpop.eup %7267  ;;  %6856 = vmatpush3.bf16.msra.mxu0 %v8181_v43  ;;  %6863 = vmatprep.subr.bf16.mxu1 %v8203_v27  ;;  %7273 = vrcp.f32 %v1837_v61 }
 0x4b6   : > { %v1834_v53 = vpop.xlane.xlu1 %1833  ;;  %v1882_v38 = vmul.f32 %v7268_v6, %v8436_v28 }
 0x4b7   : > { %7275 = vrcp.f32 %v1834_v53 }
 0x4b8   : > { %6864 = vmatpush3.bf16.msra.mxu1 %v8203_v27  ;;  %v2199_v20 = vpop.permute.xlu0 %2198  ;;  %v1893_v16 = vpack.c.bf16 %v1882_v38, %v1881_v17  ;;  %7277 = vrcp.f32 %v1825_v35 }
 0x4b9   : > { %6973 = vmatprep.subr.msk.bf16.mxu1 %vm1427_vm0, %v2126_v31  ;;  %v2209_v10 = vsel %vm1427_vm0, %v2199_v20, 0 }
 0x4ba   : > { %6857 = vmatprep.mubr.msk.bf16.mxu0 %vm1696_vm2, %v1893_v16  ;;  %v1828_v60 = vpop.xlane.xlu1 %1827 }
 0x4bb   : > { %7279 = vrcp.f32 %v1828_v60 }
 0x4bc   : > { %v2193_v36 = vpop.permute.xlu0 %2192 }
 0x4bd   : > { %v7270_v0 = vpop.eup %7269 }
 0x4be   : > { %v2128_v42 = vpop.permute.xlu1 %2127  ;;  %v7272_v19 = vpop.eup %7271  ;;  %v1888_v28 = vmul.f32 %v7270_v0, %v8446_v11 }
 0x4bf   : > { %v7274_v63 = vpop.eup %7273  ;;  %v1885_v9 = vmul.f32 %v7272_v19, %v8431_v4 }
 0x4c0   : > { %v2272_v29 = vpop.permute.xlu0 %2271  ;;  %v1887_v18 = vmul.f32 %v7274_v63, %v8421_v39 }
 0x4c1   : > { %v7276_v24 = vpop.eup %7275  ;;  %6977 = vmatprep.subr.msk.bf16.mxu0 %vm1427_vm0, %v2272_v29  ;;  %v2282_v39 = vsel %vm1427_vm0, %v2272_v29, 0 }
 0x4c2   : > { %v2201_v26 = vpop.permute.xlu1 %2200  ;;  %v1886_v59 = vmul.f32 %v7276_v24, %v8450_v52  ;;  %v7278_v15 = vpop.eup %7277  ;;  %v1896_v61 = vpack.c.bf16 %v1888_v28, %v1887_v18 }
 0x4c3   : > { %v1883_v2 = vmul.f32 %v7278_v15, %v8442_v54  ;;  %v2212_v5 = vsel %vm1427_vm0, %v2201_v26, 0 }
 0x4c4   : > { %v1895_v45 = vpack.c.bf16 %v1886_v59, %v1885_v9  ;;  %v2266_v52 = vpop.permute.xlu0 %2265 }
 0x4c5   : > { %v7280_v47 = vpop.eup %7279 }
 0x4c6   : > { %v1884_v14 = vmul.f32 %v7280_v47, %v8454_v3  ;;  %6865 = vmatprep.mubr.msk.bf16.mxu1 %vm1696_vm2, %v1895_v45  ;;  %v2195_v11 = vpop.permute.xlu1 %2194  ;;  %v2139_v3 = vsel %vm1427_vm0, %v2128_v42, 0 }
 0x4c7   : > { %6866 = vmatmul.mubr.msk.bf16.vlgmr.msra.gmra.mrb[32].mxu1 %vm1696_vm2, %v1896_v61 }
 0x4c8   : > { %6870 = vmatpush3.bf16.xpose.msra.mxu1 %v2136_v56  ;;  %6873 = vmatprep.mubr.msk.bf16.mxu1 %vm1427_vm0, %v2120_v34  ;;  %v1894_v4 = vpack.c.bf16 %v1884_v14, %v1883_v2  ;;  %v2345_v32 = vpop.permute.xlu0 %2344 }
 0x4c9   : > { %6974 = vmatprep.subr.msk.bf16.mxu1 %vm1427_vm0, %v2128_v42  ;;  %v2355_v33 = vsel %vm1427_vm0, %v2345_v32, 0 }
 0x4ca   : > { %6858 = vmatmul.mubr.msk.bf16.vlgmr.msra.gmra.mrb[40].mxu0 %vm1696_vm2, %v1894_v4  ;;  %v2274_v54 = vpop.permute.xlu1 %2273 }
 0x4cb   : > { %6886 = vmatpush3.bf16.xpose.msra.mxu0 %v2282_v39  ;;  %6889 = vmatprep.mubr.msk.bf16.mxu0 %vm1427_vm0, %v2266_v52  ;;  %v2285_v30 = vsel %vm1427_vm0, %v2274_v54, 0 }
 0x4cc   : > { %6978 = vmatprep.subr.msk.bf16.mxu0 %vm1427_vm0, %v2274_v54  ;;  %v2339_v13 = vpop.permute.xlu0 %2338 }
 0x4ce   : > { %v2268_v21 = vpop.permute.xlu1 %2267 }
 0x4d0   : > { %6872 = vmatpush3.bf16.xpose.msra.mxu1 %v2139_v3 }
 0x4d1   : > { %6975 = vmatprep.subr.msk.bf16.mxu1 %vm1427_vm0, %v2199_v20 }
 0x4d2   : > { %v2347_v57 = vpop.permute.xlu1 %2346 }
 0x4d3   : > { %6888 = vmatpush3.bf16.xpose.msra.mxu0 %v2285_v30  ;;  %v2358_v31 = vsel %vm1427_vm0, %v2347_v57, 0 }
 0x4d6   : > { %v2341_v22 = vpop.permute.xlu1 %2340 }
 0x4d7   : > { %6874 = vmatmul.mubr.msk.bf16.vlgmr.msra.gmra.mrb[36].mxu1 %vm1427_vm0, %v2122_v12 }
 0x4d8   : > { %6878 = vmatpush3.bf16.xpose.msra.mxu1 %v2209_v10  ;;  %6881 = vmatprep.mubr.msk.bf16.mxu1 %vm1427_vm0, %v2193_v36 }
 0x4d9   : > { %6976 = vmatprep.subr.msk.bf16.mxu1 %vm1427_vm0, %v2201_v26 }
 0x4da   : > { %6890 = vmatmul.mubr.msk.bf16.vlgmr.msra.gmra.mrb[44].mxu0 %vm1427_vm0, %v2268_v21 }
 0x4e0   : > { %6880 = vmatpush3.bf16.xpose.msra.mxu1 %v2212_v5 }
 0x4e1   : > { %6979 = vmatprep.subr.msk.bf16.mxu1 %vm1427_vm0, %v2345_v32 }
 0x4e7   : > { %6882 = vmatmul.mubr.msk.bf16.vlgmr.msra.gmra.mrb[40].mxu1 %vm1427_vm0, %v2195_v11 }
 0x4e8   : > { %6894 = vmatpush3.bf16.xpose.msra.mxu1 %v2355_v33  ;;  %6897 = vmatprep.mubr.msk.bf16.mxu1 %vm1427_vm0, %v2339_v13 }
 0x4e9   : > { %6980 = vmatprep.subr.msk.bf16.mxu1 %vm1427_vm0, %v2347_v57 }
 0x4f0   : > { %6896 = vmatpush3.bf16.xpose.msra.mxu1 %v2358_v31 }
 0x4f7   : > { %6898 = vmatmul.mubr.msk.bf16.vlgmr.msra.gmra.mrb[44].mxu1 %vm1427_vm0, %v2341_v22 }
 0x583   : > { %v8544_v40 = vpop.f32.mrb[36].mxu0 }
 0x584   : > { %v8546_v35 = vpop.f32.mrb[37].mxu0 }
 0x585   : > { %v8548_v48 = vpop.f32.mrb[38].mxu0 }
 0x586   : > { %v8550_v50 = vpop.f32.mrb[39].mxu0  ;;  %v8552_v49 = vpop.f32.mrb[28].mxu1 }
 0x587   : > { %v8554_v58 = vpop.f32.mrb[29].mxu1 }
 0x588   : > { %v8556_v34 = vpop.f32.mrb[30].mxu1 }
 0x589   : > { %v8558_v62 = vpop.f32.mrb[31].mxu1 }
 0x59a   : > { %v8560_v41 = vpop.f32.mrb[32].mxu1 }
 0x59b   : > { %v8562_v25 = vpop.f32.mrb[33].mxu1 }
 0x59c   : > { %v8564_v23 = vpop.f32.mrb[34].mxu1 }
 0x59d   : > { %v8566_v12 = vpop.f32.mrb[40].mxu0  ;;  %v8568_v6 = vpop.f32.mrb[35].mxu1 }
 0x59e   : > { %v8570_v53 = vpop.f32.mrb[41].mxu0 }
 0x59f   : > { %v8572_v17 = vpop.f32.mrb[42].mxu0 }
 0x5a0   : > { %v8574_v38 = vpop.f32.mrb[43].mxu0 }
 0x5aa   : > { %v6875_v20 = vpop.f32.mrb[36].mxu1 }
 0x5ab   : > { %v2175_v16 = vpop.f32.mrb[37].mxu1  ;;  %v8600_v18 = vsel %vm8288_vm3, %v6875_v20, -1e+30 }
 0x5ac   : > { %v6876_v60 = vpop.f32.mrb[38].mxu1  ;;  %v2431_v61 = vsel %vm1696_vm2, %v8600_v18, -inf  ;;  %v8612_v2 = vsel %vm8279_vm1, %v2175_v16, -1e+30 }
 0x5ad   : > { %v2178_v36 = vpop.f32.mrb[39].mxu1  ;;  %v6891_v0 = vpop.f32.mrb[44].mxu0  ;;  %v2425_v4 = vsel %vm1696_vm2, %v8612_v2, -inf  ;;  %v8620_v39 = vsel %vm8306_vm5, %v6876_v60, -1e+30 }
 0x5ae   : > { %v8578_v42 = vsel %vm8288_vm3, %v6891_v0, -1e+30  ;;  %v2321_v19 = vpop.f32.mrb[45].mxu0  ;;  %v8606_v47 = vsel %vm8292_vm4, %v2178_v36, -1e+30  ;;  %v2434_v21 = vsel %vm1696_vm2, %v8620_v39, -inf }
 0x5af   : > { %v6892_v63 = vpop.f32.mrb[46].mxu0  ;;  %v2455_v29 = vsel %vm1696_vm2, %v8578_v42, -inf  ;;  %v8584_v24 = vsel %vm8279_vm1, %v2321_v19, -1e+30  ;;  %v2428_v14 = vsel %vm1696_vm2, %v8606_v47, -inf }
 0x5b0   : > { %v8588_v28 = vsel %vm8306_vm5, %v6892_v63, -1e+30  ;;  %2456 = vmax.xlane.f32.xlu0 %v2455_v29  ;;  %v2324_v26 = vpop.f32.mrb[47].mxu0  ;;  %v2449_v15 = vsel %vm1696_vm2, %v8584_v24, -inf }
 0x5b1   : > { %v2458_v9 = vsel %vm1696_vm2, %v8588_v28, -inf  ;;  %v8594_v59 = vsel %vm8292_vm4, %v2324_v26, -1e+30 }
 0x5b2   : > { %2459 = vmax.xlane.f32.xlu1 %v2458_v9  ;;  %v2452_v45 = vsel %vm1696_vm2, %v8594_v59, -inf }
 0x5b4   : > { %2450 = vmax.xlane.f32.xlu0 %v2449_v15 }
 0x5b6   : > { %2453 = vmax.xlane.f32.xlu1 %v2452_v45 }
 0x5b8   : > { %2432 = vmax.xlane.f32.xlu0 %v2431_v61 }
 0x5ba   : > { %v6883_v11 = vpop.f32.mrb[40].mxu1  ;;  %2429 = vmax.xlane.f32.xlu1 %v2428_v14 }
 0x5bb   : > { %v2248_v56 = vpop.f32.mrb[41].mxu1  ;;  %v8636_v5 = vsel %vm8288_vm3, %v6883_v11, -1e+30 }
 0x5bc   : > { %v6884_v52 = vpop.f32.mrb[42].mxu1  ;;  %2426 = vmax.xlane.f32.xlu0 %v2425_v4  ;;  %v2443_v33 = vsel %vm1696_vm2, %v8636_v5, -inf  ;;  %v8644_v13 = vsel %vm8279_vm1, %v2248_v56, -1e+30 }
 0x5bd   : > { %v8624_v54 = vsel %vm8306_vm5, %v6884_v52, -1e+30  ;;  %v2251_v3 = vpop.f32.mrb[43].mxu1  ;;  %v2437_v57 = vsel %vm1696_vm2, %v8644_v13, -inf }
 0x5be   : > { %v2446_v30 = vsel %vm1696_vm2, %v8624_v54, -inf  ;;  %v8630_v10 = vsel %vm8292_vm4, %v2251_v3, -1e+30 }
 0x5bf   : > { %2447 = vmax.xlane.f32.xlu1 %v2446_v30  ;;  %v2440_v32 = vsel %vm1696_vm2, %v8630_v10, -inf }
 0x5c0   : > { %2435 = vmax.xlane.f32.xlu0 %v2434_v21 }
 0x5c3   : > { %2441 = vmax.xlane.f32.xlu1 %v2440_v32 }
 0x5c4   : > { %2444 = vmax.xlane.f32.xlu0 %v2443_v33 }
 0x5c8   : > { %2438 = vmax.xlane.f32.xlu0 %v2437_v57 }
 0x5ca   : > { %v6899_v31 = vpop.f32.mrb[44].mxu1 }
 0x5cb   : > { %v2394_v22 = vpop.f32.mrb[45].mxu1  ;;  %v8664_v19 = vsel %vm8288_vm3, %v6899_v31, -1e+30 }
 0x5cc   : > { %v6900_v20 = vpop.f32.mrb[46].mxu1  ;;  %v8672_v55 = vsel %vm8279_vm1, %v2394_v22, -1e+30 }
 0x5cd   : > { %v2397_v16 = vpop.f32.mrb[47].mxu1  ;;  %v8654_v60 = vsel %vm8306_vm5, %v6900_v20, -1e+30  ;;  %v2461_v8 = vsel %vm1696_vm2, %v8672_v55, -inf }
 0x5ce   : > { %v2470_v36 = vsel %vm1696_vm2, %v8654_v60, -inf  ;;  %v8660_v0 = vsel %vm8292_vm4, %v2397_v16, -1e+30 }
 0x5d4   : > { %2629 = vrot.lane.b32.xlu1 %v8137_v1, %s7694_s25  ;;  %v2464_v1 = vsel %vm1696_vm2, %v8660_v0, -inf }
 0x5de   : > { %2627 = vrot.lane.b32.xlu0 %v8142_v51, %s7694_s25  ;;  %v2467_v51 = vsel %vm1696_vm2, %v8664_v19, -inf }
 0x5f8   : > { %2471 = vmax.xlane.f32.xlu1 %v2470_v36 }
 0x5fc   : > { %2465 = vmax.xlane.f32.xlu1 %v2464_v1 }
 0x5fd   : > { %2468 = vmax.xlane.f32.xlu0 %v2467_v51 }
 0x601   : > { %2462 = vmax.xlane.f32.xlu0 %v2461_v8 }
 0x63d   : > { %v2457_v63 = vpop.xlane.xlu0 %2456 }
 0x63e   : > { %v2483_v44 = vsub.f32 %v8578_v42, %v2457_v63 }
 0x63f   : > { %v2460_v29 = vpop.xlane.xlu1 %2459 }
 0x640   : > { %v2509_v26 = vmul.f32 1.442695, %v2483_v44  ;;  %v2484_v9 = vsub.f32 %v8588_v28, %v2460_v29 }
 0x641   : > { %v2451_v15 = vpop.xlane.xlu0 %2450 }
 0x642   : > { %7281 = vpow2.f32 %v2509_v26  ;;  %v2481_v45 = vsub.f32 %v8584_v24, %v2451_v15  ;;  %v2511_v61 = vmul.f32 1.442695, %v2484_v9 }
 0x643   : > { %v2454_v37 = vpop.xlane.xlu1 %2453 }
 0x644   : > { %v2505_v14 = vmul.f32 1.442695, %v2481_v45  ;;  %v2482_v11 = vsub.f32 %v8594_v59, %v2454_v37 }
 0x645   : > { %v2433_v56 = vpop.xlane.xlu0 %2432 }
 0x646   : > { %7283 = vpow2.f32 %v2505_v14  ;;  %v2507_v4 = vmul.f32 1.442695, %v2482_v11  ;;  %v2475_v52 = vsub.f32 %v8600_v18, %v2433_v56  ;;  %v11314_v11 = vld [vmem:[#allocation11_spill] sm:$0xff]  ;;  %v11315_v56 = vld [vmem:[#allocation10_spill] sm:$0xff] }
 0x647   : > { %7285 = vpow2.f32 %v2511_v61  ;;  %v2430_v3 = vpop.xlane.xlu1 %2429 }
 0x648   : > { %7287 = vpow2.f32 %v2507_v4  ;;  %v2493_v42 = vmul.f32 1.442695, %v2475_v52  ;;  %v2474_v24 = vsub.f32 %v8606_v47, %v2430_v3 }
 0x649   : > { %v2427_v30 = vpop.xlane.xlu0 %2426 }
 0x64a   : > { %7289 = vpow2.f32 %v2493_v42  ;;  %v2473_v28 = vsub.f32 %v8612_v2, %v2427_v30  ;;  %v2491_v22 = vmul.f32 1.442695, %v2474_v24 }
 0x64c   : > { %v8682_v21 = vpop.eup %7281  ;;  %v2489_v32 = vmul.f32 1.442695, %v2473_v28  ;;  %v2448_v57 = vpop.xlane.xlu1 %2447 }
 0x64d   : > { %v2436_v33 = vpop.xlane.xlu0 %2435  ;;  %v2551_v59 = vsel %vm1696_vm2, %v8682_v21, 0.0  ;;  %v2480_v3 = vsub.f32 %v8624_v54, %v2448_v57 }
 0x64e   : > { %7291 = vpow2.f32 %v2489_v32  ;;  %v2476_v18 = vsub.f32 %v8620_v39, %v2436_v33  ;;  %2552 = vadd.xlane.f32.xlu0 %v2551_v59 }
 0x64f   : > { %v2503_v28 = vmul.f32 1.442695, %v2480_v3 }
 0x650   : > { %v8688_v31 = vpop.eup %7283  ;;  %v2495_v20 = vmul.f32 1.442695, %v2476_v18  ;;  %v2442_v51 = vpop.xlane.xlu1 %2441 }
 0x651   : > { %v8690_v16 = vpop.eup %7285  ;;  %v2445_v2 = vpop.xlane.xlu0 %2444  ;;  %v2545_v47 = vsel %vm1696_vm2, %v8688_v31, 0.0  ;;  %v2478_v24 = vsub.f32 %v8630_v10, %v2442_v51 }
 0x652   : > { %v8694_v36 = vpop.eup %7287  ;;  %7293 = vpow2.f32 %v2495_v20  ;;  %2546 = vadd.xlane.f32.xlu1 %v2545_v47  ;;  %v2554_v63 = vsel %vm1696_vm2, %v8690_v16, 0.0  ;;  %v2479_v4 = vsub.f32 %v8636_v5, %v2445_v2 }
 0x653   : > { %v2548_v1 = vsel %vm1696_vm2, %v8694_v36, 0.0  ;;  %7295 = vpow2.f32 %v2491_v22  ;;  %v2499_v33 = vmul.f32 1.442695, %v2478_v24 }
 0x654   : > { %v8698_v39 = vpop.eup %7289  ;;  %2549 = vadd.xlane.f32.xlu0 %v2548_v1  ;;  %v2630_v9 = vpop.permute.xlu1 %2629  ;;  %v2501_v52 = vmul.f32 1.442695, %v2479_v4 }
 0x655   : > { %v2439_v8 = vpop.xlane.xlu0 %2438  ;;  %v2527_v44 = vsel %vm1696_vm2, %v8698_v39, 0.0 }
 0x656   : > { %2555 = vadd.xlane.f32.xlu1 %v2554_v63  ;;  %v2477_v42 = vsub.f32 %v8644_v13, %v2439_v8  ;;  %7297 = vpow2.f32 %v2501_v52 }
 0x658   : > { %v8704_v29 = vpop.eup %7291  ;;  %2528 = vadd.xlane.f32.xlu0 %v2527_v44  ;;  %v2497_v30 = vmul.f32 1.442695, %v2477_v42 }
 0x659   : > { %v2628_v26 = vpop.permute.xlu0 %2627  ;;  %v2521_v15 = vsel %vm1696_vm2, %v8704_v29, 0.0 }
 0x65a   : > { %6901 = vmatprep.subr.bf16.mxu0 %v2628_v26  ;;  %7299 = vpow2.f32 %v2497_v30 }
 0x65b   : > { %6902 = vmatpush3.bf16.msra.mxu0 %v2628_v26  ;;  %7301 = vpow2.f32 %v2503_v28 }
 0x65c   : > { %v8708_v45 = vpop.eup %7293  ;;  %2522 = vadd.xlane.f32.xlu0 %v2521_v15  ;;  %6903 = vmatprep.subr.bf16.mxu0 %v2630_v9  ;;  %7303 = vpow2.f32 %v2499_v33 }
 0x65d   : > { %v2530_v61 = vsel %vm1696_vm2, %v8708_v45, 0.0  ;;  %v8712_v37 = vpop.eup %7295 }
 0x65e   : > { %2531 = vadd.xlane.f32.xlu1 %v2530_v61  ;;  %v2524_v14 = vsel %vm1696_vm2, %v8712_v37, 0.0 }
 0x65f   : > { %6904 = vmatpush3.bf16.msra.mxu0 %v2630_v9 }
 0x660   : > { %v8726_v20 = vpop.eup %7297 }
 0x661   : > { %v2539_v47 = vsel %vm1696_vm2, %v8726_v20, 0.0 }
 0x662   : > { %2525 = vadd.xlane.f32.xlu1 %v2524_v14 }
 0x664   : > { %v8732_v1 = vpop.eup %7299 }
 0x672   : > { %2690 = vrot.lane.b32.xlu0 %v11314_v11, %s7694_s25 }
 0x673   : > { %2692 = vrot.lane.b32.xlu1 %v11315_v56, %s7694_s25 }
 0x685   : > { %v2472_v32 = vpop.xlane.xlu1 %2471 }
 0x686   : > { %v2488_v54 = vsub.f32 %v8654_v60, %v2472_v32  ;;  %v2533_v60 = vsel %vm1696_vm2, %v8732_v1, 0.0 }
 0x689   : > { %v2466_v59 = vpop.xlane.xlu1 %2465 }
 0x68a   : > { %v2486_v18 = vsub.f32 %v8660_v0, %v2466_v59  ;;  %v2469_v22 = vpop.xlane.xlu0 %2468  ;;  %v2519_v0 = vmul.f32 1.442695, %v2488_v54 }
 0x68b   : > { %v2487_v5 = vsub.f32 %v8664_v19, %v2469_v22  ;;  %v8734_v19 = vpop.eup %7301 }
 0x68c   : > { %v2515_v13 = vmul.f32 1.442695, %v2486_v18  ;;  %v8740_v8 = vpop.eup %7303 }
 0x68d   : > { %v2517_v57 = vmul.f32 1.442695, %v2487_v5  ;;  %v2536_v26 = vsel %vm1696_vm2, %v8740_v8, 0.0 }
 0x68e   : > { %v2463_v2 = vpop.xlane.xlu0 %2462 }
 0x68f   : > { %7305 = vpow2.f32 %v2517_v57  ;;  %v2485_v10 = vsub.f32 %v8672_v55, %v2463_v2  ;;  %v2542_v55 = vsel %vm1696_vm2, %v8734_v19, 0.0 }
 0x690   : > { %7307 = vpow2.f32 %v2515_v13 }
 0x691   : > { %v2513_v51 = vmul.f32 1.442695, %v2485_v10  ;;  %2540 = vadd.xlane.f32.xlu0 %v2539_v47 }
 0x693   : > { %7309 = vpow2.f32 %v2513_v51 }
 0x694   : > { %7311 = vpow2.f32 %v2519_v0 }
 0x695   : > { %2534 = vadd.xlane.f32.xlu0 %v2533_v60 }
 0x697   : > { %2543 = vadd.xlane.f32.xlu1 %v2542_v55 }
 0x699   : > { %v8742_v63 = vpop.eup %7305 }
 0x69a   : > { %v2563_v44 = vsel %vm1696_vm2, %v8742_v63, 0.0  ;;  %v8748_v9 = vpop.eup %7307 }
 0x69b   : > { %2564 = vadd.xlane.f32.xlu0 %v2563_v44  ;;  %2537 = vadd.xlane.f32.xlu1 %v2536_v26  ;;  %v2560_v14 = vsel %vm1696_vm2, %v8748_v9, 0.0 }
 0x69d   : > { %v8750_v15 = vpop.eup %7309 }
 0x69e   : > { %v2557_v61 = vsel %vm1696_vm2, %v8750_v15, 0.0  ;;  %v8756_v11 = vpop.eup %7311 }
 0x69f   : > { %2558 = vadd.xlane.f32.xlu1 %v2557_v61  ;;  %2561 = vadd.xlane.f32.xlu0 %v2560_v14  ;;  %v2566_v56 = vsel %vm1696_vm2, %v8756_v11, 0.0 }
 0x6a3   : > { %2567 = vadd.xlane.f32.xlu1 %v2566_v56 }
 0x6b4   : > { %2755 = vrot.lane.b32.xlu1 %v8181_v43, %s7694_s25 }
 0x6b5   : > { %2753 = vrot.lane.b32.xlu0 %v8186_v46, %s7694_s25 }
 0x6b8   : > { %2816 = vrot.lane.b32.xlu1 %v8206_v7, %s7694_s25 }
 0x6bc   : > { %2818 = vrot.lane.b32.xlu1 %v8203_v27, %s7694_s25 }
 0x6db   : > { %v2553_v4 = vpop.xlane.xlu0 %2552 }
 0x6dc   : > { %7313 = vrcp.f32 %v2553_v4 }
 0x6df   : > { %v2547_v52 = vpop.xlane.xlu1 %2546 }
 0x6e1   : > { %v2550_v42 = vpop.xlane.xlu0 %2549 }
 0x6e3   : > { %v2556_v3 = vpop.xlane.xlu1 %2555 }
 0x6e4   : > { %7315 = vrcp.f32 %v2556_v3 }
 0x6e5   : > { %v2529_v30 = vpop.xlane.xlu0 %2528  ;;  %7317 = vrcp.f32 %v2547_v52 }
 0x6e6   : > { %v7314_v43 = vpop.eup %7313  ;;  %7319 = vrcp.f32 %v2550_v42 }
 0x6e7   : > { %v8769_v7 = vmul.f32 %v7314_v43, %v8682_v21 }
 0x6e9   : > { %v2523_v28 = vpop.xlane.xlu0 %2522 }
 0x6eb   : > { %v2532_v24 = vpop.xlane.xlu1 %2531 }
 0x6ec   : > { %7321 = vrcp.f32 %v2532_v24 }
 0x6ed   : > { %v2691_v46 = vpop.permute.xlu0 %2690  ;;  %7323 = vrcp.f32 %v2523_v28 }
 0x6ee   : > { %v7316_v32 = vpop.eup %7315  ;;  %6909 = vmatprep.subr.bf16.mxu1 %v2691_v46  ;;  %7325 = vrcp.f32 %v2529_v30 }
 0x6ef   : > { %v8772_v27 = vmul.f32 %v7316_v32, %v8690_v16  ;;  %6910 = vmatpush3.bf16.msra.mxu1 %v2691_v46  ;;  %v2526_v33 = vpop.xlane.xlu1 %2525  ;;  %v7318_v22 = vpop.eup %7317 }
 0x6f0   : > { %7327 = vrcp.f32 %v2526_v33  ;;  %v7320_v5 = vpop.eup %7319  ;;  %v2609_v60 = vmul.f32 %v7318_v22, %v8688_v31 }
 0x6f1   : > { %v2622_v59 = vpack.c.bf16 %v8772_v27, %v8769_v7  ;;  %v2610_v47 = vmul.f32 %v7320_v5, %v8694_v36 }
 0x6f3   : > { %v2693_v18 = vpop.permute.xlu1 %2692  ;;  %v2621_v44 = vpack.c.bf16 %v2610_v47, %v2609_v60 }
 0x6f4   : > { %6911 = vmatprep.subr.bf16.mxu1 %v2693_v18 }
 0x6f5   : > { %6912 = vmatpush3.bf16.msra.mxu1 %v2693_v18 }
 0x6f6   : > { %v7322_v54 = vpop.eup %7321 }
 0x6f7   : > { %v7324_v13 = vpop.eup %7323  ;;  %v2604_v2 = vmul.f32 %v7322_v54, %v8708_v45  ;;  %v7097_v54 = vld [vmem:[%s7844_s20] sm:$0xff]  }
 0x6f8   : > { %v7326_v57 = vpop.eup %7325  ;;  %v2601_v16 = vmul.f32 %v7324_v13, %v8704_v29  ;;  %v7098_v13 = vld [vmem:[%s7844_s20 + $0x8] sm:$0xff]  }
 0x6f9   : > { %v2603_v0 = vmul.f32 %v7326_v57, %v8698_v39  ;;  %v7101_v57 = vld [vmem:[%s7844_s20 + $0x20] sm:$0xff]  }
 0x6fa   : > { %v7328_v21 = vpop.eup %7327 }
 0x6fb   : > { %v2602_v10 = vmul.f32 %v7328_v21, %v8712_v37  ;;  %v2618_v55 = vpack.c.bf16 %v2604_v2, %v2603_v0  ;;  %v7102_v21 = vld [vmem:[%s7844_s20 + $0x28] sm:$0xff]   ;;  %v7103_v2 = vld [vmem:[%s7844_s20 + $0x30] sm:$0xff]  }
 0x6fd   : > { %v2617_v51 = vpack.c.bf16 %v2602_v10, %v2601_v16  ;;  %v7104_v16 = vld [vmem:[%s7844_s20 + $0x38] sm:$0xff]  }
 0x6ff   : > { %6905 = vmatprep.mubr.msk.bf16.mxu0 %vm1696_vm2, %v2617_v51 }
 0x700   : > { %6906 = vmatmul.mubr.msk.bf16.vlgmr.msra.gmra.mrb[48].mxu0 %vm1696_vm2, %v2618_v55 }
 0x701   : > { %6921 = vmatprep.mubr.msk.bf16.mxu0 %vm1696_vm2, %v2621_v44 }
 0x71e   : > { %v2541_v45 = vpop.xlane.xlu0 %2540 }
 0x722   : > { %v2535_v26 = vpop.xlane.xlu0 %2534 }
 0x724   : > { %v2544_v29 = vpop.xlane.xlu1 %2543 }
 0x725   : > { %7329 = vrcp.f32 %v2544_v29 }
 0x726   : > { %7331 = vrcp.f32 %v2535_v26 }
 0x727   : > { %7333 = vrcp.f32 %v2541_v45 }
 0x728   : > { %v2565_v37 = vpop.xlane.xlu0 %2564  ;;  %v2538_v36 = vpop.xlane.xlu1 %2537 }
 0x729   : > { %7335 = vrcp.f32 %v2538_v36 }
 0x72c   : > { %v2562_v39 = vpop.xlane.xlu0 %2561  ;;  %v2559_v61 = vpop.xlane.xlu1 %2558 }
 0x72d   : > { %7337 = vrcp.f32 %v2562_v39 }
 0x72e   : > { %7339 = vrcp.f32 %v2559_v61 }
 0x72f   : > { %7341 = vrcp.f32 %v2565_v37  ;;  %v7330_v56 = vpop.eup %7329 }
 0x730   : > { %v2754_v31 = vpop.permute.xlu0 %2753  ;;  %v2568_v14 = vpop.xlane.xlu1 %2567  ;;  %v2608_v3 = vmul.f32 %v7330_v56, %v8734_v19 }
 0x731   : > { %7343 = vrcp.f32 %v2568_v14  ;;  %6917 = vmatprep.subr.bf16.mxu0 %v2754_v31  ;;  %v7332_v4 = vpop.eup %7331 }
 0x732   : > { %6918 = vmatpush3.bf16.msra.mxu0 %v2754_v31  ;;  %v7334_v52 = vpop.eup %7333  ;;  %v2605_v28 = vmul.f32 %v7332_v4, %v8732_v1 }
 0x733   : > { %v7336_v42 = vpop.eup %7335  ;;  %v2607_v43 = vmul.f32 %v7334_v52, %v8726_v20 }
 0x734   : > { %v2756_v30 = vpop.permute.xlu1 %2755  ;;  %v2606_v24 = vmul.f32 %v7336_v42, %v8740_v8 }
 0x735   : > { %6919 = vmatprep.subr.bf16.mxu0 %v2756_v30  ;;  %v2620_v33 = vpack.c.bf16 %v2608_v3, %v2607_v43 }
 0x736   : > { %6920 = vmatpush3.bf16.msra.mxu0 %v2756_v30  ;;  %v2619_v32 = vpack.c.bf16 %v2606_v24, %v2605_v28 }
 0x737   : > { %v7338_v46 = vpop.eup %7337  ;;  %6933 = vmatprep.subr.bf16.mxu0 %v7097_v54 }
 0x738   : > { %v7340_v7 = vpop.eup %7339  ;;  %v2817_v27 = vpop.permute.xlu1 %2816  ;;  %v2614_v18 = vmul.f32 %v7338_v46, %v8748_v9  ;;  %6913 = vmatprep.mubr.msk.bf16.mxu1 %vm1696_vm2, %v2619_v32 }
 0x739   : > { %v7342_v22 = vpop.eup %7341  ;;  %6922 = vmatmul.mubr.msk.bf16.vlgmr.msra.gmra.mrb[52].mxu0 %vm1696_vm2, %v2622_v59  ;;  %v2613_v1 = vmul.f32 %v7340_v7, %v8750_v15  ;;  %6914 = vmatmul.mubr.msk.bf16.vlgmr.msra.gmra.mrb[48].mxu1 %vm1696_vm2, %v2620_v33  ;;  %v11316_v15 = vmov 0  }
 0x73a   : > { %6925 = vmatprep.subr.bf16.mxu1 %v2817_v27  ;;  %v2615_v8 = vmul.f32 %v7342_v22, %v8742_v63  ;;  %6934 = vmatpush3.bf16.msra.mxu0 %v7097_v54  ;;  %v7099_v63 = vld [vmem:[%s7844_s20 + $0x10] sm:$0xff]  }
 0x73b   : > { %v7344_v20 = vpop.eup %7343  ;;  %6926 = vmatpush3.bf16.msra.mxu1 %v2817_v27  ;;  %v2623_v19 = vpack.c.bf16 %v2614_v18, %v2613_v1  ;;  %6935 = vmatprep.subr.bf16.mxu0 %v7098_v13 }
 0x73c   : > { %v2616_v9 = vmul.f32 %v7344_v20, %v8756_v11  ;;  %v2819_v5 = vpop.permute.xlu1 %2818  ;;  %v7100_v11 = vld [vmem:[%s7844_s20 + $0x18] sm:$0xff]  }
 0x73d   : > { %6929 = vmatprep.mubr.msk.bf16.mxu1 %vm1696_vm2, %v2623_v19  ;;  %6927 = vmatprep.subr.bf16.mxu1 %v2819_v5 }
 0x73e   : > { %v2624_v59 = vpack.c.bf16 %v2616_v9, %v2615_v8  ;;  %6936 = vmatpush3.bf16.msra.mxu0 %v7098_v13 }
 0x73f   : > { %6928 = vmatpush3.bf16.msra.mxu1 %v2819_v5  ;;  %6937 = vmatprep.subr.bf16.mxu0 %v7099_v63 }
 0x742   : > { %6930 = vmatmul.mubr.msk.bf16.vlgmr.msra.gmra.mrb[52].mxu1 %vm1696_vm2, %v2624_v59  ;;  %6938 = vmatpush3.bf16.msra.mxu0 %v7099_v63 }
 0x743   : > { %3625 = vmatprep.mubr.bf16.mxu1 %v11316_v15  ;;  %6939 = vmatprep.subr.bf16.mxu0 %v7100_v11 }
 0x746   : > { %6940 = vmatpush3.bf16.msra.mxu0 %v7100_v11 }
 0x747   : > { %6941 = vmatprep.subr.bf16.mxu0 %v7101_v57 }
 0x74a   : > { %6942 = vmatpush3.bf16.msra.mxu0 %v7101_v57 }
 0x74b   : > { %6943 = vmatprep.subr.bf16.mxu0 %v7102_v21 }
 0x74e   : > { %6944 = vmatpush3.bf16.msra.mxu0 %v7102_v21 }
 0x74f   : > { %6945 = vmatprep.subr.bf16.mxu0 %v7103_v2 }
 0x752   : > { %6946 = vmatpush3.bf16.msra.mxu0 %v7103_v2 }
 0x753   : > { %6947 = vmatprep.subr.bf16.mxu0 %v7104_v16 }
 0x756   : > { %6948 = vmatpush3.bf16.msra.mxu0 %v7104_v16 }
 0x7d3   : > { %v6907_v10 = vpop.f32.mrb[48].mxu0 }
 0x7d4   : > { %v2673_v47 = vpop.f32.mrb[49].mxu0 }
 0x7d5   : > { %v6908_v0 = vpop.f32.mrb[50].mxu0 }
 0x7d6   : > { %v7030_v51 = vpack.i.bf16 %v6908_v0, %v6907_v10  ;;  %v2676_v60 = vpop.f32.mrb[51].mxu0 }
 0x7d7   : > { %v7025_v55 = vpack.i.bf16 %v2676_v60, %v2673_v47 }
 0x7d8   : > { %7031 = vrot.lane.b32.xlu1 %v7030_v51, %s7694_s25 }
 0x7d9   : > { %7026 = vrot.lane.b32.xlu0 %v7025_v55, %s7694_s25 }
 0x80c   : > { %v6923_v44 = vpop.f32.mrb[52].mxu0  ;;  %v6915_v45 = vpop.f32.mrb[48].mxu1 }
 0x80d   : > { %v2799_v26 = vpop.f32.mrb[53].mxu0  ;;  %v2736_v29 = vpop.f32.mrb[49].mxu1 }
 0x80e   : > { %v6924_v37 = vpop.f32.mrb[54].mxu0  ;;  %v6916_v36 = vpop.f32.mrb[50].mxu1 }
 0x80f   : > { %v7050_v39 = vpack.i.bf16 %v6924_v37, %v6923_v44  ;;  %v2802_v61 = vpop.f32.mrb[55].mxu0  ;;  %v7040_v31 = vpack.i.bf16 %v6916_v36, %v6915_v45  ;;  %v2739_v14 = vpop.f32.mrb[51].mxu1 }
 0x810   : > { %v7045_v56 = vpack.i.bf16 %v2802_v61, %v2799_v26  ;;  %v7035_v4 = vpack.i.bf16 %v2739_v14, %v2736_v29 }
 0x811   : > { %7041 = vrot.lane.b32.xlu1 %v7040_v31, %s7694_s25 }
 0x812   : > { %7036 = vrot.lane.b32.xlu0 %v7035_v4, %s7694_s25 }
 0x815   : > { %v6931_v52 = vpop.f32.mrb[52].mxu1  ;;  %7051 = vrot.lane.b32.xlu1 %v7050_v39, %s7694_s25 }
 0x816   : > { %v2862_v42 = vpop.f32.mrb[53].mxu1  ;;  %7046 = vrot.lane.b32.xlu0 %v7045_v56, %s7694_s25  ;;  %v7633_v56 = vld [vmem:[#allocation2] sm:$0xff] }
 0x817   : > { %v6932_v3 = vpop.f32.mrb[54].mxu1 }
 0x818   : > { %v7060_v30 = vpack.i.bf16 %v6932_v3, %v6931_v52  ;;  %v2865_v28 = vpop.f32.mrb[55].mxu1 }
 0x819   : > { %v7055_v24 = vpack.i.bf16 %v2865_v28, %v2862_v42  ;;  %v7634_v42 = vld [vmem:[#allocation2 + $0x8] sm:$0xff] }
 0x81a   : > { %7061 = vrot.lane.b32.xlu1 %v7060_v30, %s7694_s25  ;;  %v7635_v30 = vld [vmem:[#allocation2 + $0x10] sm:$0xff] }
 0x81b   : > { %7056 = vrot.lane.b32.xlu0 %v7055_v24, %s7694_s25 }
 0x84a   : > { %v7032_v43 = vpop.permute.xlu1 %7031 }
 0x84b   : > { %v7034_v46 = vunpack.i.h.bf16 %v7032_v43  ;;  %v7033_v32 = vunpack.i.l.bf16 %v7032_v43  ;;  %v7027_v7 = vpop.permute.xlu0 %7026  ;;  %v7636_v43 = vld [vmem:[#allocation2 + $0x18] sm:$0xff] }
 0x84c   : > { %v7029_v27 = vunpack.i.h.bf16 %v7027_v7  ;;  %v7028_v33 = vunpack.i.l.bf16 %v7027_v7 }
 0x84d   : > { %v2944_v18 = vsel %vm1427_vm0, %v8548_v48, %v7034_v46  ;;  %v2943_v22 = vsel %vm1427_vm0, %v8544_v40, %v7033_v32 }
 0x84e   : > { %v2958_v1 = vpack.c.bf16 %v2944_v18, %v2943_v22  ;;  %v2941_v20 = vsel %vm1427_vm0, %v8546_v35, %v7028_v33  ;;  %v2942_v19 = vsel %vm1427_vm0, %v8550_v50, %v7029_v27 }
 0x84f   : > { %v2957_v8 = vpack.c.bf16 %v2942_v19, %v2941_v20 }
 0x851   : > { %6949 = vmatprep.mubr.bf16.mxu0 %v2957_v8 }
 0x852   : > { %6950 = vmatmul.mubr.bf16.vlgmr.msra.gmra.mrb[56].mxu0 %v2958_v1  ;;  %v7637_v1 = vld [vmem:[#allocation2 + $0x20] sm:$0xff] }
 0x883   : > { %v7042_v9 = vpop.permute.xlu1 %7041 }
 0x884   : > { %v7044_v5 = vunpack.i.h.bf16 %v7042_v9  ;;  %v7043_v59 = vunpack.i.l.bf16 %v7042_v9  ;;  %v7037_v54 = vpop.permute.xlu0 %7036  ;;  %v7638_v9 = vld [vmem:[#allocation2 + $0x28] sm:$0xff] }
 0x885   : > { %v7039_v13 = vunpack.i.h.bf16 %v7037_v54  ;;  %v7038_v63 = vunpack.i.l.bf16 %v7037_v54 }
 0x886   : > { %v2947_v48 = vsel %vm1427_vm0, %v8552_v49, %v7043_v59  ;;  %v2948_v40 = vsel %vm1427_vm0, %v8556_v34, %v7044_v5  ;;  %v7639_v59 = vld [vmem:[#allocation2 + $0x30] sm:$0xff] }
 0x887   : > { %v7052_v11 = vpop.permute.xlu1 %7051  ;;  %v2945_v35 = vsel %vm1427_vm0, %v8554_v58, %v7038_v63  ;;  %v2946_v50 = vsel %vm1427_vm0, %v8558_v62, %v7039_v13  ;;  %v2960_v57 = vpack.c.bf16 %v2948_v40, %v2947_v48  ;;  %v7640_v48 = vld [vmem:[#allocation2 + $0x38] sm:$0xff] }
 0x888   : > { %v7054_v21 = vunpack.i.h.bf16 %v7052_v11  ;;  %v7053_v2 = vunpack.i.l.bf16 %v7052_v11  ;;  %v7047_v16 = vpop.permute.xlu0 %7046  ;;  %v2959_v10 = vpack.c.bf16 %v2946_v50, %v2945_v35 }
 0x889   : > { %v7049_v47 = vunpack.i.h.bf16 %v7047_v16  ;;  %v7048_v0 = vunpack.i.l.bf16 %v7047_v16 }
 0x88a   : > { %6953 = vmatprep.mubr.bf16.mxu0 %v2959_v10  ;;  %v2951_v49 = vsel %vm1427_vm0, %v8566_v12, %v7053_v2  ;;  %v2952_v34 = vsel %vm1427_vm0, %v8572_v17, %v7054_v21  ;;  %v7641_v21 = vld [vmem:[#allocation2 + $0x40] sm:$0xff] }
 0x88b   : > { %6954 = vmatmul.mubr.bf16.gmra.mrb[60].mxu0 %v2960_v57  ;;  %v2949_v58 = vsel %vm1427_vm0, %v8570_v53, %v7048_v0  ;;  %v2950_v62 = vsel %vm1427_vm0, %v8574_v38, %v7049_v47  ;;  %v2962_v60 = vpack.c.bf16 %v2952_v34, %v2951_v49  ;;  %v7642_v47 = vld [vmem:[#allocation2 + $0x48] sm:$0xff]  ;;  %v7643_v49 = vld [vmem:[#allocation2 + $0x50] sm:$0xff] }
 0x88c   : > { %v7062_v51 = vpop.permute.xlu1 %7061  ;;  %v2961_v26 = vpack.c.bf16 %v2950_v62, %v2949_v58  ;;  %v7644_v62 = vld [vmem:[#allocation2 + $0x58] sm:$0xff] }
 0x88d   : > { %v7064_v55 = vunpack.i.h.bf16 %v7062_v51  ;;  %v7063_v44 = vunpack.i.l.bf16 %v7062_v51  ;;  %v7057_v45 = vpop.permute.xlu0 %7056 }
 0x88e   : > { %v7059_v29 = vunpack.i.h.bf16 %v7057_v45  ;;  %v7058_v37 = vunpack.i.l.bf16 %v7057_v45  ;;  %6957 = vmatprep.mubr.bf16.mxu0 %v2961_v26 }
 0x88f   : > { %v2955_v12 = vsel %vm1427_vm0, %v8560_v41, %v7063_v44  ;;  %v2956_v17 = vsel %vm1427_vm0, %v8564_v23, %v7064_v55  ;;  %v8853_v41 = vld [vmem:[%s11317_s2] ss:$0 sm:$0xff] }
 0x890   : > { %v2953_v53 = vsel %vm1427_vm0, %v8562_v25, %v7058_v37  ;;  %v2954_v38 = vsel %vm1427_vm0, %v8568_v6, %v7059_v29  ;;  %v2964_v36 = vpack.c.bf16 %v2956_v17, %v2955_v12  ;;  %v7645_v29 = vld [vmem:[#allocation2 + $0x60] sm:$0xff] }
 0x891   : > { %v2963_v39 = vpack.c.bf16 %v2954_v38, %v2953_v53  ;;  %v7646_v53 = vld [vmem:[#allocation2 + $0x68] sm:$0xff] }
 0x893   : > { %6958 = vmatmul.mubr.bf16.gmra.mrb[64].mxu0 %v2962_v60 }
 0x894   : > { %6961 = vmatprep.mubr.bf16.mxu0 %v2963_v39 }
 0x89b   : > { %6962 = vmatmul.mubr.bf16.gmra.mrb[68].mxu0 %v2964_v36  ;;  %v7647_v36 = vld [vmem:[#allocation2 + $0x70] sm:$0xff] }
 0x89c   : > { %3738 = vmatprep.mubr.bf16.mxu0 %v11316_v15 }
 0x925   : > { %v6951_v23 = vpop.f32.mrb[56].mxu0 }
 0x926   : > { %v3070_v61 = vpop.f32.mrb[57].mxu0  ;;  %v3079_v6 = vadd.f32 %v6951_v23, %v8853_v41  ;;  %v7648_v23 = vld [vmem:[#allocation2 + $0x78] sm:$0xff] }
 0x927   : > { %v3071_v25 = vadd.f32 %v8853_v41, %v3070_v61  ;;  %v6952_v31 = vpop.f32.mrb[58].mxu0 }
 0x928   : > { %v3073_v14 = vpop.f32.mrb[59].mxu0  ;;  %v8863_v28 = vadd.f32 %v7635_v30, %v3079_v6  ;;  %v3082_v24 = vadd.f32 %v6952_v31, %v8853_v41  ;;  %v7108_v31 = vld [vmem:[%s7862_s4 + $0x8] ss:$16 sps:$4 sm:$0xff]   ;;  %v7113_v6 = vld [vmem:[%s7862_s4 + $0x24] ss:$16 sps:$4 sm:$0xff]  }
 0x929   : > { %v8857_v4 = vadd.f32 %v7633_v56, %v3071_v25  ;;  %v3074_v52 = vadd.f32 %v8853_v41, %v3073_v14  ;;  %v7107_v25 = vld [vmem:[%s7862_s4 + $0x4] ss:$16 sps:$4 sm:$0xff]   ;;  %v7110_v14 = vld [vmem:[%s7862_s4 + $0xc] ss:$16 sps:$4 sm:$0xff]  }
 0x92a   : > { %11320 = vst [vmem:[#allocation12_spill] sm:$0xff] %v8863_v28  ;;  %v8868_v46 = vadd.f32 %v7636_v43, %v3082_v24  ;;  %3593 = vmatprep.subr.bf16.mxu1 %v7107_v25  ;;  %v7116_v56 = vld [vmem:[%s7862_s4 + $0x2c] ss:$16 sps:$4 sm:$0xff]   ;;  %3706 = vmatprep.subr.bf16.mxu0 %v7110_v14 }
 0x92b   : > { %11318 = vst [vmem:[#allocation11_spill] sm:$0xff] %v8857_v4  ;;  %v8860_v3 = vadd.f32 %v7634_v42, %v3074_v52  ;;  %3151 = vadd.xlane.f32.xlu0 %v8857_v4  ;;  %v7111_v52 = vld [vmem:[%s7862_s4 + $0x20] ss:$16 sps:$4 sm:$0xff]   ;;  %3707 = vmatpush1.bf16.msra.mxu0 %v7108_v31  ;;  %v7114_v42 = vld [vmem:[%s7862_s4 + $0x28] ss:$16 sps:$4 sm:$0xff]  }
 0x92c   : > { %11321 = vst [vmem:[#allocation13_spill] sm:$0xff] %v8868_v46  ;;  %3708 = vmatprep.subr.bf16.mxu0 %v7116_v56 }
 0x92d   : > { %11319 = vst [vmem:[#allocation10_spill] sm:$0xff] %v8860_v3  ;;  %3153 = vadd.xlane.f32.xlu1 %v8860_v3 }
 0x92f   : > { %3155 = vadd.xlane.f32.xlu0 %v8863_v28  ;;  %3709 = vmatpush1.bf16.msra.mxu0 %v7114_v42 }
 0x933   : > { %3157 = vadd.xlane.f32.xlu0 %v8868_v46 }
 0x95e   : > { %v6955_v32 = vpop.f32.mrb[60].mxu0 }
 0x95f   : > { %v3086_v7 = vpop.f32.mrb[61].mxu0  ;;  %v3095_v22 = vadd.f32 %v6955_v32, %v8853_v41 }
 0x960   : > { %v3087_v27 = vadd.f32 %v8853_v41, %v3086_v7  ;;  %v6956_v33 = vpop.f32.mrb[62].mxu0 }
 0x961   : > { %v3089_v18 = vpop.f32.mrb[63].mxu0  ;;  %v3098_v8 = vadd.f32 %v6956_v33, %v8853_v41  ;;  %v8880_v54 = vadd.f32 %v7639_v59, %v3095_v22 }
 0x962   : > { %v8873_v20 = vadd.f32 %v7637_v1, %v3087_v27  ;;  %v3090_v19 = vadd.f32 %v8853_v41, %v3089_v18 }
 0x963   : > { %11324 = vst [vmem:[#allocation16_spill] sm:$0xff] %v8880_v54  ;;  %v8883_v40 = vadd.f32 %v7640_v48, %v3098_v8  ;;  %v7119_v48 = vld [vmem:[%s7862_s4 + $0x44] ss:$16 sps:$4 sm:$0xff]  }
 0x964   : > { %11322 = vst [vmem:[#allocation14_spill] sm:$0xff] %v8873_v20  ;;  %v8877_v5 = vadd.f32 %v7638_v9, %v3090_v19  ;;  %3159 = vadd.xlane.f32.xlu0 %v8873_v20 }
 0x965   : > { %11325 = vst [vmem:[#allocation17_spill] sm:$0xff] %v8883_v40 }
 0x966   : > { %11323 = vst [vmem:[#allocation15_spill] sm:$0xff] %v8877_v5  ;;  %v6959_v13 = vpop.f32.mrb[64].mxu0  ;;  %3161 = vadd.xlane.f32.xlu1 %v8877_v5 }
 0x967   : > { %v3102_v63 = vpop.f32.mrb[65].mxu0  ;;  %v3111_v57 = vadd.f32 %v6959_v13, %v8853_v41 }
 0x968   : > { %v3103_v11 = vadd.f32 %v8853_v41, %v3102_v63  ;;  %v6960_v35 = vpop.f32.mrb[66].mxu0  ;;  %3163 = vadd.xlane.f32.xlu0 %v8880_v54 }
 0x969   : > { %v3105_v50 = vpop.f32.mrb[67].mxu0  ;;  %v3114_v10 = vadd.f32 %v6960_v35, %v8853_v41  ;;  %v8896_v34 = vadd.f32 %v7643_v49, %v3111_v57  ;;  %v7117_v35 = vld [vmem:[%s7862_s4 + $0x40] ss:$16 sps:$4 sm:$0xff]   ;;  %v7125_v57 = vld [vmem:[%s7862_s4 + $0x64] ss:$16 sps:$4 sm:$0xff]  }
 0x96a   : > { %v8888_v2 = vadd.f32 %v7641_v21, %v3103_v11  ;;  %v3106_v16 = vadd.f32 %v8853_v41, %v3105_v50  ;;  %3165 = vadd.xlane.f32.xlu1 %v8883_v40  ;;  %v7122_v11 = vld [vmem:[%s7862_s4 + $0x4c] ss:$16 sps:$4 sm:$0xff]   ;;  %v7120_v50 = vld [vmem:[%s7862_s4 + $0x48] ss:$16 sps:$4 sm:$0xff]  }
 0x96b   : > { %11328 = vst [vmem:[#allocation20_spill] sm:$0xff] %v8896_v34  ;;  %v8899_v60 = vadd.f32 %v7644_v62, %v3114_v10  ;;  %3710 = vmatprep.subr.bf16.mxu0 %v7122_v11  ;;  %v7128_v21 = vld [vmem:[%s7862_s4 + $0x6c] ss:$16 sps:$4 sm:$0xff]   ;;  %v7126_v10 = vld [vmem:[%s7862_s4 + $0x68] ss:$16 sps:$4 sm:$0xff]  }
 0x96c   : > { %11326 = vst [vmem:[#allocation18_spill] sm:$0xff] %v8888_v2  ;;  %v8893_v0 = vadd.f32 %v7642_v47, %v3106_v16  ;;  %3167 = vadd.xlane.f32.xlu0 %v8888_v2  ;;  %3711 = vmatpush1.bf16.msra.mxu0 %v7120_v50  ;;  %v7123_v16 = vld [vmem:[%s7862_s4 + $0x60] ss:$16 sps:$4 sm:$0xff]   ;;  %v7131_v47 = vld [vmem:[%s7862_s4 + $0x84] ss:$16 sps:$4 sm:$0xff]  }
 0x96d   : > { %11329 = vst [vmem:[#allocation21_spill] sm:$0xff] %v8899_v60  ;;  %3712 = vmatprep.subr.bf16.mxu0 %v7128_v21  ;;  %v7134_v49 = vld [vmem:[%s7862_s4 + $0x8c] ss:$16 sps:$4 sm:$0xff]   ;;  %v7137_v62 = vld [vmem:[%s7862_s4 + $0xa4] ss:$16 sps:$4 sm:$0xff]  }
 0x96e   : > { %11327 = vst [vmem:[#allocation19_spill] sm:$0xff] %v8893_v0  ;;  %v6963_v51 = vpop.f32.mrb[68].mxu0  ;;  %3169 = vadd.xlane.f32.xlu1 %v8893_v0 }
 0x96f   : > { %v3118_v58 = vpop.f32.mrb[69].mxu0  ;;  %v3127_v26 = vadd.f32 %v6963_v51, %v8853_v41  ;;  %v7129_v51 = vld [vmem:[%s7862_s4 + $0x80] ss:$16 sps:$4 sm:$0xff]  }
 0x970   : > { %v3119_v55 = vadd.f32 %v8853_v41, %v3118_v58  ;;  %v6964_v44 = vpop.f32.mrb[70].mxu0  ;;  %3171 = vadd.xlane.f32.xlu0 %v8896_v34  ;;  %3713 = vmatpush1.bf16.msra.mxu0 %v7126_v10  ;;  %v7132_v58 = vld [vmem:[%s7862_s4 + $0x88] ss:$16 sps:$4 sm:$0xff]  }
 0x971   : > { %v3121_v45 = vpop.f32.mrb[71].mxu0  ;;  %v3130_v17 = vadd.f32 %v6964_v44, %v8853_v41  ;;  %v8912_v39 = vadd.f32 %v7647_v36, %v3127_v26  ;;  %3714 = vmatprep.subr.bf16.mxu0 %v7134_v49  ;;  %v7135_v44 = vld [vmem:[%s7862_s4 + $0xa0] ss:$16 sps:$4 sm:$0xff]   ;;  %v7143_v26 = vld [vmem:[%s7862_s4 + $0xc4] ss:$16 sps:$4 sm:$0xff]  }
 0x972   : > { %v8904_v37 = vadd.f32 %v7645_v29, %v3119_v55  ;;  %v3122_v12 = vadd.f32 %v8853_v41, %v3121_v45  ;;  %3173 = vadd.xlane.f32.xlu1 %v8899_v60  ;;  %v7105_v41 = vld [vmem:[%s7862_s4] ss:$16 sps:$4 sm:$0xff]   ;;  %v7140_v55 = vld [vmem:[%s7862_s4 + $0xac] ss:$16 sps:$4 sm:$0xff]   ;;  %v7138_v45 = vld [vmem:[%s7862_s4 + $0xa8] ss:$16 sps:$4 sm:$0xff]  }
 0x973   : > { %11332 = vst [vmem:[#allocation24_spill] sm:$0xff] %v8912_v39  ;;  %v8915_v61 = vadd.f32 %v7648_v23, %v3130_v17  ;;  %3594 = vmatpush1.bf16.msra.mxu1 %v7105_v41  ;;  %v7146_v29 = vld [vmem:[%s7862_s4 + $0xcc] ss:$16 sps:$4 sm:$0xff]   ;;  %v7144_v17 = vld [vmem:[%s7862_s4 + $0xc8] ss:$16 sps:$4 sm:$0xff]  }
 0x974   : > { %11330 = vst [vmem:[#allocation22_spill] sm:$0xff] %v8904_v37  ;;  %v8909_v38 = vadd.f32 %v7646_v53, %v3122_v12  ;;  %3175 = vadd.xlane.f32.xlu0 %v8904_v37  ;;  %3595 = vmatprep.subr.bf16.mxu1 %v7113_v6  ;;  %v7141_v12 = vld [vmem:[%s7862_s4 + $0xc0] ss:$16 sps:$4 sm:$0xff]   ;;  %v7149_v53 = vld [vmem:[%s7862_s4 + $0xe4] ss:$16 sps:$4 sm:$0xff]  }
 0x975   : > { %11333 = vst [vmem:[#allocation25_spill] sm:$0xff] %v8915_v61  ;;  %3715 = vmatpush1.bf16.msra.mxu0 %v7132_v58  ;;  %v7152_v36 = vld [vmem:[%s7862_s4 + $0xec] ss:$16 sps:$4 sm:$0xff]   ;;  %v7147_v23 = vld [vmem:[%s7862_s4 + $0xe0] ss:$16 sps:$4 sm:$0xff]  }
 0x976   : > { %11331 = vst [vmem:[#allocation23_spill] sm:$0xff] %v8909_v38  ;;  %3177 = vadd.xlane.f32.xlu1 %v8909_v38  ;;  %3716 = vmatprep.subr.bf16.mxu0 %v7140_v55  ;;  %v7150_v41 = vld [vmem:[%s7862_s4 + $0xe8] ss:$16 sps:$4 sm:$0xff]  }
 0x977   : > { %3596 = vmatpush1.bf16.msra.mxu1 %v7111_v52 }
 0x978   : > { %3179 = vadd.xlane.f32.xlu0 %v8912_v39  ;;  %3597 = vmatprep.subr.bf16.mxu1 %v7119_v48 }
 0x979   : > { %3717 = vmatpush1.bf16.msra.mxu0 %v7138_v45 }
 0x97a   : > { %3181 = vadd.xlane.f32.xlu1 %v8915_v61  ;;  %3718 = vmatprep.subr.bf16.mxu0 %v7146_v29 }
 0x97b   : > { %3598 = vmatpush1.bf16.msra.mxu1 %v7117_v35 }
 0x97c   : > { %3599 = vmatprep.subr.bf16.mxu1 %v7125_v57 }
 0x97d   : > { %3719 = vmatpush1.bf16.msra.mxu0 %v7144_v17 }
 0x97e   : > { %3720 = vmatprep.subr.bf16.mxu0 %v7152_v36 }
 0x97f   : > { %3600 = vmatpush1.bf16.msra.mxu1 %v7123_v16 }
 0x980   : > { %3601 = vmatprep.subr.bf16.mxu1 %v7131_v47 }
 0x981   : > { %3721 = vmatpush1.bf16.msra.mxu0 %v7150_v41 }
 0x983   : > { %3602 = vmatpush1.bf16.msra.mxu1 %v7129_v51 }
 0x984   : > { %3603 = vmatprep.subr.bf16.mxu1 %v7137_v62 }
 0x987   : > { %3604 = vmatpush1.bf16.msra.mxu1 %v7135_v44 }
 0x988   : > { %3605 = vmatprep.subr.bf16.mxu1 %v7143_v26 }
 0x98b   : > { %3606 = vmatpush1.bf16.msra.mxu1 %v7141_v12 }
 0x98c   : > { %3607 = vmatprep.subr.bf16.mxu1 %v7149_v53 }
 0x98f   : > { %3608 = vmatpush1.bf16.msra.mxu1 %v7147_v23 }
 0x9b8   : > { %v3152_v30 = vpop.xlane.xlu0 %3151 }
 0x9b9   : > { %v3183_v24 = vmul.f32 0.0078125, %v3152_v30 }
 0x9ba   : > { %v3154_v43 = vpop.xlane.xlu1 %3153 }
 0x9bb   : > { %v8928_v32 = vsub.f32 %v8857_v4, %v3183_v24  ;;  %v3184_v7 = vmul.f32 0.0078125, %v3154_v43 }
 0x9bc   : > { %v3156_v27 = vpop.xlane.xlu0 %3155 }
 0x9bd   : > { %v8931_v33 = vsub.f32 %v8860_v3, %v3184_v7  ;;  %v3185_v18 = vmul.f32 0.0078125, %v3156_v27  ;;  %v3215_v22 = vmul.f32 %v8928_v32, %v8928_v32 }
 0x9bf   : > { %v8936_v1 = vsub.f32 %v8863_v28, %v3185_v18  ;;  %3231 = vadd.xlane.f32.xlu0 %v3215_v22  ;;  %v3216_v19 = vmul.f32 %v8931_v33, %v8931_v33 }
 0x9c0   : > { %v3158_v8 = vpop.xlane.xlu0 %3157 }
 0x9c1   : > { %v3186_v9 = vmul.f32 0.0078125, %v3158_v8  ;;  %3233 = vadd.xlane.f32.xlu1 %v3216_v19  ;;  %v3217_v59 = vmul.f32 %v8936_v1, %v8936_v1 }
 0x9c3   : > { %v8943_v13 = vsub.f32 %v8868_v46, %v3186_v9  ;;  %3235 = vadd.xlane.f32.xlu0 %v3217_v59 }
 0x9c5   : > { %v3218_v63 = vmul.f32 %v8943_v13, %v8943_v13 }
 0x9c7   : > { %3237 = vadd.xlane.f32.xlu1 %v3218_v63 }
 0x9f1   : > { %v3160_v25 = vpop.xlane.xlu0 %3159 }
 0x9f2   : > { %v3187_v31 = vmul.f32 0.0078125, %v3160_v25 }
 0x9f3   : > { %v3162_v14 = vpop.xlane.xlu1 %3161 }
 0x9f4   : > { %v8972_v6 = vsub.f32 %v8873_v20, %v3187_v31  ;;  %v3188_v56 = vmul.f32 0.0078125, %v3162_v14 }
 0x9f5   : > { %v3164_v52 = vpop.xlane.xlu0 %3163 }
 0x9f6   : > { %v8975_v42 = vsub.f32 %v8877_v5, %v3188_v56  ;;  %v3189_v30 = vmul.f32 0.0078125, %v3164_v52  ;;  %v3219_v24 = vmul.f32 %v8972_v6, %v8972_v6 }
 0x9f7   : > { %v3166_v43 = vpop.xlane.xlu1 %3165 }
 0x9f8   : > { %v8980_v7 = vsub.f32 %v8880_v54, %v3189_v30  ;;  %v3190_v27 = vmul.f32 0.0078125, %v3166_v43  ;;  %3239 = vadd.xlane.f32.xlu0 %v3219_v24  ;;  %v3220_v18 = vmul.f32 %v8975_v42, %v8975_v42 }
 0x9f9   : > { %v3168_v22 = vpop.xlane.xlu0 %3167 }
 0x9fa   : > { %v8985_v19 = vsub.f32 %v8883_v40, %v3190_v27  ;;  %v3191_v8 = vmul.f32 0.0078125, %v3168_v22  ;;  %3241 = vadd.xlane.f32.xlu1 %v3220_v18  ;;  %v3221_v9 = vmul.f32 %v8980_v7, %v8980_v7 }
 0x9fb   : > { %v3170_v59 = vpop.xlane.xlu1 %3169 }
 0x9fc   : > { %v8990_v63 = vsub.f32 %v8888_v2, %v3191_v8  ;;  %v3192_v48 = vmul.f32 0.0078125, %v3170_v59  ;;  %3243 = vadd.xlane.f32.xlu0 %v3221_v9  ;;  %v3222_v11 = vmul.f32 %v8985_v19, %v8985_v19 }
 0x9fd   : > { %v3172_v35 = vpop.xlane.xlu0 %3171 }
 0x9fe   : > { %v8995_v50 = vsub.f32 %v8893_v0, %v3192_v48  ;;  %v3193_v57 = vmul.f32 0.0078125, %v3172_v35  ;;  %3245 = vadd.xlane.f32.xlu1 %v3222_v11  ;;  %v3223_v21 = vmul.f32 %v8990_v63, %v8990_v63 }
 0x9ff   : > { %v3174_v16 = vpop.xlane.xlu1 %3173 }
 0xa00   : > { %v9000_v10 = vsub.f32 %v8896_v34, %v3193_v57  ;;  %v3194_v47 = vmul.f32 0.0078125, %v3174_v16  ;;  %3247 = vadd.xlane.f32.xlu0 %v3223_v21  ;;  %v3224_v49 = vmul.f32 %v8995_v50, %v8995_v50  ;;  %v9036_v21 = vld [vmem:[%s11334_s14] ss:$0 sm:$0xff] }
 0xa01   : > { %v3176_v51 = vpop.xlane.xlu0 %3175 }
 0xa02   : > { %v9005_v58 = vsub.f32 %v8899_v60, %v3194_v47  ;;  %v3195_v62 = vmul.f32 0.0078125, %v3176_v51  ;;  %3249 = vadd.xlane.f32.xlu1 %v3224_v49  ;;  %v3225_v55 = vmul.f32 %v9000_v10, %v9000_v10 }
 0xa03   : > { %v3178_v44 = vpop.xlane.xlu1 %3177 }
 0xa04   : > { %v9010_v45 = vsub.f32 %v8904_v37, %v3195_v62  ;;  %v3196_v26 = vmul.f32 0.0078125, %v3178_v44  ;;  %3251 = vadd.xlane.f32.xlu0 %v3225_v55  ;;  %v3226_v29 = vmul.f32 %v9005_v58, %v9005_v58  ;;  %v9046_v55 = vld [vmem:[%s11335_s0] ss:$0 sm:$0xff] }
 0xa05   : > { %v3180_v12 = vpop.xlane.xlu0 %3179 }
 0xa06   : > { %v9015_v17 = vsub.f32 %v8909_v38, %v3196_v26  ;;  %v3197_v53 = vmul.f32 0.0078125, %v3180_v12  ;;  %3253 = vadd.xlane.f32.xlu1 %v3226_v29  ;;  %v3227_v36 = vmul.f32 %v9010_v45, %v9010_v45 }
 0xa07   : > { %v3182_v23 = vpop.xlane.xlu1 %3181 }
 0xa08   : > { %v9020_v41 = vsub.f32 %v8912_v39, %v3197_v53  ;;  %v3198_v25 = vmul.f32 0.0078125, %v3182_v23  ;;  %3255 = vadd.xlane.f32.xlu0 %v3227_v36  ;;  %v3228_v31 = vmul.f32 %v9015_v17, %v9015_v17 }
 0xa0a   : > { %v9025_v14 = vsub.f32 %v8915_v61, %v3198_v25  ;;  %3257 = vadd.xlane.f32.xlu1 %v3228_v31  ;;  %v3229_v56 = vmul.f32 %v9020_v41, %v9020_v41 }
 0xa0c   : > { %3259 = vadd.xlane.f32.xlu0 %v3229_v56  ;;  %v3230_v52 = vmul.f32 %v9025_v14, %v9025_v14 }
 0xa0e   : > { %3261 = vadd.xlane.f32.xlu1 %v3230_v52 }
 0xa4c   : > { %v3232_v30 = vpop.xlane.xlu0 %3231 }
 0xa4d   : > { %v3263_v24 = vmul.f32 0.0078125, %v3232_v30 }
 0xa4e   : > { %v3234_v43 = vpop.xlane.xlu1 %3233 }
 0xa4f   : > { %v3279_v27 = vadd.f32 1e-05, %v3263_v24  ;;  %v3264_v18 = vmul.f32 0.0078125, %v3234_v43 }
 0xa50   : > { %v3236_v22 = vpop.xlane.xlu0 %3235 }
 0xa51   : > { %7345 = vrsqrt.f32 %v3279_v27  ;;  %v3280_v8 = vadd.f32 1e-05, %v3264_v18  ;;  %v3265_v9 = vmul.f32 0.0078125, %v3236_v22 }
 0xa53   : > { %7347 = vrsqrt.f32 %v3280_v8  ;;  %v3281_v59 = vadd.f32 1e-05, %v3265_v9 }
 0xa54   : > { %v3238_v48 = vpop.xlane.xlu1 %3237 }
 0xa55   : > { %7349 = vrsqrt.f32 %v3281_v59  ;;  %v3266_v11 = vmul.f32 0.0078125, %v3238_v48 }
 0xa57   : > { %v3282_v35 = vadd.f32 1e-05, %v3266_v11 }
 0xa59   : > { %7351 = vrsqrt.f32 %v3282_v35 }
 0xa5b   : > { %v7346_v57 = vpop.eup %7345 }
 0xa5c   : > { %v3311_v16 = vmul.f32 %v7346_v57, %v8928_v32 }
 0xa5d   : > { %v7348_v47 = vpop.eup %7347 }
 0xa5e   : > { %v3312_v49 = vmul.f32 %v7348_v47, %v8931_v33  ;;  %v3333_v51 = vmul.f32 %v9036_v21, %v3311_v16 }
 0xa5f   : > { %v7350_v62 = vpop.eup %7349 }
 0xa60   : > { %v3334_v44 = vmul.f32 %v9036_v21, %v3312_v49  ;;  %v3355_v26 = vadd.f32 %v9046_v55, %v3333_v51  ;;  %v3313_v32 = vmul.f32 %v7350_v62, %v8936_v1 }
 0xa62   : > { %v3356_v29 = vadd.f32 %v9046_v55, %v3334_v44  ;;  %v3335_v36 = vmul.f32 %v9036_v21, %v3313_v32 }
 0xa63   : > { %v7352_v12 = vpop.eup %7351 }
 0xa64   : > { %v3371_v53 = vpack.c.bf16 %v3356_v29, %v3355_v26  ;;  %v3314_v33 = vmul.f32 %v7352_v12, %v8943_v13  ;;  %v3357_v31 = vadd.f32 %v9046_v55, %v3335_v36 }
 0xa66   : > { %3626 = vmatmul.mubr.bf16.vlgmr.msra.gmra.mrb[56].mxu1 %v3371_v53  ;;  %3739 = vmatmul.mubr.bf16.vlgmr.msra.gmra.mrb[72].mxu0 %v3371_v53  ;;  %v3336_v23 = vmul.f32 %v9036_v21, %v3314_v33 }
 0xa67   : > { %3635 = vmatprep.mubr.bf16.mxu1 %v11316_v15  ;;  %3748 = vmatprep.mubr.bf16.mxu0 %v11316_v15 }
 0xa68   : > { %v3358_v25 = vadd.f32 %v9046_v55, %v3336_v23 }
 0xa6a   : > { %v3372_v56 = vpack.c.bf16 %v3358_v25, %v3357_v31 }
 0xa6e   : > { %3636 = vmatmul.mubr.bf16.gmra.mrb[60].mxu1 %v3372_v56  ;;  %3749 = vmatmul.mubr.bf16.gmra.mrb[76].mxu0 %v3372_v56 }
 0xa6f   : > { %3645 = vmatprep.mubr.bf16.mxu1 %v11316_v15  ;;  %3758 = vmatprep.mubr.bf16.mxu0 %v11316_v15 }
 0xa85   : > { %v3240_v1 = vpop.xlane.xlu0 %3239 }
 0xa86   : > { %v3267_v13 = vmul.f32 0.0078125, %v3240_v1 }
 0xa87   : > { %v3242_v52 = vpop.xlane.xlu1 %3241 }
 0xa88   : > { %v3283_v30 = vadd.f32 1e-05, %v3267_v13  ;;  %v3268_v24 = vmul.f32 0.0078125, %v3242_v52 }
 0xa89   : > { %v3244_v43 = vpop.xlane.xlu0 %3243 }
 0xa8a   : > { %7353 = vrsqrt.f32 %v3283_v30  ;;  %v3284_v27 = vadd.f32 1e-05, %v3268_v24  ;;  %v3269_v18 = vmul.f32 0.0078125, %v3244_v43 }
 0xa8b   : > { %v3246_v22 = vpop.xlane.xlu1 %3245 }
 0xa8c   : > { %7355 = vrsqrt.f32 %v3284_v27  ;;  %v3285_v8 = vadd.f32 1e-05, %v3269_v18  ;;  %v3270_v9 = vmul.f32 0.0078125, %v3246_v22 }
 0xa8d   : > { %v3248_v59 = vpop.xlane.xlu0 %3247 }
 0xa8e   : > { %7357 = vrsqrt.f32 %v3285_v8  ;;  %v3286_v48 = vadd.f32 1e-05, %v3270_v9  ;;  %v3271_v11 = vmul.f32 0.0078125, %v3248_v59 }
 0xa8f   : > { %v3250_v35 = vpop.xlane.xlu1 %3249 }
 0xa90   : > { %7359 = vrsqrt.f32 %v3286_v48  ;;  %v3272_v57 = vmul.f32 0.0078125, %v3250_v35  ;;  %v3287_v16 = vadd.f32 1e-05, %v3271_v11 }
 0xa91   : > { %v3252_v49 = vpop.xlane.xlu0 %3251 }
 0xa92   : > { %v3288_v47 = vadd.f32 1e-05, %v3272_v57  ;;  %v3273_v32 = vmul.f32 0.0078125, %v3252_v49 }
 0xa93   : > { %v3254_v51 = vpop.xlane.xlu1 %3253 }
 0xa94   : > { %v7354_v62 = vpop.eup %7353  ;;  %7361 = vrsqrt.f32 %v3288_v47  ;;  %v3274_v44 = vmul.f32 0.0078125, %v3254_v51  ;;  %v3289_v56 = vadd.f32 1e-05, %v3273_v32 }
 0xa95   : > { %v3315_v26 = vmul.f32 %v7354_v62, %v8972_v6  ;;  %7363 = vrsqrt.f32 %v3287_v16  ;;  %v3256_v1 = vpop.xlane.xlu0 %3255 }
 0xa96   : > { %v7356_v29 = vpop.eup %7355  ;;  %v3290_v36 = vadd.f32 1e-05, %v3274_v44  ;;  %v3275_v18 = vmul.f32 0.0078125, %v3256_v1 }
 0xa97   : > { %v3316_v12 = vmul.f32 %v7356_v29, %v8975_v42  ;;  %v3337_v53 = vmul.f32 %v9036_v21, %v3315_v26  ;;  %v3258_v23 = vpop.xlane.xlu1 %3257 }
 0xa98   : > { %v7358_v33 = vpop.eup %7357  ;;  %7365 = vrsqrt.f32 %v3290_v36  ;;  %v3276_v42 = vmul.f32 0.0078125, %v3258_v23  ;;  %v3291_v48 = vadd.f32 1e-05, %v3275_v18 }
 0xa99   : > { %v3338_v25 = vmul.f32 %v9036_v21, %v3316_v12  ;;  %v3359_v13 = vadd.f32 %v9046_v55, %v3337_v53  ;;  %v3317_v6 = vmul.f32 %v7358_v33, %v8980_v7  ;;  %7367 = vrsqrt.f32 %v3289_v56  ;;  %v3260_v11 = vpop.xlane.xlu0 %3259 }
 0xa9a   : > { %v7360_v31 = vpop.eup %7359  ;;  %v3292_v9 = vadd.f32 1e-05, %v3276_v42  ;;  %v3277_v62 = vmul.f32 0.0078125, %v3260_v11  ;;  %v7161_v11 = vld [vmem:[%s7873_s1 + $0x50] sm:$0xff]  }
 0xa9b   : > { %v3360_v52 = vadd.f32 %v9046_v55, %v3338_v25  ;;  %v3318_v30 = vmul.f32 %v7360_v31, %v8985_v19  ;;  %v3339_v22 = vmul.f32 %v9036_v21, %v3317_v6  ;;  %v3262_v7 = vpop.xlane.xlu1 %3261 }
 0xa9c   : > { %7369 = vrsqrt.f32 %v3292_v9  ;;  %v3278_v16 = vmul.f32 0.0078125, %v3262_v7  ;;  %v3293_v32 = vadd.f32 1e-05, %v3277_v62  ;;  %v7153_v9 = vld [vmem:[%s7873_s1 + $0x40] sm:$0xff]   ;;  %v7168_v62 = vld [vmem:[%s7873_s1 + $0x98] sm:$0xff]  }
 0xa9d   : > { %v3373_v24 = vpack.c.bf16 %v3360_v52, %v3359_v13  ;;  %v3340_v43 = vmul.f32 %v9036_v21, %v3318_v30  ;;  %v3361_v35 = vadd.f32 %v9046_v55, %v3339_v22  ;;  %7371 = vrsqrt.f32 %v3291_v48  ;;  %v7154_v7 = vld [vmem:[%s7873_s1 + $0xc0] sm:$0xff]   ;;  %6645 = vmatprep.subr.bf16.mxu1 %v7153_v9  ;;  %v7160_v48 = vld [vmem:[%s7873_s1 + $0x88] sm:$0xff]  }
 0xa9e   : > { %v7362_v27 = vpop.eup %7361  ;;  %6709 = vmatprep.subr.bf16.mxu0 %v7154_v7 }
 0xa9f   : > { %3646 = vmatmul.mubr.bf16.gmra.mrb[64].mxu1 %v3373_v24  ;;  %3759 = vmatmul.mubr.bf16.gmra.mrb[80].mxu0 %v3373_v24  ;;  %v7364_v8 = vpop.eup %7363  ;;  %v3362_v19 = vadd.f32 %v9046_v55, %v3340_v43  ;;  %v3320_v59 = vmul.f32 %v7362_v27, %v8995_v50  ;;  %v3294_v50 = vadd.f32 1e-05, %v3278_v16  ;;  %v7164_v16 = vld [vmem:[%s7873_s1 + $0x90] sm:$0xff]  }
 0xaa0   : > { %3655 = vmatprep.mubr.bf16.mxu1 %v11316_v15  ;;  %3768 = vmatprep.mubr.bf16.mxu0 %v11316_v15  ;;  %v3319_v57 = vmul.f32 %v7364_v8, %v8990_v63 }
 0xaa1   : > { %v3374_v47 = vpack.c.bf16 %v3362_v19, %v3361_v35  ;;  %v3342_v49 = vmul.f32 %v9036_v21, %v3320_v59  ;;  %7373 = vrsqrt.f32 %v3294_v50  ;;  %v7156_v19 = vld [vmem:[%s7873_s1 + $0x80] sm:$0xff]   ;;  %v7158_v59 = vld [vmem:[%s7873_s1 + $0xc8] sm:$0xff]   ;;  %v7162_v35 = vld [vmem:[%s7873_s1 + $0xd0] sm:$0xff]  }
 0xaa2   : > { %v7366_v51 = vpop.eup %7365  ;;  %v3341_v44 = vmul.f32 %v9036_v21, %v3319_v57  ;;  %7375 = vrsqrt.f32 %v3293_v32  ;;  %6710 = vmatpush3.bf16.msra.mxu0 %v7156_v19  ;;  %v7163_v57 = vld [vmem:[%s7873_s1 + $0x10] sm:$0xff]   ;;  %v7171_v50 = vld [vmem:[%s7873_s1 + $0x20] sm:$0xff]   ;;  %v7174_v32 = vld [vmem:[%s7873_s1 + $0xe8] sm:$0xff]  }
 0xaa3   : > { %v7368_v26 = vpop.eup %7367  ;;  %v3364_v63 = vadd.f32 %v9046_v55, %v3342_v49  ;;  %v3322_v29 = vmul.f32 %v7366_v51, %v9005_v58  ;;  %6711 = vmatprep.subr.bf16.mxu0 %v7158_v59  ;;  %v7166_v49 = vld [vmem:[%s7873_s1 + $0xd8] sm:$0xff]  }
 0xaa4   : > { %v3363_v12 = vadd.f32 %v9046_v55, %v3341_v44  ;;  %v3321_v53 = vmul.f32 %v7368_v26, %v9000_v10  ;;  %v7167_v51 = vld [vmem:[%s7873_s1 + $0x18] sm:$0xff]   ;;  %v7169_v44 = vld [vmem:[%s7873_s1 + $0x60] sm:$0xff]  }
 0xaa5   : > { %v3344_v36 = vmul.f32 %v9036_v21, %v3322_v29  ;;  %v7170_v26 = vld [vmem:[%s7873_s1 + $0xe0] sm:$0xff]   ;;  %v7173_v29 = vld [vmem:[%s7873_s1 + $0x68] sm:$0xff]  }
 0xaa6   : > { %v3375_v33 = vpack.c.bf16 %v3364_v63, %v3363_v12  ;;  %v7370_v23 = vpop.eup %7369  ;;  %v3343_v25 = vmul.f32 %v9036_v21, %v3321_v53  ;;  %6712 = vmatpush3.bf16.msra.mxu0 %v7160_v48  ;;  %v7172_v63 = vld [vmem:[%s7873_s1 + $0xa0] sm:$0xff]   ;;  %v7175_v12 = vld [vmem:[%s7873_s1 + $0x28] sm:$0xff]  }
 0xaa7   : > { %3656 = vmatmul.mubr.bf16.gmra.mrb[68].mxu1 %v3374_v47  ;;  %3769 = vmatmul.mubr.bf16.gmra.mrb[84].mxu0 %v3374_v47  ;;  %v7372_v31 = vpop.eup %7371  ;;  %v3366_v58 = vadd.f32 %v9046_v55, %v3344_v36  ;;  %v3324_v56 = vmul.f32 %v7370_v23, %v9015_v17  ;;  %v7165_v47 = vld [vmem:[%s7873_s1 + $0x58] sm:$0xff]   ;;  %v7176_v53 = vld [vmem:[%s7873_s1 + $0xa8] sm:$0xff]   ;;  %v7178_v36 = vld [vmem:[%s7873_s1 + $0xf0] sm:$0xff]  }
 0xaa8   : > { %3665 = vmatprep.mubr.bf16.mxu1 %v11316_v15  ;;  %3778 = vmatprep.mubr.bf16.mxu0 %v11316_v15  ;;  %v3365_v10 = vadd.f32 %v9046_v55, %v3343_v25  ;;  %v3323_v1 = vmul.f32 %v7372_v31, %v9010_v45  ;;  %v7179_v23 = vld [vmem:[%s7873_s1 + $0x30] sm:$0xff]   ;;  %v7181_v31 = vld [vmem:[%s7873_s1 + $0x78] sm:$0xff]  }
 0xaa9   : > { %v3346_v52 = vmul.f32 %v9036_v21, %v3324_v56  ;;  %6713 = vmatprep.subr.bf16.mxu0 %v7162_v35  ;;  %v7180_v25 = vld [vmem:[%s7873_s1 + $0xb0] sm:$0xff]   ;;  %v7183_v56 = vld [vmem:[%s7873_s1 + $0x38] sm:$0xff]  }
 0xaaa   : > { %v3376_v13 = vpack.c.bf16 %v3366_v58, %v3365_v10  ;;  %v3345_v30 = vmul.f32 %v9036_v21, %v3323_v1  ;;  %6714 = vmatpush3.bf16.msra.mxu0 %v7164_v16  ;;  %v7182_v58 = vld [vmem:[%s7873_s1 + $0xf8] sm:$0xff]   ;;  %v3411_v1 = vld [vmem:[%s7868_s21] sm:$0xf] }
 0xaab   : > { %v7374_v6 = vpop.eup %7373  ;;  %v3368_v24 = vadd.f32 %v9046_v55, %v3346_v52  ;;  %6715 = vmatprep.subr.bf16.mxu0 %v7166_v49  ;;  %v7184_v10 = vld [vmem:[%s7873_s1 + $0xb8] sm:$0xff]  }
 0xaac   : > { %v7376_v42 = vpop.eup %7375  ;;  %v3326_v17 = vmul.f32 %v7374_v6, %v9025_v14  ;;  %v3367_v45 = vadd.f32 %v9046_v55, %v3345_v30 }
 0xaad   : > { %v3325_v43 = vmul.f32 %v7376_v42, %v9020_v41 }
 0xaae   : > { %v3377_v27 = vpack.c.bf16 %v3368_v24, %v3367_v45  ;;  %v3348_v18 = vmul.f32 %v9036_v21, %v3326_v17  ;;  %6716 = vmatpush3.bf16.msra.mxu0 %v7168_v62 }
 0xaaf   : > { %3666 = vmatmul.mubr.bf16.gmra.mrb[72].mxu1 %v3375_v33  ;;  %3779 = vmatmul.mubr.bf16.gmra.mrb[88].mxu0 %v3375_v33  ;;  %v3347_v22 = vmul.f32 %v9036_v21, %v3325_v43  ;;  %v7155_v21 = vld [vmem:[%s7873_s1] sm:$0xff]   ;;  %v7177_v33 = vld [vmem:[%s7873_s1 + $0x70] sm:$0xff]  }
 0xab0   : > { %3675 = vmatprep.mubr.bf16.mxu1 %v11316_v15  ;;  %3788 = vmatprep.mubr.bf16.mxu0 %v11316_v15  ;;  %v3370_v14 = vadd.f32 %v9046_v55, %v3348_v18 }
 0xab1   : > { %v3369_v41 = vadd.f32 %v9046_v55, %v3347_v22  ;;  %6646 = vmatpush3.bf16.msra.mxu1 %v7155_v21  ;;  %v7159_v55 = vld [vmem:[%s7873_s1 + $0x8] sm:$0xff]   ;;  %6717 = vmatprep.subr.bf16.mxu0 %v7170_v26 }
 0xab2   : > { %6718 = vmatpush3.bf16.msra.mxu0 %v7172_v63 }
 0xab3   : > { %v3378_v8 = vpack.c.bf16 %v3370_v14, %v3369_v41  ;;  %6719 = vmatprep.subr.bf16.mxu0 %v7174_v32 }
 0xab6   : > { %6720 = vmatpush3.bf16.msra.mxu0 %v7176_v53 }
 0xab7   : > { %3676 = vmatmul.mubr.bf16.gmra.mrb[76].mxu1 %v3376_v13  ;;  %3789 = vmatmul.mubr.bf16.gmra.mrb[92].mxu0 %v3376_v13  ;;  %v11336_v13 = vld [vmem:[#allocation9_spill] sm:$0xff] }
 0xab8   : > { %3685 = vmatprep.mubr.bf16.mxu1 %v11316_v15  ;;  %3798 = vmatprep.mubr.bf16.mxu0 %v11316_v15  ;;  %v3427_v52 = vsub.s32 3, %v11336_v13  ;;  %v11337_v6 = vsub.s32 0, %v11336_v13  ;;  %v11338_v42 = vsub.s32 2, %v11336_v13  ;;  %v11339_v17 = vsub.s32 1, %v11336_v13 }
 0xab9   : > { %6721 = vmatprep.subr.bf16.mxu0 %v7178_v36 }
 0xaba   : > { %6722 = vmatpush3.bf16.msra.mxu0 %v7180_v25  ;;  %v9143_v30 = vrot.slane %v3411_v1, %v11337_v6  ;;  %v9147_v24 = vrot.slane %v3411_v1, %v11338_v42  ;;  %v9151_v45 = vrot.slane %v3411_v1, %v11339_v17  ;;  %v9153_v43 = vrot.slane %v3411_v1, %v3427_v52 }
 0xabb   : > { %6723 = vmatprep.subr.bf16.mxu0 %v7182_v58 }
 0xabe   : > { %6724 = vmatpush3.bf16.msra.mxu0 %v7184_v10 }
 0xabf   : > { %3686 = vmatmul.mubr.bf16.gmra.mrb[80].mxu1 %v3377_v27  ;;  %3799 = vmatmul.mubr.bf16.gmra.mrb[96].mxu0 %v3377_v27 }
 0xac0   : > { %3695 = vmatprep.mubr.bf16.mxu1 %v11316_v15  ;;  %3808 = vmatprep.mubr.bf16.mxu0 %v11316_v15  ;;  %v7157_v15 = vld [vmem:[%s7873_s1 + $0x48] sm:$0xff]  }
 0xac1   : > { %6647 = vmatprep.subr.bf16.mxu1 %v7157_v15 }
 0xac2   : > { %6648 = vmatpush3.bf16.msra.mxu1 %v7159_v55 }
 0xac3   : > { %6649 = vmatprep.subr.bf16.mxu1 %v7161_v11 }
 0xac6   : > { %6650 = vmatpush3.bf16.msra.mxu1 %v7163_v57 }
 0xac7   : > { %3696 = vmatmul.mubr.bf16.gmra.mrb[84].mxu1 %v3378_v8  ;;  %3809 = vmatmul.mubr.bf16.gmra.mrb[100].mxu0 %v3378_v8 }
 0xac8   : > { %6651 = vmatprep.subr.bf16.mxu1 %v7165_v47 }
 0xaca   : > { %6652 = vmatpush3.bf16.msra.mxu1 %v7167_v51 }
 0xacb   : > { %6653 = vmatprep.subr.bf16.mxu1 %v7169_v44 }
 0xace   : > { %6654 = vmatpush3.bf16.msra.mxu1 %v7171_v50 }
 0xacf   : > { %6655 = vmatprep.subr.bf16.mxu1 %v7173_v29 }
 0xad2   : > { %6656 = vmatpush3.bf16.msra.mxu1 %v7175_v12 }
 0xad3   : > { %6657 = vmatprep.subr.bf16.mxu1 %v7177_v33 }
 0xad6   : > { %6658 = vmatpush3.bf16.msra.mxu1 %v7179_v23 }
 0xad7   : > { %6659 = vmatprep.subr.bf16.mxu1 %v7181_v31 }
 0xada   : > { %6660 = vmatpush3.bf16.msra.mxu1 %v7183_v56 }
 0xb39   : > { %v3627_v27 = vpop.f32.mrb[56].mxu1  ;;  %v3740_v18 = vpop.f32.mrb[72].mxu0 }
 0xb3a   : > { %v9156_v22 = vadd.f32 %v3627_v27, %v9143_v30  ;;  %v9159_v14 = vadd.f32 %v3740_v18, %v9147_v24  ;;  %v3629_v41 = vpop.f32.mrb[57].mxu1  ;;  %v3742_v8 = vpop.f32.mrb[73].mxu0 }
 0xb3b   : > { %v9162_v9 = vadd.f32 %v3629_v41, %v9151_v45  ;;  %v9165_v7 = vadd.f32 %v3742_v8, %v9153_v43  ;;  %v3631_v21 = vpop.f32.mrb[58].mxu1  ;;  %v3744_v19 = vpop.f32.mrb[74].mxu0 }
 0xb3c   : > { %v9168_v15 = vmul.f32 0.70710677, %v9156_v22  ;;  %v9171_v59 = vmul.f32 0.70710677, %v9159_v14  ;;  %v3633_v50 = vpop.f32.mrb[59].mxu1  ;;  %v3746_v63 = vpop.f32.mrb[75].mxu0  ;;  %v9194_v53 = vadd.f32 %v3631_v21, %v9143_v30  ;;  %v9201_v23 = vadd.f32 %v3744_v19, %v9147_v24 }
 0xb3d   : > { %v9174_v55 = vmul.f32 0.70710677, %v9162_v9  ;;  %v9177_v48 = vmul.f32 0.70710677, %v9165_v7  ;;  %v9211_v10 = vadd.f32 %v3633_v50, %v9151_v45  ;;  %v9222_v17 = vadd.f32 %v3746_v63, %v9153_v43 }
 0xb3e   : > { %v3948_v11 = vand.u32 2147483647, %v9168_v15  ;;  %v3950_v35 = vand.u32 2147483647, %v9171_v59  ;;  %v9208_v56 = vmul.f32 0.70710677, %v9194_v53 }
 0xb3f   : > { %v9182_v57 = vand.u32 2147483647, %v9174_v55  ;;  %v9185_v16 = vand.u32 2147483647, %v9177_v48  ;;  %v9218_v6 = vmul.f32 0.70710677, %v9201_v23 }
 0xb40   : > { %v4012_v47 = vmul.f32 0.3275911, %v3948_v11  ;;  %v4014_v49 = vmul.f32 0.3275911, %v3950_v35  ;;  %v4844_v52 = vsub.f32 0.0, %v3948_v11  ;;  %v4846_v27 = vsub.f32 0.0, %v3950_v35 }
 0xb41   : > { %v4013_v51 = vmul.f32 0.3275911, %v9182_v57  ;;  %v4015_v26 = vmul.f32 0.3275911, %v9185_v16  ;;  %v9189_v29 = vpop.f32.mrb[60].mxu1  ;;  %v9191_v32 = vpop.f32.mrb[76].mxu0 }
 0xb42   : > { %v4076_v62 = vadd.f32 1.0, %v4012_v47  ;;  %v4078_v44 = vadd.f32 1.0, %v4014_v49  ;;  %v9196_v33 = vpop.f32.mrb[61].mxu1  ;;  %v9198_v36 = vpop.f32.mrb[77].mxu0  ;;  %v3952_v42 = vand.u32 2147483647, %v9208_v56  ;;  %v4908_v21 = vmul.f32 %v4844_v52, %v3948_v11 }
 0xb43   : > { %v4077_v12 = vadd.f32 1.0, %v4013_v51  ;;  %v9203_v25 = vpop.f32.mrb[62].mxu1  ;;  %v9205_v31 = vpop.f32.mrb[78].mxu0  ;;  %v4079_v58 = vadd.f32 1.0, %v4015_v26  ;;  %v3954_v18 = vand.u32 2147483647, %v9218_v6 }
 0xb44   : > { %7377 = vrcp.f32 %v4076_v62  ;;  %v9213_v1 = vpop.f32.mrb[63].mxu1  ;;  %v9215_v13 = vpop.f32.mrb[79].mxu0  ;;  %v9226_v41 = vmul.f32 0.70710677, %v9211_v10  ;;  %v4016_v8 = vmul.f32 0.3275911, %v3952_v42  ;;  %v4910_v62 = vmul.f32 %v4846_v27, %v3950_v35 }
 0xb45   : > { %7379 = vrcp.f32 %v4078_v44  ;;  %v4018_v19 = vmul.f32 0.3275911, %v3954_v18  ;;  %v9230_v51 = vmul.f32 0.70710677, %v9222_v17  ;;  %v4848_v63 = vsub.f32 0.0, %v3952_v42 }
 0xb46   : > { %7381 = vrcp.f32 %v4077_v12  ;;  %v3953_v47 = vand.u32 2147483647, %v9226_v41  ;;  %v4080_v49 = vadd.f32 1.0, %v4016_v8  ;;  %v4972_v52 = vmul.f32 1.442695, %v4908_v21 }
 0xb47   : > { %7383 = vrcp.f32 %v4079_v58  ;;  %v4082_v44 = vadd.f32 1.0, %v4018_v19  ;;  %v9235_v12 = vand.u32 2147483647, %v9230_v51  ;;  %v4850_v39 = vsub.f32 0.0, %v3954_v18 }
 0xb48   : > { %v4017_v26 = vmul.f32 0.3275911, %v3953_v47  ;;  %7385 = vrcp.f32 %v4080_v49  ;;  %v4976_v19 = vmul.f32 1.442695, %v4910_v62  ;;  %v4912_v37 = vmul.f32 %v4848_v63, %v3952_v42 }
 0xb49   : > { %7387 = vrcp.f32 %v4082_v44  ;;  %v4019_v35 = vmul.f32 0.3275911, %v9235_v12  ;;  %v9245_v34 = vmul.f32 0.5, %v9156_v22  ;;  %v4845_v62 = vsub.f32 0.0, %v9182_v57 }
 0xb4a   : > { %v4081_v8 = vadd.f32 1.0, %v4017_v26  ;;  %v4847_v22 = vsub.f32 0.0, %v9185_v16  ;;  %v4849_v40 = vsub.f32 0.0, %v3953_v47  ;;  %vm5228_vm6 = vcmp.ge.f32.partialorder %v9168_v15, 0.0 }
 0xb4b   : > { %v4083_v60 = vadd.f32 1.0, %v4019_v35  ;;  %vm5230_vm7 = vcmp.ge.f32.partialorder %v9171_v59, 0.0  ;;  %vm5232_vm8 = vcmp.ge.f32.partialorder %v9208_v56, 0.0  ;;  %vm5234_vm9 = vcmp.ge.f32.partialorder %v9218_v6, 0.0 }
 0xb4c   : > { %7389 = vrcp.f32 %v4081_v8  ;;  %v4980_v8 = vmul.f32 1.442695, %v4912_v37  ;;  %v4913_v5 = vmul.f32 %v4849_v40, %v3953_v47  ;;  %v9281_v47 = vadd.f32 %v9189_v29, %v9143_v30 }
 0xb4d   : > { %7391 = vpow2.f32 %v4972_v52  ;;  %vm5233_vm10 = vcmp.ge.f32.partialorder %v9226_v41, 0.0  ;;  %vm5229_vm11 = vcmp.ge.f32.partialorder %v9174_v55, 0.0  ;;  %vm5235_vm12 = vcmp.ge.f32.partialorder %v9230_v51, 0.0 }
 0xb4e   : > { %v9232_v50 = vpop.eup %7377  ;;  %7393 = vrcp.f32 %v4083_v60  ;;  %v4909_v60 = vmul.f32 %v4845_v62, %v9182_v57  ;;  %vm5231_vm13 = vcmp.ge.f32.partialorder %v9177_v48, 0.0  ;;  %v9438_v51 = vadd.f32 %v9213_v1, %v9151_v45 }
 0xb4f   : > { %v9237_v58 = vpop.eup %7379  ;;  %v4268_v11 = vmul.f32 1.0614054, %v9232_v50  ;;  %7395 = vpow2.f32 %v4976_v19 }
 0xb50   : > { %v4270_v61 = vmul.f32 1.0614054, %v9237_v58  ;;  %v9242_v38 = vpop.eup %7381  ;;  %7397 = vpow2.f32 %v4980_v8 }
 0xb51   : > { %v4332_v27 = vadd.f32 -1.4531521, %v4268_v11  ;;  %v4269_v44 = vmul.f32 1.0614054, %v9242_v38  ;;  %v9249_v26 = vpop.eup %7383  ;;  %v4914_v11 = vmul.f32 %v4850_v39, %v3954_v18  ;;  %v9260_v39 = vmul.f32 0.5, %v9159_v14 }
 0xb52   : > { %v4334_v49 = vadd.f32 -1.4531521, %v4270_v61  ;;  %v4271_v42 = vmul.f32 1.0614054, %v9249_v26 }
 0xb53   : > { %v4396_v21 = vmul.f32 %v9232_v50, %v4332_v27  ;;  %v4333_v61 = vadd.f32 -1.4531521, %v4269_v44 }
 0xb54   : > { %v4398_v0 = vmul.f32 %v9237_v58, %v4334_v49  ;;  %v4335_v52 = vadd.f32 -1.4531521, %v4271_v42  ;;  %v9257_v49 = vpop.eup %7385 }
 0xb55   : > { %v4460_v2 = vadd.f32 1.4214138, %v4396_v21  ;;  %v4397_v27 = vmul.f32 %v9242_v38, %v4333_v61  ;;  %v9264_v19 = vpop.eup %7387  ;;  %v4911_v61 = vmul.f32 %v4847_v22, %v9185_v16  ;;  %v4851_v22 = vsub.f32 0.0, %v9235_v12 }
 0xb56   : > { %v4462_v63 = vadd.f32 1.4214138, %v4398_v0  ;;  %v4984_v0 = vmul.f32 1.442695, %v4914_v11  ;;  %v4274_v42 = vmul.f32 1.0614054, %v9264_v19  ;;  %v4399_v54 = vmul.f32 %v9249_v26, %v4335_v52  ;;  %v9271_v57 = vpop.eup %7389 }
 0xb57   : > { %v4524_v35 = vmul.f32 %v9232_v50, %v4460_v2  ;;  %v4461_v37 = vadd.f32 1.4214138, %v4397_v27  ;;  %v4272_v2 = vmul.f32 1.0614054, %v9257_v49  ;;  %v4974_v11 = vmul.f32 1.442695, %v4909_v60  ;;  %v7392_v8 = vpop.eup %7391 }
 0xb58   : > { %v4526_v18 = vmul.f32 %v9237_v58, %v4462_v63  ;;  %7399 = vpow2.f32 %v4984_v0  ;;  %v4273_v40 = vmul.f32 1.0614054, %v9271_v57  ;;  %v9283_v60 = vpop.eup %7393  ;;  %v4915_v29 = vmul.f32 %v4851_v22, %v9235_v12 }
 0xb59   : > { %v4588_v21 = vadd.f32 -0.28449672, %v4524_v35  ;;  %v4336_v63 = vadd.f32 -1.4531521, %v4272_v2  ;;  %v4338_v35 = vadd.f32 -1.4531521, %v4274_v42  ;;  %v7396_v42 = vpop.eup %7395 }
 0xb5a   : > { %v4590_v44 = vadd.f32 -0.28449672, %v4526_v18  ;;  %v4525_v18 = vmul.f32 %v9242_v38, %v4461_v37  ;;  %v4463_v2 = vadd.f32 1.4214138, %v4399_v54  ;;  %v9296_v12 = vmul.f32 0.70710677, %v9281_v47 }
 0xb5b   : > { %v4652_v14 = vmul.f32 %v9232_v50, %v4588_v21  ;;  %v4400_v16 = vmul.f32 %v9257_v49, %v4336_v63  ;;  %v4402_v52 = vmul.f32 %v9264_v19, %v4338_v35  ;;  %v4275_v35 = vmul.f32 1.0614054, %v9283_v60 }
 0xb5c   : > { %v4654_v62 = vmul.f32 %v9237_v58, %v4590_v44  ;;  %v4982_v44 = vmul.f32 1.442695, %v4913_v5  ;;  %v4589_v46 = vadd.f32 -0.28449672, %v4525_v18  ;;  %v4527_v5 = vmul.f32 %v9249_v26, %v4463_v2 }
 0xb5d   : > { %v4716_v27 = vadd.f32 0.2548296, %v4652_v14  ;;  %v4464_v37 = vadd.f32 1.4214138, %v4400_v16  ;;  %v4466_v63 = vadd.f32 1.4214138, %v4402_v52  ;;  %v7398_v16 = vpop.eup %7397 }
 0xb5e   : > { %v4718_v21 = vadd.f32 0.2548296, %v4654_v62  ;;  %v4337_v62 = vadd.f32 -1.4531521, %v4273_v40  ;;  %7401 = vpow2.f32 %v4982_v44  ;;  %v4653_v52 = vmul.f32 %v9242_v38, %v4589_v46 }
 0xb5f   : > { %v4780_v0 = vmul.f32 %v9232_v50, %v4716_v27  ;;  %v4528_v28 = vmul.f32 %v9257_v49, %v4464_v37  ;;  %v4530_v4 = vmul.f32 %v9264_v19, %v4466_v63  ;;  %v4339_v50 = vadd.f32 -1.4531521, %v4275_v35 }
 0xb60   : > { %v4782_v14 = vmul.f32 %v9237_v58, %v4718_v21  ;;  %v4401_v54 = vmul.f32 %v9271_v57, %v4337_v62  ;;  %v4978_v27 = vmul.f32 1.442695, %v4911_v61  ;;  %7403 = vpow2.f32 %v4974_v11 }
 0xb61   : > { %v5100_v20 = vmul.f32 %v7392_v8, %v4780_v0  ;;  %v4592_v58 = vadd.f32 -0.28449672, %v4528_v28  ;;  %v4594_v8 = vadd.f32 -0.28449672, %v4530_v4  ;;  %v4403_v21 = vmul.f32 %v9283_v60, %v4339_v50 }
 0xb62   : > { %v5102_v3 = vmul.f32 %v7396_v42, %v4782_v14  ;;  %v4465_v18 = vadd.f32 1.4214138, %v4401_v54  ;;  %v4986_v0 = vmul.f32 1.442695, %v4915_v29  ;;  %v7400_v2 = vpop.eup %7399  ;;  %v4591_v4 = vadd.f32 -0.28449672, %v4527_v5 }
 0xb63   : > { %v5164_v22 = vsub.f32 1.0, %v5100_v20  ;;  %v4656_v40 = vmul.f32 %v9257_v49, %v4592_v58  ;;  %v4658_v28 = vmul.f32 %v9264_v19, %v4594_v8  ;;  %v4467_v44 = vadd.f32 1.4214138, %v4403_v21 }
 0xb64   : > { %v5166_v61 = vsub.f32 1.0, %v5102_v3  ;;  %v4529_v37 = vmul.f32 %v9271_v57, %v4465_v18  ;;  %v3823_v42 = vmul.f32 0.5, %v9194_v53  ;;  %v9305_v46 = vand.u32 2147483647, %v9296_v12 }
 0xb65   : > { %v4720_v14 = vadd.f32 0.2548296, %v4656_v40  ;;  %v4722_v20 = vadd.f32 0.2548296, %v4658_v28  ;;  %v5292_v62 = vsub.f32 0.0, %v5164_v22  ;;  %7405 = vpow2.f32 %v4986_v0 }
 0xb66   : > { %v4593_v63 = vadd.f32 -0.28449672, %v4529_v37  ;;  %v4717_v35 = vadd.f32 0.2548296, %v4653_v52  ;;  %v5294_v29 = vsub.f32 0.0, %v5166_v61  ;;  %v4531_v5 = vmul.f32 %v9283_v60, %v4467_v44 }
 0xb67   : > { %v4784_v3 = vmul.f32 %v9257_v49, %v4720_v14  ;;  %v4786_v54 = vmul.f32 %v9264_v19, %v4722_v20  ;;  %v4655_v53 = vmul.f32 %v9249_v26, %v4591_v4  ;;  %7407 = vpow2.f32 %v4978_v27 }
 0xb68   : > { %v4657_v50 = vmul.f32 %v9271_v57, %v4593_v63  ;;  %v9314_v58 = vadd.f32 %v9191_v32, %v9147_v24  ;;  %v4595_v21 = vadd.f32 -0.28449672, %v4531_v5  ;;  %v4020_v49 = vmul.f32 0.3275911, %v9305_v46  ;;  %v7402_v52 = vpop.eup %7401 }
 0xb69   : > { %v5104_v11 = vmul.f32 %v7398_v16, %v4784_v3  ;;  %v5106_v8 = vmul.f32 %v7400_v2, %v4786_v54  ;;  %v5356_v19 = vsel %vm5228_vm6, %v5164_v22, %v5292_v62  ;;  %v5358_v27 = vsel %vm5230_vm7, %v5166_v61, %v5294_v29 }
 0xb6a   : > { %v4721_v18 = vadd.f32 0.2548296, %v4657_v50  ;;  %v4781_v32 = vmul.f32 %v9242_v38, %v4717_v35  ;;  %v4719_v2 = vadd.f32 0.2548296, %v4655_v53  ;;  %v4659_v37 = vmul.f32 %v9283_v60, %v4595_v21  ;;  %v7404_v20 = vpop.eup %7403 }
 0xb6b   : > { %v5168_v40 = vsub.f32 1.0, %v5104_v11  ;;  %v5170_v16 = vsub.f32 1.0, %v5106_v8  ;;  %v9327_v15 = vmul.f32 0.70710677, %v9314_v58  ;;  %v5420_v22 = vadd.f32 1.0, %v5356_v19 }
 0xb6c   : > { %v4785_v0 = vmul.f32 %v9271_v57, %v4721_v18  ;;  %v4084_v56 = vadd.f32 1.0, %v4020_v49  ;;  %v9331_v4 = vadd.f32 %v9196_v33, %v9151_v45  ;;  %v5422_v59 = vadd.f32 1.0, %v5358_v27 }
 0xb6d   : > { %v5296_v28 = vsub.f32 0.0, %v5168_v40  ;;  %v5298_v44 = vsub.f32 0.0, %v5170_v16  ;;  %v4723_v14 = vadd.f32 0.2548296, %v4659_v37  ;;  %v3825_v63 = vmul.f32 0.5, %v9201_v23 }
 0xb6e   : > { %v5105_v38 = vmul.f32 %v7402_v52, %v4785_v0  ;;  %v9337_v35 = vand.u32 2147483647, %v9327_v15  ;;  %v5101_v29 = vmul.f32 %v7404_v20, %v4781_v32  ;;  %v4783_v54 = vmul.f32 %v9249_v26, %v4719_v2 }
 0xb6f   : > { %v5360_v61 = vsel %vm5232_vm8, %v5168_v40, %v5296_v28  ;;  %v5362_v62 = vsel %vm5234_vm9, %v5170_v16, %v5298_v44  ;;  %v7406_v3 = vpop.eup %7405  ;;  %v4787_v50 = vmul.f32 %v9283_v60, %v4723_v14  ;;  %v9344_v53 = vmul.f32 %v5420_v22, %v9245_v34 }
 0xb70   : > { %v5424_v57 = vadd.f32 1.0, %v5360_v61  ;;  %v5426_v33 = vadd.f32 1.0, %v5362_v62  ;;  %7409 = vrcp.f32 %v4084_v56  ;;  %v9349_v23 = vmul.f32 0.70710677, %v9331_v4 }
 0xb71   : > { %v7408_v18 = vpop.eup %7407  ;;  %v9356_v26 = vmul.f32 %v5422_v59, %v9260_v39  ;;  %v5169_v21 = vsub.f32 1.0, %v5105_v38  ;;  %v5107_v49 = vmul.f32 %v7406_v3, %v4787_v50  ;;  %v4022_v19 = vmul.f32 0.3275911, %v9337_v35 }
 0xb72   : > { %v9341_v5 = vpop.f32.mrb[64].mxu1  ;;  %v9346_v11 = vmul.f32 %v5424_v57, %v3823_v42  ;;  %v9351_v6 = vpop.f32.mrb[80].mxu0  ;;  %v9358_v60 = vmul.f32 %v5426_v33, %v3825_v63  ;;  %v9368_v40 = vand.u32 2147483647, %v9349_v23  ;;  %v5165_v32 = vsub.f32 1.0, %v5101_v29 }
 0xb73   : > { %v9353_v8 = vpop.f32.mrb[65].mxu1  ;;  %v9360_v34 = vpop.f32.mrb[81].mxu0  ;;  %v5103_v16 = vmul.f32 %v7408_v18, %v4783_v54  ;;  %v5297_v37 = vsub.f32 0.0, %v5169_v21  ;;  %v5171_v22 = vsub.f32 1.0, %v5107_v49  ;;  %v4086_v44 = vadd.f32 1.0, %v4022_v19 }
 0xb74   : > { %v9362_v42 = vpop.f32.mrb[66].mxu1  ;;  %v9370_v27 = vpop.f32.mrb[82].mxu0  ;;  %v4021_v28 = vmul.f32 0.3275911, %v9368_v40  ;;  %v9381_v59 = vadd.f32 %v9198_v36, %v9153_v43  ;;  %v5293_v61 = vsub.f32 0.0, %v5165_v32  ;;  %v9385_v14 = vadd.f32 %v9203_v25, %v9143_v30 }
 0xb75   : > { %v9372_v39 = vpop.f32.mrb[67].mxu1  ;;  %v9376_v2 = vpop.f32.mrb[83].mxu0  ;;  %v5167_v38 = vsub.f32 1.0, %v5103_v16  ;;  %v9389_v20 = vadd.f32 %v9205_v31, %v9147_v24  ;;  %v5361_v3 = vsel %vm5233_vm10, %v5169_v21, %v5297_v37  ;;  %v5299_v29 = vsub.f32 0.0, %v5171_v22 }
 0xb76   : > { %v4085_v56 = vadd.f32 1.0, %v4021_v28  ;;  %v9401_v25 = vmul.f32 0.70710677, %v9381_v59  ;;  %v9404_v54 = vmul.f32 0.70710677, %v9385_v14  ;;  %v5357_v21 = vsel %vm5229_vm11, %v5165_v32, %v5293_v61 }
 0xb77   : > { %v9412_v41 = vmul.f32 0.70710677, %v9389_v20  ;;  %v5295_v49 = vsub.f32 0.0, %v5167_v38  ;;  %v5425_v37 = vadd.f32 1.0, %v5361_v3  ;;  %v5421_v0 = vadd.f32 1.0, %v5357_v21 }
 0xb78   : > { %7411 = vrcp.f32 %v4085_v56  ;;  %v9419_v19 = vand.u32 2147483647, %v9401_v25  ;;  %v9422_v16 = vand.u32 2147483647, %v9404_v54  ;;  %v3824_v52 = vmul.f32 0.5, %v9211_v10 }
 0xb79   : > { %7413 = vrcp.f32 %v4086_v44  ;;  %v9428_v55 = vand.u32 2147483647, %v9412_v41  ;;  %v5363_v44 = vsel %vm5235_vm12, %v5171_v22, %v5299_v29  ;;  %v5359_v3 = vsel %vm5231_vm13, %v5167_v38, %v5295_v49 }
 0xb7a   : > { %v9391_v57 = vpop.f32.mrb[68].mxu1  ;;  %v9393_v63 = vpop.f32.mrb[84].mxu0  ;;  %v4023_v32 = vmul.f32 0.3275911, %v9419_v19  ;;  %v4024_v61 = vmul.f32 0.3275911, %v9422_v16 }
 0xb7b   : > { %11340 = vst [vmem:[#allocation9_spill] sm:$0xff] %v9391_v57  ;;  %11341 = vst [vmem:[#allocation26_spill] sm:$0xff] %v9393_v63  ;;  %v9396_v62 = vpop.f32.mrb[69].mxu1  ;;  %v9398_v36 = vpop.f32.mrb[85].mxu0  ;;  %v5427_v21 = vadd.f32 1.0, %v5363_v44  ;;  %v5423_v49 = vadd.f32 1.0, %v5359_v3 }
 0xb7c   : > { %11342 = vst [vmem:[#allocation27_spill] sm:$0xff] %v9396_v62  ;;  %11343 = vst [vmem:[#allocation28_spill] sm:$0xff] %v9398_v36  ;;  %v9406_v31 = vpop.f32.mrb[70].mxu1  ;;  %v9408_v33 = vpop.eup %7409  ;;  %v4088_v36 = vadd.f32 1.0, %v4024_v61  ;;  %vm5236_vm14 = vcmp.ge.f32.partialorder %v9296_v12, 0.0  ;;  %vm5237_vm15 = vcmp.ge.f32.partialorder %v9349_v23, 0.0 }
 0xb7d   : > { %11344 = vst [vmem:[#allocation29_spill] sm:$0xff] %v9406_v31  ;;  %v9414_v50 = vpop.f32.mrb[86].mxu0  ;;  %v9416_v18 = vpop.f32.mrb[71].mxu1  ;;  %v4276_v56 = vmul.f32 1.0614054, %v9408_v33  ;;  %v5489_v31 = vmul.f32 %v5425_v37, %v3824_v52  ;;  %vm5238_vm0 = vcmp.ge.f32.partialorder %v9327_v15, 0.0 }
 0xb7e   : > { %11345 = vst [vmem:[#allocation30_spill] sm:$0xff] %v9414_v50  ;;  %11346 = vst [vmem:[#allocation31_spill] sm:$0xff] %v9416_v18  ;;  %v9424_v28 = vpop.f32.mrb[87].mxu0  ;;  %v4087_v18 = vadd.f32 1.0, %v4023_v32  ;;  %v3820_v50 = vmul.f32 0.5, %v9162_v9  ;;  %v3826_v32 = vmul.f32 0.5, %v9222_v17 }
 0xb7f   : > { %11347 = vst [vmem:[#allocation32_spill] sm:$0xff] %v9424_v28  ;;  %v4026_v28 = vmul.f32 0.3275911, %v9428_v55  ;;  %v4340_v48 = vadd.f32 -1.4531521, %v4276_v56  ;;  %v3822_v9 = vmul.f32 0.5, %v9165_v7 }
 0xb80   : > { %7415 = vrcp.f32 %v4087_v18  ;;  %v5485_v38 = vmul.f32 %v5421_v0, %v3820_v50  ;;  %v5491_v52 = vmul.f32 %v5427_v21, %v3826_v32  ;;  %v9457_v18 = vadd.f32 %v9215_v13, %v9153_v43 }
 0xb81   : > { %v4090_v10 = vadd.f32 1.0, %v4026_v28  ;;  %7417 = vrcp.f32 %v4088_v36  ;;  %v4404_v0 = vmul.f32 %v9408_v33, %v4340_v48  ;;  %v5487_v36 = vmul.f32 %v5423_v49, %v3822_v9 }
 0xb82   : > { %v9440_v22 = vpop.f32.mrb[72].mxu1  ;;  %v9442_v29 = vpop.f32.mrb[88].mxu0  ;;  %v5549_v28 = vpack.c.bf16 %v5489_v31, %v5485_v38  ;;  %v9462_v37 = vmul.f32 0.70710677, %v9457_v18  ;;  %v4852_v7 = vsub.f32 0.0, %v9305_v46  ;;  %v11351_v31 = vpack.c.bf16 %v9346_v11, %v9344_v53 }
 0xb83   : > { %11348 = vst [vmem:[#allocation33_spill] sm:$0xff] %v9440_v22  ;;  %11349 = vst [vmem:[#allocation34_spill] sm:$0xff] %v9442_v29  ;;  %v9445_v62 = vpop.eup %7411  ;;  %v9450_v22 = vmul.f32 0.70710677, %v9438_v51  ;;  %7419 = vrcp.f32 %v4090_v10  ;;  %v9464_v44 = vpop.f32.mrb[73].mxu1  ;;  %v5551_v3 = vpack.c.bf16 %v5491_v52, %v5487_v36  ;;  %v9476_v21 = vadd.f32 %v9341_v5, %v9143_v30 }
 0xb84   : > { %v4277_v1 = vmul.f32 1.0614054, %v9445_v62  ;;  %v9452_v29 = vpop.eup %7413  ;;  %5868 = vmatprep.mubr.bf16.mxu1 %v5549_v28  ;;  %11350 = vst [vmem:[#allocation35_spill] sm:$0xff] %v9464_v44  ;;  %v9472_v61 = vand.u32 2147483647, %v9462_v37  ;;  %v4916_v11 = vmul.f32 %v4852_v7, %v9305_v46  ;;  %v4853_v9 = vsub.f32 0.0, %v9368_v40 }
 0xb85   : > { %v3961_v17 = vand.u32 2147483647, %v9450_v22  ;;  %v4278_v56 = vmul.f32 1.0614054, %v9452_v29  ;;  %5869 = vmatmul.mubr.bf16.vlgmr.msra.gmra.mrb[88].mxu1 %v11351_v31  ;;  %11352 = vst [vmem:[#allocation36_spill] sm:$0xff] %v9476_v21  ;;  %5965 = vmatprep.mubr.bf16.mxu0 %v5551_v3  ;;  %v11354_v5 = vpack.c.bf16 %v9358_v60, %v9356_v26  ;;  %v4854_v28 = vsub.f32 0.0, %v9337_v35 }
 0xb86   : > { %v4341_v50 = vadd.f32 -1.4531521, %v4277_v1  ;;  %v4468_v48 = vadd.f32 1.4214138, %v4404_v0  ;;  %v4027_v49 = vmul.f32 0.3275911, %v9472_v61 }
 0xb87   : > { %v4025_v13 = vmul.f32 0.3275911, %v3961_v17  ;;  %v9481_v32 = vmul.f32 0.70710677, %v9476_v21  ;;  %v4342_v1 = vadd.f32 -1.4531521, %v4278_v56  ;;  %5966 = vmatmul.mubr.bf16.vlgmr.msra.gmra.mrb[104].mxu0 %v11354_v5 }
 0xb88   : > { %v4405_v10 = vmul.f32 %v9445_v62, %v4341_v50  ;;  %v4091_v50 = vadd.f32 1.0, %v4027_v49  ;;  %v9494_v36 = vpop.f32.mrb[89].mxu0  ;;  %v4988_v60 = vmul.f32 1.442695, %v4916_v11  ;;  %v4918_v49 = vmul.f32 %v4854_v28, %v9337_v35 }
 0xb89   : > { %v4089_v38 = vadd.f32 1.0, %v4025_v13  ;;  %11353 = vst [vmem:[#allocation37_spill] sm:$0xff] %v9481_v32  ;;  %11355 = vst [vmem:[#allocation38_spill] sm:$0xff] %v9494_v36  ;;  %v4532_v13 = vmul.f32 %v9408_v33, %v4468_v48  ;;  %v9499_v31 = vand.u32 2147483647, %v9481_v32  ;;  %v4406_v3 = vmul.f32 %v9452_v29, %v4342_v1  ;;  %v9552_v57 = vpop.f32.mrb[90].mxu0 }
 0xb8a   : > { %v9483_v53 = vpop.eup %7415  ;;  %v4469_v46 = vadd.f32 1.4214138, %v4405_v10  ;;  %v4857_v48 = vsub.f32 0.0, %v3961_v17  ;;  %v9517_v28 = vmul.f32 0.5, %v9331_v4  ;;  %vm5241_vm1 = vcmp.ge.f32.partialorder %v9450_v22, 0.0 }
 0xb8b   : > { %7421 = vrcp.f32 %v4089_v38  ;;  %v9490_v52 = vpop.eup %7417  ;;  %v4279_v0 = vmul.f32 1.0614054, %v9483_v53  ;;  %v4917_v38 = vmul.f32 %v4853_v9, %v9368_v40  ;;  %v4596_v10 = vadd.f32 -0.28449672, %v4532_v13 }
 0xb8c   : > { %v4280_v7 = vmul.f32 1.0614054, %v9490_v52  ;;  %7423 = vrcp.f32 %v4091_v50  ;;  %v4533_v36 = vmul.f32 %v9445_v62, %v4469_v46  ;;  %v9509_v50 = vmul.f32 0.5, %v9281_v47 }
 0xb8d   : > { %v4343_v56 = vadd.f32 -1.4531521, %v4279_v0  ;;  %v9501_v26 = vpop.eup %7419  ;;  %v4028_v11 = vmul.f32 0.3275911, %v9499_v31  ;;  %7425 = vpow2.f32 %v4988_v60  ;;  %v9514_v40 = vmul.f32 0.5, %v9314_v58 }
 0xb8e   : > { %v4282_v5 = vmul.f32 1.0614054, %v9501_v26  ;;  %v4344_v0 = vadd.f32 -1.4531521, %v4280_v7  ;;  %11356 = vst [vmem:[#allocation39_spill] sm:$0xff] %v9509_v50  ;;  %v4921_v13 = vmul.f32 %v4857_v48, %v3961_v17  ;;  %v4859_v46 = vsub.f32 0.0, %v9472_v61 }
 0xb8f   : > { %v4407_v44 = vmul.f32 %v9483_v53, %v4343_v56  ;;  %11357 = vst [vmem:[#allocation40_spill] sm:$0xff] %v9514_v40  ;;  %v4470_v35 = vadd.f32 1.4214138, %v4406_v3  ;;  %v4990_v1 = vmul.f32 1.442695, %v4917_v38  ;;  %v4660_v7 = vmul.f32 %v9408_v33, %v4596_v10 }
 0xb90   : > { %v4346_v32 = vadd.f32 -1.4531521, %v4282_v5  ;;  %v4992_v9 = vmul.f32 1.442695, %v4918_v49  ;;  %v4597_v56 = vadd.f32 -0.28449672, %v4533_v36  ;;  %v4408_v5 = vmul.f32 %v9490_v52, %v4344_v0 }
 0xb91   : > { %v9526_v58 = vadd.f32 %v9351_v6, %v9147_v24  ;;  %v4471_v60 = vadd.f32 1.4214138, %v4407_v44  ;;  %v4092_v38 = vadd.f32 1.0, %v4028_v11  ;;  %v4534_v17 = vmul.f32 %v9452_v29, %v4470_v35  ;;  %v9533_v36 = vpop.f32.mrb[74].mxu1 }
 0xb92   : > { %v4410_v3 = vmul.f32 %v9501_v26, %v4346_v32  ;;  %7427 = vpow2.f32 %v4990_v1  ;;  %v4855_v49 = vsub.f32 0.0, %v9419_v19  ;;  %v4856_v48 = vsub.f32 0.0, %v9422_v16  ;;  %11359 = vst [vmem:[#allocation42_spill] sm:$0xff] %v9533_v36 }
 0xb93   : > { %11358 = vst [vmem:[#allocation41_spill] sm:$0xff] %v9526_v58  ;;  %v4858_v6 = vsub.f32 0.0, %v9428_v55  ;;  %v4998_v44 = vmul.f32 1.442695, %v4921_v13  ;;  %v4923_v32 = vmul.f32 %v4859_v46, %v9472_v61  ;;  %v4661_v21 = vmul.f32 %v9445_v62, %v4597_v56 }
 0xb94   : > { %v4472_v11 = vadd.f32 1.4214138, %v4408_v5  ;;  %v9542_v1 = vmul.f32 0.70710677, %v9526_v58  ;;  %v4535_v40 = vmul.f32 %v9483_v53, %v4471_v60  ;;  %v4474_v63 = vadd.f32 1.4214138, %v4410_v3 }
 0xb95   : > { %v9520_v47 = vpop.eup %7421  ;;  %7429 = vrcp.f32 %v4092_v38  ;;  %v4598_v50 = vadd.f32 -0.28449672, %v4534_v17  ;;  %v4724_v46 = vadd.f32 0.2548296, %v4660_v7  ;;  %v4920_v56 = vmul.f32 %v4856_v48, %v9422_v16 }
 0xb96   : > { %v4281_v4 = vmul.f32 1.0614054, %v9520_v47  ;;  %v9535_v10 = vpop.eup %7423  ;;  %v9548_v61 = vand.u32 2147483647, %v9542_v1  ;;  %v4922_v5 = vmul.f32 %v4858_v6, %v9428_v55  ;;  %v4725_v3 = vadd.f32 0.2548296, %v4661_v21 }
 0xb97   : > { %v4283_v35 = vmul.f32 1.0614054, %v9535_v10  ;;  %v7426_v60 = vpop.eup %7425  ;;  %7431 = vpow2.f32 %v4998_v44  ;;  %v4538_v17 = vmul.f32 %v9501_v26, %v4474_v63  ;;  %v5002_v7 = vmul.f32 1.442695, %v4923_v32 }
 0xb98   : > { %v4345_v0 = vadd.f32 -1.4531521, %v4281_v4  ;;  %v4919_v4 = vmul.f32 %v4855_v49, %v9419_v19  ;;  %v4599_v19 = vadd.f32 -0.28449672, %v4535_v40  ;;  %v4662_v16 = vmul.f32 %v9452_v29, %v4598_v50 }
 0xb99   : > { %v4347_v13 = vadd.f32 -1.4531521, %v4283_v35  ;;  %v4788_v6 = vmul.f32 %v9408_v33, %v4724_v46  ;;  %7433 = vpow2.f32 %v4992_v9  ;;  %v4996_v21 = vmul.f32 1.442695, %v4920_v56 }
 0xb9a   : > { %v4409_v36 = vmul.f32 %v9520_v47, %v4345_v0  ;;  %v4536_v0 = vmul.f32 %v9490_v52, %v4472_v11  ;;  %v4994_v48 = vmul.f32 1.442695, %v4919_v4  ;;  %v4789_v35 = vmul.f32 %v9445_v62, %v4725_v3 }
 0xb9b   : > { %v4411_v38 = vmul.f32 %v9535_v10, %v4347_v13  ;;  %v5000_v13 = vmul.f32 1.442695, %v4922_v5  ;;  %v4602_v32 = vadd.f32 -0.28449672, %v4538_v17  ;;  %7435 = vpow2.f32 %v5002_v7 }
 0xb9c   : > { %v4473_v58 = vadd.f32 1.4214138, %v4409_v36  ;;  %v4030_v36 = vmul.f32 0.3275911, %v9548_v61  ;;  %v7428_v44 = vpop.eup %7427  ;;  %v4600_v40 = vadd.f32 -0.28449672, %v4536_v0  ;;  %7437 = vpow2.f32 %v4994_v48 }
 0xb9d   : > { %v4475_v55 = vadd.f32 1.4214138, %v4411_v38  ;;  %v4726_v4 = vadd.f32 0.2548296, %v4662_v16  ;;  %v5108_v46 = vmul.f32 %v7426_v60, %v4788_v6  ;;  %7439 = vpow2.f32 %v4996_v21 }
 0xb9e   : > { %v4537_v49 = vmul.f32 %v9520_v47, %v4473_v58  ;;  %v4663_v58 = vmul.f32 %v9483_v53, %v4599_v19  ;;  %v4094_v33 = vadd.f32 1.0, %v4030_v36  ;;  %v9569_v62 = vadd.f32 %v9353_v8, %v9151_v45  ;;  %v9573_v19 = vpop.f32.mrb[75].mxu1  ;;  %v9584_v36 = vpop.f32.mrb[91].mxu0 }
 0xb9f   : > { %v4539_v63 = vmul.f32 %v9535_v10, %v4475_v55  ;;  %v9565_v9 = vpop.eup %7429  ;;  %v5109_v5 = vmul.f32 %v7428_v44, %v4789_v35  ;;  %v4664_v3 = vmul.f32 %v9490_v52, %v4600_v40  ;;  %7441 = vpow2.f32 %v5000_v13  ;;  %11360 = vst [vmem:[#allocation43_spill] sm:$0xff] %v9573_v19  ;;  %11361 = vst [vmem:[#allocation44_spill] sm:$0xff] %v9584_v36 }
 0xba0   : > { %v4601_v11 = vadd.f32 -0.28449672, %v4537_v49  ;;  %v4727_v17 = vadd.f32 0.2548296, %v4663_v58  ;;  %v4666_v49 = vmul.f32 %v9501_v26, %v4602_v32  ;;  %v9579_v60 = vadd.f32 %v9360_v34, %v9153_v43 }
 0xba1   : > { %v4603_v38 = vadd.f32 -0.28449672, %v4539_v63  ;;  %v7432_v16 = vpop.eup %7431  ;;  %v4790_v8 = vmul.f32 %v9452_v29, %v4726_v4  ;;  %v4284_v55 = vmul.f32 1.0614054, %v9565_v9  ;;  %7443 = vrcp.f32 %v4094_v33 }
 0xba2   : > { %v4665_v50 = vmul.f32 %v9520_v47, %v4601_v11  ;;  %v5172_v6 = vsub.f32 1.0, %v5108_v46  ;;  %v9589_v21 = vmul.f32 0.70710677, %v9569_v62  ;;  %v5173_v34 = vsub.f32 1.0, %v5109_v5 }
 0xba3   : > { %v4667_v0 = vmul.f32 %v9535_v10, %v4603_v38  ;;  %v4728_v11 = vadd.f32 0.2548296, %v4664_v3  ;;  %v7434_v29 = vpop.eup %7433  ;;  %v4791_v40 = vmul.f32 %v9483_v53, %v4727_v17  ;;  %v4730_v13 = vadd.f32 0.2548296, %v4666_v49 }
 0xba4   : > { %v4729_v56 = vadd.f32 0.2548296, %v4665_v50  ;;  %v9594_v63 = vand.u32 2147483647, %v9589_v21  ;;  %v9597_v58 = vmul.f32 0.70710677, %v9579_v60  ;;  %v5110_v32 = vmul.f32 %v7434_v29, %v4790_v8 }
 0xba5   : > { %v4731_v48 = vadd.f32 0.2548296, %v4667_v0  ;;  %v9600_v50 = vmul.f32 0.5, %v9381_v59  ;;  %v9603_v4 = vmul.f32 0.5, %v9385_v14  ;;  %v4348_v38 = vadd.f32 -1.4531521, %v4284_v55  ;;  %v7436_v33 = vpop.eup %7435 }
 0xba6   : > { %v4793_v7 = vmul.f32 %v9520_v47, %v4729_v56  ;;  %v4860_v47 = vsub.f32 0.0, %v9499_v31  ;;  %v9606_v46 = vmul.f32 0.5, %v9438_v51  ;;  %v4029_v56 = vmul.f32 0.3275911, %v9594_v63  ;;  %v7438_v5 = vpop.eup %7437 }
 0xba7   : > { %v4795_v35 = vmul.f32 %v9535_v10, %v4731_v48  ;;  %v5300_v10 = vsub.f32 0.0, %v5172_v6  ;;  %v5301_v3 = vsub.f32 0.0, %v5173_v34  ;;  %v9611_v59 = vand.u32 2147483647, %v9597_v58  ;;  %v7440_v49 = vpop.eup %7439 }
 0xba8   : > { %v5113_v44 = vmul.f32 %v7432_v16, %v4793_v7  ;;  %v4924_v53 = vmul.f32 %v4860_v47, %v9499_v31  ;;  %v5111_v14 = vmul.f32 %v7438_v5, %v4791_v40  ;;  %v4792_v7 = vmul.f32 %v9490_v52, %v4728_v11  ;;  %v9635_v40 = vpop.f32.mrb[76].mxu1 }
 0xba9   : > { %v5115_v17 = vmul.f32 %v7436_v33, %v4795_v35  ;;  %v4794_v51 = vmul.f32 %v9501_v26, %v4730_v13  ;;  %v4093_v16 = vadd.f32 1.0, %v4029_v56  ;;  %v7442_v8 = vpop.eup %7441  ;;  %v5174_v31 = vsub.f32 1.0, %v5110_v32  ;;  %11362 = vst [vmem:[#allocation45_spill] sm:$0xff] %v9635_v40  ;;  %v11384_v40 = vld [vmem:[#allocation31_spill] sm:$0xff] }
 0xbaa   : > { %v5177_v0 = vsub.f32 1.0, %v5113_v44  ;;  %v4412_v48 = vmul.f32 %v9565_v9, %v4348_v38  ;;  %v4031_v55 = vmul.f32 0.3275911, %v9611_v59  ;;  %v9620_v47 = vadd.f32 %v9362_v42, %v9143_v30  ;;  %v9637_v38 = vpop.f32.mrb[92].mxu0 }
 0xbab   : > { %v9624_v44 = vsel %vm5236_vm14, %v5172_v6, %v5300_v10  ;;  %v9628_v52 = vmul.f32 0.5, %v9457_v18  ;;  %7445 = vrcp.f32 %v4093_v16  ;;  %v9630_v26 = vpop.eup %7443  ;;  %v5365_v11 = vsel %vm5237_vm15, %v5173_v34, %v5301_v3  ;;  %11363 = vst [vmem:[#allocation46_spill] sm:$0xff] %v9637_v38  ;;  %v11374_v38 = vld [vmem:[#allocation41_spill] sm:$0xff] }
 0xbac   : > { %vm5239_vm2 = vcmp.ge.f32.partialorder %v9401_v25, 0.0  ;;  %v5305_v35 = vsub.f32 0.0, %v5177_v0  ;;  %v5179_v42 = vsub.f32 1.0, %v5115_v17  ;;  %v4095_v29 = vadd.f32 1.0, %v4031_v55  ;;  %v9670_v55 = vpop.f32.mrb[77].mxu1 }
 0xbad   : > { %v5175_v12 = vsub.f32 1.0, %v5111_v14  ;;  %v5112_v6 = vmul.f32 %v7440_v49, %v4792_v7  ;;  %v5114_v13 = vmul.f32 %v7442_v8, %v4794_v51  ;;  %v5004_v32 = vmul.f32 1.442695, %v4924_v53  ;;  %11364 = vst [vmem:[#allocation47_spill] sm:$0xff] %v9670_v55 }
 0xbae   : > { %v5302_v18 = vsub.f32 0.0, %v5174_v31  ;;  %v4476_v33 = vadd.f32 1.4214138, %v4412_v48  ;;  %7447 = vrcp.f32 %v4095_v29  ;;  %v9640_v10 = vmul.f32 0.70710677, %v9620_v47 }
 0xbaf   : > { %v5429_v23 = vadd.f32 1.0, %v5365_v11  ;;  %vm5243_vm3 = vcmp.ge.f32.partialorder %v9462_v37, 0.0  ;;  %v4286_v34 = vmul.f32 1.0614054, %v9630_v26  ;;  %v9646_v56 = vadd.f32 %v9370_v27, %v9147_v24 }
 0xbb0   : > { %vm5240_vm4 = vcmp.ge.f32.partialorder %v9404_v54, 0.0  ;;  %v5369_v53 = vsel %vm5241_vm1, %v5177_v0, %v5305_v35  ;;  %v5307_v5 = vsub.f32 0.0, %v5179_v42  ;;  %v9652_v3 = vand.u32 2147483647, %v9640_v10 }
 0xbb1   : > { %v9656_v17 = vadd.f32 %v9372_v39, %v9151_v45  ;;  %v5303_v49 = vsub.f32 0.0, %v5175_v12  ;;  %v5176_v14 = vsub.f32 1.0, %v5112_v6  ;;  %v5178_v7 = vsub.f32 1.0, %v5114_v13 }
 0xbb2   : > { %vm5242_vm5 = vcmp.ge.f32.partialorder %v9412_v41, 0.0  ;;  %7449 = vpow2.f32 %v5004_v32  ;;  %v5366_v27 = vsel %vm5238_vm0, %v5174_v31, %v5302_v18  ;;  %v4540_v22 = vmul.f32 %v9565_v9, %v4476_v33 }
 0xbb3   : > { %v4032_v0 = vmul.f32 0.3275911, %v9652_v3  ;;  %v9664_v51 = vmul.f32 0.70710677, %v9646_v56  ;;  %v5493_v16 = vmul.f32 %v5429_v23, %v9517_v28  ;;  %v5433_v39 = vadd.f32 1.0, %v5369_v53 }
 0xbb4   : > { %v4350_v8 = vadd.f32 -1.4531521, %v4286_v34  ;;  %v9668_v48 = vmul.f32 0.70710677, %v9656_v17  ;;  %v5371_v15 = vsel %vm5243_vm3, %v5179_v42, %v5307_v5  ;;  %v9679_v35 = vadd.f32 %v9376_v2, %v9153_v43 }
 0xbb5   : > { %v4096_v31 = vadd.f32 1.0, %v4032_v0  ;;  %v9675_v11 = vand.u32 2147483647, %v9664_v51  ;;  %v9681_v29 = vpop.eup %7445  ;;  %v5367_v28 = vsel %vm5239_vm2, %v5175_v12, %v5303_v49  ;;  %v5304_v6 = vsub.f32 0.0, %v5176_v14 }
 0xbb6   : > { %v5306_v13 = vsub.f32 0.0, %v5178_v7  ;;  %v9686_v32 = vand.u32 2147483647, %v9668_v48  ;;  %v4604_v37 = vadd.f32 -0.28449672, %v4540_v22  ;;  %v5435_v33 = vadd.f32 1.0, %v5371_v15 }
 0xbb7   : > { %v4285_v42 = vmul.f32 1.0614054, %v9681_v29  ;;  %7451 = vrcp.f32 %v4096_v31  ;;  %v4034_v18 = vmul.f32 0.3275911, %v9675_v11  ;;  %v4414_v2 = vmul.f32 %v9630_v26, %v4350_v8 }
 0xbb8   : > { %v4862_v23 = vsub.f32 0.0, %v9548_v61  ;;  %v4033_v34 = vmul.f32 0.3275911, %v9686_v32  ;;  %v9693_v25 = vpop.eup %7447  ;;  %v5497_v12 = vmul.f32 %v5433_v39, %v9606_v46  ;;  %v9697_v49 = vmul.f32 0.70710677, %v9679_v35 }
 0xbb9   : > { %v4349_v53 = vadd.f32 -1.4531521, %v4285_v42  ;;  %v4098_v5 = vadd.f32 1.0, %v4034_v18  ;;  %v5431_v22 = vadd.f32 1.0, %v5367_v28  ;;  %v5368_v0 = vsel %vm5240_vm4, %v5176_v14, %v5304_v6 }
 0xbba   : > { %v4287_v15 = vmul.f32 1.0614054, %v9693_v25  ;;  %v4097_v8 = vadd.f32 1.0, %v4033_v34  ;;  %v5370_v31 = vsel %vm5242_vm5, %v5178_v7, %v5306_v13  ;;  %v4668_v55 = vmul.f32 %v9565_v9, %v4604_v37 }
 0xbbb   : > { %7453 = vrcp.f32 %v4098_v5  ;;  %v9706_v46 = vand.u32 2147483647, %v9697_v49  ;;  %v5499_v42 = vmul.f32 %v5435_v33, %v9628_v52  ;;  %v4478_v18 = vadd.f32 1.4214138, %v4414_v2  ;;  %v9715_v5 = vpop.f32.mrb[93].mxu0 }
 0xbbc   : > { %v7450_v39 = vpop.eup %7449  ;;  %v4351_v28 = vadd.f32 -1.4531521, %v4287_v15  ;;  %7455 = vrcp.f32 %v4097_v8  ;;  %v5432_v54 = vadd.f32 1.0, %v5368_v0  ;;  %v4413_v14 = vmul.f32 %v9681_v29, %v4349_v53  ;;  %11365 = vst [vmem:[#allocation48_spill] sm:$0xff] %v9715_v5 }
 0xbbd   : > { %v4035_v6 = vmul.f32 0.3275911, %v9706_v46  ;;  %v5553_v34 = vpack.c.bf16 %v5497_v12, %v5493_v16  ;;  %v5428_v41 = vadd.f32 1.0, %v9624_v44  ;;  %v5495_v7 = vmul.f32 %v5431_v22, %v9600_v50 }
 0xbbe   : > { %v3833_v13 = vmul.f32 0.5, %v9389_v20  ;;  %v4926_v37 = vmul.f32 %v4862_v23, %v9548_v61  ;;  %v5430_v52 = vadd.f32 1.0, %v5366_v27  ;;  %v5434_v33 = vadd.f32 1.0, %v5370_v31  ;;  %v11366_v61 = vld [vmem:[#allocation9_spill] sm:$0xff]  ;;  %v11368_v31 = vld [vmem:[#allocation26_spill] sm:$0xff] }
 0xbbf   : > { %v4732_v2 = vadd.f32 0.2548296, %v4668_v55  ;;  %v4099_v15 = vadd.f32 1.0, %v4035_v6  ;;  %5876 = vmatprep.mubr.bf16.mxu1 %v5553_v34  ;;  %v4542_v53 = vmul.f32 %v9630_v26, %v4478_v18  ;;  %v4861_v0 = vsub.f32 0.0, %v9594_v63  ;;  %v11367_v55 = vld [vmem:[#allocation39_spill] sm:$0xff] }
 0xbc0   : > { %v4415_v16 = vmul.f32 %v9693_v25, %v4351_v28  ;;  %v5555_v44 = vpack.c.bf16 %v5499_v42, %v5495_v7  ;;  %v5496_v20 = vmul.f32 %v5432_v54, %v9603_v4  ;;  %v4477_v50 = vadd.f32 1.4214138, %v4413_v14 }
 0xbc1   : > { %v9720_v12 = vpop.eup %7451  ;;  %7457 = vrcp.f32 %v4099_v15  ;;  %v9725_v27 = vadd.f32 %v11366_v61, %v9143_v30  ;;  %v5492_v23 = vmul.f32 %v5428_v41, %v11367_v55  ;;  %v5008_v22 = vmul.f32 1.442695, %v4926_v37  ;;  %v11369_v37 = vld [vmem:[#allocation40_spill] sm:$0xff]  ;;  %v9756_v61 = vpop.f32.mrb[78].mxu1 }
 0xbc2   : > { %v4288_v8 = vmul.f32 1.0614054, %v9720_v12  ;;  %5973 = vmatprep.mubr.bf16.mxu0 %v5555_v44  ;;  %v9731_v18 = vadd.f32 %v11368_v31, %v9147_v24  ;;  %v5498_v42 = vmul.f32 %v5434_v33, %v3833_v13  ;;  %v4796_v28 = vmul.f32 %v9565_v9, %v4732_v2  ;;  %11370 = vst [vmem:[#allocation9_spill] sm:$0xff] %v9756_v61 }
 0xbc3   : > { %v4863_v4 = vsub.f32 0.0, %v9611_v59  ;;  %v9736_v54 = vmul.f32 0.70710677, %v9725_v27  ;;  %v4606_v14 = vadd.f32 -0.28449672, %v4542_v53  ;;  %v4925_v6 = vmul.f32 %v4861_v0, %v9594_v63 }
 0xbc4   : > { %v4479_v34 = vadd.f32 1.4214138, %v4415_v16  ;;  %v4352_v41 = vadd.f32 -1.4531521, %v4288_v8  ;;  %v5494_v15 = vmul.f32 %v5430_v52, %v11369_v37  ;;  %v4541_v44 = vmul.f32 %v9681_v29, %v4477_v50 }
 0xbc5   : > { %v9739_v7 = vpop.eup %7453  ;;  %v9744_v13 = vand.u32 2147483647, %v9736_v54  ;;  %v5552_v9 = vpack.c.bf16 %v5496_v20, %v5492_v23  ;;  %7459 = vpow2.f32 %v5008_v22  ;;  %v9751_v63 = vmul.f32 0.70710677, %v9731_v18 }
 0xbc6   : > { %v9746_v33 = vpop.eup %7455  ;;  %v4416_v2 = vmul.f32 %v9720_v12, %v4352_v41  ;;  %v4290_v53 = vmul.f32 1.0614054, %v9739_v7  ;;  %v5116_v0 = vmul.f32 %v7450_v39, %v4796_v28  ;;  %v4927_v16 = vmul.f32 %v4863_v4, %v9611_v59 }
 0xbc7   : > { %v4289_v52 = vmul.f32 1.0614054, %v9746_v33  ;;  %v4036_v50 = vmul.f32 0.3275911, %v9744_v13  ;;  %5877 = vmatmul.mubr.bf16.gmra.mrb[92].mxu1 %v5552_v9  ;;  %v4670_v20 = vmul.f32 %v9630_v26, %v4606_v14  ;;  %v5006_v55 = vmul.f32 1.442695, %v4925_v6 }
 0xbc8   : > { %v4543_v23 = vmul.f32 %v9693_v25, %v4479_v34  ;;  %v5554_v22 = vpack.c.bf16 %v5498_v42, %v5494_v15  ;;  %v4605_v8 = vadd.f32 -0.28449672, %v4541_v44  ;;  %v4480_v31 = vadd.f32 1.4214138, %v4416_v2 }
 0xbc9   : > { %v4864_v41 = vsub.f32 0.0, %v9652_v3  ;;  %v4100_v39 = vadd.f32 1.0, %v4036_v50  ;;  %v4354_v28 = vadd.f32 -1.4531521, %v4290_v53  ;;  %v4353_v59 = vadd.f32 -1.4531521, %v4289_v52 }
 0xbca   : > { %v9762_v4 = vand.u32 2147483647, %v9751_v63  ;;  %5974 = vmatmul.mubr.bf16.gmra.mrb[108].mxu0 %v5554_v22  ;;  %v5180_v9 = vsub.f32 1.0, %v5116_v0  ;;  %v5010_v61 = vmul.f32 1.442695, %v4927_v16  ;;  %v4669_v34 = vmul.f32 %v9681_v29, %v4605_v8  ;;  %v11371_v16 = vld [vmem:[#allocation36_spill] sm:$0xff] }
 0xbcb   : > { %v9764_v37 = vpop.eup %7457  ;;  %7461 = vrcp.f32 %v4100_v39  ;;  %v4734_v14 = vadd.f32 0.2548296, %v4670_v20  ;;  %v4607_v6 = vadd.f32 -0.28449672, %v4543_v23  ;;  %v4544_v15 = vmul.f32 %v9720_v12, %v4480_v31 }
 0xbcc   : > { %v4291_v42 = vmul.f32 1.0614054, %v9764_v37  ;;  %7463 = vpow2.f32 %v5006_v55  ;;  %v4038_v44 = vmul.f32 0.3275911, %v9762_v4  ;;  %v4928_v2 = vmul.f32 %v4864_v41, %v9652_v3 }
 0xbcd   : > { %v4418_v53 = vmul.f32 %v9739_v7, %v4354_v28  ;;  %v4417_v52 = vmul.f32 %v9746_v33, %v4353_v59  ;;  %v9774_v50 = vmul.f32 0.5, %v11371_v16  ;;  %v4866_v20 = vsub.f32 0.0, %v9675_v11  ;;  %v9780_v28 = vpop.f32.mrb[94].mxu0 }
 0xbce   : > { %v4355_v0 = vadd.f32 -1.4531521, %v4291_v42  ;;  %v4102_v23 = vadd.f32 1.0, %v4038_v44  ;;  %v4798_v55 = vmul.f32 %v9630_v26, %v4734_v14  ;;  %v4671_v8 = vmul.f32 %v9693_v25, %v4607_v6  ;;  %11372 = vst [vmem:[#allocation39_spill] sm:$0xff] %v9780_v28  ;;  %v11373_v44 = vld [vmem:[#allocation37_spill] sm:$0xff] }
 0xbcf   : > { %v7460_v22 = vpop.eup %7459  ;;  %7465 = vpow2.f32 %v5010_v61  ;;  %v4865_v31 = vsub.f32 0.0, %v9686_v32  ;;  %v5308_v3 = vsub.f32 0.0, %v5180_v9  ;;  %v4733_v41 = vadd.f32 0.2548296, %v4669_v34 }
 0xbd0   : > { %v4608_v39 = vadd.f32 -0.28449672, %v4544_v15  ;;  %7467 = vrcp.f32 %v4102_v23  ;;  %v5012_v59 = vmul.f32 1.442695, %v4928_v2  ;;  %v4482_v42 = vadd.f32 1.4214138, %v4418_v53 }
 0xbd1   : > { %v4481_v16 = vadd.f32 1.4214138, %v4417_v52  ;;  %v4419_v5 = vmul.f32 %v9764_v37, %v4355_v0  ;;  %vm5244_vm6 = vcmp.ge.f32.partialorder %v11373_v44, 0.0  ;;  %v9785_v26 = vmul.f32 0.5, %v11374_v38  ;;  %v11375_v2 = vld [vmem:[#allocation27_spill] sm:$0xff] }
 0xbd2   : > { %v9788_v61 = vmul.f32 0.5, %v9569_v62  ;;  %v4930_v14 = vmul.f32 %v4866_v20, %v9675_v11  ;;  %v5118_v6 = vmul.f32 %v7460_v22, %v4798_v55  ;;  %v4735_v34 = vadd.f32 0.2548296, %v4671_v8  ;;  %v9805_v22 = vpop.f32.mrb[79].mxu1 }
 0xbd3   : > { %v4929_v15 = vmul.f32 %v4865_v31, %v9686_v32  ;;  %v9794_v53 = vadd.f32 %v11375_v2, %v9151_v45  ;;  %v5372_v0 = vsel %vm5244_vm6, %v5180_v9, %v5308_v3  ;;  %v4797_v23 = vmul.f32 %v9681_v29, %v4733_v41  ;;  %11376 = vst [vmem:[#allocation26_spill] sm:$0xff] %v9805_v22 }
 0xbd4   : > { %v9800_v38 = vmul.f32 0.5, %v9579_v60  ;;  %v4672_v62 = vmul.f32 %v9720_v12, %v4608_v39  ;;  %7469 = vpow2.f32 %v5012_v59  ;;  %v4546_v11 = vmul.f32 %v9739_v7, %v4482_v42 }
 0xbd5   : > { %v9796_v52 = vpop.eup %7461  ;;  %v4545_v20 = vmul.f32 %v9746_v33, %v4481_v16  ;;  %v4483_v32 = vadd.f32 1.4214138, %v4419_v5  ;;  %vm5246_vm7 = vcmp.ge.f32.partialorder %v9542_v1, 0.0  ;;  %v9809_v9 = vmul.f32 0.5, %v9620_v47 }
 0xbd6   : > { %v7464_v55 = vpop.eup %7463  ;;  %v5016_v29 = vmul.f32 1.442695, %v4930_v14  ;;  %v4867_v60 = vsub.f32 0.0, %v9706_v46  ;;  %v9813_v8 = vmul.f32 0.70710677, %v9794_v53  ;;  %v5182_v31 = vsub.f32 1.0, %v5118_v6 }
 0xbd7   : > { %v4799_v3 = vmul.f32 %v9693_v25, %v4735_v34  ;;  %v5014_v41 = vmul.f32 1.442695, %v4929_v15  ;;  %v4292_v5 = vmul.f32 1.0614054, %v9796_v52  ;;  %v5436_v39 = vadd.f32 1.0, %v5372_v0  ;;  %v9824_v6 = vpop.f32.mrb[95].mxu0 }
 0xbd8   : > { %v5117_v59 = vmul.f32 %v7464_v55, %v4797_v23  ;;  %v4736_v42 = vadd.f32 0.2548296, %v4672_v62  ;;  %v9818_v16 = vand.u32 2147483647, %v9813_v8  ;;  %v9821_v44 = vmul.f32 0.5, %v9646_v56  ;;  %11377 = vst [vmem:[#allocation40_spill] sm:$0xff] %v9824_v6 }
 0xbd9   : > { %v7466_v47 = vpop.eup %7465  ;;  %v4610_v14 = vadd.f32 -0.28449672, %v4546_v11  ;;  %v4609_v2 = vadd.f32 -0.28449672, %v4545_v20  ;;  %v4547_v22 = vmul.f32 %v9764_v37, %v4483_v32  ;;  %7471 = vpow2.f32 %v5016_v29  ;;  %v11378_v55 = vld [vmem:[#allocation28_spill] sm:$0xff] }
 0xbda   : > { %v9826_v25 = vpop.eup %7467  ;;  %v9829_v34 = vmul.f32 0.5, %v9656_v17  ;;  %v4931_v15 = vmul.f32 %v4867_v60, %v9706_v46  ;;  %v4037_v0 = vmul.f32 0.3275911, %v9818_v16  ;;  %v5310_v23 = vsub.f32 0.0, %v5182_v31 }
 0xbdb   : > { %vm5245_vm8 = vcmp.ge.f32.partialorder %v9589_v21, 0.0  ;;  %v5119_v56 = vmul.f32 %v7466_v47, %v4799_v3  ;;  %7473 = vpow2.f32 %v5014_v41  ;;  %v4356_v62 = vadd.f32 -1.4531521, %v4292_v5  ;;  %v11380_v41 = vld [vmem:[#allocation29_spill] sm:$0xff]  ;;  %v9881_v21 = vpop.f32.mrb[96].mxu0 }
 0xbdc   : > { %v5181_v11 = vsub.f32 1.0, %v5117_v59  ;;  %v4800_v20 = vmul.f32 %v9720_v12, %v4736_v42  ;;  %v4101_v32 = vadd.f32 1.0, %v4037_v0  ;;  %v9837_v29 = vadd.f32 %v11378_v55, %v9153_v43  ;;  %11382 = vst [vmem:[#allocation41_spill] sm:$0xff] %v9881_v21 }
 0xbdd   : > { %v4674_v17 = vmul.f32 %v9739_v7, %v4610_v14  ;;  %v4673_v46 = vmul.f32 %v9746_v33, %v4609_v2  ;;  %v4611_v60 = vadd.f32 -0.28449672, %v4547_v22  ;;  %v4294_v6 = vmul.f32 1.0614054, %v9826_v25 }
 0xbde   : > { %v9843_v28 = vmul.f32 %v5436_v39, %v9774_v50  ;;  %v5018_v3 = vmul.f32 1.442695, %v4931_v15  ;;  %7475 = vrcp.f32 %v4101_v32  ;;  %v9847_v12 = vadd.f32 %v11380_v41, %v9143_v30  ;;  %v7470_v5 = vpop.eup %7469 }
 0xbdf   : > { %v5374_v59 = vsel %vm5246_vm7, %v5182_v31, %v5310_v23  ;;  %v5183_v42 = vsub.f32 1.0, %v5119_v56  ;;  %vm5247_vm9 = vcmp.ge.f32.partialorder %v9597_v58, 0.0  ;;  %v4420_v22 = vmul.f32 %v9796_v52, %v4356_v62 }
 0xbe0   : > { %11379 = vst [vmem:[#allocation36_spill] sm:$0xff] %v9843_v28  ;;  %v4868_v47 = vsub.f32 0.0, %v9744_v13  ;;  %v5309_v14 = vsub.f32 0.0, %v5181_v11  ;;  %v5120_v50 = vmul.f32 %v7470_v5, %v4800_v20  ;;  %v9855_v39 = vmul.f32 0.5, %v9679_v35 }
 0xbe1   : > { %v9858_v2 = vmul.f32 0.70710677, %v9837_v29  ;;  %v4738_v15 = vadd.f32 0.2548296, %v4674_v17  ;;  %v4737_v0 = vadd.f32 0.2548296, %v4673_v46  ;;  %v4675_v1 = vmul.f32 %v9764_v37, %v4611_v60 }
 0xbe2   : > { %v4358_v31 = vadd.f32 -1.4531521, %v4294_v6  ;;  %v5438_v23 = vadd.f32 1.0, %v5374_v59  ;;  %7477 = vpow2.f32 %v5018_v3  ;;  %v9865_v62 = vmul.f32 0.70710677, %v9847_v12  ;;  %v9876_v3 = vpop.f32.mrb[80].mxu1 }
 0xbe3   : > { %v9862_v56 = vand.u32 2147483647, %v9858_v2  ;;  %v5311_v20 = vsub.f32 0.0, %v5183_v42  ;;  %v4484_v32 = vadd.f32 1.4214138, %v4420_v22  ;;  %v4932_v35 = vmul.f32 %v4868_v47, %v9744_v13  ;;  %v7472_v41 = vpop.eup %7471  ;;  %11381 = vst [vmem:[#allocation37_spill] sm:$0xff] %v9876_v3 }
 0xbe4   : > { %v4870_v55 = vsub.f32 0.0, %v9762_v4  ;;  %v5373_v17 = vsel %vm5245_vm8, %v5181_v11, %v5309_v14  ;;  %v5184_v46 = vsub.f32 1.0, %v5120_v50  ;;  %vm5248_vm10 = vcmp.ge.f32.partialorder %v9640_v10, 0.0  ;;  %v11383_v50 = vld [vmem:[#allocation30_spill] sm:$0xff] }
 0xbe5   : > { %v4039_v6 = vmul.f32 0.3275911, %v9862_v56  ;;  %v9874_v60 = vand.u32 2147483647, %v9865_v62  ;;  %v7474_v5 = vpop.eup %7473  ;;  %v4802_v59 = vmul.f32 %v9739_v7, %v4738_v15  ;;  %v4801_v13 = vmul.f32 %v9746_v33, %v4737_v0 }
 0xbe6   : > { %v4739_v22 = vadd.f32 0.2548296, %v4675_v1  ;;  %v4422_v47 = vmul.f32 %v9826_v25, %v4358_v31  ;;  %v9886_v28 = vadd.f32 %v11383_v50, %v9147_v24  ;;  %v9890_v3 = vadd.f32 %v11384_v40, %v9151_v45 }
 0xbe7   : > { %v4103_v11 = vadd.f32 1.0, %v4039_v6  ;;  %v4040_v14 = vmul.f32 0.3275911, %v9874_v60  ;;  %v9893_v7 = vmul.f32 0.5, %v9725_v27  ;;  %v5020_v33 = vmul.f32 1.442695, %v4932_v35 }
 0xbe8   : > { %v9896_v15 = vmul.f32 0.5, %v9731_v18  ;;  %v4934_v0 = vmul.f32 %v4870_v55, %v9762_v4  ;;  %v9899_v1 = vpop.eup %7475  ;;  %v5375_v31 = vsel %vm5247_vm9, %v5183_v42, %v5311_v20  ;;  %v4548_v6 = vmul.f32 %v9796_v52, %v4484_v32  ;;  %v9914_v32 = vpop.f32.mrb[81].mxu1 }
 0xbe9   : > { %7479 = vrcp.f32 %v4103_v11  ;;  %v4104_v50 = vadd.f32 1.0, %v4040_v14  ;;  %v5437_v40 = vadd.f32 1.0, %v5373_v17  ;;  %v5312_v21 = vsub.f32 0.0, %v5184_v46  ;;  %11385 = vst [vmem:[#allocation27_spill] sm:$0xff] %v9914_v32 }
 0xbea   : > { %v5122_v36 = vmul.f32 %v7472_v41, %v4802_v59  ;;  %v4803_v27 = vmul.f32 %v9764_v37, %v4739_v22  ;;  %v9905_v35 = vmul.f32 %v7474_v5, %v4801_v13  ;;  %v4486_v18 = vadd.f32 1.4214138, %v4422_v47 }
 0xbeb   : > { %v9908_v19 = vmul.f32 0.70710677, %v9886_v28  ;;  %v9911_v4 = vmul.f32 0.70710677, %v9890_v3  ;;  %v5439_v58 = vadd.f32 1.0, %v5375_v31  ;;  %7481 = vrcp.f32 %v4104_v50 }
 0xbec   : > { %v5024_v42 = vmul.f32 1.442695, %v4934_v0  ;;  %v4293_v20 = vmul.f32 1.0614054, %v9899_v1  ;;  %v7478_v55 = vpop.eup %7477  ;;  %v9917_v41 = vmul.f32 %v5438_v23, %v9785_v26  ;;  %vm5250_vm11 = vcmp.ge.f32.partialorder %v9664_v51, 0.0 }
 0xbed   : > { %v4612_v37 = vadd.f32 -0.28449672, %v4548_v6  ;;  %v9921_v17 = vand.u32 2147483647, %v9908_v19  ;;  %v9924_v5 = vand.u32 2147483647, %v9911_v4  ;;  %v5376_v59 = vsel %vm5248_vm10, %v5184_v46, %v5312_v21 }
 0xbee   : > { %11386 = vst [vmem:[#allocation28_spill] sm:$0xff] %v9917_v41  ;;  %v5186_v13 = vsub.f32 1.0, %v5122_v36  ;;  %v5123_v22 = vmul.f32 %v7478_v55, %v4803_v27  ;;  %7483 = vpow2.f32 %v5020_v33  ;;  %v5185_v47 = vsub.f32 1.0, %v9905_v35  ;;  %v11389_v36 = vld [vmem:[#allocation32_spill] sm:$0xff]  ;;  %v11391_v55 = vld [vmem:[#allocation33_spill] sm:$0xff] }
 0xbef   : > { %vm5249_vm12 = vcmp.ge.f32.partialorder %v9668_v48, 0.0  ;;  %v4550_v26 = vmul.f32 %v9826_v25, %v4486_v18  ;;  %v4042_v23 = vmul.f32 0.3275911, %v9921_v17  ;;  %v4041_v11 = vmul.f32 0.3275911, %v9924_v5 }
 0xbf0   : > { %v9934_v14 = vmul.f32 %v5437_v40, %v9788_v61  ;;  %v9937_v0 = vmul.f32 %v5439_v58, %v9800_v38  ;;  %v4357_v10 = vadd.f32 -1.4531521, %v4293_v20  ;;  %v9941_v46 = vadd.f32 %v11389_v36, %v9153_v43  ;;  %v9946_v40 = vpop.f32.mrb[97].mxu0 }
 0xbf1   : > { %vm5251_vm13 = vcmp.ge.f32.partialorder %v9697_v49, 0.0  ;;  %v4676_v21 = vmul.f32 %v9796_v52, %v4612_v37  ;;  %7485 = vpow2.f32 %v5024_v42  ;;  %v4106_v33 = vadd.f32 1.0, %v4042_v23  ;;  %11390 = vst [vmem:[#allocation31_spill] sm:$0xff] %v9946_v40 }
 0xbf2   : > { %11387 = vst [vmem:[#allocation29_spill] sm:$0xff] %v9934_v14  ;;  %11388 = vst [vmem:[#allocation30_spill] sm:$0xff] %v9937_v0  ;;  %v4105_v31 = vadd.f32 1.0, %v4041_v11  ;;  %v5440_v6 = vadd.f32 1.0, %v5376_v59  ;;  %v5314_v50 = vsub.f32 0.0, %v5186_v13  ;;  %v5187_v27 = vsub.f32 1.0, %v5123_v22 }
 0xbf3   : > { %v4869_v61 = vsub.f32 0.0, %v9818_v16  ;;  %v9948_v38 = vpop.eup %7479  ;;  %v5313_v35 = vsub.f32 0.0, %v5185_v47  ;;  %v4614_v18 = vadd.f32 -0.28449672, %v4550_v26  ;;  %7487 = vrcp.f32 %v4106_v33 }
 0xbf4   : > { %v9951_v58 = vmul.f32 0.70710677, %v9941_v46  ;;  %v4421_v20 = vmul.f32 %v9899_v1, %v4357_v10  ;;  %v4295_v42 = vmul.f32 1.0614054, %v9948_v38  ;;  %7489 = vrcp.f32 %v4105_v31 }
 0xbf5   : > { %v9957_v37 = vadd.f32 %v11391_v55, %v9143_v30  ;;  %v4740_v59 = vadd.f32 0.2548296, %v4676_v21  ;;  %v9960_v22 = vmul.f32 0.5, %v9794_v53  ;;  %v9963_v23 = vmul.f32 0.5, %v9837_v29  ;;  %v9968_v11 = vpop.eup %7481 }
 0xbf6   : > { %v9966_v26 = vand.u32 2147483647, %v9951_v58  ;;  %v9971_v10 = vmul.f32 %v5440_v6, %v9809_v9  ;;  %v5378_v36 = vsel %vm5250_vm11, %v5186_v13, %v5314_v50  ;;  %v5315_v33 = vsub.f32 0.0, %v5187_v27 }
 0xbf7   : > { %v4359_v31 = vadd.f32 -1.4531521, %v4295_v42  ;;  %v4678_v21 = vmul.f32 %v9826_v25, %v4614_v18  ;;  %v4933_v53 = vmul.f32 %v4869_v61, %v9818_v16  ;;  %v4296_v29 = vmul.f32 1.0614054, %v9968_v11  ;;  %v11394_v16 = vld [vmem:[#allocation34_spill] sm:$0xff] }
 0xbf8   : > { %11392 = vst [vmem:[#allocation32_spill] sm:$0xff] %v9971_v10  ;;  %v4043_v55 = vmul.f32 0.3275911, %v9966_v26  ;;  %v7484_v41 = vpop.eup %7483  ;;  %v5377_v0 = vsel %vm5249_vm12, %v5185_v47, %v5313_v35  ;;  %v4485_v14 = vadd.f32 1.4214138, %v4421_v20  ;;  %v4804_v13 = vmul.f32 %v9796_v52, %v4740_v59  ;;  %v9998_v59 = vpop.f32.mrb[82].mxu1 }
 0xbf9   : > { %v4423_v9 = vmul.f32 %v9948_v38, %v4359_v31  ;;  %v9983_v51 = vmul.f32 0.70710677, %v9957_v37  ;;  %v4360_v6 = vadd.f32 -1.4531521, %v4296_v29  ;;  %v9988_v61 = vadd.f32 %v11394_v16, %v9147_v24  ;;  %11395 = vst [vmem:[#allocation34_spill] sm:$0xff] %v9998_v59 }
 0xbfa   : > { %v4107_v50 = vadd.f32 1.0, %v4043_v55  ;;  %v5442_v18 = vadd.f32 1.0, %v5378_v36  ;;  %v5379_v42 = vsel %vm5251_vm13, %v5187_v27, %v5315_v33  ;;  %v4871_v48 = vsub.f32 0.0, %v9862_v56 }
 0xbfb   : > { %11393 = vst [vmem:[#allocation33_spill] sm:$0xff] %v9983_v51  ;;  %v9994_v47 = vand.u32 2147483647, %v9983_v51  ;;  %v7486_v35 = vpop.eup %7485  ;;  %v4742_v20 = vadd.f32 0.2548296, %v4678_v21  ;;  %v4424_v31 = vmul.f32 %v9968_v11, %v4360_v6  ;;  %v4872_v52 = vsub.f32 0.0, %v9874_v60 }
 0xbfc   : > { %7491 = vrcp.f32 %v4107_v50  ;;  %v5441_v29 = vadd.f32 1.0, %v5377_v0  ;;  %v4549_v36 = vmul.f32 %v9899_v1, %v4485_v14  ;;  %v4487_v55 = vadd.f32 1.4214138, %v4423_v9 }
 0xbfd   : > { %v4044_v49 = vmul.f32 0.3275911, %v9994_v47  ;;  %v10002_v27 = vpop.eup %7487  ;;  %v5124_v33 = vmul.f32 %v7484_v41, %v4804_v13  ;;  %v5022_v16 = vmul.f32 1.442695, %v4933_v53  ;;  %v4488_v10 = vadd.f32 1.4214138, %v4424_v31 }
 0xbfe   : > { %v10005_v21 = vmul.f32 0.70710677, %v9988_v61  ;;  %v10007_v6 = vpop.eup %7489  ;;  %v10010_v50 = vmul.f32 %v5442_v18, %v9821_v44  ;;  %v5443_v59 = vadd.f32 1.0, %v5379_v42  ;;  %v4935_v0 = vmul.f32 %v4871_v48, %v9862_v56 }
 0xbff   : > { %v4298_v14 = vmul.f32 1.0614054, %v10002_v27  ;;  %v4806_v9 = vmul.f32 %v9826_v25, %v4742_v20  ;;  %v4936_v40 = vmul.f32 %v4872_v52, %v9874_v60  ;;  %v4297_v41 = vmul.f32 1.0614054, %v10007_v6  ;;  %v10031_v20 = vpop.f32.mrb[98].mxu0 }
 0xc00   : > { %11396 = vst [vmem:[#allocation49_spill] sm:$0xff] %v10010_v50  ;;  %v4108_v53 = vadd.f32 1.0, %v4044_v49  ;;  %v4613_v13 = vadd.f32 -0.28449672, %v4549_v36  ;;  %v4551_v31 = vmul.f32 %v9948_v38, %v4487_v55  ;;  %v10019_v51 = vand.u32 2147483647, %v10005_v21 }
 0xc01   : > { %v4362_v32 = vadd.f32 -1.4531521, %v4298_v14  ;;  %v5188_v44 = vsub.f32 1.0, %v5124_v33  ;;  %vm5252_vm14 = vcmp.ge.f32.partialorder %v9736_v54, 0.0  ;;  %v4552_v56 = vmul.f32 %v9968_v11, %v4488_v10  ;;  %11398 = vst [vmem:[#allocation51_spill] sm:$0xff] %v10031_v20  ;;  %v11400_v10 = vld [vmem:[#allocation35_spill] sm:$0xff] }
 0xc02   : > { %v4361_v18 = vadd.f32 -1.4531521, %v4297_v41  ;;  %7493 = vrcp.f32 %v4108_v53  ;;  %v10024_v25 = vmul.f32 %v5441_v29, %v9829_v34  ;;  %v10027_v60 = vmul.f32 0.5, %v9847_v12  ;;  %v10072_v50 = vpop.f32.mrb[83].mxu1 }
 0xc03   : > { %v4426_v42 = vmul.f32 %v10002_v27, %v4362_v32  ;;  %v4046_v48 = vmul.f32 0.3275911, %v10019_v51  ;;  %v10034_v52 = vmul.f32 %v5443_v59, %v9855_v39  ;;  %v5126_v36 = vmul.f32 %v7486_v35, %v4806_v9 }
 0xc04   : > { %11397 = vst [vmem:[#allocation50_spill] sm:$0xff] %v10024_v25  ;;  %7495 = vpow2.f32 %v5022_v16  ;;  %v10038_v55 = vadd.f32 %v11400_v10, %v9151_v45  ;;  %v4677_v34 = vmul.f32 %v9899_v1, %v4613_v13  ;;  %v4615_v29 = vadd.f32 -0.28449672, %v4551_v31 }
 0xc05   : > { %11399 = vst [vmem:[#allocation52_spill] sm:$0xff] %v10034_v52  ;;  %v5026_v12 = vmul.f32 1.442695, %v4935_v0  ;;  %v4110_v49 = vadd.f32 1.0, %v4046_v48  ;;  %v5316_v32 = vsub.f32 0.0, %v5188_v44  ;;  %v4425_v53 = vmul.f32 %v10007_v6, %v4361_v18 }
 0xc06   : > { %v10041_v33 = vpop.eup %7491  ;;  %v4616_v14 = vadd.f32 -0.28449672, %v4552_v56  ;;  %v5028_v41 = vmul.f32 1.442695, %v4936_v40  ;;  %v4490_v39 = vadd.f32 1.4214138, %v4426_v42  ;;  %v4679_v31 = vmul.f32 %v9948_v38, %v4615_v29 }
 0xc07   : > { %v4874_v35 = vsub.f32 0.0, %v9921_v17  ;;  %v4299_v59 = vmul.f32 1.0614054, %v10041_v33  ;;  %7497 = vrcp.f32 %v4110_v49  ;;  %v5190_v16 = vsub.f32 1.0, %v5126_v36 }
 0xc08   : > { %vm5254_vm15 = vcmp.ge.f32.partialorder %v9751_v63, 0.0  ;;  %v10048_v9 = vmul.f32 0.5, %v9886_v28  ;;  %v4873_v0 = vsub.f32 0.0, %v9924_v5  ;;  %v10052_v13 = vmul.f32 0.70710677, %v10038_v55 }
 0xc09   : > { %v4741_v40 = vadd.f32 0.2548296, %v4677_v34  ;;  %7499 = vpow2.f32 %v5026_v12  ;;  %v4363_v56 = vadd.f32 -1.4531521, %v4299_v59  ;;  %v4680_v18 = vmul.f32 %v9968_v11, %v4616_v14 }
 0xc0a   : > { %7501 = vpow2.f32 %v5028_v41  ;;  %v4489_v42 = vadd.f32 1.4214138, %v4425_v53  ;;  %v10057_v48 = vand.u32 2147483647, %v10052_v13  ;;  %v5380_v28 = vsel %vm5252_vm14, %v5188_v44, %v5316_v32 }
 0xc0b   : > { %v4554_v36 = vmul.f32 %v10002_v27, %v4490_v39  ;;  %v4938_v10 = vmul.f32 %v4874_v35, %v9921_v17  ;;  %v4427_v34 = vmul.f32 %v10041_v33, %v4363_v56  ;;  %v5318_v29 = vsub.f32 0.0, %v5190_v16 }
 0xc0c   : > { %v10064_v49 = vpop.eup %7493  ;;  %v4937_v12 = vmul.f32 %v4873_v0, %v9924_v5  ;;  %v4875_v14 = vsub.f32 0.0, %v9966_v26  ;;  %v4045_v41 = vmul.f32 0.3275911, %v10057_v48  ;;  %v4805_v53 = vmul.f32 %v9899_v1, %v4741_v40 }
 0xc0d   : > { %v4743_v59 = vadd.f32 0.2548296, %v4679_v31  ;;  %v4491_v54 = vadd.f32 1.4214138, %v4427_v34  ;;  %v4300_v44 = vmul.f32 1.0614054, %v10064_v49  ;;  %v4553_v35 = vmul.f32 %v10007_v6, %v4489_v42 }
 0xc0e   : > { %v7496_v32 = vpop.eup %7495  ;;  %v5444_v39 = vadd.f32 1.0, %v5380_v28  ;;  %v4744_v17 = vadd.f32 0.2548296, %v4680_v18  ;;  %v4109_v56 = vadd.f32 1.0, %v4045_v41  ;;  %v4618_v52 = vadd.f32 -0.28449672, %v4554_v36 }
 0xc0f   : > { %v5032_v5 = vmul.f32 1.442695, %v4938_v10  ;;  %v4555_v0 = vmul.f32 %v10041_v33, %v4491_v54  ;;  %v4364_v25 = vadd.f32 -1.4531521, %v4300_v44  ;;  %v10076_v20 = vmul.f32 0.5, %v9890_v3  ;;  %v11401_v36 = vld [vmem:[#allocation38_spill] sm:$0xff] }
 0xc10   : > { %v5030_v1 = vmul.f32 1.442695, %v4937_v12  ;;  %v4939_v40 = vmul.f32 %v4875_v14, %v9966_v26  ;;  %7503 = vrcp.f32 %v4109_v56  ;;  %v5382_v18 = vsel %vm5254_vm15, %v5190_v16, %v5318_v29 }
 0xc11   : > { %v10079_v31 = vpop.eup %7497  ;;  %v10083_v42 = vmul.f32 %v7496_v32, %v4805_v53  ;;  %v4807_v28 = vmul.f32 %v9948_v38, %v4743_v59  ;;  %v10088_v10 = vadd.f32 %v11401_v36, %v9153_v43  ;;  %v10091_v3 = vmul.f32 %v5444_v39, %v9893_v7  ;;  %v10097_v38 = vpop.f32.mrb[99].mxu0 }
 0xc12   : > { %v4808_v34 = vmul.f32 %v9968_v11, %v4744_v17  ;;  %v4617_v26 = vadd.f32 -0.28449672, %v4553_v35  ;;  %v4302_v12 = vmul.f32 1.0614054, %v10079_v31  ;;  %v4682_v63 = vmul.f32 %v10002_v27, %v4618_v52  ;;  %11403 = vst [vmem:[#allocation38_spill] sm:$0xff] %v10097_v38  ;;  %v11404_v17 = vld [vmem:[#allocation42_spill] sm:$0xff] }
 0xc13   : > { %11402 = vst [vmem:[#allocation35_spill] sm:$0xff] %v10091_v3  ;;  %v7500_v14 = vpop.eup %7499  ;;  %7505 = vpow2.f32 %v5032_v5  ;;  %v4619_v16 = vadd.f32 -0.28449672, %v4555_v0  ;;  %v4428_v29 = vmul.f32 %v10064_v49, %v4364_v25  ;;  %v5446_v53 = vadd.f32 1.0, %v5382_v18 }
 0xc14   : > { %v7502_v41 = vpop.eup %7501  ;;  %7507 = vpow2.f32 %v5030_v1  ;;  %v5034_v59 = vmul.f32 1.442695, %v4939_v40  ;;  %v4366_v7 = vadd.f32 -1.4531521, %v4302_v12  ;;  %v5189_v54 = vsub.f32 1.0, %v10083_v42 }
 0xc15   : > { %v5127_v11 = vmul.f32 %v7500_v14, %v4807_v28  ;;  %v4876_v44 = vsub.f32 0.0, %v9994_v47  ;;  %v10102_v32 = vmul.f32 0.70710677, %v10088_v10  ;;  %vm5253_vm0 = vcmp.ge.f32.partialorder %v9813_v8, 0.0 }
 0xc16   : > { %v5128_v52 = vmul.f32 %v7502_v41, %v4808_v34  ;;  %v4681_v25 = vmul.f32 %v10007_v6, %v4617_v26  ;;  %v4430_v39 = vmul.f32 %v10079_v31, %v4366_v7  ;;  %v10109_v35 = vadd.f32 %v11404_v17, %v9143_v30 }
 0xc17   : > { %v4746_v56 = vadd.f32 0.2548296, %v4682_v63  ;;  %v4683_v5 = vmul.f32 %v10041_v33, %v4619_v16  ;;  %v4492_v0 = vadd.f32 1.4214138, %v4428_v29  ;;  %v10113_v1 = vand.u32 2147483647, %v10102_v32 }
 0xc18   : > { %v10116_v40 = vmul.f32 %v5446_v53, %v9896_v15  ;;  %vm5255_vm1 = vcmp.ge.f32.partialorder %v9858_v2, 0.0  ;;  %v10120_v18 = vmul.f32 0.5, %v9941_v46  ;;  %v10123_v42 = vmul.f32 0.5, %v9957_v37 }
 0xc19   : > { %v4878_v28 = vsub.f32 0.0, %v10019_v51  ;;  %v5191_v36 = vsub.f32 1.0, %v5127_v11  ;;  %vm5256_vm2 = vcmp.ge.f32.partialorder %v9865_v62, 0.0  ;;  %7509 = vpow2.f32 %v5034_v59 }
 0xc1a   : > { %11405 = vst [vmem:[#allocation42_spill] sm:$0xff] %v10116_v40  ;;  %v4494_v34 = vadd.f32 1.4214138, %v4430_v39  ;;  %v4047_v26 = vmul.f32 0.3275911, %v10113_v1  ;;  %v10128_v12 = vpop.eup %7503  ;;  %v5192_v15 = vsub.f32 1.0, %v5128_v52  ;;  %v4940_v63 = vmul.f32 %v4876_v44, %v9994_v47 }
 0xc1b   : > { %v4745_v14 = vadd.f32 0.2548296, %v4681_v25  ;;  %v10132_v46 = vmul.f32 0.70710677, %v10109_v35  ;;  %v5317_v37 = vsub.f32 0.0, %v5189_v54  ;;  %v4810_v16 = vmul.f32 %v10002_v27, %v4746_v56  ;;  %v10141_v52 = vpop.f32.mrb[84].mxu1 }
 0xc1c   : > { %v4747_v29 = vadd.f32 0.2548296, %v4683_v5  ;;  %v4556_v41 = vmul.f32 %v10064_v49, %v4492_v0  ;;  %v4942_v53 = vmul.f32 %v4878_v28, %v10019_v51  ;;  %v4301_v59 = vmul.f32 1.0614054, %v10128_v12  ;;  %11406 = vst [vmem:[#allocation53_spill] sm:$0xff] %v10141_v52  ;;  %v10152_v0 = vpop.f32.mrb[100].mxu0 }
 0xc1d   : > { %v4111_v7 = vadd.f32 1.0, %v4047_v26  ;;  %v10139_v11 = vand.u32 2147483647, %v10132_v46  ;;  %v7506_v47 = vpop.eup %7505  ;;  %v5319_v44 = vsub.f32 0.0, %v5191_v36  ;;  %v10144_v25 = vmul.f32 0.5, %v9988_v61 }
 0xc1e   : > { %v4558_v27 = vmul.f32 %v10079_v31, %v4494_v34  ;;  %v10148_v39 = vmul.f32 0.5, %v10038_v55  ;;  %v7508_v17 = vpop.eup %7507  ;;  %v5320_v51 = vsub.f32 0.0, %v5192_v15  ;;  %v4809_v56 = vmul.f32 %v10007_v6, %v4745_v14 }
 0xc1f   : > { %7511 = vrcp.f32 %v4111_v7  ;;  %v4048_v5 = vmul.f32 0.3275911, %v10139_v11  ;;  %v5381_v28 = vsel %vm5253_vm0, %v5189_v54, %v5317_v37  ;;  %v5130_v26 = vmul.f32 %v7506_v47, %v4810_v16 }
 0xc20   : > { %v4620_v61 = vadd.f32 -0.28449672, %v4556_v41  ;;  %v5036_v40 = vmul.f32 1.442695, %v4940_v63  ;;  %v4811_v34 = vmul.f32 %v10041_v33, %v4747_v29  ;;  %v5040_v3 = vmul.f32 1.442695, %v4942_v53 }
 0xc21   : > { %v4365_v55 = vadd.f32 -1.4531521, %v4301_v59  ;;  %v4112_v52 = vadd.f32 1.0, %v4048_v5  ;;  %v5383_v38 = vsel %vm5255_vm1, %v5191_v36, %v5319_v44  ;;  %v4622_v6 = vadd.f32 -0.28449672, %v4558_v27  ;;  %v11407_v33 = vld [vmem:[#allocation43_spill] sm:$0xff] }
 0xc22   : > { %v4877_v14 = vsub.f32 0.0, %v10057_v48  ;;  %v10162_v7 = vadd.f32 %v9552_v57, %v9147_v24  ;;  %v5384_v8 = vsel %vm5256_vm2, %v5192_v15, %v5320_v51  ;;  %vm5258_vm3 = vcmp.ge.f32.partialorder %v9908_v19, 0.0  ;;  %v10190_v27 = vpop.f32.mrb[85].mxu1 }
 0xc23   : > { %v5129_v54 = vmul.f32 %v7508_v17, %v4809_v56  ;;  %7513 = vrcp.f32 %v4112_v52  ;;  %v10169_v63 = vadd.f32 %v11407_v33, %v9151_v45  ;;  %v7510_v2 = vpop.eup %7509  ;;  %v5445_v36 = vadd.f32 1.0, %v5381_v28  ;;  %v10199_v56 = vpop.f32.mrb[101].mxu0 }
 0xc24   : > { %v5194_v37 = vsub.f32 1.0, %v5130_v26  ;;  %v4684_v16 = vmul.f32 %v10064_v49, %v4620_v61  ;;  %7515 = vpow2.f32 %v5036_v40  ;;  %v5131_v29 = vmul.f32 %v7510_v2, %v4811_v34  ;;  %11409 = vst [vmem:[#allocation54_spill] sm:$0xff] %v10199_v56  ;;  %v11410_v26 = vld [vmem:[#allocation44_spill] sm:$0xff] }
 0xc25   : > { %v4429_v57 = vmul.f32 %v10128_v12, %v4365_v55  ;;  %v10174_v62 = vmul.f32 0.70710677, %v10162_v7  ;;  %v10177_v15 = vmul.f32 0.70710677, %v10169_v63  ;;  %v5447_v41 = vadd.f32 1.0, %v5383_v38 }
 0xc26   : > { %v10179_v53 = vadd.f32 1.0, %v5384_v8  ;;  %vm5257_vm4 = vcmp.ge.f32.partialorder %v9911_v4, 0.0  ;;  %v4686_v59 = vmul.f32 %v10079_v31, %v4622_v6  ;;  %7517 = vpow2.f32 %v5040_v3 }
 0xc27   : > { %v5193_v52 = vsub.f32 1.0, %v5129_v54  ;;  %v4941_v40 = vmul.f32 %v4877_v14, %v10057_v48  ;;  %v10185_v47 = vmul.f32 0.5, %v10088_v10  ;;  %v10188_v44 = vand.u32 2147483647, %v10174_v62 }
 0xc28   : > { %v10193_v38 = vmul.f32 %v5445_v36, %v9960_v22  ;;  %v5322_v17 = vsub.f32 0.0, %v5194_v37  ;;  %vm5259_vm5 = vcmp.ge.f32.partialorder %v9951_v58, 0.0  ;;  %v4748_v51 = vadd.f32 0.2548296, %v4684_v16  ;;  %v11415_v58 = vld [vmem:[#allocation46_spill] sm:$0xff] }
 0xc29   : > { %v10197_v3 = vand.u32 2147483647, %v10177_v15  ;;  %v10201_v48 = vpop.eup %7511  ;;  %v5195_v10 = vsub.f32 1.0, %v5131_v29  ;;  %v4493_v5 = vadd.f32 1.4214138, %v4429_v57  ;;  %v10206_v61 = vadd.f32 %v11410_v26, %v9153_v43 }
 0xc2a   : > { %11408 = vst [vmem:[#allocation43_spill] sm:$0xff] %v10193_v38  ;;  %v4050_v28 = vmul.f32 0.3275911, %v10188_v44  ;;  %v10209_v22 = vmul.f32 %v5447_v41, %v9963_v23  ;;  %v4750_v34 = vadd.f32 0.2548296, %v4686_v59  ;;  %v5321_v14 = vsub.f32 0.0, %v5193_v52 }
 0xc2b   : > { %v4303_v55 = vmul.f32 1.0614054, %v10201_v48  ;;  %v4049_v6 = vmul.f32 0.3275911, %v10197_v3  ;;  %v5038_v8 = vmul.f32 1.442695, %v4941_v40  ;;  %v5386_v2 = vsel %vm5258_vm3, %v5194_v37, %v5322_v17 }
 0xc2c   : > { %11411 = vst [vmem:[#allocation44_spill] sm:$0xff] %v10209_v22  ;;  %v4879_v54 = vsub.f32 0.0, %v10113_v1  ;;  %v4114_v33 = vadd.f32 1.0, %v4050_v28  ;;  %v4812_v36 = vmul.f32 %v10064_v49, %v4748_v51  ;;  %v5323_v23 = vsub.f32 0.0, %v5195_v10  ;;  %v11412_v49 = vld [vmem:[#allocation45_spill] sm:$0xff] }
 0xc2d   : > { %v4367_v16 = vadd.f32 -1.4531521, %v4303_v55  ;;  %v4113_v29 = vadd.f32 1.0, %v4049_v6  ;;  %v10217_v57 = vpop.eup %7513  ;;  %v4557_v41 = vmul.f32 %v10128_v12, %v4493_v5  ;;  %v10221_v59 = vmul.f32 0.70710677, %v10206_v61 }
 0xc2e   : > { %7519 = vrcp.f32 %v4114_v33  ;;  %v7516_v40 = vpop.eup %7515  ;;  %v4814_v26 = vmul.f32 %v10079_v31, %v4750_v34  ;;  %v4304_v19 = vmul.f32 1.0614054, %v10217_v57  ;;  %v10228_v37 = vadd.f32 %v11412_v49, %v9143_v30 }
 0xc2f   : > { %v4431_v28 = vmul.f32 %v10201_v48, %v4367_v16  ;;  %v5385_v17 = vsel %vm5257_vm4, %v5193_v52, %v5321_v14  ;;  %7521 = vpow2.f32 %v5038_v8  ;;  %v4943_v51 = vmul.f32 %v4879_v54, %v10113_v1  ;;  %v10240_v52 = vpop.f32.mrb[86].mxu1 }
 0xc30   : > { %v10234_v5 = vand.u32 2147483647, %v10221_v59  ;;  %v7518_v55 = vpop.eup %7517  ;;  %v5132_v6 = vmul.f32 %v7516_v40, %v4812_v36  ;;  %v4368_v31 = vadd.f32 -1.4531521, %v4304_v19  ;;  %v4880_v34 = vsub.f32 0.0, %v10139_v11  ;;  %11413 = vst [vmem:[#allocation45_spill] sm:$0xff] %v10240_v52 }
 0xc31   : > { %7523 = vrcp.f32 %v4113_v29  ;;  %v5450_v33 = vadd.f32 1.0, %v5386_v2  ;;  %v5387_v16 = vsel %vm5259_vm5, %v5195_v10, %v5323_v23  ;;  %v4621_v49 = vadd.f32 -0.28449672, %v4557_v41  ;;  %v11414_v36 = vld [vmem:[#allocation33_spill] sm:$0xff] }
 0xc32   : > { %v4051_v4 = vmul.f32 0.3275911, %v10234_v5  ;;  %v5449_v14 = vadd.f32 1.0, %v5385_v17  ;;  %v5134_v1 = vmul.f32 %v7518_v55, %v4814_v26  ;;  %v4495_v8 = vadd.f32 1.4214138, %v4431_v28 }
 0xc33   : > { %v10243_v54 = vmul.f32 0.70710677, %v10228_v37  ;;  %vm5260_vm6 = vcmp.ge.f32.partialorder %v11414_v36, 0.0  ;;  %v5042_v40 = vmul.f32 1.442695, %v4943_v51  ;;  %v4432_v29 = vmul.f32 %v10217_v57, %v4368_v31 }
 0xc34   : > { %v4115_v2 = vadd.f32 1.0, %v4051_v4  ;;  %v10249_v10 = vadd.f32 %v11415_v58, %v9147_v24  ;;  %v5451_v23 = vadd.f32 1.0, %v5387_v16  ;;  %v5196_v41 = vsub.f32 1.0, %v5132_v6 }
 0xc35   : > { %v4944_v19 = vmul.f32 %v4880_v34, %v10139_v11  ;;  %v10253_v26 = vand.u32 2147483647, %v10243_v54  ;;  %v10257_v28 = vmul.f32 %v10179_v53, %v10027_v60  ;;  %vm5262_vm7 = vcmp.ge.f32.partialorder %v10005_v21, 0.0 }
 0xc36   : > { %v4685_v17 = vmul.f32 %v10128_v12, %v4621_v49  ;;  %v10262_v51 = vmul.f32 0.5, %v10109_v35  ;;  %7525 = vrcp.f32 %v4115_v2  ;;  %v10265_v55 = vmul.f32 %v5450_v33, %v10048_v9 }
 0xc37   : > { %11416 = vst [vmem:[#allocation33_spill] sm:$0xff] %v10257_v28  ;;  %v5198_v6 = vsub.f32 1.0, %v5134_v1  ;;  %v4559_v11 = vmul.f32 %v10201_v48, %v4495_v8  ;;  %v4052_v31 = vmul.f32 0.3275911, %v10253_v26  ;;  %v10272_v60 = vmul.f32 %v5449_v14, %v10076_v20  ;;  %v11420_v20 = vld [vmem:[#allocation47_spill] sm:$0xff] }
 0xc38   : > { %11417 = vst [vmem:[#allocation46_spill] sm:$0xff] %v10265_v55  ;;  %v10269_v34 = vpop.eup %7519  ;;  %7527 = vpow2.f32 %v5042_v40  ;;  %v4496_v53 = vadd.f32 1.4214138, %v4432_v29  ;;  %v10275_v16 = vmul.f32 0.70710677, %v10249_v10  ;;  %v10278_v35 = vmul.f32 %v5451_v23, %v10120_v18  ;;  %v10288_v40 = vpop.f32.mrb[102].mxu0 }
 0xc39   : > { %11418 = vst [vmem:[#allocation55_spill] sm:$0xff] %v10272_v60  ;;  %v5324_v9 = vsub.f32 0.0, %v5196_v41  ;;  %v5044_v33 = vmul.f32 1.442695, %v4944_v19  ;;  %v4306_v49 = vmul.f32 1.0614054, %v10269_v34  ;;  %v7522_v4 = vpop.eup %7521  ;;  %v10286_v14 = vadd.f32 %v11420_v20, %v9151_v45 }
 0xc3a   : > { %11419 = vst [vmem:[#allocation56_spill] sm:$0xff] %v10278_v35  ;;  %v4749_v1 = vadd.f32 0.2548296, %v4685_v17  ;;  %v4116_v8 = vadd.f32 1.0, %v4052_v31  ;;  %v10282_v2 = vand.u32 2147483647, %v10275_v16  ;;  %v4560_v17 = vmul.f32 %v10217_v57, %v4496_v53 }
 0xc3b   : > { %11421 = vst [vmem:[#allocation47_spill] sm:$0xff] %v10288_v40  ;;  %v10290_v29 = vpop.eup %7523  ;;  %v5326_v18 = vsub.f32 0.0, %v5198_v6  ;;  %v4623_v58 = vadd.f32 -0.28449672, %v4559_v11  ;;  %v10293_v23 = vmul.f32 0.5, %v10162_v7  ;;  %v5388_v20 = vsel %vm5260_vm6, %v5196_v41, %v5324_v9 }
 0xc3c   : > { %v4370_v19 = vadd.f32 -1.4531521, %v4306_v49  ;;  %v4305_v31 = vmul.f32 1.0614054, %v10290_v29  ;;  %7529 = vrcp.f32 %v4116_v8  ;;  %v4054_v55 = vmul.f32 0.3275911, %v10282_v2 }
 0xc3d   : > { %v4882_v35 = vsub.f32 0.0, %v10188_v44  ;;  %v10303_v11 = vmul.f32 0.5, %v10169_v63  ;;  %v4813_v7 = vmul.f32 %v10128_v12, %v4749_v1  ;;  %v10307_v53 = vmul.f32 0.70710677, %v10286_v14 }
 0xc3e   : > { %v4434_v28 = vmul.f32 %v10269_v34, %v4370_v19  ;;  %v4369_v49 = vadd.f32 -1.4531521, %v4305_v31  ;;  %v4118_v22 = vadd.f32 1.0, %v4054_v55  ;;  %v5390_v8 = vsel %vm5262_vm7, %v5198_v6, %v5326_v18  ;;  %v10319_v55 = vpop.f32.mrb[87].mxu1 }
 0xc3f   : > { %v4687_v36 = vmul.f32 %v10201_v48, %v4623_v58  ;;  %v4881_v9 = vsub.f32 0.0, %v10197_v3  ;;  %v4624_v60 = vadd.f32 -0.28449672, %v4560_v17  ;;  %v10317_v12 = vand.u32 2147483647, %v10307_v53  ;;  %11422 = vst [vmem:[#allocation57_spill] sm:$0xff] %v10319_v55 }
 0xc40   : > { %v4498_v41 = vadd.f32 1.4214138, %v4434_v28  ;;  %v10313_v19 = vpop.eup %7525  ;;  %v4433_v63 = vmul.f32 %v10290_v29, %v4369_v49  ;;  %7531 = vrcp.f32 %v4118_v22  ;;  %v4946_v6 = vmul.f32 %v4882_v35, %v10188_v44 }
 0xc41   : > { %7533 = vpow2.f32 %v5044_v33  ;;  %v4307_v28 = vmul.f32 1.0614054, %v10313_v19  ;;  %v5452_v18 = vadd.f32 1.0, %v5388_v20  ;;  %v5133_v58 = vmul.f32 %v7522_v4, %v4813_v7  ;;  %v11423_v20 = vld [vmem:[#allocation48_spill] sm:$0xff] }
 0xc42   : > { %v4562_v21 = vmul.f32 %v10269_v34, %v4498_v41  ;;  %v7528_v1 = vpop.eup %7527  ;;  %v4497_v31 = vadd.f32 1.4214138, %v4433_v63  ;;  %v4053_v17 = vmul.f32 0.3275911, %v10317_v12  ;;  %v5454_v49 = vadd.f32 1.0, %v5390_v8 }
 0xc43   : > { %v4751_v22 = vadd.f32 0.2548296, %v4687_v36  ;;  %v4945_v38 = vmul.f32 %v4881_v9, %v10197_v3  ;;  %v4371_v40 = vadd.f32 -1.4531521, %v4307_v28  ;;  %v4688_v55 = vmul.f32 %v10217_v57, %v4624_v60 }
 0xc44   : > { %v4626_v33 = vadd.f32 -0.28449672, %v4562_v21  ;;  %v4883_v41 = vsub.f32 0.0, %v10234_v5  ;;  %v4117_v52 = vadd.f32 1.0, %v4053_v17  ;;  %v5048_v44 = vmul.f32 1.442695, %v4946_v6 }
 0xc45   : > { %v10329_v35 = vmul.f32 0.5, %v10206_v61  ;;  %v4435_v4 = vmul.f32 %v10313_v19, %v4371_v40  ;;  %v10334_v7 = vadd.f32 %v11423_v20, %v9153_v43  ;;  %v10339_v3 = vmul.f32 %v5452_v18, %v10123_v42 }
 0xc46   : > { %v10336_v8 = vpop.eup %7529  ;;  %v5197_v60 = vsub.f32 1.0, %v5133_v58  ;;  %vm5261_vm8 = vcmp.ge.f32.partialorder %v10052_v13, 0.0  ;;  %v4561_v36 = vmul.f32 %v10290_v29, %v4497_v31  ;;  %7535 = vrcp.f32 %v4117_v52 }
 0xc47   : > { %11424 = vst [vmem:[#allocation48_spill] sm:$0xff] %v10339_v3  ;;  %v10344_v61 = vmul.f32 %v5454_v49, %v10144_v25  ;;  %v4815_v40 = vmul.f32 %v10201_v48, %v4751_v22  ;;  %v4499_v9 = vadd.f32 1.4214138, %v4435_v4  ;;  %v4308_v63 = vmul.f32 1.0614054, %v10336_v8  ;;  %v10354_v25 = vpop.f32.mrb[103].mxu0 }
 0xc48   : > { %v4752_v21 = vadd.f32 0.2548296, %v4688_v55  ;;  %v4690_v6 = vmul.f32 %v10269_v34, %v4626_v33  ;;  %v5046_v28 = vmul.f32 1.442695, %v4945_v38  ;;  %v4947_v42 = vmul.f32 %v4883_v41, %v10234_v5  ;;  %11426 = vst [vmem:[#allocation59_spill] sm:$0xff] %v10354_v25  ;;  %v11427_v49 = vld [vmem:[#allocation9_spill] sm:$0xff] }
 0xc49   : > { %11425 = vst [vmem:[#allocation58_spill] sm:$0xff] %v10344_v61  ;;  %7537 = vpow2.f32 %v5048_v44  ;;  %v4563_v18 = vmul.f32 %v10313_v19, %v4499_v9  ;;  %v4372_v58 = vadd.f32 -1.4531521, %v4308_v63  ;;  %v10352_v52 = vmul.f32 0.70710677, %v10334_v7 }
 0xc4a   : > { %v10356_v31 = vpop.eup %7531  ;;  %v5325_v48 = vsub.f32 0.0, %v5197_v60  ;;  %v4625_v17 = vadd.f32 -0.28449672, %v4561_v36  ;;  %v4884_v55 = vsub.f32 0.0, %v10253_v26  ;;  %v10361_v38 = vadd.f32 %v11427_v49, %v9143_v30 }
 0xc4b   : > { %v7534_v5 = vpop.eup %7533  ;;  %v5135_v22 = vmul.f32 %v7528_v1, %v4815_v40  ;;  %v4436_v33 = vmul.f32 %v10336_v8, %v4372_v58  ;;  %v4310_v41 = vmul.f32 1.0614054, %v10356_v31  ;;  %v4886_v44 = vsub.f32 0.0, %v10282_v2 }
 0xc4c   : > { %v4754_v4 = vadd.f32 0.2548296, %v4690_v6  ;;  %7539 = vpow2.f32 %v5046_v28  ;;  %v5050_v20 = vmul.f32 1.442695, %v4947_v42  ;;  %v10367_v9 = vand.u32 2147483647, %v10352_v52 }
 0xc4d   : > { %v4816_v36 = vmul.f32 %v10217_v57, %v4752_v21  ;;  %v4627_v63 = vadd.f32 -0.28449672, %v4563_v18  ;;  %v4500_v61 = vadd.f32 1.4214138, %v4436_v33  ;;  %v4374_v49 = vadd.f32 -1.4531521, %v4310_v41 }
 0xc4e   : > { %vm5263_vm9 = vcmp.ge.f32.partialorder %v10102_v32, 0.0  ;;  %v4689_v1 = vmul.f32 %v10290_v29, %v4625_v17  ;;  %v4948_v40 = vmul.f32 %v4884_v55, %v10253_v26  ;;  %v4055_v58 = vmul.f32 0.3275911, %v10367_v9 }
 0xc4f   : > { %v10375_v6 = vmul.f32 0.70710677, %v10361_v38  ;;  %v5389_v28 = vsel %vm5261_vm8, %v5197_v60, %v5325_v48  ;;  %v5199_v42 = vsub.f32 1.0, %v5135_v22  ;;  %v4438_v57 = vmul.f32 %v10356_v31, %v4374_v49 }
 0xc50   : > { %v4950_v21 = vmul.f32 %v4886_v44, %v10282_v2  ;;  %v10381_v18 = vpop.eup %7535  ;;  %v4818_v33 = vmul.f32 %v10269_v34, %v4754_v4  ;;  %v4564_v17 = vmul.f32 %v10336_v8, %v4500_v61  ;;  %v4119_v26 = vadd.f32 1.0, %v4055_v58 }
 0xc51   : > { %v10386_v55 = vand.u32 2147483647, %v10375_v6  ;;  %v5136_v41 = vmul.f32 %v7534_v5, %v4816_v36  ;;  %v4691_v3 = vmul.f32 %v10313_v19, %v4627_v63  ;;  %7541 = vpow2.f32 %v5050_v20 }
 0xc52   : > { %v4502_v13 = vadd.f32 1.4214138, %v4438_v57  ;;  %v4753_v60 = vadd.f32 0.2548296, %v4689_v1  ;;  %v5052_v48 = vmul.f32 1.442695, %v4948_v40  ;;  %7543 = vrcp.f32 %v4119_v26 }
 0xc53   : > { %v4309_v22 = vmul.f32 1.0614054, %v10381_v18  ;;  %v7538_v2 = vpop.eup %7537  ;;  %v5327_v44 = vsub.f32 0.0, %v5199_v42  ;;  %v5056_v4 = vmul.f32 1.442695, %v4950_v21  ;;  %v4885_v61 = vsub.f32 0.0, %v10317_v12 }
 0xc54   : > { %v4566_v34 = vmul.f32 %v10356_v31, %v4502_v13  ;;  %v5138_v49 = vmul.f32 %v7538_v2, %v4818_v33  ;;  %v4628_v58 = vadd.f32 -0.28449672, %v4564_v17  ;;  %v4056_v5 = vmul.f32 0.3275911, %v10386_v55  ;;  %v11428_v21 = vld [vmem:[#allocation39_spill] sm:$0xff] }
 0xc55   : > { %v4373_v25 = vadd.f32 -1.4531521, %v4309_v22  ;;  %v5453_v36 = vadd.f32 1.0, %v5389_v28  ;;  %v5200_v20 = vsub.f32 1.0, %v5136_v41  ;;  %vm5264_vm10 = vcmp.ge.f32.partialorder %v10132_v46, 0.0 }
 0xc56   : > { %v4755_v63 = vadd.f32 0.2548296, %v4691_v3  ;;  %v4630_v1 = vadd.f32 -0.28449672, %v4566_v34  ;;  %v7540_v40 = vpop.eup %7539  ;;  %v4817_v57 = vmul.f32 %v10290_v29, %v4753_v60  ;;  %v4120_v13 = vadd.f32 1.0, %v4056_v5 }
 0xc57   : > { %v4437_v26 = vmul.f32 %v10381_v18, %v4373_v25  ;;  %v10398_v56 = vadd.f32 %v11428_v21, %v9147_v24  ;;  %v5391_v33 = vsel %vm5263_vm9, %v5199_v42, %v5327_v44  ;;  %vm5266_vm11 = vcmp.ge.f32.partialorder %v10174_v62, 0.0 }
 0xc58   : > { %v10404_v28 = vmul.f32 0.5, %v10228_v37  ;;  %7545 = vpow2.f32 %v5052_v48  ;;  %v4949_v3 = vmul.f32 %v4885_v61, %v10317_v12  ;;  %v5202_v17 = vsub.f32 1.0, %v5138_v49 }
 0xc59   : > { %v4692_v29 = vmul.f32 %v10336_v8, %v4628_v58  ;;  %v4501_v25 = vadd.f32 1.4214138, %v4437_v26  ;;  %7547 = vrcp.f32 %v4120_v13  ;;  %v10409_v41 = vmul.f32 %v5453_v36, %v10148_v39  ;;  %v11429_v39 = vld [vmem:[#allocation26_spill] sm:$0xff] }
 0xc5a   : > { %v4819_v60 = vmul.f32 %v10313_v19, %v4755_v63  ;;  %v4694_v32 = vmul.f32 %v10356_v31, %v4630_v1  ;;  %7549 = vpow2.f32 %v5056_v4  ;;  %v5455_v42 = vadd.f32 1.0, %v5391_v33 }
 0xc5b   : > { %v5328_v22 = vsub.f32 0.0, %v5200_v20  ;;  %v5137_v37 = vmul.f32 %v7540_v40, %v4817_v57  ;;  %v10414_v48 = vmul.f32 0.70710677, %v10398_v56  ;;  %v7542_v12 = vpop.eup %7541  ;;  %v10417_v2 = vmul.f32 0.5, %v10249_v10 }
 0xc5c   : > { %v4565_v44 = vmul.f32 %v10381_v18, %v4501_v25  ;;  %v5054_v34 = vmul.f32 1.442695, %v4949_v3  ;;  %v10422_v61 = vadd.f32 %v11429_v39, %v9151_v45  ;;  %v10424_v19 = vpop.eup %7543  ;;  %v5330_v4 = vsub.f32 0.0, %v5202_v17 }
 0xc5d   : > { %v4756_v49 = vadd.f32 0.2548296, %v4692_v29  ;;  %v4887_v58 = vsub.f32 0.0, %v10367_v9  ;;  %v10428_v5 = vand.u32 2147483647, %v10414_v48  ;;  %vm5265_vm12 = vcmp.ge.f32.partialorder %v10177_v15, 0.0 }
 0xc5e   : > { %v5139_v10 = vmul.f32 %v7542_v12, %v4819_v60  ;;  %v4758_v36 = vadd.f32 0.2548296, %v4694_v32  ;;  %v10432_v63 = vmul.f32 0.5, %v10286_v14  ;;  %v4311_v1 = vmul.f32 1.0614054, %v10424_v19 }
 0xc5f   : > { %v10436_v40 = vmul.f32 %v5455_v42, %v10185_v47  ;;  %v5392_v57 = vsel %vm5264_vm10, %v5200_v20, %v5328_v22  ;;  %v5201_v26 = vsub.f32 1.0, %v5137_v37  ;;  %v4058_v13 = vmul.f32 0.3275911, %v10428_v5  ;;  %v11430_v37 = vld [vmem:[#allocation40_spill] sm:$0xff] }
 0xc60   : > { %v4629_v21 = vadd.f32 -0.28449672, %v4565_v44  ;;  %7551 = vpow2.f32 %v5054_v34  ;;  %v4375_v33 = vadd.f32 -1.4531521, %v4311_v1  ;;  %v10442_v3 = vmul.f32 0.70710677, %v10422_v61 }
 0xc61   : > { %v5394_v14 = vsel %vm5266_vm11, %v5202_v17, %v5330_v4  ;;  %vm5267_vm13 = vcmp.ge.f32.partialorder %v10221_v59, 0.0  ;;  %v4820_v47 = vmul.f32 %v10336_v8, %v4756_v49  ;;  %v4951_v29 = vmul.f32 %v4887_v58, %v10367_v9 }
 0xc62   : > { %v4122_v46 = vadd.f32 1.0, %v4058_v13  ;;  %v7546_v20 = vpop.eup %7545  ;;  %v5203_v25 = vsub.f32 1.0, %v5139_v10  ;;  %v4822_v60 = vmul.f32 %v10356_v31, %v4758_v36  ;;  %v4439_v32 = vmul.f32 %v10424_v19, %v4375_v33 }
 0xc63   : > { %v10452_v42 = vand.u32 2147483647, %v10442_v3  ;;  %v10454_v22 = vpop.eup %7547  ;;  %v5456_v62 = vadd.f32 1.0, %v5392_v57  ;;  %v5329_v17 = vsub.f32 0.0, %v5201_v26  ;;  %v10458_v8 = vadd.f32 %v11430_v37, %v9153_v43 }
 0xc64   : > { %7553 = vrcp.f32 %v4122_v46  ;;  %v7550_v9 = vpop.eup %7549  ;;  %v4693_v12 = vmul.f32 %v10381_v18, %v4629_v21  ;;  %v4503_v44 = vadd.f32 1.4214138, %v4439_v32  ;;  %v4312_v31 = vmul.f32 1.0614054, %v10454_v22 }
 0xc65   : > { %v4057_v34 = vmul.f32 0.3275911, %v10452_v42  ;;  %v5458_v39 = vadd.f32 1.0, %v5394_v14  ;;  %v5140_v4 = vmul.f32 %v7546_v20, %v4820_v47  ;;  %v10464_v49 = vmul.f32 0.5, %v10334_v7  ;;  %v11431_v47 = vld [vmem:[#allocation37_spill] sm:$0xff] }
 0xc66   : > { %v5058_v58 = vmul.f32 1.442695, %v4951_v29  ;;  %v5331_v10 = vsub.f32 0.0, %v5203_v25  ;;  %v5142_v36 = vmul.f32 %v7550_v9, %v4822_v60  ;;  %v4376_v1 = vadd.f32 -1.4531521, %v4312_v31 }
 0xc67   : > { %v4121_v57 = vadd.f32 1.0, %v4057_v34  ;;  %v5393_v13 = vsel %vm5265_vm12, %v5201_v26, %v5329_v17  ;;  %v4567_v21 = vmul.f32 %v10424_v19, %v4503_v44  ;;  %v4888_v33 = vsub.f32 0.0, %v10386_v55 }
 0xc68   : > { %v10471_v46 = vmul.f32 0.70710677, %v10458_v8  ;;  %vm5268_vm14 = vcmp.ge.f32.partialorder %v10243_v54, 0.0  ;;  %v4757_v14 = vadd.f32 0.2548296, %v4693_v12  ;;  %v4440_v7 = vmul.f32 %v10454_v22, %v4376_v1 }
 0xc69   : > { %7555 = vrcp.f32 %v4121_v57  ;;  %v10477_v29 = vadd.f32 %v11431_v47, %v9143_v30  ;;  %v10480_v15 = vmul.f32 %v5456_v62, %v10262_v51  ;;  %v5204_v26 = vsub.f32 1.0, %v5140_v4 }
 0xc6a   : > { %vm5270_vm15 = vcmp.ge.f32.partialorder %v10275_v16, 0.0  ;;  %v10484_v20 = vmul.f32 0.5, %v10361_v38  ;;  %v10487_v60 = vand.u32 2147483647, %v10471_v46  ;;  %v7552_v32 = vpop.eup %7551  ;;  %v5395_v17 = vsel %vm5267_vm13, %v5203_v25, %v5331_v10  ;;  %v11434_v16 = vld [vmem:[#allocation27_spill] sm:$0xff] }
 0xc6b   : > { %v5206_v37 = vsub.f32 1.0, %v5142_v36  ;;  %v4504_v9 = vadd.f32 1.4214138, %v4440_v7  ;;  %v10492_v12 = vmul.f32 0.70710677, %v10477_v29  ;;  %v10495_v51 = vmul.f32 %v5458_v39, %v10293_v23  ;;  %v11433_v23 = vld [vmem:[#allocation41_spill] sm:$0xff] }
 0xc6c   : > { %v5457_v62 = vadd.f32 1.0, %v5393_v13  ;;  %v4631_v44 = vadd.f32 -0.28449672, %v4567_v21  ;;  %v4059_v38 = vmul.f32 0.3275911, %v10487_v60  ;;  %v4821_v31 = vmul.f32 %v10381_v18, %v4757_v14 }
 0xc6d   : > { %11432 = vst [vmem:[#allocation9_spill] sm:$0xff] %v10495_v51  ;;  %7557 = vpow2.f32 %v5058_v58  ;;  %v4952_v34 = vmul.f32 %v4888_v33, %v10386_v55  ;;  %v10501_v59 = vand.u32 2147483647, %v10492_v12  ;;  %v5459_v4 = vadd.f32 1.0, %v5395_v17 }
 0xc6e   : > { %v10503_v25 = vpop.eup %7553  ;;  %v5332_v10 = vsub.f32 0.0, %v5204_v26  ;;  %v4123_v36 = vadd.f32 1.0, %v4059_v38  ;;  %v10507_v39 = vadd.f32 %v11433_v23, %v9147_v24  ;;  %v5334_v1 = vsub.f32 0.0, %v5206_v37 }
 0xc6f   : > { %v4568_v57 = vmul.f32 %v10454_v22, %v4504_v9  ;;  %v4314_v18 = vmul.f32 1.0614054, %v10503_v25  ;;  %v4890_v58 = vsub.f32 0.0, %v10428_v5  ;;  %v10513_v55 = vmul.f32 %v5457_v62, %v10303_v11 }
 0xc70   : > { %v4695_v13 = vmul.f32 %v10424_v19, %v4631_v44  ;;  %7559 = vrcp.f32 %v4123_v36  ;;  %v4060_v21 = vmul.f32 0.3275911, %v10501_v59  ;;  %v5141_v33 = vmul.f32 %v7552_v32, %v4821_v31 }
 0xc71   : > { %v5060_v14 = vmul.f32 1.442695, %v4952_v34  ;;  %v10518_v7 = vmul.f32 0.5, %v10398_v56  ;;  %v4378_v47 = vadd.f32 -1.4531521, %v4314_v18  ;;  %v10521_v17 = vmul.f32 %v5459_v4, %v10329_v35 }
 0xc72   : > { %v5396_v9 = vsel %vm5268_vm14, %v5204_v26, %v5332_v10  ;;  %v4124_v38 = vadd.f32 1.0, %v4060_v21  ;;  %v10526_v11 = vmul.f32 0.70710677, %v10507_v39  ;;  %v5398_v32 = vsel %vm5270_vm15, %v5206_v37, %v5334_v1 }
 0xc73   : > { %v10528_v62 = vpop.eup %7555  ;;  %v4632_v44 = vadd.f32 -0.28449672, %v4568_v57  ;;  %v4442_v56 = vmul.f32 %v10503_v25, %v4378_v47  ;;  %v4954_v31 = vmul.f32 %v4890_v58, %v10428_v5  ;;  %v4759_v34 = vadd.f32 0.2548296, %v4695_v13 }
 0xc74   : > { %v4313_v35 = vmul.f32 1.0614054, %v10528_v62  ;;  %7561 = vrcp.f32 %v4124_v38  ;;  %v10536_v54 = vand.u32 2147483647, %v10526_v11  ;;  %v5205_v26 = vsub.f32 1.0, %v5141_v33 }
 0xc75   : > { %vm5269_vm0 = vcmp.ge.f32.partialorder %v10307_v53, 0.0  ;;  %v4506_v4 = vadd.f32 1.4214138, %v4442_v56  ;;  %v4889_v10 = vsub.f32 0.0, %v10452_v42  ;;  %v10542_v37 = vadd.f32 %v11434_v16, %v9151_v45 }
 0xc76   : > { %7563 = vpow2.f32 %v5060_v14  ;;  %v10545_v5 = vmul.f32 0.5, %v10422_v61  ;;  %v4377_v36 = vadd.f32 -1.4531521, %v4313_v35  ;;  %v4062_v23 = vmul.f32 0.3275911, %v10536_v54 }
 0xc77   : > { %v7558_v1 = vpop.eup %7557  ;;  %v5460_v57 = vadd.f32 1.0, %v5396_v9  ;;  %v4696_v18 = vmul.f32 %v10454_v22, %v4632_v44  ;;  %v4570_v58 = vmul.f32 %v10503_v25, %v4506_v4  ;;  %v5064_v13 = vmul.f32 1.442695, %v4954_v31 }
 0xc78   : > { %v5462_v21 = vadd.f32 1.0, %v5398_v32  ;;  %v4823_v33 = vmul.f32 %v10424_v19, %v4759_v34  ;;  %v4441_v47 = vmul.f32 %v10528_v62, %v4377_v36  ;;  %v4126_v38 = vadd.f32 1.0, %v4062_v23  ;;  %v11435_v32 = vld [vmem:[#allocation31_spill] sm:$0xff] }
 0xc79   : > { %v5333_v14 = vsub.f32 0.0, %v5205_v26  ;;  %v4634_v56 = vadd.f32 -0.28449672, %v4570_v58  ;;  %v4953_v61 = vmul.f32 %v4889_v10, %v10452_v42  ;;  %v10554_v35 = vmul.f32 0.70710677, %v10542_v37 }
 0xc7a   : > { %v10556_v16 = vpop.eup %7559  ;;  %v4505_v9 = vadd.f32 1.4214138, %v4441_v47  ;;  %v4891_v44 = vsub.f32 0.0, %v10487_v60  ;;  %7565 = vrcp.f32 %v4126_v38  ;;  %v10561_v31 = vadd.f32 %v11435_v32, %v9153_v43 }
 0xc7b   : > { %v10564_v19 = vmul.f32 %v5460_v57, %v10404_v28  ;;  %v4760_v34 = vadd.f32 0.2548296, %v4696_v18  ;;  %v4315_v4 = vmul.f32 1.0614054, %v10556_v16  ;;  %v10568_v42 = vand.u32 2147483647, %v10554_v35 }
 0xc7c   : > { %v5143_v10 = vmul.f32 %v7558_v1, %v4823_v33  ;;  %v4698_v36 = vmul.f32 %v10503_v25, %v4634_v56  ;;  %7567 = vpow2.f32 %v5064_v13  ;;  %v10572_v23 = vmul.f32 0.5, %v10458_v8 }
 0xc7d   : > { %11436 = vst [vmem:[#allocation39_spill] sm:$0xff] %v10564_v19  ;;  %v10575_v58 = vmul.f32 %v5462_v21, %v10417_v2  ;;  %v4569_v47 = vmul.f32 %v10528_v62, %v4505_v9  ;;  %v4379_v28 = vadd.f32 -1.4531521, %v4315_v4  ;;  %v4061_v57 = vmul.f32 0.3275911, %v10568_v42 }
 0xc7e   : > { %v10579_v18 = vpop.eup %7561  ;;  %v5397_v38 = vsel %vm5269_vm0, %v5205_v26, %v5333_v14  ;;  %v5062_v1 = vmul.f32 1.442695, %v4953_v61  ;;  %v4955_v33 = vmul.f32 %v4891_v44, %v10487_v60  ;;  %v10585_v13 = vmul.f32 0.70710677, %v10561_v31 }
 0xc7f   : > { %11437 = vst [vmem:[#allocation26_spill] sm:$0xff] %v10575_v58  ;;  %vm5271_vm1 = vcmp.ge.f32.partialorder %v10352_v52, 0.0  ;;  %v4824_v2 = vmul.f32 %v10454_v22, %v4760_v34  ;;  %v4443_v8 = vmul.f32 %v10556_v16, %v4379_v28  ;;  %v4316_v21 = vmul.f32 1.0614054, %v10579_v18 }
 0xc80   : > { %v4125_v56 = vadd.f32 1.0, %v4061_v57  ;;  %v7564_v9 = vpop.eup %7563  ;;  %v5207_v32 = vsub.f32 1.0, %v5143_v10  ;;  %v4762_v4 = vadd.f32 0.2548296, %v4698_v36  ;;  %v4892_v53 = vsub.f32 0.0, %v10501_v59 }
 0xc81   : > { %v10593_v26 = vand.u32 2147483647, %v10585_v13  ;;  %v4633_v60 = vadd.f32 -0.28449672, %v4569_v47  ;;  %v4507_v14 = vadd.f32 1.4214138, %v4443_v8  ;;  %v10596_v28 = vmul.f32 %v7564_v9, %v4824_v2 }
 0xc82   : > { %v4380_v61 = vadd.f32 -1.4531521, %v4316_v21  ;;  %7569 = vrcp.f32 %v4125_v56  ;;  %v5461_v44 = vadd.f32 1.0, %v5397_v38  ;;  %v5066_v22 = vmul.f32 1.442695, %v4955_v33  ;;  %v11438_v38 = vld [vmem:[#allocation34_spill] sm:$0xff] }
 0xc83   : > { %7571 = vpow2.f32 %v5062_v1  ;;  %v4063_v34 = vmul.f32 0.3275911, %v10593_v26  ;;  %v4571_v57 = vmul.f32 %v10556_v16, %v4507_v14  ;;  %v4894_v36 = vsub.f32 0.0, %v10536_v54 }
 0xc84   : > { %v4444_v10 = vmul.f32 %v10579_v18, %v4380_v61  ;;  %v10601_v58 = vpop.eup %7565  ;;  %v5335_v19 = vsub.f32 0.0, %v5207_v32  ;;  %v4956_v47 = vmul.f32 %v4892_v53, %v10501_v59  ;;  %v10606_v1 = vadd.f32 %v11438_v38, %v9143_v30  ;;  %v10618_v53 = vpop.f32.mrb[88].mxu1 }
 0xc85   : > { %v4127_v8 = vadd.f32 1.0, %v4063_v34  ;;  %v4826_v33 = vmul.f32 %v10503_v25, %v4762_v4  ;;  %v4697_v2 = vmul.f32 %v10528_v62, %v4633_v60  ;;  %v4635_v21 = vadd.f32 -0.28449672, %v4571_v57  ;;  %11440 = vst [vmem:[#allocation37_spill] sm:$0xff] %v10618_v53  ;;  %v10620_v34 = vpop.f32.mrb[104].mxu0 }
 0xc86   : > { %v4508_v56 = vadd.f32 1.4214138, %v4444_v10  ;;  %v7568_v9 = vpop.eup %7567  ;;  %v10611_v14 = vmul.f32 %v5461_v44, %v10432_v63  ;;  %vm5272_vm2 = vcmp.ge.f32.partialorder %v10375_v6, 0.0  ;;  %v10615_v61 = vmul.f32 0.5, %v10477_v29  ;;  %11441 = vst [vmem:[#allocation41_spill] sm:$0xff] %v10620_v34  ;;  %v10628_v44 = vpop.f32.mrb[89].mxu1 }
 0xc87   : > { %v4318_v59 = vmul.f32 1.0614054, %v10601_v58  ;;  %7573 = vrcp.f32 %v4127_v8  ;;  %v5208_v25 = vsub.f32 1.0, %v10596_v28  ;;  %v10625_v60 = vmul.f32 0.5, %v10507_v39  ;;  %11442 = vst [vmem:[#allocation27_spill] sm:$0xff] %v10628_v44  ;;  %v10630_v29 = vpop.f32.mrb[105].mxu0 }
 0xc88   : > { %11439 = vst [vmem:[#allocation40_spill] sm:$0xff] %v10611_v14  ;;  %v4572_v4 = vmul.f32 %v10579_v18, %v4508_v56  ;;  %v4958_v63 = vmul.f32 %v4894_v36, %v10536_v54  ;;  %11443 = vst [vmem:[#allocation31_spill] sm:$0xff] %v10630_v29  ;;  %v5399_v57 = vsel %vm5271_vm1, %v5207_v32, %v5335_v19  ;;  %v5068_v10 = vmul.f32 1.442695, %v4956_v47  ;;  %v10638_v39 = vpop.f32.mrb[90].mxu1  ;;  %v10640_v54 = vpop.f32.mrb[106].mxu0 }
 0xc89   : > { %v4382_v8 = vadd.f32 -1.4531521, %v4318_v59  ;;  %v10635_v38 = vmul.f32 0.70710677, %v10606_v1  ;;  %v5146_v28 = vmul.f32 %v7568_v9, %v4826_v33  ;;  %v4761_v34 = vadd.f32 0.2548296, %v4697_v2 }
 0xc8a   : > { %v4699_v56 = vmul.f32 %v10556_v16, %v4635_v21  ;;  %7575 = vpow2.f32 %v5066_v22  ;;  %11444 = vst [vmem:[#allocation34_spill] sm:$0xff] %v10638_v39  ;;  %11445 = vst [vmem:[#allocation60_spill] sm:$0xff] %v10640_v54  ;;  %v10644_v29 = vmul.f32 0.5, %v10542_v37  ;;  %v11446_v19 = vld [vmem:[#allocation51_spill] sm:$0xff]  ;;  %v10653_v47 = vpop.f32.mrb[91].mxu1  ;;  %v10655_v33 = vpop.f32.mrb[107].mxu0 }
 0xc8b   : > { %v4446_v36 = vmul.f32 %v10601_v58, %v4382_v8  ;;  %v10647_v52 = vand.u32 2147483647, %v10635_v38  ;;  %v10651_v32 = vadd.f32 %v11446_v19, %v9147_v24  ;;  %11447 = vst [vmem:[#allocation51_spill] sm:$0xff] %v10653_v47  ;;  %11448 = vst [vmem:[#allocation61_spill] sm:$0xff] %v10655_v33  ;;  %v5463_v2 = vadd.f32 1.0, %v5399_v57 }
 0xc8c   : > { %v10657_v22 = vpop.eup %7569  ;;  %v5336_v21 = vsub.f32 0.0, %v5208_v25  ;;  %v4636_v9 = vadd.f32 -0.28449672, %v4572_v4  ;;  %v5072_v59 = vmul.f32 1.442695, %v4958_v63  ;;  %vm5274_vm3 = vcmp.ge.f32.partialorder %v10414_v48, 0.0 }
 0xc8d   : > { %v7572_v8 = vpop.eup %7571  ;;  %7577 = vpow2.f32 %v5068_v10  ;;  %v4510_v37 = vadd.f32 1.4214138, %v4446_v36  ;;  %v4317_v54 = vmul.f32 1.0614054, %v10657_v22  ;;  %v4064_v19 = vmul.f32 0.3275911, %v10647_v52 }
 0xc8e   : > { %v5210_v39 = vsub.f32 1.0, %v5146_v28  ;;  %v4825_v47 = vmul.f32 %v10528_v62, %v4761_v34  ;;  %v4763_v44 = vadd.f32 0.2548296, %v4699_v56  ;;  %v4893_v33 = vsub.f32 0.0, %v10568_v42 }
 0xc8f   : > { %v4574_v57 = vmul.f32 %v10601_v58, %v4510_v37  ;;  %v4381_v53 = vadd.f32 -1.4531521, %v4317_v54  ;;  %v4128_v4 = vadd.f32 1.0, %v4064_v19  ;;  %v10666_v63 = vmul.f32 0.70710677, %v10651_v32 }
 0xc90   : > { %v10669_v10 = vmul.f32 %v5463_v2, %v10464_v49  ;;  %v5400_v36 = vsel %vm5272_vm2, %v5208_v25, %v5336_v21  ;;  %v4700_v28 = vmul.f32 %v10579_v18, %v4636_v9  ;;  %v4895_v62 = vsub.f32 0.0, %v10593_v26 }
 0xc91   : > { %v10675_v34 = vpop.eup %7573  ;;  %v4638_v56 = vadd.f32 -0.28449672, %v4574_v57  ;;  %v4445_v37 = vmul.f32 %v10657_v22, %v4381_v53  ;;  %7579 = vrcp.f32 %v4128_v4  ;;  %v10679_v54 = vand.u32 2147483647, %v10666_v63 }
 0xc92   : > { %11449 = vst [vmem:[#allocation62_spill] sm:$0xff] %v10669_v10  ;;  %v5338_v19 = vsub.f32 0.0, %v5210_v39  ;;  %v5145_v14 = vmul.f32 %v7572_v8, %v4825_v47  ;;  %v4957_v49 = vmul.f32 %v4893_v33, %v10568_v42  ;;  %v4319_v6 = vmul.f32 1.0614054, %v10675_v34 }
 0xc93   : > { %v4827_v25 = vmul.f32 %v10556_v16, %v4763_v44  ;;  %7581 = vpow2.f32 %v5072_v59  ;;  %v4509_v2 = vadd.f32 1.4214138, %v4445_v37  ;;  %v4066_v21 = vmul.f32 0.3275911, %v10679_v54 }
 0xc94   : > { %v7576_v9 = vpop.eup %7575  ;;  %v4764_v57 = vadd.f32 0.2548296, %v4700_v28  ;;  %v4702_v53 = vmul.f32 %v10601_v58, %v4638_v56  ;;  %v10687_v4 = vmul.f32 0.5, %v10561_v31  ;;  %v4383_v10 = vadd.f32 -1.4531521, %v4319_v6 }
 0xc95   : > { %v5464_v51 = vadd.f32 1.0, %v5400_v36  ;;  %vm5273_vm4 = vcmp.ge.f32.partialorder %v10442_v3, 0.0  ;;  %v4573_v42 = vmul.f32 %v10657_v22, %v4509_v2  ;;  %v4959_v47 = vmul.f32 %v4895_v62, %v10593_v26 }
 0xc96   : > { %v4130_v16 = vadd.f32 1.0, %v4066_v21  ;;  %v5402_v44 = vsel %vm5274_vm3, %v5210_v39, %v5338_v19  ;;  %v5209_v33 = vsub.f32 1.0, %v5145_v14  ;;  %v5070_v59 = vmul.f32 1.442695, %v4957_v49 }
 0xc97   : > { %v4447_v8 = vmul.f32 %v10675_v34, %v4383_v10  ;;  %v7578_v28 = vpop.eup %7577  ;;  %v5147_v56 = vmul.f32 %v7576_v9, %v4827_v25  ;;  %v4637_v31 = vadd.f32 -0.28449672, %v4573_v42  ;;  %v4896_v37 = vsub.f32 0.0, %v10647_v52  ;;  %v11450_v10 = vld [vmem:[#allocation38_spill] sm:$0xff] }
 0xc98   : > { %7583 = vrcp.f32 %v4130_v16  ;;  %v4828_v36 = vmul.f32 %v10579_v18, %v4764_v57  ;;  %v4766_v6 = vadd.f32 0.2548296, %v4702_v53  ;;  %v10699_v26 = vadd.f32 %v10072_v50, %v9151_v45 }
 0xc99   : > { %v4511_v2 = vadd.f32 1.4214138, %v4447_v8  ;;  %v10702_v48 = vmul.f32 %v5464_v51, %v10484_v20  ;;  %v4701_v14 = vmul.f32 %v10657_v22, %v4637_v31  ;;  %v5074_v39 = vmul.f32 1.442695, %v4959_v47 }
 0xc9a   : > { %v10707_v62 = vadd.f32 %v11450_v10, %v9153_v43  ;;  %v5337_v19 = vsub.f32 0.0, %v5209_v33  ;;  %vm5275_vm5 = vcmp.ge.f32.partialorder %v10471_v46, 0.0  ;;  %7585 = vpow2.f32 %v5070_v59 }
 0xc9b   : > { %v4575_v18 = vmul.f32 %v10675_v34, %v4511_v2  ;;  %v10712_v49 = vmul.f32 0.70710677, %v10699_v26  ;;  %v10714_v50 = vpop.eup %7579  ;;  %v5466_v20 = vadd.f32 1.0, %v5402_v44  ;;  %v5211_v51 = vsub.f32 1.0, %v5147_v56  ;;  %v10743_v2 = vpop.f32.mrb[92].mxu1 }
 0xc9c   : > { %v10717_v25 = vmul.f32 0.5, %v10606_v1  ;;  %v4960_v21 = vmul.f32 %v4896_v37, %v10647_v52  ;;  %v10720_v9 = vmul.f32 %v7578_v28, %v4828_v36  ;;  %v4830_v57 = vmul.f32 %v10601_v58, %v4766_v6 }
 0xc9d   : > { %v4320_v53 = vmul.f32 1.0614054, %v10714_v50  ;;  %v10725_v42 = vand.u32 2147483647, %v10712_v49  ;;  %v7582_v47 = vpop.eup %7581  ;;  %v4765_v16 = vadd.f32 0.2548296, %v4701_v14  ;;  %7587 = vpow2.f32 %v5074_v39 }
 0xc9e   : > { %v4639_v59 = vadd.f32 -0.28449672, %v4575_v18  ;;  %v10728_v44 = vmul.f32 0.70710677, %v10707_v62  ;;  %v5401_v1 = vsel %vm5273_vm4, %v5209_v33, %v5337_v19  ;;  %v10733_v8 = vmul.f32 0.5, %v10651_v32  ;;  %v11451_v19 = vld [vmem:[#allocation53_spill] sm:$0xff] }
 0xc9f   : > { %v4384_v52 = vadd.f32 -1.4531521, %v4320_v53  ;;  %v4065_v58 = vmul.f32 0.3275911, %v10725_v42  ;;  %v5339_v28 = vsub.f32 0.0, %v5211_v51  ;;  %vm5276_vm6 = vcmp.ge.f32.partialorder %v10492_v12, 0.0 }
 0xca0   : > { %v5076_v56 = vmul.f32 1.442695, %v4960_v21  ;;  %v4898_v31 = vsub.f32 0.0, %v10679_v54  ;;  %v10739_v37 = vand.u32 2147483647, %v10728_v44  ;;  %v5212_v36 = vsub.f32 1.0, %v10720_v9 }
 0xca1   : > { %v5150_v6 = vmul.f32 %v7582_v47, %v4830_v57  ;;  %v4448_v3 = vmul.f32 %v10714_v50, %v4384_v52  ;;  %v4129_v33 = vadd.f32 1.0, %v4065_v58  ;;  %v4829_v14 = vmul.f32 %v10657_v22, %v4765_v16  ;;  %v10754_v21 = vpop.f32.mrb[93].mxu1  ;;  %v10766_v58 = vpop.f32.mrb[108].mxu0 }
 0xca2   : > { %v10745_v32 = vpop.eup %7583  ;;  %v4703_v39 = vmul.f32 %v10675_v34, %v4639_v59  ;;  %v4067_v10 = vmul.f32 0.3275911, %v10739_v37  ;;  %v10752_v18 = vadd.f32 %v11451_v19, %v9143_v30  ;;  %11452 = vst [vmem:[#allocation38_spill] sm:$0xff] %v10754_v21  ;;  %v10757_v9 = vmul.f32 %v5466_v20, %v10518_v7  ;;  %v10760_v52 = vpop.f32.mrb[94].mxu1 }
 0xca3   : > { %v5465_v57 = vadd.f32 1.0, %v5401_v1  ;;  %v4512_v53 = vadd.f32 1.4214138, %v4448_v3  ;;  %v4322_v47 = vmul.f32 1.0614054, %v10745_v32  ;;  %11453 = vst [vmem:[#allocation53_spill] sm:$0xff] %v10760_v52  ;;  %v5403_v22 = vsel %vm5275_vm5, %v5211_v51, %v5339_v28 }
 0xca4   : > { %vm5278_vm7 = vcmp.ge.f32.partialorder %v10526_v11, 0.0  ;;  %v4962_v16 = vmul.f32 %v4898_v31, %v10679_v54  ;;  %7589 = vrcp.f32 %v4129_v33  ;;  %v4131_v59 = vadd.f32 1.0, %v4067_v10  ;;  %v10768_v19 = vpop.f32.mrb[95].mxu1  ;;  %v7586_v7 = vpop.eup %7585 }
 0xca5   : > { %11454 = vst [vmem:[#allocation63_spill] sm:$0xff] %v10768_v19  ;;  %v5340_v20 = vsub.f32 0.0, %v5212_v36  ;;  %v5214_v1 = vsub.f32 1.0, %v5150_v6  ;;  %v4576_v3 = vmul.f32 %v10714_v50, %v4512_v53  ;;  %v4386_v21 = vadd.f32 -1.4531521, %v4322_v47  ;;  %v10771_v52 = vpop.f32.mrb[109].mxu0 }
 0xca6   : > { %v5149_v46 = vmul.f32 %v7586_v7, %v4829_v14  ;;  %v4767_v51 = vadd.f32 0.2548296, %v4703_v39  ;;  %7591 = vpow2.f32 %v5076_v56  ;;  %v10774_v28 = vmul.f32 0.70710677, %v10752_v18  ;;  %v10776_v54 = vpop.f32.mrb[110].mxu0 }
 0xca7   : > { %11455 = vst [vmem:[#allocation64_spill] sm:$0xff] %v10776_v54  ;;  %v5467_v31 = vadd.f32 1.0, %v5403_v22  ;;  %v4640_v33 = vadd.f32 -0.28449672, %v4576_v3  ;;  %v4450_v10 = vmul.f32 %v10745_v32, %v4386_v21  ;;  %v4897_v19 = vsub.f32 0.0, %v10725_v42  ;;  %v10780_v6 = vpop.f32.mrb[111].mxu0  ;;  %v7588_v53 = vpop.eup %7587 }
 0xca8   : > { %11456 = vst [vmem:[#allocation65_spill] sm:$0xff] %v10780_v6  ;;  %v10783_v47 = vmul.f32 %v5465_v57, %v10545_v5  ;;  %v5080_v14 = vmul.f32 1.442695, %v4962_v16  ;;  %7593 = vrcp.f32 %v4131_v59  ;;  %v4004_v56 = vand.u32 2147483647, %v10774_v28 }
 0xca9   : > { %v5404_v39 = vsel %vm5276_vm6, %v5212_v36, %v5340_v20  ;;  %v5342_v7 = vsub.f32 0.0, %v5214_v1  ;;  %vm5277_vm8 = vcmp.ge.f32.partialorder %v10554_v35, 0.0  ;;  %v4704_v21 = vmul.f32 %v10714_v50, %v4640_v33 }
 0xcaa   : > { %v4514_v22 = vadd.f32 1.4214138, %v4450_v10  ;;  %v5213_v3 = vsub.f32 1.0, %v5149_v46  ;;  %v4831_v6 = vmul.f32 %v10675_v34, %v4767_v51  ;;  %v4068_v54 = vmul.f32 0.3275911, %v4004_v56 }
 0xcab   : > { %v10793_v5 = vadd.f32 %v10152_v0, %v9147_v24  ;;  %v10796_v57 = vmul.f32 %v5467_v31, %v10572_v23  ;;  %v4961_v36 = vmul.f32 %v4897_v19, %v10725_v42  ;;  %v10802_v16 = vadd.f32 %v10190_v27, %v9151_v45 }
 0xcac   : > { %v4578_v12 = vmul.f32 %v10745_v32, %v4514_v22  ;;  %v5468_v59 = vadd.f32 1.0, %v5404_v39  ;;  %v4768_v20 = vadd.f32 0.2548296, %v4704_v21  ;;  %7595 = vpow2.f32 %v5080_v14 }
 0xcad   : > { %11457 = vst [vmem:[#allocation66_spill] sm:$0xff] %v10793_v5  ;;  %11458 = vst [vmem:[#allocation67_spill] sm:$0xff] %v10802_v16  ;;  %v4132_v34 = vadd.f32 1.0, %v4068_v54  ;;  %v5406_v46 = vsel %vm5278_vm7, %v5214_v1, %v5342_v7  ;;  %v4899_v51 = vsub.f32 0.0, %v10739_v37  ;;  %v10808_v23 = vmul.f32 0.70710677, %v10793_v5 }
 0xcae   : > { %v4642_v0 = vadd.f32 -0.28449672, %v4578_v12  ;;  %v10810_v31 = vpop.eup %7589  ;;  %v5341_v42 = vsub.f32 0.0, %v5213_v3  ;;  %v5151_v19 = vmul.f32 %v7588_v53, %v4831_v6  ;;  %v10813_v27 = vmul.f32 0.70710677, %v10802_v16 }
 0xcaf   : > { %7597 = vrcp.f32 %v4132_v34  ;;  %v4321_v54 = vmul.f32 1.0614054, %v10810_v31  ;;  %v5078_v11 = vmul.f32 1.442695, %v4961_v36  ;;  %v10818_v1 = vand.u32 2147483647, %v10808_v23 }
 0xcb0   : > { %11459 = vst [vmem:[#allocation68_spill] sm:$0xff] %v10813_v27  ;;  %v4706_v33 = vmul.f32 %v10745_v32, %v4642_v0  ;;  %v7592_v10 = vpop.eup %7591  ;;  %v10821_v14 = vmul.f32 %v5468_v59, %v10615_v61  ;;  %v4832_v39 = vmul.f32 %v10714_v50, %v4768_v20  ;;  %v10825_v6 = vmul.f32 0.5, %v10699_v26 }
 0xcb1   : > { %v10828_v53 = vand.u32 2147483647, %v10813_v27  ;;  %v5470_v7 = vadd.f32 1.0, %v5406_v46  ;;  %vm5279_vm9 = vcmp.ge.f32.partialorder %v10585_v13, 0.0  ;;  %v4385_v21 = vadd.f32 -1.4531521, %v4321_v54 }
 0xcb2   : > { %v4963_v22 = vmul.f32 %v4899_v51, %v10739_v37  ;;  %v4900_v12 = vsub.f32 0.0, %v4004_v56  ;;  %v10832_v36 = vpop.eup %7593  ;;  %v5405_v61 = vsel %vm5277_vm8, %v5213_v3, %v5341_v42  ;;  %v5215_v59 = vsub.f32 1.0, %v5151_v19  ;;  %v11460_v51 = vld [vmem:[#allocation54_spill] sm:$0xff] }
 0xcb3   : > { %v4070_v50 = vmul.f32 0.3275911, %v10818_v1  ;;  %v4069_v26 = vmul.f32 0.3275911, %v10828_v53  ;;  %v4770_v20 = vadd.f32 0.2548296, %v4706_v33  ;;  %v4449_v34 = vmul.f32 %v10810_v31, %v4385_v21 }
 0xcb4   : > { %7599 = vpow2.f32 %v5078_v11  ;;  %v4323_v46 = vmul.f32 1.0614054, %v10832_v36  ;;  %v5152_v0 = vmul.f32 %v7592_v10, %v4832_v39  ;;  %v10842_v16 = vadd.f32 %v11460_v51, %v9153_v43 }
 0xcb5   : > { %v4134_v54 = vadd.f32 1.0, %v4070_v50  ;;  %v4133_v37 = vadd.f32 1.0, %v4069_v26  ;;  %v5469_v35 = vadd.f32 1.0, %v5405_v61  ;;  %v4513_v3 = vadd.f32 1.4214138, %v4449_v34 }
 0xcb6   : > { %11461 = vst [vmem:[#allocation54_spill] sm:$0xff] %v10842_v16  ;;  %v4387_v42 = vadd.f32 -1.4531521, %v4323_v46  ;;  %v4964_v19 = vmul.f32 %v4900_v12, %v4004_v56  ;;  %v7596_v27 = vpop.eup %7595  ;;  %v10845_v5 = vmul.f32 %v5470_v7, %v10625_v60  ;;  %v5343_v33 = vsub.f32 0.0, %v5215_v59 }
 0xcb7   : > { %v10848_v11 = vmul.f32 0.5, %v10707_v62  ;;  %7601 = vrcp.f32 %v4134_v54  ;;  %vm5280_vm10 = vcmp.ge.f32.partialorder %v10635_v38, 0.0  ;;  %v4834_v10 = vmul.f32 %v10745_v32, %v4770_v20 }
 0xcb8   : > { %v4577_v39 = vmul.f32 %v10810_v31, %v4513_v3  ;;  %v4451_v21 = vmul.f32 %v10832_v36, %v4387_v42  ;;  %7603 = vrcp.f32 %v4133_v37  ;;  %v5216_v56 = vsub.f32 1.0, %v5152_v0 }
 0xcb9   : > { %v10854_v61 = vpop.eup %7597  ;;  %v5082_v12 = vmul.f32 1.442695, %v4963_v22  ;;  %v10857_v60 = vmul.f32 0.5, %v10752_v18  ;;  %v10860_v62 = vmul.f32 0.70710677, %v10842_v16  ;;  %v10863_v7 = vmul.f32 %v5469_v35, %v10644_v29  ;;  %v11463_v29 = vld [vmem:[#allocation45_spill] sm:$0xff] }
 0xcba   : > { %v4641_v50 = vadd.f32 -0.28449672, %v4577_v39  ;;  %v4515_v32 = vadd.f32 1.4214138, %v4451_v21  ;;  %v5084_v26 = vmul.f32 1.442695, %v4964_v19  ;;  %v5407_v20 = vsel %vm5279_vm9, %v5215_v59, %v5343_v33 }
 0xcbb   : > { %11462 = vst [vmem:[#allocation69_spill] sm:$0xff] %v10860_v62  ;;  %v4324_v34 = vmul.f32 1.0614054, %v10854_v61  ;;  %v4902_v46 = vsub.f32 0.0, %v10818_v1  ;;  %v10870_v22 = vand.u32 2147483647, %v10860_v62  ;;  %v5154_v18 = vmul.f32 %v7596_v27, %v4834_v10 }
 0xcbc   : > { %v4705_v0 = vmul.f32 %v10810_v31, %v4641_v50  ;;  %v4579_v54 = vmul.f32 %v10832_v36, %v4515_v32  ;;  %v10876_v37 = vadd.f32 %v11463_v29, %v9143_v30  ;;  %v5344_v51 = vsub.f32 0.0, %v5216_v56  ;;  %v11464_v30 = vld [vmem:[#allocation47_spill] sm:$0xff] }
 0xcbd   : > { %v4388_v35 = vadd.f32 -1.4531521, %v4324_v34  ;;  %v4901_v13 = vsub.f32 0.0, %v10828_v53  ;;  %v4071_v59 = vmul.f32 0.3275911, %v10870_v22  ;;  %v5471_v42 = vadd.f32 1.0, %v5407_v20 }
 0xcbe   : > { %v7600_v3 = vpop.eup %7599  ;;  %v4769_v19 = vadd.f32 0.2548296, %v4705_v0  ;;  %v4643_v33 = vadd.f32 -0.28449672, %v4579_v54  ;;  %7605 = vpow2.f32 %v5082_v12  ;;  %vm5282_vm11 = vcmp.ge.f32.partialorder %v10666_v63, 0.0 }
 0xcbf   : > { %v4452_v27 = vmul.f32 %v10854_v61, %v4388_v35  ;;  %v4966_v10 = vmul.f32 %v4902_v46, %v10818_v1  ;;  %v4135_v39 = vadd.f32 1.0, %v4071_v59  ;;  %v10885_v21 = vadd.f32 %v11464_v30, %v9147_v24 }
 0xcc0   : > { %v5218_v50 = vsub.f32 1.0, %v5154_v18  ;;  %v4707_v32 = vmul.f32 %v10832_v36, %v4643_v33  ;;  %7607 = vpow2.f32 %v5084_v26  ;;  %v10889_v20 = vmul.f32 0.70710677, %v10876_v37 }
 0xcc1   : > { %v10891_v34 = vpop.eup %7601  ;;  %v5408_v12 = vsel %vm5280_vm10, %v5216_v56, %v5344_v51  ;;  %v4516_v0 = vadd.f32 1.4214138, %v4452_v27  ;;  %v4965_v1 = vmul.f32 %v4901_v13, %v10828_v53  ;;  %7609 = vrcp.f32 %v4135_v39 }
 0xcc2   : > { %v10896_v46 = vpop.eup %7603  ;;  %v4833_v24 = vmul.f32 %v10810_v31, %v4769_v19  ;;  %v4771_v18 = vadd.f32 0.2548296, %v4707_v32  ;;  %v4326_v54 = vmul.f32 1.0614054, %v10891_v34  ;;  %v4008_v26 = vand.u32 2147483647, %v10889_v20 }
 0xcc3   : > { %v4580_v29 = vmul.f32 %v10854_v61, %v4516_v0  ;;  %v5088_v35 = vmul.f32 1.442695, %v4966_v10  ;;  %v4325_v59 = vmul.f32 1.0614054, %v10896_v46  ;;  %v10904_v38 = vmul.f32 0.70710677, %v10885_v21 }
 0xcc4   : > { %v5472_v56 = vadd.f32 1.0, %v5408_v12  ;;  %v5346_v53 = vsub.f32 0.0, %v5218_v50  ;;  %v4390_v51 = vadd.f32 -1.4531521, %v4326_v54  ;;  %v4072_v13 = vmul.f32 0.3275911, %v4008_v26 }
 0xcc5   : > { %v4835_v33 = vmul.f32 %v10832_v36, %v4771_v18  ;;  %v4644_v31 = vadd.f32 -0.28449672, %v4580_v29  ;;  %v4389_v19 = vadd.f32 -1.4531521, %v4325_v59  ;;  %v5086_v27 = vmul.f32 1.442695, %v4965_v1 }
 0xcc6   : > { %v10908_v39 = vmul.f32 %v5471_v42, %v10687_v4  ;;  %v5153_v30 = vmul.f32 %v7600_v3, %v4833_v24  ;;  %v4454_v10 = vmul.f32 %v10891_v34, %v4390_v51  ;;  %v4136_v32 = vadd.f32 1.0, %v4072_v13 }
 0xcc7   : > { %v4708_v0 = vmul.f32 %v10854_v61, %v4644_v31  ;;  %7611 = vpow2.f32 %v5088_v35  ;;  %v4453_v12 = vmul.f32 %v10896_v46, %v4389_v19  ;;  %v4010_v54 = vand.u32 2147483647, %v10904_v38  ;;  %v11465_v31 = vld [vmem:[#allocation57_spill] sm:$0xff] }
 0xcc8   : > { %v7606_v16 = vpop.eup %7605  ;;  %v10915_v36 = vmul.f32 %v5472_v56, %v10717_v25  ;;  %v5410_v1 = vsel %vm5282_vm11, %v5218_v50, %v5346_v53  ;;  %v4518_v4 = vadd.f32 1.4214138, %v4454_v10  ;;  %7613 = vrcp.f32 %v4136_v32 }
 0xcc9   : > { %v5155_v3 = vmul.f32 %v7606_v16, %v4835_v33  ;;  %v4772_v42 = vadd.f32 0.2548296, %v4708_v0  ;;  %v4517_v24 = vadd.f32 1.4214138, %v4453_v12  ;;  %7615 = vpow2.f32 %v5086_v27 }
 0xcca   : > { %v7608_v18 = vpop.eup %7607  ;;  %v5217_v29 = vsub.f32 1.0, %v5153_v30  ;;  %vm5281_vm12 = vcmp.ge.f32.partialorder %v10712_v49, 0.0  ;;  %v4582_v35 = vmul.f32 %v10891_v34, %v4518_v4  ;;  %v4903_v59 = vsub.f32 0.0, %v10870_v22 }
 0xccb   : > { %v4074_v51 = vmul.f32 0.3275911, %v4010_v54  ;;  %v10922_v25 = vpop.eup %7609  ;;  %v5474_v56 = vadd.f32 1.0, %v5410_v1  ;;  %v4836_v63 = vmul.f32 %v10854_v61, %v4772_v42  ;;  %v4581_v50 = vmul.f32 %v10896_v46, %v4517_v24 }
 0xccc   : > { %v4904_v16 = vsub.f32 0.0, %v4008_v26  ;;  %vm5283_vm13 = vcmp.ge.f32.partialorder %v10728_v44, 0.0  ;;  %vm5284_vm14 = vcmp.ge.f32.partialorder %v10774_v28, 0.0  ;;  %v4646_v53 = vadd.f32 -0.28449672, %v4582_v35 }
 0xccd   : > { %v4327_v13 = vmul.f32 1.0614054, %v10922_v25  ;;  %v10930_v33 = vmul.f32 0.5, %v10876_v37  ;;  %v10934_v19 = vadd.f32 %v11465_v31, %v9151_v45  ;;  %v5219_v27 = vsub.f32 1.0, %v5155_v3 }
 0xcce   : > { %v5156_v30 = vmul.f32 %v7608_v18, %v4836_v63  ;;  %v4645_v61 = vadd.f32 -0.28449672, %v4581_v50  ;;  %v4138_v10 = vadd.f32 1.0, %v4074_v51  ;;  %v5345_v32 = vsub.f32 0.0, %v5217_v29  ;;  %v11467_v50 = vld [vmem:[#allocation59_spill] sm:$0xff] }
 0xccf   : > { %11466 = vst [vmem:[#allocation45_spill] sm:$0xff] %v10934_v19  ;;  %v4710_v0 = vmul.f32 %v10891_v34, %v4646_v53  ;;  %v4391_v12 = vadd.f32 -1.4531521, %v4327_v13  ;;  %v4967_v1 = vmul.f32 %v4903_v59, %v10870_v22  ;;  %v4968_v24 = vmul.f32 %v4904_v16, %v4008_v26  ;;  %v11468_v22 = vld [vmem:[#allocation29_spill] sm:$0xff]  ;;  %v11469_v59 = vld [vmem:[#allocation50_spill] sm:$0xff] }
 0xcd0   : > { %v5220_v4 = vsub.f32 1.0, %v5156_v30  ;;  %v4709_v42 = vmul.f32 %v10896_v46, %v4645_v61  ;;  %7617 = vrcp.f32 %v4138_v10  ;;  %v4906_v45 = vsub.f32 0.0, %v4010_v54 }
 0xcd1   : > { %v4774_v37 = vadd.f32 0.2548296, %v4710_v0  ;;  %v4455_v35 = vmul.f32 %v10922_v25, %v4391_v12  ;;  %v10941_v3 = vmul.f32 0.70710677, %v10934_v19  ;;  %v7612_v18 = vpop.eup %7611  ;;  %v5347_v51 = vsub.f32 0.0, %v5219_v27 }
 0xcd2   : > { %v5348_v63 = vsub.f32 0.0, %v5220_v4  ;;  %v10945_v53 = vadd.f32 %v11467_v50, %v9153_v43  ;;  %v5557_v13 = vpack.c.bf16 %v11469_v59, %v11468_v22  ;;  %v10949_v31 = vpop.eup %7613  ;;  %v4773_v16 = vadd.f32 0.2548296, %v4709_v42 }
 0xcd3   : > { %v4838_v26 = vmul.f32 %v10891_v34, %v4774_v37  ;;  %v4519_v30 = vadd.f32 1.4214138, %v4455_v35  ;;  %v4009_v61 = vand.u32 2147483647, %v10941_v3  ;;  %v7616_v10 = vpop.eup %7615  ;;  %v5409_v0 = vsel %vm5281_vm12, %v5217_v29, %v5345_v32 }
 0xcd4   : > { %v5090_v12 = vmul.f32 1.442695, %v4967_v1  ;;  %v4328_v19 = vmul.f32 1.0614054, %v10949_v31  ;;  %v5092_v43 = vmul.f32 1.442695, %v4968_v24  ;;  %5884 = vmatprep.mubr.bf16.mxu1 %v5557_v13  ;;  %v4970_v59 = vmul.f32 %v4906_v45, %v4010_v54 }
 0xcd5   : > { %v5158_v50 = vmul.f32 %v7612_v18, %v4838_v26  ;;  %v4583_v22 = vmul.f32 %v10922_v25, %v4519_v30  ;;  %v4073_v62 = vmul.f32 0.3275911, %v4009_v61  ;;  %v5411_v34 = vsel %vm5283_vm13, %v5219_v27, %v5347_v51 }
 0xcd6   : > { %v5412_v42 = vsel %vm5284_vm14, %v5220_v4, %v5348_v63  ;;  %v4392_v37 = vadd.f32 -1.4531521, %v4328_v19  ;;  %v10962_v49 = vmul.f32 0.70710677, %v10945_v53  ;;  %vm5286_vm15 = vcmp.ge.f32.partialorder %v10808_v23, 0.0 }
 0xcd7   : > { %v4837_v29 = vmul.f32 %v10896_v46, %v4773_v16  ;;  %v4647_v32 = vadd.f32 -0.28449672, %v4583_v22  ;;  %v4137_v1 = vadd.f32 1.0, %v4073_v62  ;;  %v4905_v24 = vsub.f32 0.0, %v4009_v61  ;;  %v11470_v22 = vld [vmem:[#allocation30_spill] sm:$0xff] }
 0xcd8   : > { %v5473_v35 = vadd.f32 1.0, %v5409_v0  ;;  %v5222_v54 = vsub.f32 1.0, %v5158_v50  ;;  %v4456_v45 = vmul.f32 %v10949_v31, %v4392_v37  ;;  %v10968_v44 = vand.u32 2147483647, %v10962_v49 }
 0xcd9   : > { %v10971_v28 = vmul.f32 %v5474_v56, %v10733_v8  ;;  %v5475_v19 = vadd.f32 1.0, %v5411_v34  ;;  %v5096_v27 = vmul.f32 1.442695, %v4970_v59  ;;  %7619 = vrcp.f32 %v4137_v1  ;;  %v11471_v59 = vld [vmem:[#allocation52_spill] sm:$0xff] }
 0xcda   : > { %v10973_v4 = vpop.eup %7617  ;;  %v5476_v18 = vadd.f32 1.0, %v5412_v42  ;;  %v4711_v46 = vmul.f32 %v10922_v25, %v4647_v32  ;;  %v4520_v62 = vadd.f32 1.4214138, %v4456_v45  ;;  %7621 = vpow2.f32 %v5092_v43  ;;  %v11474_v1 = vld [vmem:[#allocation28_spill] sm:$0xff] }
 0xcdb   : > { %v10976_v51 = vmul.f32 %v7616_v10, %v4837_v29  ;;  %v4330_v63 = vmul.f32 1.0614054, %v10973_v4  ;;  %v4969_v13 = vmul.f32 %v4905_v24, %v4009_v61  ;;  %v4075_v26 = vmul.f32 0.3275911, %v10968_v44  ;;  %v11472_v29 = vld [vmem:[#allocation36_spill] sm:$0xff]  ;;  %v11475_v24 = vld [vmem:[#allocation49_spill] sm:$0xff] }
 0xcdc   : > { %v10981_v8 = vmul.f32 %v5473_v35, %v10825_v6  ;;  %v5350_v56 = vsub.f32 0.0, %v5222_v54  ;;  %7623 = vpow2.f32 %v5090_v12  ;;  %v4584_v16 = vmul.f32 %v10949_v31, %v4520_v62  ;;  %v11478_v62 = vld [vmem:[#allocation44_spill] sm:$0xff] }
 0xcdd   : > { %v10985_v30 = vmul.f32 %v5475_v19, %v10848_v11  ;;  %v4394_v0 = vadd.f32 -1.4531521, %v4330_v63  ;;  %7625 = vpow2.f32 %v5096_v27  ;;  %v4139_v43 = vadd.f32 1.0, %v4075_v26  ;;  %v11476_v27 = vld [vmem:[#allocation43_spill] sm:$0xff]  ;;  %v11479_v63 = vld [vmem:[#allocation56_spill] sm:$0xff] }
 0xcde   : > { %v10988_v10 = vmul.f32 %v5476_v18, %v10857_v60  ;;  %v4775_v50 = vadd.f32 0.2548296, %v4711_v46  ;;  %v4648_v61 = vadd.f32 -0.28449672, %v4584_v16  ;;  %v5559_v34 = vpack.c.bf16 %v11471_v59, %v11470_v22  ;;  %v11473_v60 = vld [vmem:[#allocation32_spill] sm:$0xff]  ;;  %v11477_v18 = vld [vmem:[#allocation55_spill] sm:$0xff] }
 0xcdf   : > { %v4458_v12 = vmul.f32 %v10973_v4, %v4394_v0  ;;  %v5094_v42 = vmul.f32 1.442695, %v4969_v13  ;;  %7627 = vrcp.f32 %v4139_v43  ;;  %v5414_v11 = vsel %vm5286_vm15, %v5222_v54, %v5350_v56  ;;  %v11480_v26 = vld [vmem:[#allocation35_spill] sm:$0xff]  ;;  %v11481_v56 = vld [vmem:[#allocation33_spill] sm:$0xff]  ;;  %v11482_v0 = vld [vmem:[#allocation42_spill] sm:$0xff] }
 0xce0   : > { %v4712_v37 = vmul.f32 %v10949_v31, %v4648_v61  ;;  %5981 = vmatprep.mubr.bf16.mxu0 %v5559_v34  ;;  %v5556_v32 = vpack.c.bf16 %v11473_v60, %v11472_v29  ;;  %v5558_v35 = vpack.c.bf16 %v11475_v24, %v11474_v1  ;;  %v4907_v19 = vsub.f32 0.0, %v10968_v44  ;;  %v11483_v43 = vld [vmem:[#allocation46_spill] sm:$0xff]  ;;  %v11484_v60 = vld [vmem:[#allocation48_spill] sm:$0xff]  ;;  %v11486_v1 = vld [vmem:[#allocation9_spill] sm:$0xff] }
 0xce1   : > { %v4522_v45 = vadd.f32 1.4214138, %v4458_v12  ;;  %v5561_v46 = vpack.c.bf16 %v11477_v18, %v11476_v27  ;;  %v5563_v13 = vpack.c.bf16 %v11479_v63, %v11478_v62  ;;  %v4839_v23 = vmul.f32 %v10922_v25, %v4775_v50  ;;  %v11494_v62 = vld [vmem:[#allocation31_spill] sm:$0xff] }
 0xce2   : > { %v4776_v54 = vadd.f32 0.2548296, %v4712_v37  ;;  %5885 = vmatmul.mubr.bf16.gmra.mrb[96].mxu1 %v5556_v32  ;;  %5982 = vmatmul.mubr.bf16.gmra.mrb[112].mxu0 %v5558_v35  ;;  %v5560_v16 = vpack.c.bf16 %v11481_v56, %v11480_v26  ;;  %v5562_v61 = vpack.c.bf16 %v11483_v43, %v11482_v0  ;;  %v11013_v59 = vadd.f32 1.0, %v5414_v11  ;;  %v11485_v32 = vld [vmem:[#allocation58_spill] sm:$0xff] }
 0xce3   : > { %v11011_v22 = vpop.eup %7619  ;;  %vm5288_vm0 = vcmp.ge.f32.partialorder %v10889_v20, 0.0  ;;  %v4586_v34 = vmul.f32 %v10973_v4, %v4522_v45  ;;  %5892 = vmatprep.mubr.bf16.mxu1 %v5561_v46  ;;  %5989 = vmatprep.mubr.bf16.mxu0 %v5563_v13  ;;  %v5565_v25 = vpack.c.bf16 %v10513_v55, %v10409_v41  ;;  %v5567_v50 = vpack.c.bf16 %v10521_v17, %v10436_v40  ;;  %v11487_v45 = vld [vmem:[#allocation40_spill] sm:$0xff]  ;;  %v11488_v41 = vld [vmem:[#allocation62_spill] sm:$0xff]  ;;  %v11489_v46 = vld [vmem:[#allocation39_spill] sm:$0xff] }
 0xce4   : > { %v7622_v12 = vpop.eup %7621  ;;  %v4840_v37 = vmul.f32 %v10949_v31, %v4776_v54  ;;  %v4329_v29 = vmul.f32 1.0614054, %v11011_v22  ;;  %v5564_v11 = vpack.c.bf16 %v10480_v15, %v11484_v60  ;;  %v5566_v24 = vpack.c.bf16 %v11486_v1, %v11485_v32  ;;  %v11490_v54 = vld [vmem:[#allocation26_spill] sm:$0xff] }
 0xce5   : > { %v4650_v35 = vadd.f32 -0.28449672, %v4586_v34  ;;  %7629 = vpow2.f32 %v5094_v42  ;;  %v4971_v31 = vmul.f32 %v4907_v19, %v10968_v44  ;;  %v11493_v42 = vld [vmem:[#allocation41_spill] sm:$0xff]  ;;  %vm5290_vm1 = vcmp.ge.f32.partialorder %v10904_v38, 0.0 }
 0xce6   : > { %v7624_v40 = vpop.eup %7623  ;;  %v5160_v17 = vmul.f32 %v7622_v12, %v4840_v37  ;;  %v4393_v18 = vadd.f32 -1.4531521, %v4329_v29  ;;  %v11491_v29 = vld [vmem:[#allocation37_spill] sm:$0xff]  ;;  %v6727_v56 = vadd.f32 %v11494_v62, %v11493_v42  ;;  %v11509_v15 = vpack.c.bf16 %v10783_v47, %v11487_v45 }
 0xce7   : > { %v7626_v63 = vpop.eup %7625  ;;  %v4714_v13 = vmul.f32 %v10973_v4, %v4650_v35  ;;  %v11041_v0 = vmul.f32 %v7624_v40, %v4839_v23  ;;  %v11492_v35 = vld [vmem:[#allocation27_spill] sm:$0xff]  ;;  %v5098_v55 = vmul.f32 1.442695, %v4971_v31  ;;  %v11498_v62 = vld [vmem:[#allocation61_spill] sm:$0xff]  ;;  %v11510_v60 = vpack.c.bf16 %v10796_v57, %v11488_v41  ;;  %v11512_v57 = vld [vmem:[#allocation68_spill] sm:$0xff] }
 0xce8   : > { %v5224_v43 = vsub.f32 1.0, %v5160_v17  ;;  %v4457_v44 = vmul.f32 %v11011_v22, %v4393_v18  ;;  %v6663_v26 = vadd.f32 %v11492_v35, %v11491_v29  ;;  %v11495_v18 = vld [vmem:[#allocation34_spill] sm:$0xff]  ;;  %v11497_v35 = vld [vmem:[#allocation60_spill] sm:$0xff]  ;;  %v11500_v31 = vld [vmem:[#allocation11_spill] sm:$0xff]  ;;  %vm5285_vm2 = vcmp.ge.f32.partialorder %v11512_v57, 0.0 }
 0xce9   : > { %v11046_v34 = vpop.eup %7627  ;;  %v4778_v12 = vadd.f32 0.2548296, %v4714_v13  ;;  %v11496_v13 = vld [vmem:[#allocation51_spill] sm:$0xff]  ;;  %v6730_v42 = vadd.f32 %v11498_v62, %v11497_v35  ;;  %v11505_v62 = vld [vmem:[#allocation65_spill] sm:$0xff]  ;;  %7631 = vpow2.f32 %v5098_v55  ;;  %vm5289_vm3 = vcmp.ge.f32.partialorder %v10941_v3, 0.0 }
 0xcea   : > { %v5352_v23 = vsub.f32 0.0, %v5224_v43  ;;  %v4521_v40 = vadd.f32 1.4214138, %v4457_v44  ;;  %v4331_v17 = vmul.f32 1.0614054, %v11046_v34  ;;  %5893 = vmatmul.mubr.bf16.gmra.mrb[100].mxu1 %v5560_v16  ;;  %5990 = vmatmul.mubr.bf16.gmra.mrb[116].mxu0 %v5562_v61  ;;  %v6666_v19 = vadd.f32 %v11496_v13, %v11495_v18 }
 0xceb   : > { %v4842_v37 = vmul.f32 %v10973_v4, %v4778_v12  ;;  %5900 = vmatprep.mubr.bf16.mxu1 %v5565_v25  ;;  %5997 = vmatprep.mubr.bf16.mxu0 %v5567_v50  ;;  %v5968_v29 = vadd.f32 %v6727_v56, %v6663_v26  ;;  %v11069_v16 = vld [vmem:[%s700_s23] ss:$0 sm:$0xff]  ;;  %v11499_v4 = vld [vmem:[#allocation38_spill] sm:$0xff]  ;;  %vm5291_vm5 = vcmp.ge.f32.partialorder %v10962_v49, 0.0  ;;  %vm6097_vm6 = vcmask (!%p6541_p9), 1041409  }
 0xcec   : > { %v5416_v27 = vsel %vm5288_vm0, %v5224_v43, %v5352_v23  ;;  %v4585_v44 = vmul.f32 %v11011_v22, %v4521_v40  ;;  %v4395_v6 = vadd.f32 -1.4531521, %v4331_v17  ;;  %v6669_v61 = vadd.f32 %v11499_v4, %v10743_v2  ;;  %v11501_v23 = vld [vmem:[#allocation53_spill] sm:$0xff]  ;;  %v11502_v40 = vld [vmem:[#allocation63_spill] sm:$0xff] }
 0xced   : > { %v5480_v25 = vadd.f32 1.0, %v5416_v27  ;;  %v5162_v50 = vmul.f32 %v7626_v63, %v4842_v37  ;;  %v6030_v26 = vadd.f32 %v5968_v29, %v11500_v31  ;;  %v5971_v56 = vadd.f32 %v6730_v42, %v6666_v19  ;;  %v11503_v27 = vld [vmem:[#allocation10_spill] sm:$0xff] }
 0xcee   : > { %v4649_v12 = vadd.f32 -0.28449672, %v4585_v44  ;;  %v4459_v20 = vmul.f32 %v11046_v34, %v4395_v6  ;;  %v6733_v43 = vadd.f32 %v10771_v52, %v10766_v58  ;;  %v6672_v17 = vadd.f32 %v11502_v40, %v11501_v23  ;;  %v11504_v6 = vld [vmem:[#allocation64_spill] sm:$0xff] }
 0xcef   : > { %v7630_v18 = vpop.eup %7629  ;;  %v11080_v13 = vmul.f32 %v5480_v25, %v10930_v33  ;;  %v5226_v35 = vsub.f32 1.0, %v5162_v50  ;;  %v6053_v2 = vadd.f32 %v11069_v16, %v6030_v26  ;;  %v6031_v63 = vadd.f32 %v5971_v56, %v11503_v27  ;;  %v11507_v50 = vld [vmem:[#allocation66_spill] sm:$0xff] }
 0xcf0   : > { %v4713_v19 = vmul.f32 %v11011_v22, %v4649_v12  ;;  %v4523_v37 = vadd.f32 1.4214138, %v4459_v20  ;;  %v5976_v29 = vadd.f32 %v6733_v43, %v6669_v61  ;;  %v6736_v42 = vadd.f32 %v11505_v62, %v11504_v6  ;;  %v11506_v61 = vld [vmem:[#allocation12_spill] sm:$0xff]  ;;  %v11511_v43 = vld [vmem:[#allocation13_spill] sm:$0xff] }
 0xcf1   : > { %v5354_v52 = vsub.f32 0.0, %v5226_v35  ;;  %v5576_v58 = vpack.c.bf16 %v11080_v13, %v10988_v10  ;;  %6069 = vst [vmem:[#allocation2] sm:$0xff] %v6053_v2  ;;  %v6054_v33 = vadd.f32 %v11069_v16, %v6031_v63  ;;  %v3877_v31 = vmul.f32 0.5, %v11507_v50  ;;  %v11525_v13 = vld [vmem:[#allocation15_spill] sm:$0xff] }
 0xcf2   : > { %v4777_v44 = vadd.f32 0.2548296, %v4713_v19  ;;  %v4587_v4 = vmul.f32 %v11046_v34, %v4523_v37  ;;  %5901 = vmatmul.mubr.bf16.gmra.mrb[104].mxu1 %v5564_v11  ;;  %5998 = vmatmul.mubr.bf16.gmra.mrb[120].mxu0 %v5566_v24  ;;  %v6032_v25 = vadd.f32 %v5976_v29, %v11506_v61  ;;  %v5979_v55 = vadd.f32 %v6736_v42, %v6672_v17  ;;  %v11519_v42 = vld [vmem:[#allocation69_spill] sm:$0xff] }
 0xcf3   : > { %v11508_v26 = vsub.f32 1.0, %v10976_v51  ;;  %v3881_v12 = vmul.f32 0.5, %v10885_v21  ;;  %v5418_v20 = vsel %vm5290_vm1, %v5226_v35, %v5354_v52  ;;  %5908 = vmatprep.mubr.bf16.mxu1 %v11509_v15  ;;  %6005 = vmatprep.mubr.bf16.mxu0 %v11510_v60  ;;  %6070 = vst [vmem:[#allocation2 + $0x8] sm:$0xff] %v6054_v33  ;;  %v5542_v21 = vmul.f32 %v11013_v59, %v3877_v31  ;;  %v7632_v37 = vpop.eup %7631 }
 0xcf4   : > { %v5482_v11 = vadd.f32 1.0, %v5418_v20  ;;  %v4841_v32 = vmul.f32 %v11011_v22, %v4777_v44  ;;  %v4651_v1 = vadd.f32 -0.28449672, %v4587_v4  ;;  %v6055_v24 = vadd.f32 %v11069_v16, %v6032_v25 }
 0xcf5   : > { %v5349_v56 = vsub.f32 0.0, %v11508_v26  ;;  %v6033_v38 = vadd.f32 %v5979_v55, %v11511_v43  ;;  %v5223_v23 = vsub.f32 1.0, %v11041_v0  ;;  %v11513_v22 = vmov %v11508_v26  ;;  %v11523_v55 = vld [vmem:[#allocation54_spill] sm:$0xff] }
 0xcf6   : > { %v5546_v40 = vmul.f32 %v5482_v11, %v3881_v12  ;;  %v5161_v47 = vmul.f32 %v7630_v18, %v4841_v32  ;;  %v4715_v45 = vmul.f32 %v11046_v34, %v4651_v1  ;;  %6071 = vst [vmem:[#allocation2 + $0x10] sm:$0xff] %v6055_v24  ;;  %v11514_v63 = vpack.c.bf16 %v10702_v48, %v11489_v46  ;;  %v11518_v48 = vld [vmem:[#allocation67_spill] sm:$0xff]  ;;  %v11524_v43 = vld [vmem:[#allocation14_spill] sm:$0xff] }
 0xcf7   : > { %v11118_v41 = vadd.f32 %v11069_v16, %v6033_v38  ;;  %v5413_v17 = vsel %vm5285_vm2, %v11513_v22, %v5349_v56  ;;  %v5351_v27 = vsub.f32 0.0, %v5223_v23  ;;  %v11515_v19 = vpack.c.bf16 %v10757_v9, %v11490_v54  ;;  %v11520_v9 = vld [vmem:[#allocation45_spill] sm:$0xff] }
 0xcf8   : > { %v5225_v35 = vsub.f32 1.0, %v5161_v47  ;;  %v4779_v2 = vadd.f32 0.2548296, %v4715_v45  ;;  %v5578_v59 = vpack.c.bf16 %v5546_v40, %v5542_v21  ;;  %v5477_v51 = vadd.f32 1.0, %v5413_v17 }
 0xcf9   : > { %6072 = vst [vmem:[#allocation2 + $0x18] sm:$0xff] %v11118_v41  ;;  %v11516_v29 = vpack.c.bf16 %v10981_v8, %v10863_v7  ;;  %v11517_v6 = vpack.c.bf16 %v10985_v30, %v10908_v39  ;;  %v3876_v46 = vmul.f32 0.5, %v11518_v48  ;;  %vm5287_vm4 = vcmp.ge.f32.partialorder %v11519_v42, 0.0 }
 0xcfa   : > { %v5353_v0 = vsub.f32 0.0, %v5225_v35  ;;  %v4843_v18 = vmul.f32 %v11046_v34, %v4779_v2  ;;  %5909 = vmatmul.mubr.bf16.gmra.mrb[108].mxu1 %v11514_v63  ;;  %6006 = vmatmul.mubr.bf16.gmra.mrb[124].mxu0 %v11515_v19  ;;  %v3880_v54 = vmul.f32 0.5, %v11520_v9  ;;  %v5415_v33 = vsel %vm5287_vm4, %v5223_v23, %v5351_v27 }
 0xcfb   : > { %5916 = vmatprep.mubr.bf16.mxu1 %v11516_v29  ;;  %6013 = vmatprep.mubr.bf16.mxu0 %v11517_v6  ;;  %v5541_v3 = vmul.f32 %v5477_v51, %v3876_v46  ;;  %v5479_v7 = vadd.f32 1.0, %v5415_v33  ;;  %v11521_v30 = vpack.c.bf16 %v10915_v36, %v10821_v14  ;;  %v11522_v25 = vpack.c.bf16 %v10971_v28, %v10845_v5 }
 0xcfc   : > { %v5417_v34 = vsel %vm5289_vm3, %v5225_v35, %v5353_v0  ;;  %v5163_v62 = vmul.f32 %v7632_v37, %v4843_v18  ;;  %v3878_v50 = vmul.f32 0.5, %v11523_v55  ;;  %v3882_v31 = vmul.f32 0.5, %v10945_v53  ;;  %v11526_v37 = vld [vmem:[#allocation16_spill] sm:$0xff] }
 0xcfd   : > { %v5481_v52 = vadd.f32 1.0, %v5417_v34  ;;  %v11527_v34 = vld [vmem:[#allocation17_spill] sm:$0xff]  ;;  %vm6100_vm7 = vcmask (!%p6541_p9), 1042434   ;;  %vm6108_vm8 = vcmask (!%p6541_p9), 1042432   ;;  %vm6104_vm9 = vcmask (!%p6541_p9), 1047559  }
 0xcfe   : > { %v5227_v44 = vsub.f32 1.0, %v5163_v62  ;;  %v5543_v56 = vmul.f32 %v5479_v7, %v3878_v50 }
 0xcff   : > { %v5545_v4 = vmul.f32 %v5481_v52, %v3880_v54 }
 0xd00   : > { %v5355_v61 = vsub.f32 0.0, %v5227_v44 }
 0xd01   : > { %v5577_v8 = vpack.c.bf16 %v5545_v4, %v5541_v3 }
 0xd02   : > { %v5419_v39 = vsel %vm5291_vm5, %v5227_v44, %v5355_v61  ;;  %5917 = vmatmul.mubr.bf16.gmra.mrb[112].mxu1 %v11521_v30  ;;  %6014 = vmatmul.mubr.bf16.gmra.mrb[128].mxu0 %v11522_v25  ;;  %v11528_v30 = vld [vmem:[#allocation18_spill] sm:$0xff] }
 0xd03   : > { %v5483_v26 = vadd.f32 1.0, %v5419_v39  ;;  %5924 = vmatprep.mubr.bf16.mxu1 %v5577_v8 }
 0xd05   : > { %v5547_v12 = vmul.f32 %v5483_v26, %v3882_v31  ;;  %v11529_v31 = vld [vmem:[#allocation19_spill] sm:$0xff] }
 0xd07   : > { %v5579_v20 = vpack.c.bf16 %v5547_v12, %v5543_v56 }
 0xd09   : > { %6021 = vmatprep.mubr.bf16.mxu0 %v5579_v20 }
 0xd0a   : > { %5925 = vmatmul.mubr.bf16.gmra.mrb[116].mxu1 %v5576_v58  ;;  %6022 = vmatmul.mubr.bf16.gmra.mrb[132].mxu0 %v5578_v59 }
 0xdb5   : > { %v6673_v14 = vpop.f32.mrb[96].mxu1  ;;  %v6737_v36 = vpop.f32.mrb[112].mxu0 }
 0xdb6   : > { %v6674_v49 = vpop.f32.mrb[97].mxu1  ;;  %v6738_v5 = vpop.f32.mrb[113].mxu0 }
 0xdb7   : > { %v6675_v28 = vadd.f32 %v6674_v49, %v6673_v14  ;;  %v6739_v15 = vadd.f32 %v6738_v5, %v6737_v36  ;;  %v6676_v60 = vpop.f32.mrb[98].mxu1  ;;  %v6740_v11 = vpop.f32.mrb[114].mxu0 }
 0xdb8   : > { %v6677_v53 = vpop.f32.mrb[99].mxu1  ;;  %v6741_v32 = vpop.f32.mrb[115].mxu0 }
 0xdb9   : > { %v5984_v1 = vadd.f32 %v6739_v15, %v6675_v28  ;;  %v6678_v24 = vadd.f32 %v6677_v53, %v6676_v60  ;;  %v6742_v21 = vadd.f32 %v6741_v32, %v6740_v11 }
 0xdbb   : > { %v6034_v38 = vadd.f32 %v5984_v1, %v11524_v43  ;;  %v5987_v23 = vadd.f32 %v6742_v21, %v6678_v24  ;;  %v11530_v24 = vld [vmem:[#allocation20_spill] sm:$0xff] }
 0xdbd   : > { %v6057_v10 = vadd.f32 %v11069_v16, %v6034_v38  ;;  %v6035_v58 = vadd.f32 %v5987_v23, %v11525_v13  ;;  %v6679_v40 = vpop.f32.mrb[100].mxu1  ;;  %v6743_v47 = vpop.f32.mrb[116].mxu0  ;;  %v11531_v23 = vld [vmem:[#allocation21_spill] sm:$0xff] }
 0xdbe   : > { %v6680_v45 = vpop.f32.mrb[101].mxu1  ;;  %v6744_v57 = vpop.f32.mrb[117].mxu0 }
 0xdbf   : > { %6073 = vst [vmem:[#allocation2 + $0x20] sm:$0xff] %v6057_v10  ;;  %v6058_v22 = vadd.f32 %v11069_v16, %v6035_v58  ;;  %v6681_v17 = vadd.f32 %v6680_v45, %v6679_v40  ;;  %v6745_v35 = vadd.f32 %v6744_v57, %v6743_v47  ;;  %v6682_v2 = vpop.f32.mrb[102].mxu1  ;;  %v6746_v59 = vpop.f32.mrb[118].mxu0 }
 0xdc0   : > { %v6683_v27 = vpop.f32.mrb[103].mxu1  ;;  %v6747_v0 = vpop.f32.mrb[119].mxu0 }
 0xdc1   : > { %6074 = vst [vmem:[#allocation2 + $0x28] sm:$0xff] %v6058_v22  ;;  %v5992_v18 = vadd.f32 %v6745_v35, %v6681_v17  ;;  %v6684_v63 = vadd.f32 %v6683_v27, %v6682_v2  ;;  %v6748_v19 = vadd.f32 %v6747_v0, %v6746_v59 }
 0xdc3   : > { %v6036_v51 = vadd.f32 %v5992_v18, %v11526_v37  ;;  %v5995_v29 = vadd.f32 %v6748_v19, %v6684_v63  ;;  %v11532_v63 = vld [vmem:[#allocation22_spill] sm:$0xff] }
 0xdc5   : > { %v6059_v6 = vadd.f32 %v11069_v16, %v6036_v51  ;;  %v6037_v62 = vadd.f32 %v5995_v29, %v11527_v34  ;;  %v6685_v48 = vpop.f32.mrb[104].mxu1  ;;  %v6749_v46 = vpop.f32.mrb[120].mxu0  ;;  %v11533_v29 = vld [vmem:[#allocation23_spill] sm:$0xff] }
 0xdc6   : > { %v6686_v42 = vpop.f32.mrb[105].mxu1  ;;  %v6750_v9 = vpop.f32.mrb[121].mxu0 }
 0xdc7   : > { %6075 = vst [vmem:[#allocation2 + $0x30] sm:$0xff] %v6059_v6  ;;  %v11160_v54 = vadd.f32 %v11069_v16, %v6037_v62  ;;  %v6687_v52 = vadd.f32 %v6686_v42, %v6685_v48  ;;  %v6751_v33 = vadd.f32 %v6750_v9, %v6749_v46  ;;  %v6688_v44 = vpop.f32.mrb[106].mxu1  ;;  %v6752_v3 = vpop.f32.mrb[122].mxu0 }
 0xdc8   : > { %v6689_v4 = vpop.f32.mrb[107].mxu1  ;;  %v6753_v61 = vpop.f32.mrb[123].mxu0 }
 0xdc9   : > { %6076 = vst [vmem:[#allocation2 + $0x38] sm:$0xff] %v11160_v54  ;;  %v6000_v7 = vadd.f32 %v6751_v33, %v6687_v52  ;;  %v6690_v8 = vadd.f32 %v6689_v4, %v6688_v44  ;;  %v6754_v39 = vadd.f32 %v6753_v61, %v6752_v3 }
 0xdcb   : > { %v6038_v25 = vadd.f32 %v6000_v7, %v11528_v30  ;;  %v6003_v55 = vadd.f32 %v6754_v39, %v6690_v8  ;;  %v11534_v39 = vld [vmem:[#allocation24_spill] sm:$0xff] }
 0xdcd   : > { %v6061_v50 = vadd.f32 %v11069_v16, %v6038_v25  ;;  %v6039_v26 = vadd.f32 %v6003_v55, %v11529_v31  ;;  %v6691_v56 = vpop.f32.mrb[108].mxu1  ;;  %v6755_v12 = vpop.f32.mrb[124].mxu0 }
 0xdce   : > { %v6692_v20 = vpop.f32.mrb[109].mxu1  ;;  %v6756_v14 = vpop.f32.mrb[125].mxu0 }
 0xdcf   : > { %6077 = vst [vmem:[#allocation2 + $0x40] sm:$0xff] %v6061_v50  ;;  %v6062_v36 = vadd.f32 %v11069_v16, %v6039_v26  ;;  %v6693_v49 = vadd.f32 %v6692_v20, %v6691_v56  ;;  %v6757_v5 = vadd.f32 %v6756_v14, %v6755_v12  ;;  %v6694_v28 = vpop.f32.mrb[110].mxu1  ;;  %v6758_v15 = vpop.f32.mrb[126].mxu0  ;;  %v11535_v50 = vld [vmem:[#allocation25_spill] sm:$0xff]  ;;  %v6095_v56 = vrot.slane (!%p6541_p9), %v11160_v54, 7 }
 0xdd0   : > { %v6695_v60 = vpop.f32.mrb[111].mxu1  ;;  %v6759_v11 = vpop.f32.mrb[127].mxu0 }
 0xdd1   : > { %6078 = vst [vmem:[#allocation2 + $0x48] sm:$0xff] %v6062_v36  ;;  %v6008_v53 = vadd.f32 %v6757_v5, %v6693_v49  ;;  %v6696_v32 = vadd.f32 %v6695_v60, %v6694_v28  ;;  %v6760_v1 = vadd.f32 %v6759_v11, %v6758_v15 }
 0xdd3   : > { %v6040_v21 = vadd.f32 %v6008_v53, %v11530_v24  ;;  %v6011_v43 = vadd.f32 %v6760_v1, %v6696_v32 }
 0xdd5   : > { %v6063_v38 = vadd.f32 %v11069_v16, %v6040_v21  ;;  %v6041_v10 = vadd.f32 %v6011_v43, %v11531_v23  ;;  %v6697_v13 = vpop.f32.mrb[112].mxu1  ;;  %v6761_v58 = vpop.f32.mrb[128].mxu0 }
 0xdd6   : > { %v6698_v40 = vpop.f32.mrb[113].mxu1  ;;  %v6762_v47 = vpop.f32.mrb[129].mxu0 }
 0xdd7   : > { %6079 = vst [vmem:[#allocation2 + $0x50] sm:$0xff] %v6063_v38  ;;  %v6064_v45 = vadd.f32 %v11069_v16, %v6041_v10  ;;  %v6699_v57 = vadd.f32 %v6698_v40, %v6697_v13  ;;  %v6763_v22 = vadd.f32 %v6762_v47, %v6761_v58  ;;  %v6700_v17 = vpop.f32.mrb[114].mxu1  ;;  %v6764_v35 = vpop.f32.mrb[130].mxu0 }
 0xdd8   : > { %v6701_v2 = vpop.f32.mrb[115].mxu1  ;;  %v6765_v59 = vpop.f32.mrb[131].mxu0 }
 0xdd9   : > { %6080 = vst [vmem:[#allocation2 + $0x58] sm:$0xff] %v6064_v45  ;;  %v6016_v27 = vadd.f32 %v6763_v22, %v6699_v57  ;;  %v6702_v0 = vadd.f32 %v6701_v2, %v6700_v17  ;;  %v6766_v18 = vadd.f32 %v6765_v59, %v6764_v35  ;;  %v6096_v12 = vrot.slane (!%p6541_p9), %v6064_v45, 6 }
 0xddb   : > { %v6042_v19 = vadd.f32 %v6016_v27, %v11532_v63  ;;  %v6019_v37 = vadd.f32 %v6766_v18, %v6702_v0  ;;  %v6098_v14 = vsel (!%p6541_p9), %vm6097_vm6, %v6096_v12, %v6095_v56 }
 0xddd   : > { %v6065_v51 = vadd.f32 %v11069_v16, %v6042_v19  ;;  %v6043_v6 = vadd.f32 %v6019_v37, %v11533_v29  ;;  %v6703_v34 = vpop.f32.mrb[116].mxu1  ;;  %v6767_v62 = vpop.f32.mrb[132].mxu0  ;;  %v6542_v37 = vld [vmem:[%s11537_s19] ss:$0 sm:$0xff] (!%p6541_p9) }
 0xdde   : > { %v6704_v48 = vpop.f32.mrb[117].mxu1  ;;  %v6768_v46 = vpop.f32.mrb[133].mxu0 }
 0xddf   : > { %6081 = vst [vmem:[#allocation2 + $0x60] sm:$0xff] %v6065_v51  ;;  %v6066_v42 = vadd.f32 %v11069_v16, %v6043_v6  ;;  %v6705_v9 = vadd.f32 %v6704_v48, %v6703_v34  ;;  %v6769_v52 = vadd.f32 %v6768_v46, %v6767_v62  ;;  %v6706_v33 = vpop.f32.mrb[118].mxu1  ;;  %v6770_v44 = vpop.f32.mrb[134].mxu0  ;;  %v6543_v62 = vld [vmem:[%s11538_s29] ss:$0 sm:$0xff] (!%p6541_p9) }
 0xde0   : > { %v6707_v3 = vpop.f32.mrb[119].mxu1  ;;  %v6771_v4 = vpop.f32.mrb[135].mxu0 }
 0xde1   : > { %6082 = vst [vmem:[#allocation2 + $0x68] sm:$0xff] %v6066_v42  ;;  %v6024_v61 = vadd.f32 %v6769_v52, %v6705_v9  ;;  %v6708_v7 = vadd.f32 %v6707_v3, %v6706_v33  ;;  %v6772_v8 = vadd.f32 %v6771_v4, %v6770_v44 }
 0xde3   : > { %v6044_v30 = vadd.f32 %v6024_v61, %v11534_v39  ;;  %v6027_v25 = vadd.f32 %v6772_v8, %v6708_v7  ;;  %6088 = sbr.rel (%p6541_p9) target bundleno = 3890 (0xf32), region = 88 }
 0xde5   : > { %v6067_v55 = vadd.f32 %v11069_v16, %v6044_v30  ;;  %v6045_v31 = vadd.f32 %v6027_v25, %v11535_v50 }
 0xde7   : > { %6083 = vst [vmem:[#allocation2 + $0x70] sm:$0xff] %v6067_v55  ;;  %v6068_v26 = vadd.f32 %v11069_v16, %v6045_v31  ;;  %v6105_v16 = vsel (!%p6541_p9), %vm6104_vm9, %v11118_v41, 0.0 }
 0xde9   : > { %6084 = vst [vmem:[#allocation2 + $0x78] sm:$0xff] %v6068_v26  ;;  %v6099_v20 = vrot.slane (!%p6541_p9), %v6068_v26, 5 }
 0xdeb   : > { %v6101_v36 = vsel %vm6100_vm7, %v6099_v20, %v6098_v14 }
 0xdec   : > { %v6109_v49 = vsel %vm6108_vm8, %v6101_v36, 0.0 }
 0xded   : > { %6110 = vadd.xlane.f32.xlu0 %v6109_v49 }
 0xdf1   : > { %6106 = vadd.xlane.f32.xlu0 %v6105_v16 }
 0xe7a   : > { %v6111_v5 = vpop.xlane.xlu0 %6110 }
 0xe7b   : > { %v6113_v28 = vmul.f32 0.0078125, %v6111_v5 }
 0xe7d   : > { %v6116_v15 = vrot.slane %v6113_v28, 1  ;;  %v6117_v60 = vrot.slane %v6113_v28, 2  ;;  %v6118_v11 = vrot.slane %v6113_v28, 3 }
 0xe7e   : > { %v6107_v53 = vpop.xlane.xlu0 %6106 }
 0xe7f   : > { %v6124_v32 = vsub.f32 %v11160_v54, %v6116_v15  ;;  %v6125_v1 = vsub.f32 %v6064_v45, %v6117_v60  ;;  %v6126_v24 = vsub.f32 %v6068_v26, %v6118_v11  ;;  %v6112_v21 = vmul.f32 0.0078125, %v6107_v53 }
 0xe81   : > { %v6128_v43 = vmul.f32 %v6124_v32, %v6124_v32  ;;  %v6129_v38 = vmul.f32 %v6125_v1, %v6125_v1  ;;  %v6123_v23 = vsub.f32 %v11118_v41, %v6112_v21  ;;  %v6130_v10 = vmul.f32 %v6126_v24, %v6126_v24 }
 0xe83   : > { %v6135_v13 = vrot.slane %v6128_v43, 7  ;;  %v6136_v58 = vrot.slane %v6129_v38, 6  ;;  %v6138_v40 = vrot.slane %v6130_v10, 5  ;;  %v6127_v47 = vmul.f32 %v6123_v23, %v6123_v23 }
 0xe85   : > { %v6137_v57 = vsel %vm6097_vm6, %v6136_v58, %v6135_v13  ;;  %v6142_v54 = vsel %vm6104_vm9, %v6127_v47, 0.0 }
 0xe86   : > { %v6139_v22 = vsel %vm6100_vm7, %v6138_v40, %v6137_v57 }
 0xe87   : > { %v6145_v17 = vsel %vm6108_vm8, %v6139_v22, 0.0 }
 0xe88   : > { %6146 = vadd.xlane.f32.xlu1 %v6145_v17 }
 0xe8c   : > { %6143 = vadd.xlane.f32.xlu1 %v6142_v54 }
 0xf15   : > { %v6147_v45 = vpop.xlane.xlu1 %6146 }
 0xf16   : > { %v6149_v35 = vmul.f32 0.0078125, %v6147_v45 }
 0xf18   : > { %v6151_v2 = vadd.f32 1e-05, %v6149_v35 }
 0xf19   : > { %v6144_v59 = vpop.xlane.xlu1 %6143 }
 0xf1a   : > { %7649 = vrsqrt.f32 %v6151_v2  ;;  %v6148_v41 = vmul.f32 0.0078125, %v6144_v59 }
 0xf1c   : > { %v6150_v27 = vadd.f32 1e-05, %v6148_v41 }
 0xf1e   : > { %7651 = vrsqrt.f32 %v6150_v27 }
 0xf24   : > { %v7650_v0 = vpop.eup %7649 }
 0xf25   : > { %v6156_v18 = vrot.slane %v7650_v0, 1  ;;  %v6157_v63 = vrot.slane %v7650_v0, 2  ;;  %v6158_v19 = vrot.slane %v7650_v0, 3 }
 0xf27   : > { %v6164_v51 = vmul.f32 %v6156_v18, %v6124_v32  ;;  %v6165_v29 = vmul.f32 %v6157_v63, %v6125_v1  ;;  %v6166_v6 = vmul.f32 %v6158_v19, %v6126_v24 }
 0xf28   : > { %v7652_v34 = vpop.eup %7651 }
 0xf29   : > { %v6163_v48 = vmul.f32 %v7652_v34, %v6123_v23  ;;  %v6174_v46 = vmul.f32 %v6542_v37, %v6164_v51  ;;  %v6175_v42 = vmul.f32 %v6542_v37, %v6165_v29  ;;  %v6176_v9 = vmul.f32 %v6542_v37, %v6166_v6 }
 0xf2b   : > { %v6173_v52 = vmul.f32 %v6542_v37, %v6163_v48  ;;  %v6184_v33 = vadd.f32 %v6543_v62, %v6174_v46  ;;  %v6185_v44 = vadd.f32 %v6543_v62, %v6175_v42  ;;  %v6186_v3 = vadd.f32 %v6543_v62, %v6176_v9 }
 0xf2d   : > { %v6183_v4 = vadd.f32 %v6543_v62, %v6173_v52  ;;  %v6191_v61 = vrot.slane %v6184_v33, 7  ;;  %v6192_v7 = vrot.slane %v6185_v44, 6  ;;  %v6194_v8 = vrot.slane %v6186_v3, 5 }
 0xf2f   : > { %v6193_v39 = vsel %vm6097_vm6, %v6192_v7, %v6191_v61  ;;  %6198 = vst [vmem:[%s7885_s13 - $0x7] sm:$0x80] %v6183_v4 }
 0xf30   : > { %v6195_v30 = vsel %vm6100_vm7, %v6194_v8, %v6193_v39 }
 0xf31   : > { %6199 = vst [vmem:[%s7885_s13 + $0x1] sm:$0x7] %v6195_v30 }
 0xf32 PF: > { %s11539_s17 = sld [smem:[#allocation6_spill]]  ;;  %s11540_s18 = sld [smem:[#allocation4_spill]] }
 0xf33   : > { %s11541_s19 = sld [smem:[#allocation5_spill]]  ;;  %s11542_s20 = sld [smem:[#allocation7_spill]] }
 0xf34   : > { %s11543_s21 = sld [smem:[#allocation8_spill]] }
 0xf38   : > { %s25_s22 = sadd.s32 1, %s11539_s17  }
 0xf39   : > { %p22_p10 = scmp.ge.s32.totalorder %s25_s22, 6  }
 0xf3b   :  { %24 = sbr.rel (!%p22_p10) target bundleno = 8 (0x8), region = 154 }

</bundles_post_ra>
